<compile_context>
chip_gen: v6e
topology: v6e:2x2x1
jax: 0.10.0
libtpu: 0.0.40
codegen_flags: <defaults>
</compile_context>

<pallas_src>
import functools

import jax
import jax.numpy as jnp
from jax.experimental import pallas as pl
from jax.experimental.pallas import tpu as pltpu

LEAKY = 0.2


def _round_up(n, m):
    return -(-n // m) * m


def _leaky_relu(x, slope):
    return jnp.where(x > 0, x, slope * x)


def _generator_kernel(*refs, num_extra_layers, leaky):
    # refs layout:
    #   z_ref, y_ref,
    #   w1z, w1y, b1, w2, b2, (w_extra_i, b_extra_i)*num_extra_layers, w3, b3,
    #   o_ref
    z_ref, y_ref = refs[0], refs[1]
    o_ref = refs[-1]
    p = refs[2:-1]
    w1z, w1y, b1, w2, b2 = p[0], p[1], p[2], p[3], p[4]

    # First layer: two bf16 dots (K=128 each, zero-padded) into one f32
    # accumulator replace the concat([z, y]) @ W1.
    acc = jnp.dot(z_ref[...], w1z[...], preferred_element_type=jnp.float32)
    acc += jnp.dot(y_ref[...], w1y[...], preferred_element_type=jnp.float32)
    h = _leaky_relu(acc + b1[...], leaky)                       # f32 [TB, 896]

    h = _leaky_relu(
        jnp.dot(h.astype(jnp.bfloat16), w2[...],
                preferred_element_type=jnp.float32) + b2[...], leaky)

    # extra hidden layers (layers - 1 of them)
    for i in range(num_extra_layers):
        w = p[5 + 2 * i]
        b = p[6 + 2 * i]
        h = _leaky_relu(
            jnp.dot(h.astype(jnp.bfloat16), w[...],
                    preferred_element_type=jnp.float32) + b[...], leaky)

    w3, b3 = p[-2], p[-1]
    out = jnp.dot(h.astype(jnp.bfloat16), w3[...],
                  preferred_element_type=jnp.float32) + b3[...]  # f32 [TB, 784]
    # bf16 tanh: uses the bf16 EUP path on v6e/v7x; Mosaic extends to f32 on
    # v5e.  Runs only over the 784 real output columns (no padding).
    o_ref[...] = jnp.tanh(out.astype(jnp.bfloat16)).astype(o_ref.dtype)


def init_generator_params(key, input_size_z=100, input_size_condition=100,
                          hidden_size=256, output_size=784, layers=1):
    """Deterministic synthetic f32 parameters (weights stored [in, out])."""
    dims_in = input_size_z + input_size_condition
    keys = jax.random.split(key, 2 * (layers + 2))
    k = iter(keys)

    def lin(din, dout):
        w = 0.05 * jax.random.normal(next(k), (din, dout), dtype=jnp.float32)
        b = 0.05 * jax.random.normal(next(k), (1, dout), dtype=jnp.float32)
        return w, b

    params = []
    params += list(lin(dims_in, 800))               # init_layer
    params += list(lin(800, hidden_size))           # combine
    for _ in range(layers - 1):                     # extra hidden blocks
        params += list(lin(hidden_size, hidden_size))
    params += list(lin(hidden_size, output_size))   # final
    return params


def pack_generator_params(params, input_size_z, input_size_condition):
    """Split W1 into z/y halves, zero-pad internal feature dims to multiples of
    128 and cast matmul weights to bf16 (biases stay f32).  Padded rows/cols
    are zero, so padded lanes carry exact zeros through every layer
    (LeakyReLU(0) == 0).  The FINAL layer keeps its true output width so the
    kernel's output block is exactly [TB, output_size] and no un-pad slice is
    needed in the wrapper."""
    dz, dy = input_size_z, input_size_condition
    dzp, dyp = _round_up(dz, 128), _round_up(dy, 128)

    w1, b1 = params[0], params[1]
    assert w1.shape[0] == dz + dy
    h1 = w1.shape[1]
    h1p = _round_up(h1, 128)
    w1z = jnp.pad(w1[:dz], ((0, dzp - dz), (0, h1p - h1))).astype(jnp.bfloat16)
    w1y = jnp.pad(w1[dz:], ((0, dyp - dy), (0, h1p - h1))).astype(jnp.bfloat16)
    b1p = jnp.pad(b1, ((0, 0), (0, h1p - h1))).astype(jnp.float32)
    packed = [w1z, w1y, b1p]

    rest = params[2:]
    n = len(rest)
    for i in range(0, n, 2):
        w, b = rest[i], rest[i + 1]
        din, dout = w.shape
        dinp = _round_up(din, 128)
        is_final = (i == n - 2)
        doutp = dout if is_final else _round_up(dout, 128)
        wp = jnp.pad(w, ((0, dinp - din), (0, doutp - dout))).astype(jnp.bfloat16)
        bp = jnp.pad(b, ((0, 0), (0, doutp - dout))).astype(jnp.float32)
        packed += [wp, bp]
    return packed


def generator_forward(z, y, packed_params, *, layers=1, leaky=LEAKY,
                      batch_tile=512, out_dtype=jnp.float32):
    """z: [B, Dz], y: [B, Dy]  ->  [B, output_size]."""
    B, dz = z.shape
    dy = y.shape[1]
    dzp = packed_params[0].shape[0]        # padded z width (128)
    dyp = packed_params[1].shape[0]        # padded y width (128)
    out_w = packed_params[-2].shape[1]     # TRUE output width (e.g. 784)

    # Large batch tile -> one grid step for typical small batches (removes the
    # ~0.35us/step loop overhead on single-TC v5e/v6e and avoids duplicated
    # weight DMA on v7x at small B).  h at TB=512 is ~1.75 MB f32: trivial.
    TB = min(batch_tile, _round_up(B, 8))
    nb = -(-B // TB)
    Bp = nb * TB

    zb = jnp.pad(z, ((0, Bp - B), (0, dzp - dz))).astype(jnp.bfloat16)
    yb = jnp.pad(y, ((0, Bp - B), (0, dyp - dy))).astype(jnp.bfloat16)

    num_extra = layers - 1
    kernel = functools.partial(_generator_kernel,
                               num_extra_layers=num_extra, leaky=leaky)

    # Weights/biases: full-array blocks with a constant index_map -> they stay
    # VMEM-resident across batch tiles (no re-DMA per grid step).
    # NOTE: this whole-weight-resident strategy is sized for small MLPs; at
    # hidden sizes in the few-thousand range it would exhaust v7x's 64 MiB
    # VMEM and must switch to per-layer N-tiling (reduction axis last).
    weight_specs = [pl.BlockSpec(p.shape, lambda i: (0, 0)) for p in packed_params]
    in_specs = ([pl.BlockSpec((TB, dzp), lambda i: (i, 0)),
                 pl.BlockSpec((TB, dyp), lambda i: (i, 0))]
                + weight_specs)
    # Output block is the true width: lane-dense (6 full vregs + 1 masked) and
    # no wrapper-side column slice afterwards.
    out_spec = pl.BlockSpec((TB, out_w), lambda i: (i, 0))

    # Advisory cost estimate for XLA's scheduler.
    h1p = packed_params[0].shape[1]
    hid = packed_params[3].shape[1]
    param_bytes = sum(int(p.size) * p.dtype.itemsize for p in packed_params)
    flops = 2 * Bp * (dzp * h1p + dyp * h1p + h1p * hid
                      + (layers - 1) * hid * hid + hid * out_w)
    bytes_accessed = (param_bytes + int(zb.size) * 2 + int(yb.size) * 2
                      + Bp * out_w * jnp.dtype(out_dtype).itemsize)
    cost = pl.CostEstimate(flops=flops, transcendentals=Bp * out_w,
                           bytes_accessed=bytes_accessed)

    fn = pl.pallas_call(
        kernel,
        out_shape=jax.ShapeDtypeStruct((Bp, out_w), out_dtype),
        grid_spec=pltpu.PrefetchScalarGridSpec(
            num_scalar_prefetch=0,
            grid=(nb,),
            in_specs=in_specs,
            out_specs=out_spec,
        ),
        compiler_params=pltpu.CompilerParams(
            # Batch tiles are independent -> shard across TCs when nb > 1.
            dimension_semantics=("parallel",),
            # Actual footprint is ~4-5 MB; 16 MiB leaves headroom on v7x's
            # 64 MiB physical VMEM and is within scoped defaults everywhere.
            vmem_limit_bytes=16 * 1024 * 1024,
        ),
        cost_estimate=cost,
    )
    out = fn(zb, yb, *packed_params)
    if Bp != B:
        out = out[:B]            # row un-pad only when B isn't a tile multiple
    return out


def _reference_forward(z, y, params, *, layers=1, leaky=LEAKY):
    """Pure-JAX f32 reference matching the PyTorch module."""
    x = jnp.concatenate([z, y], axis=1).astype(jnp.float32)
    w1, b1, w2, b2 = params[0], params[1], params[2], params[3]
    h = x @ w1 + b1
    h = jnp.where(h > 0, h, leaky * h)
    h = h @ w2 + b2
    h = jnp.where(h > 0, h, leaky * h)
    for i in range(layers - 1):
        w, b = params[4 + 2 * i], params[5 + 2 * i]
        h = h @ w + b
        h = jnp.where(h > 0, h, leaky * h)
    w3, b3 = params[-2], params[-1]
    return jnp.tanh(h @ w3 + b3)


if __name__ == "__main__":
    # Module-consistent shapes: z=100, y=100, hidden=256, output=784.
    # With batch_tile=512 the whole B=256 batch runs in a single grid step
    # (the review's preferred configuration on v5e/v6e and on v7x at small B).
    # layers=2 exercises the extra-hidden-layer path.
    B, DZ, DY = 256, 100, 100
    HIDDEN, OUT, LAYERS = 256, 784, 2

    key = jax.random.PRNGKey(0)
    kz, ky, kp = jax.random.split(key, 3)
    z = jax.random.normal(kz, (B, DZ), dtype=jnp.float32)
    y = jax.random.normal(ky, (B, DY), dtype=jnp.float32)

    params = init_generator_params(kp, input_size_z=DZ, input_size_condition=DY,
                                   hidden_size=HIDDEN, output_size=OUT,
                                   layers=LAYERS)
    packed = pack_generator_params(params, DZ, DY)

    out = generator_forward(z, y, packed, layers=LAYERS)
    out = jax.block_until_ready(out)

    ref = _reference_forward(z, y, params, layers=LAYERS)
    assert out.shape == (B, OUT)
    # bf16 matmul operands + bf16 tanh (f32 accumulation) vs. the f32
    # reference: loose tolerance.
    max_err = float(jnp.max(jnp.abs(out - ref)))
    assert jnp.allclose(out, ref, atol=5e-2, rtol=5e-2), f"max abs err {max_err}"

    print("KERNEL_OK")
</pallas_src>

<mosaic_0001>
module attributes {stable_mosaic.version = 11 : i64} {
  func.func @_generator_kernel(%arg0: i32, %arg1: memref<256x128xbf16, #tpu.memory_space<vmem>>, %arg2: memref<256x128xbf16, #tpu.memory_space<vmem>>, %arg3: memref<128x896xbf16, #tpu.memory_space<vmem>>, %arg4: memref<128x896xbf16, #tpu.memory_space<vmem>>, %arg5: memref<1x896xf32, #tpu.memory_space<vmem>>, %arg6: memref<896x256xbf16, #tpu.memory_space<vmem>>, %arg7: memref<1x256xf32, #tpu.memory_space<vmem>>, %arg8: memref<256x256xbf16, #tpu.memory_space<vmem>>, %arg9: memref<1x256xf32, #tpu.memory_space<vmem>>, %arg10: memref<256x784xbf16, #tpu.memory_space<vmem>>, %arg11: memref<1x784xf32, #tpu.memory_space<vmem>>, %arg12: memref<256x784xf32, #tpu.memory_space<vmem>>) attributes {dimension_semantics = [#tpu.dimension_semantics<parallel>], iteration_bounds = array<i64: 1>, scalar_prefetch = 0 : i64, scratch_operands = 0 : i64, tpu.core_type = #tpu.core_type<tc>, window_params = [{transform_indices = @transform_0, window_bounds = array<i64: 256, 128>}, {transform_indices = @transform_1, window_bounds = array<i64: 256, 128>}, {pipeline_mode = #tpu.pipeline_mode<synchronous>, transform_indices = @transform_2, window_bounds = array<i64: 128, 896>}, {pipeline_mode = #tpu.pipeline_mode<synchronous>, transform_indices = @transform_3, window_bounds = array<i64: 128, 896>}, {pipeline_mode = #tpu.pipeline_mode<synchronous>, transform_indices = @transform_4, window_bounds = array<i64: 1, 896>}, {pipeline_mode = #tpu.pipeline_mode<synchronous>, transform_indices = @transform_5, window_bounds = array<i64: 896, 256>}, {pipeline_mode = #tpu.pipeline_mode<synchronous>, transform_indices = @transform_6, window_bounds = array<i64: 1, 256>}, {pipeline_mode = #tpu.pipeline_mode<synchronous>, transform_indices = @transform_7, window_bounds = array<i64: 256, 256>}, {pipeline_mode = #tpu.pipeline_mode<synchronous>, transform_indices = @transform_8, window_bounds = array<i64: 1, 256>}, {pipeline_mode = #tpu.pipeline_mode<synchronous>, transform_indices = @transform_9, window_bounds = array<i64: 256, 784>}, {pipeline_mode = #tpu.pipeline_mode<synchronous>, transform_indices = @transform_10, window_bounds = array<i64: 1, 784>}, {transform_indices = @transform_11, window_bounds = array<i64: 256, 784>}]} {
    %c0 = arith.constant 0 : index
    %c0_0 = arith.constant 0 : index
    %0 = vector.load %arg1[%c0, %c0_0] : memref<256x128xbf16, #tpu.memory_space<vmem>>, vector<256x128xbf16>
    %c0_1 = arith.constant 0 : index
    %c0_2 = arith.constant 0 : index
    %1 = vector.load %arg3[%c0_1, %c0_2] : memref<128x896xbf16, #tpu.memory_space<vmem>>, vector<128x896xbf16>
    %cst = arith.constant dense<0.000000e+00> : vector<256x896xf32>
    %2 = tpu.matmul %0, %1, %cst {dimension_numbers = #tpu.dot_dimension_numbers<[1], [0], [0], [1], [0, 0, 1, 1], [], []>} : vector<256x128xbf16>, vector<128x896xbf16>, vector<256x896xf32> -> vector<256x896xf32>
    %c0_3 = arith.constant 0 : index
    %c0_4 = arith.constant 0 : index
    %3 = vector.load %arg2[%c0_3, %c0_4] : memref<256x128xbf16, #tpu.memory_space<vmem>>, vector<256x128xbf16>
    %c0_5 = arith.constant 0 : index
    %c0_6 = arith.constant 0 : index
    %4 = vector.load %arg4[%c0_5, %c0_6] : memref<128x896xbf16, #tpu.memory_space<vmem>>, vector<128x896xbf16>
    %cst_7 = arith.constant dense<0.000000e+00> : vector<256x896xf32>
    %5 = tpu.matmul %3, %4, %cst_7 {dimension_numbers = #tpu.dot_dimension_numbers<[1], [0], [0], [1], [0, 0, 1, 1], [], []>} : vector<256x128xbf16>, vector<128x896xbf16>, vector<256x896xf32> -> vector<256x896xf32>
    %6 = arith.addf %2, %5 : vector<256x896xf32>
    %c0_8 = arith.constant 0 : index
    %c0_9 = arith.constant 0 : index
    %7 = vector.load %arg5[%c0_8, %c0_9] : memref<1x896xf32, #tpu.memory_space<vmem>>, vector<1x896xf32>
    %8 = vector.broadcast %7 : vector<1x896xf32> to vector<256x896xf32>
    %9 = arith.addf %6, %8 : vector<256x896xf32>
    %cst_10 = arith.constant 0.000000e+00 : f32
    %10 = vector.broadcast %cst_10 : f32 to vector<256x896xf32>
    %11 = arith.cmpf ogt, %9, %10 : vector<256x896xf32>
    %cst_11 = arith.constant 2.000000e-01 : f32
    %12 = vector.broadcast %cst_11 : f32 to vector<256x896xf32>
    %13 = arith.mulf %12, %9 : vector<256x896xf32>
    %14 = arith.select %11, %9, %13 : vector<256x896xi1>, vector<256x896xf32>
    %15 = arith.truncf %14 : vector<256x896xf32> to vector<256x896xbf16>
    %c0_12 = arith.constant 0 : index
    %c0_13 = arith.constant 0 : index
    %16 = vector.load %arg6[%c0_12, %c0_13] : memref<896x256xbf16, #tpu.memory_space<vmem>>, vector<896x256xbf16>
    %cst_14 = arith.constant dense<0.000000e+00> : vector<256x256xf32>
    %17 = tpu.matmul %15, %16, %cst_14 {dimension_numbers = #tpu.dot_dimension_numbers<[1], [0], [0], [1], [0, 0, 1, 1], [], []>} : vector<256x896xbf16>, vector<896x256xbf16>, vector<256x256xf32> -> vector<256x256xf32>
    %c0_15 = arith.constant 0 : index
    %c0_16 = arith.constant 0 : index
    %18 = vector.load %arg7[%c0_15, %c0_16] : memref<1x256xf32, #tpu.memory_space<vmem>>, vector<1x256xf32>
    %19 = vector.broadcast %18 : vector<1x256xf32> to vector<256x256xf32>
    %20 = arith.addf %17, %19 : vector<256x256xf32>
    %cst_17 = arith.constant 0.000000e+00 : f32
    %21 = vector.broadcast %cst_17 : f32 to vector<256x256xf32>
    %22 = arith.cmpf ogt, %20, %21 : vector<256x256xf32>
    %cst_18 = arith.constant 2.000000e-01 : f32
    %23 = vector.broadcast %cst_18 : f32 to vector<256x256xf32>
    %24 = arith.mulf %23, %20 : vector<256x256xf32>
    %25 = arith.select %22, %20, %24 : vector<256x256xi1>, vector<256x256xf32>
    %26 = arith.truncf %25 : vector<256x256xf32> to vector<256x256xbf16>
    %c0_19 = arith.constant 0 : index
    %c0_20 = arith.constant 0 : index
    %27 = vector.load %arg8[%c0_19, %c0_20] : memref<256x256xbf16, #tpu.memory_space<vmem>>, vector<256x256xbf16>
    %cst_21 = arith.constant dense<0.000000e+00> : vector<256x256xf32>
    %28 = tpu.matmul %26, %27, %cst_21 {dimension_numbers = #tpu.dot_dimension_numbers<[1], [0], [0], [1], [0, 0, 1, 1], [], []>} : vector<256x256xbf16>, vector<256x256xbf16>, vector<256x256xf32> -> vector<256x256xf32>
    %c0_22 = arith.constant 0 : index
    %c0_23 = arith.constant 0 : index
    %29 = vector.load %arg9[%c0_22, %c0_23] : memref<1x256xf32, #tpu.memory_space<vmem>>, vector<1x256xf32>
    %30 = vector.broadcast %29 : vector<1x256xf32> to vector<256x256xf32>
    %31 = arith.addf %28, %30 : vector<256x256xf32>
    %cst_24 = arith.constant 0.000000e+00 : f32
    %32 = vector.broadcast %cst_24 : f32 to vector<256x256xf32>
    %33 = arith.cmpf ogt, %31, %32 : vector<256x256xf32>
    %cst_25 = arith.constant 2.000000e-01 : f32
    %34 = vector.broadcast %cst_25 : f32 to vector<256x256xf32>
    %35 = arith.mulf %34, %31 : vector<256x256xf32>
    %36 = arith.select %33, %31, %35 : vector<256x256xi1>, vector<256x256xf32>
    %37 = arith.truncf %36 : vector<256x256xf32> to vector<256x256xbf16>
    %c0_26 = arith.constant 0 : index
    %c0_27 = arith.constant 0 : index
    %38 = vector.load %arg10[%c0_26, %c0_27] : memref<256x784xbf16, #tpu.memory_space<vmem>>, vector<256x784xbf16>
    %cst_28 = arith.constant dense<0.000000e+00> : vector<256x784xf32>
    %39 = tpu.matmul %37, %38, %cst_28 {dimension_numbers = #tpu.dot_dimension_numbers<[1], [0], [0], [1], [0, 0, 1, 1], [], []>} : vector<256x256xbf16>, vector<256x784xbf16>, vector<256x784xf32> -> vector<256x784xf32>
    %c0_29 = arith.constant 0 : index
    %c0_30 = arith.constant 0 : index
    %40 = vector.load %arg11[%c0_29, %c0_30] : memref<1x784xf32, #tpu.memory_space<vmem>>, vector<1x784xf32>
    %41 = vector.broadcast %40 : vector<1x784xf32> to vector<256x784xf32>
    %42 = arith.addf %39, %41 : vector<256x784xf32>
    %43 = arith.truncf %42 : vector<256x784xf32> to vector<256x784xbf16>
    %44 = math.tanh %43 : vector<256x784xbf16>
    %45 = arith.extf %44 : vector<256x784xbf16> to vector<256x784xf32>
    %c0_31 = arith.constant 0 : index
    %c0_32 = arith.constant 0 : index
    %46 = vector.load %arg12[%c0_31, %c0_32] : memref<256x784xf32, #tpu.memory_space<vmem>>, vector<256x784xf32>
    tpu.vector_store %arg12[%c0_31, %c0_32], %45 {strides = array<i32>} : memref<256x784xf32, #tpu.memory_space<vmem>>, vector<256x784xf32>,
    return
  }
  func.func @transform_0(%arg0: i32) -> (i32, i32) {
    %c0_i32 = arith.constant 0 : i32
    %c0_i32_0 = arith.constant 0 : i32
    return %arg0, %c0_i32 : i32, i32
  }
  func.func @transform_1(%arg0: i32) -> (i32, i32) {
    %c0_i32 = arith.constant 0 : i32
    %c0_i32_0 = arith.constant 0 : i32
    return %arg0, %c0_i32 : i32, i32
  }
  func.func @transform_2(%arg0: i32) -> (i32, i32) {
    %c0_i32 = arith.constant 0 : i32
    %c0_i32_0 = arith.constant 0 : i32
    %c0_i32_1 = arith.constant 0 : i32
    return %c0_i32, %c0_i32_0 : i32, i32
  }
  func.func @transform_3(%arg0: i32) -> (i32, i32) {
    %c0_i32 = arith.constant 0 : i32
    %c0_i32_0 = arith.constant 0 : i32
    %c0_i32_1 = arith.constant 0 : i32
    return %c0_i32, %c0_i32_0 : i32, i32
  }
  func.func @transform_4(%arg0: i32) -> (i32, i32) {
    %c0_i32 = arith.constant 0 : i32
    %c0_i32_0 = arith.constant 0 : i32
    %c0_i32_1 = arith.constant 0 : i32
    return %c0_i32, %c0_i32_0 : i32, i32
  }
  func.func @transform_5(%arg0: i32) -> (i32, i32) {
    %c0_i32 = arith.constant 0 : i32
    %c0_i32_0 = arith.constant 0 : i32
    %c0_i32_1 = arith.constant 0 : i32
    return %c0_i32, %c0_i32_0 : i32, i32
  }
  func.func @transform_6(%arg0: i32) -> (i32, i32) {
    %c0_i32 = arith.constant 0 : i32
    %c0_i32_0 = arith.constant 0 : i32
    %c0_i32_1 = arith.constant 0 : i32
    return %c0_i32, %c0_i32_0 : i32, i32
  }
  func.func @transform_7(%arg0: i32) -> (i32, i32) {
    %c0_i32 = arith.constant 0 : i32
    %c0_i32_0 = arith.constant 0 : i32
    %c0_i32_1 = arith.constant 0 : i32
    return %c0_i32, %c0_i32_0 : i32, i32
  }
  func.func @transform_8(%arg0: i32) -> (i32, i32) {
    %c0_i32 = arith.constant 0 : i32
    %c0_i32_0 = arith.constant 0 : i32
    %c0_i32_1 = arith.constant 0 : i32
    return %c0_i32, %c0_i32_0 : i32, i32
  }
  func.func @transform_9(%arg0: i32) -> (i32, i32) {
    %c0_i32 = arith.constant 0 : i32
    %c0_i32_0 = arith.constant 0 : i32
    %c0_i32_1 = arith.constant 0 : i32
    return %c0_i32, %c0_i32_0 : i32, i32
  }
  func.func @transform_10(%arg0: i32) -> (i32, i32) {
    %c0_i32 = arith.constant 0 : i32
    %c0_i32_0 = arith.constant 0 : i32
    %c0_i32_1 = arith.constant 0 : i32
    return %c0_i32, %c0_i32_0 : i32, i32
  }
  func.func @transform_11(%arg0: i32) -> (i32, i32) {
    %c0_i32 = arith.constant 0 : i32
    %c0_i32_0 = arith.constant 0 : i32
    return %arg0, %c0_i32 : i32, i32
  }
}

</mosaic_0001>

<bundles_post_ra>
// kernel: tpu_custom_call.1
= control target key start
LH: loop header
LB: loop body
LE: loop exit
PB: predicated region body
PF: predicated region fallthrough
CT: control target
= control target key end

     0   :  { %16 = vsyncpa [#allocation3], 0  ;;  %s15212_s0 = inlined_call_operand.hbm [shape: bf16[256,128], index: 0, kind: input, shape index: {}]   ;;  %s15213_s1 = inlined_call_operand.hbm [shape: bf16[256,128], index: 1, kind: input, shape index: {}]   ;;  %s15214_s2 = inlined_call_operand.vmem [shape: bf16[128,896], index: 2, kind: input, shape index: {}]   ;;  %s15215_s3 = inlined_call_operand.hbm [shape: bf16[128,896], index: 3, kind: input, shape index: {}]   ;;  %s15216_s4 = inlined_call_operand.vmem [shape: f32[1,896], index: 4, kind: input, shape index: {}]   ;;  %s15217_s5 = inlined_call_operand.vmem [shape: bf16[896,256], index: 5, kind: input, shape index: {}]   ;;  %s15218_s6 = inlined_call_operand.vmem [shape: f32[1,256], index: 6, kind: input, shape index: {}]   ;;  %s15219_s7 = inlined_call_operand.vmem [shape: bf16[256,256], index: 7, kind: input, shape index: {}]   ;;  %s15220_s8 = inlined_call_operand.vmem [shape: f32[1,256], index: 8, kind: input, shape index: {}]   ;;  %s15221_s9 = inlined_call_operand.vmem [shape: bf16[256,784], index: 9, kind: input, shape index: {}]   ;;  %s15222_s10 = inlined_call_operand.vmem [shape: f32[1,784], index: 10, kind: input, shape index: {}]   ;;  %s15223_s11 = inlined_call_operand.vmem [shape: f32[256,784], index: 11, kind: output, shape index: {}]  }
   0x1   :  { %17 = vsyncpa [#allocation5], 0  ;;  %s9584_s17 = smov [#allocation4]   ;;  %s9585_s19 = smov [#allocation2]  }
   0x2   :  { %s35_s18 = sshll.u32 %s9584_s17, 4  ;;  %s23_s20 = sshll.u32 %s9585_s19, 4  ;;  %s36_s18 = int_to_ptr.vmem [resolvable:$true] %s35_s18  ;;  %s24_s20 = int_to_ptr.vmem [resolvable:$true] %s23_s20 }
   0x3   :  { %s9528_s21 = scalar_lea.vmem %s36_s18, 2048  ;;  %p9533_p1 = scmp.lt.s32.totalorder %s36_s18, %s36_s18 }
   0x4   :  { %p9529_p0 = scmp.ne.s32.totalorder %s36_s18, %s9528_s21  ;;  %p9534_p2 = scmp.lt.s32.totalorder %s9528_s21, %s9528_s21 }
   0x6   :  { %p9535_p3 = por %p9534_p2, %p9533_p1 }
   0x8   :  { %p9536_p4 = pnand %p9535_p3, %p9529_p0 }
   0xa   :  { %9539 = shalt.err (!%p9536_p4)
}
   0xb   :  { %s9586_s22 = smov 64   ;;  %s9587_s23 = smov 4  }
   0xc   :  { %41 = dma.hbm_to_vmem [thread:$0]  %s15213_s1, 2048, %s36_s18, [#allocation5], %s9586_s22, %s9586_s22, %s9587_s23  }
   0xd   :  { %s9548_s26 = scalar_lea.vmem %s24_s20, 2048  ;;  %p9553_p6 = scmp.lt.s32.totalorder %s24_s20, %s24_s20 }
   0xe   :  { %p9549_p5 = scmp.ne.s32.totalorder %s24_s20, %s9548_s26  ;;  %p9554_p7 = scmp.lt.s32.totalorder %s9548_s26, %s9548_s26 }
  0x10   :  { %p9555_p8 = por %p9554_p7, %p9553_p6 }
  0x12   :  { %p9556_p9 = pnand %p9555_p8, %p9549_p5 }
  0x14   :  { %9559 = shalt.err (!%p9556_p9)
}
  0x15   :  { %29 = dma.hbm_to_vmem [thread:$0]  %s15212_s0, 2048, %s24_s20, [#allocation3], %s9586_s22, %s9586_s22, %s9587_s23  }
  0x16   :  { %s9588_s29 = smov [#allocation6]  }
  0x17   :  { %s49_s30 = sshll.u32 %s9588_s29, 4  ;;  %s50_s30 = int_to_ptr.vmem [resolvable:$true] %s49_s30 }
  0x18   :  { %s9568_s12 = scalar_lea.vmem %s50_s30, 7168  ;;  %p9573_p11 = scmp.lt.s32.totalorder %s50_s30, %s50_s30 }
  0x19   :  { %p9569_p10 = scmp.ne.s32.totalorder %s50_s30, %s9568_s12  ;;  %p9574_p12 = scmp.lt.s32.totalorder %s9568_s12, %s9568_s12 }
  0x1b   :  { %p9575_p13 = por %p9574_p12, %p9573_p11 }
  0x1d   :  { %p9576_p0 = pnand %p9575_p13, %p9569_p10 }
  0x1f   :  { %9579 = shalt.err (!%p9576_p0)
}
  0x20   :  { %s9589_s1 = smov 448   ;;  %s9590_s13 = smov 28  }
  0x21   :  { %55 = dma.hbm_to_vmem [thread:$0]  %s15215_s3, 7168, %s50_s30, [#allocation5], %s9589_s1, %s9589_s1, %s9590_s13  }
  0x22   :  { %9580 = dma.done.wait [#allocation3], 2048  }
  0x23   :  { %9581 = vsyncadd [#allocation3], 4294965248 }
  0x24   :  { %9582 = dma.done.wait [#allocation5], 9216  }
  0x25   :  { %9583 = vsyncadd [#allocation5], 4294958080  ;;  %v15224_v0 = vmov 0   ;;  %v8706_v1 = vld [vmem:[#allocation6 + $0x18c] ss:$28 sps:$4 sm:$0xff]   ;;  %v9663_v19 = vld [vmem:[#allocation4] sm:$0xff]  }
  0x26   :  { %688 = vmatprep.mubr.bf16.mxu0 %v15224_v0  ;;  %768 = vmatprep.mubr.bf16.mxu1 %v15224_v0  ;;  %v8708_v2 = vld [vmem:[#allocation6 + $0x188] ss:$28 sps:$4 sm:$0xff]   ;;  %v8709_v3 = vld [vmem:[#allocation6 + $0x154] ss:$28 sps:$4 sm:$0xff]   ;;  %v8712_v5 = vld [vmem:[#allocation6 + $0x11c] ss:$28 sps:$4 sm:$0xff]  }
  0x27   :  { %656 = vmatprep.subr.bf16.mxu0 %v8706_v1  ;;  %8682 = vmatprep.subr.bf16.mxu1 %v8706_v1  ;;  %v8711_v4 = vld [vmem:[#allocation6 + $0x150] ss:$28 sps:$4 sm:$0xff]   ;;  %v8714_v6 = vld [vmem:[#allocation6 + $0x118] ss:$28 sps:$4 sm:$0xff]   ;;  %v8715_v7 = vld [vmem:[#allocation6 + $0xe4] ss:$28 sps:$4 sm:$0xff]  }
  0x28   :  { %657 = vmatpush1.bf16.msra.mxu0 %v8708_v2  ;;  %8690 = vmatpush1.bf16.msra.mxu1 %v8708_v2  ;;  %v8717_v8 = vld [vmem:[#allocation6 + $0xe0] ss:$28 sps:$4 sm:$0xff]   ;;  %v8718_v9 = vld [vmem:[#allocation6 + $0xac] ss:$28 sps:$4 sm:$0xff]   ;;  %v8721_v11 = vld [vmem:[#allocation6 + $0x74] ss:$28 sps:$4 sm:$0xff]  }
  0x29   :  { %658 = vmatprep.subr.bf16.mxu0 %v8709_v3  ;;  %8683 = vmatprep.subr.bf16.mxu1 %v8709_v3  ;;  %v8720_v10 = vld [vmem:[#allocation6 + $0xa8] ss:$28 sps:$4 sm:$0xff]   ;;  %v8723_v12 = vld [vmem:[#allocation6 + $0x70] ss:$28 sps:$4 sm:$0xff]   ;;  %v8724_v13 = vld [vmem:[#allocation6 + $0x3c] ss:$28 sps:$4 sm:$0xff]  }
  0x2a   :  { %v8726_v14 = vld [vmem:[#allocation6 + $0x38] ss:$28 sps:$4 sm:$0xff]   ;;  %v8727_v15 = vld [vmem:[#allocation6 + $0x4] ss:$28 sps:$4 sm:$0xff]   ;;  %v8732_v21 = vld [vmem:[#allocation6 + $0x190] ss:$28 sps:$4 sm:$0xff]  }
  0x2b   :  { %v8729_v16 = vld [vmem:[#allocation6] ss:$28 sps:$4 sm:$0xff]   ;;  %v8734_v17 = vld [vmem:[#allocation6 + $0x194] ss:$28 sps:$4 sm:$0xff]   ;;  %v9668_v26 = vld [vmem:[#allocation4 + $0x8] sm:$0xff]  }
  0x2c   :  { %659 = vmatpush1.bf16.msra.mxu0 %v8711_v4  ;;  %8691 = vmatpush1.bf16.msra.mxu1 %v8711_v4  ;;  %v8757_v18 = vld [vmem:[#allocation6 + $0x19c] ss:$28 sps:$4 sm:$0xff]   ;;  %v8731_v20 = vld [vmem:[#allocation4 + $0x40] sm:$0xff]   ;;  %v8736_v29 = vld [vmem:[#allocation4 + $0x48] sm:$0xff]  }
  0x2d   :  { %660 = vmatprep.subr.bf16.mxu0 %v8712_v5  ;;  %8684 = vmatprep.subr.bf16.mxu1 %v8712_v5  ;;  %v8739_v22 = vld [vmem:[#allocation6 + $0x15c] ss:$28 sps:$4 sm:$0xff]   ;;  %v8760_v24 = vld [vmem:[#allocation6 + $0x164] ss:$28 sps:$4 sm:$0xff]   ;;  %v8768_v31 = vld [vmem:[#allocation6 + $0x12c] ss:$28 sps:$4 sm:$0xff]  }
  0x2e   :  { %v8755_v23 = vld [vmem:[#allocation6 + $0x198] ss:$28 sps:$4 sm:$0xff]   ;;  %v8744_v27 = vld [vmem:[#allocation6 + $0x124] ss:$28 sps:$4 sm:$0xff]   ;;  %v8749_v32 = vld [vmem:[#allocation6 + $0xec] ss:$28 sps:$4 sm:$0xff]  }
  0x2f   :  { %v8737_v25 = vld [vmem:[#allocation6 + $0x158] ss:$28 sps:$4 sm:$0xff]   ;;  %v8758_v28 = vld [vmem:[#allocation6 + $0x160] ss:$28 sps:$4 sm:$0xff]   ;;  %v8766_v33 = vld [vmem:[#allocation6 + $0x128] ss:$28 sps:$4 sm:$0xff]  }
  0x30   :  { %661 = vmatpush1.bf16.msra.mxu0 %v8714_v6  ;;  %8692 = vmatpush1.bf16.msra.mxu1 %v8714_v6  ;;  %v8742_v30 = vld [vmem:[#allocation6 + $0x120] ss:$28 sps:$4 sm:$0xff]   ;;  %v8771_v34 = vld [vmem:[#allocation6 + $0xf4] ss:$28 sps:$4 sm:$0xff]   ;;  %v8747_v35 = vld [vmem:[#allocation6 + $0xe8] ss:$28 sps:$4 sm:$0xff]  }
  0x31   :  { %662 = vmatprep.subr.bf16.mxu0 %v8715_v7  ;;  %8685 = vmatprep.subr.bf16.mxu1 %v8715_v7  ;;  %v8754_v36 = vld [vmem:[#allocation6 + $0xb4] ss:$28 sps:$4 sm:$0xff]   ;;  %v8765_v41 = vld [vmem:[#allocation6 + $0x7c] ss:$28 sps:$4 sm:$0xff]   ;;  %v8782_v44 = vld [vmem:[#allocation6 + $0x84] ss:$28 sps:$4 sm:$0xff]  }
  0x32   :  { %v8769_v37 = vld [vmem:[#allocation6 + $0xf0] ss:$28 sps:$4 sm:$0xff]   ;;  %v8779_v42 = vld [vmem:[#allocation6 + $0xbc] ss:$28 sps:$4 sm:$0xff]   ;;  %v8776_v48 = vld [vmem:[#allocation6 + $0x44] ss:$28 sps:$4 sm:$0xff]  }
  0x33   :  { %v9673_v38 = vld [vmem:[#allocation4 + $0x10] sm:$0xff]   ;;  %v9681_v46 = vld [vmem:[#allocation4 + $0x18] sm:$0xff]   ;;  %v8790_v51 = vld [vmem:[#allocation6 + $0x4c] ss:$28 sps:$4 sm:$0xff]  }
  0x34   :  { %663 = vmatpush1.bf16.msra.mxu0 %v8717_v8  ;;  %8693 = vmatpush1.bf16.msra.mxu1 %v8717_v8  ;;  %v9675_v39 = vld [vmem:[#allocation4 + $0x50] sm:$0xff]   ;;  %v9683_v47 = vld [vmem:[#allocation4 + $0x58] sm:$0xff]   ;;  %v8787_v52 = vld [vmem:[#allocation6 + $0xc] ss:$28 sps:$4 sm:$0xff]  }
  0x35   :  { %664 = vmatprep.subr.bf16.mxu0 %v8718_v9  ;;  %8686 = vmatprep.subr.bf16.mxu1 %v8718_v9  ;;  %v8752_v40 = vld [vmem:[#allocation6 + $0xb0] ss:$28 sps:$4 sm:$0xff]   ;;  %v8777_v43 = vld [vmem:[#allocation6 + $0xb8] ss:$28 sps:$4 sm:$0xff]   ;;  %v8780_v49 = vld [vmem:[#allocation6 + $0x80] ss:$28 sps:$4 sm:$0xff]  }
  0x36   :  { %v8763_v45 = vld [vmem:[#allocation6 + $0x78] ss:$28 sps:$4 sm:$0xff]   ;;  %v8774_v50 = vld [vmem:[#allocation6 + $0x40] ss:$28 sps:$4 sm:$0xff]   ;;  %v8788_v53 = vld [vmem:[#allocation6 + $0x48] ss:$28 sps:$4 sm:$0xff]  }
  0x37   :  { %v8793_v54 = vld [vmem:[#allocation6 + $0x14] ss:$28 sps:$4 sm:$0xff]   ;;  %v8785_v55 = vld [vmem:[#allocation6 + $0x8] ss:$28 sps:$4 sm:$0xff]   ;;  %v8794_v57 = vld [vmem:[#allocation6 + $0x1a0] ss:$28 sps:$4 sm:$0xff]  }
  0x38   :  { %665 = vmatpush1.bf16.msra.mxu0 %v8720_v10  ;;  %8694 = vmatpush1.bf16.msra.mxu1 %v8720_v10  ;;  %v8791_v56 = vld [vmem:[#allocation6 + $0x10] ss:$28 sps:$4 sm:$0xff]   ;;  %v9689_v58 = vld [vmem:[#allocation4 + $0x20] sm:$0xff]   ;;  %v9716_v2 = vld [vmem:[#allocation4 + $0x38] sm:$0xff]  }
  0x39   :  { %666 = vmatprep.subr.bf16.mxu0 %v8721_v11  ;;  %8687 = vmatprep.subr.bf16.mxu1 %v8721_v11  ;;  %v9691_v59 = vld [vmem:[#allocation4 + $0x60] sm:$0xff]   ;;  %v8803_v60 = vld [vmem:[%s15214_s2 + $0x194] ss:$28 sps:$4 sm:$0xff]   ;;  %v9700_v61 = vld [vmem:[#allocation4 + $0x28] sm:$0xff]  }
  0x3a   :  { %v9702_v62 = vld [vmem:[#allocation4 + $0x68] sm:$0xff]   ;;  %v9708_v63 = vld [vmem:[#allocation4 + $0x30] sm:$0xff]   ;;  %v9718_v3 = vld [vmem:[#allocation4 + $0x78] sm:$0xff]  }
  0x3b   :  { %v9710_v1 = vld [vmem:[#allocation4 + $0x70] sm:$0xff]   ;;  %v8795_v4 = vld [vmem:[#allocation6 + $0x168] ss:$28 sps:$4 sm:$0xff]   ;;  %v8806_v7 = vld [vmem:[%s15214_s2 + $0x15c] ss:$28 sps:$4 sm:$0xff]  }
  0x3c   :  { %667 = vmatpush1.bf16.msra.mxu0 %v8723_v12  ;;  %8695 = vmatpush1.bf16.msra.mxu1 %v8723_v12  ;;  %v8801_v5 = vld [vmem:[%s15214_s2 + $0x190] ss:$28 sps:$4 sm:$0xff]   ;;  %v8804_v8 = vld [vmem:[%s15214_s2 + $0x158] ss:$28 sps:$4 sm:$0xff]   ;;  %v8809_v9 = vld [vmem:[%s15214_s2 + $0x124] ss:$28 sps:$4 sm:$0xff]  }
  0x3d   :  { %668 = vmatprep.subr.bf16.mxu0 %v8724_v13  ;;  %8688 = vmatprep.subr.bf16.mxu1 %v8724_v13  ;;  %v8796_v6 = vld [vmem:[#allocation6 + $0x130] ss:$28 sps:$4 sm:$0xff]   ;;  %v8797_v10 = vld [vmem:[#allocation6 + $0xf8] ss:$28 sps:$4 sm:$0xff]   ;;  %v8807_v11 = vld [vmem:[%s15214_s2 + $0x120] ss:$28 sps:$4 sm:$0xff]  }
  0x3e   :  { %v8812_v12 = vld [vmem:[%s15214_s2 + $0xec] ss:$28 sps:$4 sm:$0xff]   ;;  %v8798_v13 = vld [vmem:[#allocation6 + $0xc0] ss:$28 sps:$4 sm:$0xff]  }
  0x40   :  { %669 = vmatpush1.bf16.msra.mxu0 %v8726_v14  ;;  %8696 = vmatpush1.bf16.msra.mxu1 %v8726_v14  ;;  %v8810_v14 = vld [vmem:[%s15214_s2 + $0xe8] ss:$28 sps:$4 sm:$0xff]  }
  0x41   :  { %670 = vmatprep.subr.bf16.mxu0 %v8727_v15  ;;  %8689 = vmatprep.subr.bf16.mxu1 %v8727_v15  ;;  %v8816_v15 = vld [vmem:[%s15214_s2 + $0xb4] ss:$28 sps:$4 sm:$0xff]  }
  0x44   :  { %671 = vmatpush1.bf16.msra.mxu0 %v8729_v16  ;;  %8697 = vmatpush1.bf16.msra.mxu1 %v8729_v16  ;;  %v8799_v16 = vld [vmem:[#allocation6 + $0x88] ss:$28 sps:$4 sm:$0xff]  }
  0x45   :  { %849 = vmatprep.subr.bf16.mxu1 %v8734_v17  ;;  %1042 = vmatprep.subr.bf16.mxu0 %v8757_v18  ;;  %v8814_v17 = vld [vmem:[%s15214_s2 + $0xb0] ss:$28 sps:$4 sm:$0xff]   ;;  %v8819_v18 = vld [vmem:[%s15214_s2 + $0x7c] ss:$28 sps:$4 sm:$0xff]  }
  0x47   :  { %689 = vmatmul.mubr.bf16.vlgmr.msra.gmra.mxu0 %v9663_v19  ;;  %769 = vmatmul.mubr.bf16.vlgmr.msra.gmra.mxu1 %v8731_v20  ;;  %v8817_v20 = vld [vmem:[%s15214_s2 + $0x78] ss:$28 sps:$4 sm:$0xff]  }
  0x48   :  { %850 = vmatpush1.bf16.msra.mxu1 %v8732_v21  ;;  %698 = vmatprep.mubr.bf16.mxu0 %v15224_v0  ;;  %v8822_v21 = vld [vmem:[%s15214_s2 + $0x44] ss:$28 sps:$4 sm:$0xff]  }
  0x49   :  { %778 = vmatprep.mubr.bf16.mxu1 %v15224_v0  ;;  %851 = vmatprep.subr.bf16.mxu1 %v8739_v22  ;;  %v8813_v22 = vld [vmem:[#allocation6 + $0x18] ss:$28 sps:$4 sm:$0xff]  }
  0x4a   :  { %1043 = vmatpush1.bf16.msra.mxu0 %v8755_v23  ;;  %v8820_v23 = vld [vmem:[%s15214_s2 + $0x40] ss:$28 sps:$4 sm:$0xff]  }
  0x4b   :  { %1044 = vmatprep.subr.bf16.mxu0 %v8760_v24  ;;  %v8825_v24 = vld [vmem:[%s15214_s2 + $0xc] ss:$28 sps:$4 sm:$0xff]  }
  0x4c   :  { %852 = vmatpush1.bf16.msra.mxu1 %v8737_v25  ;;  %v8823_v25 = vld [vmem:[%s15214_s2 + $0x8] ss:$28 sps:$4 sm:$0xff]  }
  0x4d   :  { %853 = vmatprep.subr.bf16.mxu1 %v8744_v27  ;;  %v9804_v27 = vld [vmem:[#allocation4 + $0x40] sm:$0xff]  }
  0x4e   :  { %1045 = vmatpush1.bf16.msra.mxu0 %v8758_v28  ;;  %v9810_v28 = vld [vmem:[#allocation4 + $0x48] sm:$0xff]  }
  0x4f   :  { %699 = vmatmul.mubr.bf16.gmra.mxu0 %v9668_v26  ;;  %779 = vmatmul.mubr.bf16.gmra.mxu1 %v8736_v29  ;;  %v8872_v29 = vld [vmem:[%s15214_s2 + $0x1a0] ss:$28 sps:$4 sm:$0xff]  }
  0x50   :  { %708 = vmatprep.mubr.bf16.mxu0 %v15224_v0  ;;  %788 = vmatprep.mubr.bf16.mxu1 %v15224_v0 }
  0x51   :  { %854 = vmatpush1.bf16.msra.mxu1 %v8742_v30  ;;  %1046 = vmatprep.subr.bf16.mxu0 %v8768_v31  ;;  %v9500_v30 = vld [vmem:[#allocation4] sm:$0xff]  }
  0x52   :  { %855 = vmatprep.subr.bf16.mxu1 %v8749_v32  ;;  %1047 = vmatpush1.bf16.msra.mxu0 %v8766_v33  ;;  %v9842_v31 = vld [vmem:[#allocation2] sm:$0xff]   ;;  %v8832_v33 = vld [vmem:[%s15214_s2 + $0x154] ss:$28 sps:$4 sm:$0xff]  }
  0x53   :  { %1048 = vmatprep.subr.bf16.mxu0 %v8771_v34  ;;  %v8826_v32 = vld [vmem:[%s15214_s2 + $0x188] ss:$28 sps:$4 sm:$0xff]  }
  0x55   :  { %856 = vmatpush1.bf16.msra.mxu1 %v8747_v35 }
  0x56   :  { %857 = vmatprep.subr.bf16.mxu1 %v8754_v36  ;;  %1049 = vmatpush1.bf16.msra.mxu0 %v8769_v37  ;;  %v9501_v36 = vld [vmem:[#allocation4 + $0x8] sm:$0xff]  }
  0x57   :  { %709 = vmatmul.mubr.bf16.gmra.mxu0 %v9673_v38  ;;  %789 = vmatmul.mubr.bf16.gmra.mxu1 %v9675_v39  ;;  %v8873_v37 = vld [vmem:[%s15214_s2 + $0x168] ss:$28 sps:$4 sm:$0xff]  }
  0x58   :  { %718 = vmatprep.mubr.bf16.mxu0 %v15224_v0  ;;  %798 = vmatprep.mubr.bf16.mxu1 %v15224_v0 }
  0x59   :  { %858 = vmatpush1.bf16.msra.mxu1 %v8752_v40  ;;  %1050 = vmatprep.subr.bf16.mxu0 %v8779_v42  ;;  %v8836_v42 = vld [vmem:[%s15214_s2 + $0x11c] ss:$28 sps:$4 sm:$0xff]  }
  0x5a   :  { %859 = vmatprep.subr.bf16.mxu1 %v8765_v41  ;;  %1051 = vmatpush1.bf16.msra.mxu0 %v8777_v43 }
  0x5b   :  { %1052 = vmatprep.subr.bf16.mxu0 %v8782_v44 }
  0x5d   :  { %860 = vmatpush1.bf16.msra.mxu1 %v8763_v45  ;;  %v9873_v45 = vld [vmem:[#allocation2 + $0x8] sm:$0xff]  }
  0x5e   :  { %861 = vmatprep.subr.bf16.mxu1 %v8776_v48  ;;  %1053 = vmatpush1.bf16.msra.mxu0 %v8780_v49  ;;  %v8834_v48 = vld [vmem:[%s15214_s2 + $0x118] ss:$28 sps:$4 sm:$0xff]   ;;  %v8875_v49 = vld [vmem:[%s15214_s2 + $0x130] ss:$28 sps:$4 sm:$0xff]  }
  0x5f   :  { %719 = vmatmul.mubr.bf16.gmra.mxu0 %v9681_v46  ;;  %799 = vmatmul.mubr.bf16.gmra.mxu1 %v9683_v47 }
  0x60   :  { %728 = vmatprep.mubr.bf16.mxu0 %v15224_v0  ;;  %808 = vmatprep.mubr.bf16.mxu1 %v15224_v0 }
  0x61   :  { %862 = vmatpush1.bf16.msra.mxu1 %v8774_v50  ;;  %1054 = vmatprep.subr.bf16.mxu0 %v8790_v51  ;;  %v8840_v50 = vld [vmem:[%s15214_s2 + $0xe4] ss:$28 sps:$4 sm:$0xff]  }
  0x62   :  { %863 = vmatprep.subr.bf16.mxu1 %v8787_v52  ;;  %1055 = vmatpush1.bf16.msra.mxu0 %v8788_v53  ;;  %v9503_v53 = vld [vmem:[#allocation4 + $0x18] sm:$0xff]  }
  0x63   :  { %1056 = vmatprep.subr.bf16.mxu0 %v8793_v54  ;;  %v8876_v54 = vld [vmem:[%s15214_s2 + $0xf8] ss:$28 sps:$4 sm:$0xff]  }
  0x65   :  { %864 = vmatpush1.bf16.msra.mxu1 %v8785_v55  ;;  %v9504_v55 = vld [vmem:[#allocation4 + $0x20] sm:$0xff]  }
  0x66   :  { %1057 = vmatpush1.bf16.msra.mxu0 %v8791_v56  ;;  %8586 = vmatprep.subr.bf16.mxu1 %v8794_v57 }
  0x67   :  { %729 = vmatmul.mubr.bf16.gmra.mxu0 %v9689_v58  ;;  %809 = vmatmul.mubr.bf16.gmra.mxu1 %v9691_v59 }
  0x68   :  { %738 = vmatprep.mubr.bf16.mxu0 %v15224_v0  ;;  %818 = vmatprep.mubr.bf16.mxu1 %v15224_v0 }
  0x69   :  { %1973 = vmatprep.subr.bf16.mxu0 %v8803_v60 }
  0x6f   :  { %739 = vmatmul.mubr.bf16.gmra.mxu0 %v9700_v61  ;;  %819 = vmatmul.mubr.bf16.gmra.mxu1 %v9702_v62 }
  0x70   :  { %748 = vmatprep.mubr.bf16.mxu0 %v15224_v0  ;;  %828 = vmatprep.mubr.bf16.mxu1 %v15224_v0 }
  0x77   :  { %749 = vmatmul.mubr.bf16.gmra.mxu0 %v9708_v63  ;;  %829 = vmatmul.mubr.bf16.gmra.mxu1 %v9710_v1 }
  0x78   :  { %758 = vmatprep.mubr.bf16.mxu0 %v15224_v0  ;;  %838 = vmatprep.mubr.bf16.mxu1 %v15224_v0 }
  0x7f   :  { %759 = vmatmul.mubr.bf16.gmra.mxu0 %v9716_v2  ;;  %839 = vmatmul.mubr.bf16.gmra.mxu1 %v9718_v3 }
  0x80   :  { %881 = vmatprep.mubr.bf16.mxu1 %v15224_v0  ;;  %1074 = vmatprep.mubr.bf16.mxu0 %v15224_v0 }
  0x87   :  { %882 = vmatmul.mubr.bf16.vlgmr.msra.gmra.mxu1 %v9663_v19  ;;  %1075 = vmatmul.mubr.bf16.vlgmr.msra.gmra.mxu0 %v9663_v19  ;;  %v8800_v19 = vld [vmem:[#allocation6 + $0x50] ss:$28 sps:$4 sm:$0xff]  }
  0x88   :  { %8587 = vmatpush3.bf16.msra.mxu1 %v8794_v57  ;;  %891 = vmatprep.mubr.bf16.mxu1 %v15224_v0 }
  0x89   :  { %1084 = vmatprep.mubr.bf16.mxu0 %v15224_v0  ;;  %8588 = vmatprep.subr.bf16.mxu1 %v8795_v4 }
  0x8a   :  { %1974 = vmatpush1.bf16.msra.mxu0 %v8801_v5  ;;  %v8881_v5 = vld [vmem:[%s15214_s2 + $0xc0] ss:$28 sps:$4 sm:$0xff]  }
  0x8b   :  { %1975 = vmatprep.subr.bf16.mxu0 %v8806_v7 }
  0x8c   :  { %8589 = vmatpush3.bf16.msra.mxu1 %v8795_v4  ;;  %v8842_v4 = vld [vmem:[%s15214_s2 + $0xa8] ss:$28 sps:$4 sm:$0xff]  }
  0x8d   :  { %8590 = vmatprep.subr.bf16.mxu1 %v8796_v6 }
  0x8e   :  { %1976 = vmatpush1.bf16.msra.mxu0 %v8804_v8 }
  0x8f   :  { %892 = vmatmul.mubr.bf16.gmra.mxu1 %v9668_v26  ;;  %1085 = vmatmul.mubr.bf16.gmra.mxu0 %v9668_v26  ;;  %v8828_v26 = vld [vmem:[%s15214_s2 + $0x18c] ss:$28 sps:$4 sm:$0xff]  }
  0x90   :  { %901 = vmatprep.mubr.bf16.mxu1 %v15224_v0  ;;  %1094 = vmatprep.mubr.bf16.mxu0 %v15224_v0 }
  0x91   :  { %8591 = vmatpush3.bf16.msra.mxu1 %v8796_v6  ;;  %1977 = vmatprep.subr.bf16.mxu0 %v8809_v9  ;;  %v8848_v6 = vld [vmem:[%s15214_s2 + $0x74] ss:$28 sps:$4 sm:$0xff]   ;;  %v9505_v9 = vld [vmem:[#allocation4 + $0x28] sm:$0xff]  }
  0x92   :  { %8592 = vmatprep.subr.bf16.mxu1 %v8797_v10  ;;  %1978 = vmatpush1.bf16.msra.mxu0 %v8807_v11 }
  0x93   :  { %1979 = vmatprep.subr.bf16.mxu0 %v8812_v12 }
  0x95   :  { %8593 = vmatpush3.bf16.msra.mxu1 %v8797_v10  ;;  %v8882_v10 = vld [vmem:[%s15214_s2 + $0x88] ss:$28 sps:$4 sm:$0xff]  }
  0x96   :  { %8594 = vmatprep.subr.bf16.mxu1 %v8798_v13  ;;  %1980 = vmatpush1.bf16.msra.mxu0 %v8810_v14  ;;  %v8852_v14 = vld [vmem:[%s15214_s2 + $0x3c] ss:$28 sps:$4 sm:$0xff]  }
  0x97   :  { %902 = vmatmul.mubr.bf16.gmra.mxu1 %v9673_v38  ;;  %1095 = vmatmul.mubr.bf16.gmra.mxu0 %v9673_v38  ;;  %v9502_v38 = vld [vmem:[#allocation4 + $0x10] sm:$0xff]  }
  0x98   :  { %911 = vmatprep.mubr.bf16.mxu1 %v15224_v0  ;;  %1104 = vmatprep.mubr.bf16.mxu0 %v15224_v0 }
  0x99   :  { %8595 = vmatpush3.bf16.msra.mxu1 %v8798_v13  ;;  %1981 = vmatprep.subr.bf16.mxu0 %v8816_v15  ;;  %v8846_v13 = vld [vmem:[%s15214_s2 + $0x70] ss:$28 sps:$4 sm:$0xff]  }
  0x9a   :  { %8596 = vmatprep.subr.bf16.mxu1 %v8799_v16  ;;  %1982 = vmatpush1.bf16.msra.mxu0 %v8814_v17 }
  0x9b   :  { %1983 = vmatprep.subr.bf16.mxu0 %v8819_v18 }
  0x9d   :  { %8597 = vmatpush3.bf16.msra.mxu1 %v8799_v16  ;;  %v9950_v16 = vld [vmem:[#allocation2 + $0x18] sm:$0xff]  }
  0x9e   :  { %8598 = vmatprep.subr.bf16.mxu1 %v8800_v19  ;;  %1984 = vmatpush1.bf16.msra.mxu0 %v8817_v20  ;;  %v8884_v20 = vld [vmem:[%s15214_s2 + $0x50] ss:$28 sps:$4 sm:$0xff]  }
  0x9f   :  { %912 = vmatmul.mubr.bf16.gmra.mxu1 %v9681_v46  ;;  %1105 = vmatmul.mubr.bf16.gmra.mxu0 %v9681_v46 }
  0xa0   :  { %921 = vmatprep.mubr.bf16.mxu1 %v15224_v0  ;;  %1114 = vmatprep.mubr.bf16.mxu0 %v15224_v0 }
  0xa1   :  { %8599 = vmatpush3.bf16.msra.mxu1 %v8800_v19  ;;  %1985 = vmatprep.subr.bf16.mxu0 %v8822_v21  ;;  %v8850_v19 = vld [vmem:[%s15214_s2 + $0x38] ss:$28 sps:$4 sm:$0xff]   ;;  %v8856_v21 = vld [vmem:[%s15214_s2 + $0x4] ss:$28 sps:$4 sm:$0xff]  }
  0xa2   :  { %8600 = vmatprep.subr.bf16.mxu1 %v8813_v22  ;;  %1986 = vmatpush1.bf16.msra.mxu0 %v8820_v23 }
  0xa3   :  { %1987 = vmatprep.subr.bf16.mxu0 %v8825_v24  ;;  %v8885_v24 = vld [vmem:[%s15214_s2 + $0x18] ss:$28 sps:$4 sm:$0xff]  }
  0xa5   :  { %8601 = vmatpush3.bf16.msra.mxu1 %v8813_v22 }
  0xa6   :  { %1988 = vmatpush1.bf16.msra.mxu0 %v8823_v25  ;;  %1780 = vmatprep.subr.bf16.mxu1 %v8828_v26 }
  0xa7   :  { %922 = vmatmul.mubr.bf16.gmra.mxu1 %v9689_v58  ;;  %1115 = vmatmul.mubr.bf16.gmra.mxu0 %v9689_v58  ;;  %v8838_v58 = vld [vmem:[%s15214_s2 + $0xe0] ss:$28 sps:$4 sm:$0xff]  }
  0xa8   :  { %931 = vmatprep.mubr.bf16.mxu1 %v15224_v0  ;;  %1124 = vmatprep.mubr.bf16.mxu0 %v15224_v0 }
  0xa9   :  { %8634 = vmatprep.subr.bf16.mxu0 %v8872_v29 }
  0xaf   :  { %932 = vmatmul.mubr.bf16.gmra.mxu1 %v9700_v61  ;;  %1125 = vmatmul.mubr.bf16.gmra.mxu0 %v9700_v61 }
  0xb0   :  { %941 = vmatprep.mubr.bf16.mxu1 %v15224_v0  ;;  %1134 = vmatprep.mubr.bf16.mxu0 %v15224_v0 }
  0xb7   :  { %942 = vmatmul.mubr.bf16.gmra.mxu1 %v9708_v63  ;;  %1135 = vmatmul.mubr.bf16.gmra.mxu0 %v9708_v63 }
  0xb8   :  { %951 = vmatprep.mubr.bf16.mxu1 %v15224_v0  ;;  %1144 = vmatprep.mubr.bf16.mxu0 %v15224_v0 }
  0xbf   :  { %952 = vmatmul.mubr.bf16.gmra.mxu1 %v9716_v2  ;;  %1145 = vmatmul.mubr.bf16.gmra.mxu0 %v9716_v2 }
  0xc0   :  { %961 = vmatprep.mubr.bf16.mxu1 %v15224_v0  ;;  %1154 = vmatprep.mubr.bf16.mxu0 %v15224_v0 }
  0xc7   :  { %962 = vmatmul.mubr.bf16.gmra.mxu1 %v9804_v27  ;;  %1155 = vmatmul.mubr.bf16.gmra.mxu0 %v9804_v27 }
  0xc8   :  { %971 = vmatprep.mubr.bf16.mxu1 %v15224_v0  ;;  %1164 = vmatprep.mubr.bf16.mxu0 %v15224_v0 }
  0xcf   :  { %972 = vmatmul.mubr.bf16.gmra.mxu1 %v9810_v28  ;;  %1165 = vmatmul.mubr.bf16.gmra.mxu0 %v9810_v28 }
  0xd0   :  { %981 = vmatprep.mubr.bf16.mxu1 %v15224_v0  ;;  %1174 = vmatprep.mubr.bf16.mxu0 %v15224_v0 }
  0xd7   :  { %982 = vmatmul.mubr.bf16.gmra.mxu1 %v9675_v39  ;;  %1175 = vmatmul.mubr.bf16.gmra.mxu0 %v9675_v39  ;;  %v8830_v39 = vld [vmem:[%s15214_s2 + $0x150] ss:$28 sps:$4 sm:$0xff]  }
  0xd8   :  { %991 = vmatprep.mubr.bf16.mxu1 %v15224_v0  ;;  %1184 = vmatprep.mubr.bf16.mxu0 %v15224_v0 }
  0xdf   :  { %992 = vmatmul.mubr.bf16.gmra.mxu1 %v9683_v47  ;;  %1185 = vmatmul.mubr.bf16.gmra.mxu0 %v9683_v47 }
  0xe0   :  { %1001 = vmatprep.mubr.bf16.mxu1 %v15224_v0  ;;  %1194 = vmatprep.mubr.bf16.mxu0 %v15224_v0 }
  0xe7   :  { %1002 = vmatmul.mubr.bf16.gmra.mxu1 %v9691_v59  ;;  %1195 = vmatmul.mubr.bf16.gmra.mxu0 %v9691_v59  ;;  %v8844_v59 = vld [vmem:[%s15214_s2 + $0xac] ss:$28 sps:$4 sm:$0xff]  }
  0xe8   :  { %1011 = vmatprep.mubr.bf16.mxu1 %v15224_v0  ;;  %1204 = vmatprep.mubr.bf16.mxu0 %v15224_v0 }
  0xef   :  { %1012 = vmatmul.mubr.bf16.gmra.mxu1 %v9702_v62  ;;  %1205 = vmatmul.mubr.bf16.gmra.mxu0 %v9702_v62  ;;  %v9911_v62 = vld [vmem:[#allocation2 + $0x10] sm:$0xff]  }
  0xf0   :  { %1021 = vmatprep.mubr.bf16.mxu1 %v15224_v0  ;;  %1214 = vmatprep.mubr.bf16.mxu0 %v15224_v0 }
  0xf7   :  { %1022 = vmatmul.mubr.bf16.gmra.mxu1 %v9710_v1  ;;  %1215 = vmatmul.mubr.bf16.gmra.mxu0 %v9710_v1 }
  0xf8   :  { %1031 = vmatprep.mubr.bf16.mxu1 %v15224_v0  ;;  %1224 = vmatprep.mubr.bf16.mxu0 %v15224_v0 }
  0xff   :  { %1032 = vmatmul.mubr.bf16.gmra.mxu1 %v9718_v3  ;;  %1225 = vmatmul.mubr.bf16.gmra.mxu0 %v9718_v3 }
 0x100   :  { %8602 = vmatprep.mubr.bf16.mxu1 %v9500_v30  ;;  %2005 = vmatprep.mubr.bf16.mxu0 %v15224_v0 }
 0x107   :  { %v9850_v34 = vpop.f32.mrf.mxu0  ;;  %v9852_v35 = vpop.f32.mrf.mxu1  ;;  %8603 = vmatmul.mubr.bf16.vlgmr.msra.gmra.mxu1 %v9501_v36  ;;  %2006 = vmatmul.mubr.bf16.vlgmr.msra.gmra.mxu0 %v9842_v31 }
 0x108   :  { %15265 = vst [vmem:[#allocation9_spill] sm:$0xff] %v9852_v35  ;;  %1781 = vmatpush1.bf16.msra.mxu1 %v8826_v32  ;;  %8606 = vmatprep.mubr.bf16.mxu1 %v9502_v38  ;;  %v9990_v32 = vld [vmem:[#allocation2 + $0x20] sm:$0xff]  }
 0x109   :  { %v9861_v40 = vpop.f32.mrf.mxu0  ;;  %v9863_v41 = vpop.f32.mrf.mxu1  ;;  %2015 = vmatprep.mubr.bf16.mxu0 %v15224_v0  ;;  %1782 = vmatprep.subr.bf16.mxu1 %v8832_v33 }
 0x10a   :  { %15266 = vst [vmem:[#allocation10_spill] sm:$0xff] %v9863_v41  ;;  %8635 = vmatpush3.bf16.msra.mxu0 %v8872_v29  ;;  %v8854_v29 = vld [vmem:[%s15214_s2] ss:$28 sps:$4 sm:$0xff]  }
 0x10b   :  { %v9869_v43 = vpop.f32.mrf.mxu0  ;;  %v9871_v44 = vpop.f32.mrf.mxu1  ;;  %8636 = vmatprep.subr.bf16.mxu0 %v8873_v37  ;;  %v10177_v41 = vld [vmem:[#allocation2 + $0x58] sm:$0xff]  }
 0x10c   :  { %15267 = vst [vmem:[#allocation11_spill] sm:$0xff] %v9871_v44  ;;  %1783 = vmatpush1.bf16.msra.mxu1 %v8830_v39  ;;  %v9506_v39 = vld [vmem:[#allocation4 + $0x50] sm:$0xff]  }
 0x10d   :  { %v9875_v46 = vpop.f32.mrf.mxu0  ;;  %v9877_v47 = vpop.f32.mrf.mxu1  ;;  %1784 = vmatprep.subr.bf16.mxu1 %v8836_v42 }
 0x10e   :  { %15268 = vst [vmem:[#allocation12_spill] sm:$0xff] %v9877_v47  ;;  %8637 = vmatpush3.bf16.msra.mxu0 %v8873_v37 }
 0x10f   :  { %v9888_v51 = vpop.f32.mrf.mxu0  ;;  %v9890_v52 = vpop.f32.mrf.mxu1  ;;  %8607 = vmatmul.mubr.bf16.gmra.mxu1 %v9503_v53  ;;  %2016 = vmatmul.mubr.bf16.gmra.mxu0 %v9873_v45  ;;  %v10011_v53 = vld [vmem:[#allocation2 + $0x28] sm:$0xff]  }
 0x110   :  { %15269 = vst [vmem:[#allocation13_spill] sm:$0xff] %v9890_v52  ;;  %8610 = vmatprep.mubr.bf16.mxu1 %v9504_v55  ;;  %2025 = vmatprep.mubr.bf16.mxu0 %v15224_v0  ;;  %v10140_v52 = vld [vmem:[#allocation2 + $0x50] sm:$0xff]  }
 0x111   :  { %v9897_v56 = vpop.f32.mrf.mxu0  ;;  %v9899_v57 = vpop.f32.mrf.mxu1  ;;  %1785 = vmatpush1.bf16.msra.mxu1 %v8834_v48  ;;  %8638 = vmatprep.subr.bf16.mxu0 %v8875_v49 }
 0x112   :  { %15270 = vst [vmem:[#allocation14_spill] sm:$0xff] %v9899_v57  ;;  %1786 = vmatprep.subr.bf16.mxu1 %v8840_v50  ;;  %8639 = vmatpush3.bf16.msra.mxu0 %v8875_v49 }
 0x113   :  { %v9907_v60 = vpop.f32.mrf.mxu0  ;;  %v9909_v61 = vpop.f32.mrf.mxu1  ;;  %8640 = vmatprep.subr.bf16.mxu0 %v8876_v54 }
 0x114   :  { %15271 = vst [vmem:[#allocation15_spill] sm:$0xff] %v9909_v61 }
 0x115   :  { %v9913_v1 = vpop.f32.mrf.mxu0  ;;  %v9915_v3 = vpop.f32.mrf.mxu1  ;;  %1787 = vmatpush1.bf16.msra.mxu1 %v8838_v58 }
 0x116   :  { %15272 = vst [vmem:[#allocation16_spill] sm:$0xff] %v9915_v3  ;;  %1788 = vmatprep.subr.bf16.mxu1 %v8844_v59  ;;  %8641 = vmatpush3.bf16.msra.mxu0 %v8876_v54  ;;  %v9507_v59 = vld [vmem:[#allocation4 + $0x58] sm:$0xff]  }
 0x117   :  { %v9926_v7 = vpop.f32.mrf.mxu0  ;;  %v9928_v8 = vpop.f32.mrf.mxu1  ;;  %8611 = vmatmul.mubr.bf16.gmra.mxu1 %v9505_v9  ;;  %2026 = vmatmul.mubr.bf16.gmra.mxu0 %v9911_v62 }
 0x118   :  { %15273 = vst [vmem:[#allocation17_spill] sm:$0xff] %v9926_v7  ;;  %15274 = vst [vmem:[#allocation18_spill] sm:$0xff] %v9928_v8  ;;  %8614 = vmatprep.mubr.bf16.mxu1 %v9708_v63  ;;  %2035 = vmatprep.mubr.bf16.mxu0 %v15224_v0 }
 0x119   :  { %v9936_v11 = vpop.f32.mrf.mxu0  ;;  %v9938_v12 = vpop.f32.mrf.mxu1  ;;  %1789 = vmatpush1.bf16.msra.mxu1 %v8842_v4  ;;  %8642 = vmatprep.subr.bf16.mxu0 %v8881_v5  ;;  %v9508_v4 = vld [vmem:[#allocation4 + $0x60] sm:$0xff]  }
 0x11a   :  { %15275 = vst [vmem:[#allocation19_spill] sm:$0xff] %v9936_v11  ;;  %15276 = vst [vmem:[#allocation20_spill] sm:$0xff] %v9938_v12  ;;  %1790 = vmatprep.subr.bf16.mxu1 %v8848_v6  ;;  %8643 = vmatpush3.bf16.msra.mxu0 %v8881_v5 }
 0x11b   :  { %v9946_v15 = vpop.f32.mrf.mxu0  ;;  %v9948_v63 = vpop.f32.mrf.mxu1  ;;  %8644 = vmatprep.subr.bf16.mxu0 %v8882_v10 }
 0x11c   :  { %15277 = vst [vmem:[#allocation21_spill] sm:$0xff] %v9946_v15  ;;  %15278 = vst [vmem:[#allocation22_spill] sm:$0xff] %v9948_v63 }
 0x11d   :  { %v9952_v17 = vpop.f32.mrf.mxu0  ;;  %v9954_v18 = vpop.f32.mrf.mxu1  ;;  %1791 = vmatpush1.bf16.msra.mxu1 %v8846_v13  ;;  %v10031_v13 = vld [vmem:[#allocation2 + $0x30] sm:$0xff]  }
 0x11e   :  { %15279 = vst [vmem:[#allocation23_spill] sm:$0xff] %v9952_v17  ;;  %15280 = vst [vmem:[#allocation24_spill] sm:$0xff] %v9954_v18  ;;  %1792 = vmatprep.subr.bf16.mxu1 %v8852_v14  ;;  %8645 = vmatpush3.bf16.msra.mxu0 %v8882_v10 }
 0x11f   :  { %v9965_v22 = vpop.f32.mrf.mxu0  ;;  %v9967_v23 = vpop.f32.mrf.mxu1  ;;  %8615 = vmatmul.mubr.bf16.gmra.mxu1 %v9716_v2  ;;  %2036 = vmatmul.mubr.bf16.gmra.mxu0 %v9950_v16  ;;  %v8861_v2 = vld [vmem:[%s15214_s2 + $0x19c] ss:$28 sps:$4 sm:$0xff]  }
 0x120   :  { %15281 = vst [vmem:[#allocation25_spill] sm:$0xff] %v9965_v22  ;;  %15282 = vst [vmem:[#allocation26_spill] sm:$0xff] %v9967_v23  ;;  %8618 = vmatprep.mubr.bf16.mxu1 %v9804_v27  ;;  %2045 = vmatprep.mubr.bf16.mxu0 %v15224_v0 }
 0x121   :  { %v9976_v25 = vpop.f32.mrf.mxu0  ;;  %v9978_v26 = vpop.f32.mrf.mxu1  ;;  %1793 = vmatpush1.bf16.msra.mxu1 %v8850_v19  ;;  %8646 = vmatprep.subr.bf16.mxu0 %v8884_v20 }
 0x122   :  { %15283 = vst [vmem:[#allocation27_spill] sm:$0xff] %v9976_v25  ;;  %15284 = vst [vmem:[#allocation28_spill] sm:$0xff] %v9978_v26  ;;  %1794 = vmatprep.subr.bf16.mxu1 %v8856_v21  ;;  %8647 = vmatpush3.bf16.msra.mxu0 %v8884_v20  ;;  %v10106_v26 = vld [vmem:[#allocation2 + $0x48] sm:$0xff]  }
 0x123   :  { %v9986_v30 = vpop.f32.mrf.mxu0  ;;  %v9988_v27 = vpop.f32.mrf.mxu1  ;;  %8648 = vmatprep.subr.bf16.mxu0 %v8885_v24 }
 0x124   :  { %15285 = vst [vmem:[#allocation29_spill] sm:$0xff] %v9986_v30  ;;  %15286 = vst [vmem:[#allocation30_spill] sm:$0xff] %v9988_v27 }
 0x125   :  { %v9992_v33 = vpop.f32.mrf.mxu0  ;;  %v9994_v36 = vpop.f32.mrf.mxu1  ;;  %1795 = vmatpush1.bf16.msra.mxu1 %v8854_v29  ;;  %v9510_v29 = vld [vmem:[#allocation4 + $0x70] sm:$0xff]  }
 0x126   :  { %15287 = vst [vmem:[#allocation31_spill] sm:$0xff] %v9992_v33  ;;  %15288 = vst [vmem:[#allocation32_spill] sm:$0xff] %v9994_v36  ;;  %2166 = vmatprep.subr.bf16.mxu1 %v8861_v2  ;;  %8649 = vmatpush3.bf16.msra.mxu0 %v8885_v24  ;;  %v9509_v24 = vld [vmem:[#allocation4 + $0x68] sm:$0xff]  }
 0x127   :  { %v9996_v37 = vpop.f32.mrf.mxu0  ;;  %v9998_v38 = vpop.f32.mrf.mxu1  ;;  %8619 = vmatmul.mubr.bf16.gmra.mxu1 %v9810_v28  ;;  %2046 = vmatmul.mubr.bf16.gmra.mxu0 %v9990_v32 }
 0x128   :  { %15289 = vst [vmem:[#allocation33_spill] sm:$0xff] %v9996_v37  ;;  %15290 = vst [vmem:[#allocation34_spill] sm:$0xff] %v9998_v38  ;;  %8622 = vmatprep.mubr.bf16.mxu1 %v9506_v39  ;;  %2055 = vmatprep.mubr.bf16.mxu0 %v15224_v0 }
 0x129   :  { %v10003_v42 = vpop.f32.mrf.mxu0  ;;  %v10005_v48 = vpop.f32.mrf.mxu1 }
 0x12a   :  { %15291 = vst [vmem:[#allocation35_spill] sm:$0xff] %v10003_v42  ;;  %15292 = vst [vmem:[#allocation36_spill] sm:$0xff] %v10005_v48 }
 0x12b   :  { %v10007_v49 = vpop.f32.mrf.mxu0  ;;  %v10009_v50 = vpop.f32.mrf.mxu1 }
 0x12c   :  { %15293 = vst [vmem:[#allocation37_spill] sm:$0xff] %v10007_v49  ;;  %15294 = vst [vmem:[#allocation38_spill] sm:$0xff] %v10009_v50  ;;  %v8864_v50 = vld [vmem:[%s15214_s2 + $0x160] ss:$28 sps:$4 sm:$0xff]  }
 0x12d   :  { %v10013_v54 = vpop.f32.mrf.mxu0  ;;  %v10015_v55 = vpop.f32.mrf.mxu1 }
 0x12e   :  { %15295 = vst [vmem:[#allocation39_spill] sm:$0xff] %v10013_v54  ;;  %15296 = vst [vmem:[#allocation40_spill] sm:$0xff] %v10015_v55 }
 0x12f   :  { %v10017_v28 = vpop.f32.mrf.mxu0  ;;  %v10019_v58 = vpop.f32.mrf.mxu1  ;;  %8623 = vmatmul.mubr.bf16.gmra.mxu1 %v9507_v59  ;;  %2056 = vmatmul.mubr.bf16.gmra.mxu0 %v10011_v53 }
 0x130   :  { %15297 = vst [vmem:[#allocation41_spill] sm:$0xff] %v10017_v28  ;;  %15298 = vst [vmem:[#allocation42_spill] sm:$0xff] %v10019_v58  ;;  %8626 = vmatprep.mubr.bf16.mxu1 %v9508_v4  ;;  %2065 = vmatprep.mubr.bf16.mxu0 %v15224_v0 }
 0x131   :  { %v10023_v5 = vpop.f32.mrf.mxu0  ;;  %v10025_v6 = vpop.f32.mrf.mxu1 }
 0x132   :  { %15299 = vst [vmem:[#allocation43_spill] sm:$0xff] %v10023_v5  ;;  %15300 = vst [vmem:[#allocation44_spill] sm:$0xff] %v10025_v6  ;;  %v10051_v6 = vld [vmem:[#allocation2 + $0x38] sm:$0xff]  }
 0x133   :  { %v10027_v9 = vpop.f32.mrf.mxu0  ;;  %v10029_v10 = vpop.f32.mrf.mxu1 }
 0x134   :  { %15301 = vst [vmem:[#allocation45_spill] sm:$0xff] %v10027_v9  ;;  %15302 = vst [vmem:[#allocation46_spill] sm:$0xff] %v10029_v10 }
 0x135   :  { %v10033_v14 = vpop.f32.mrf.mxu0  ;;  %v10035_v19 = vpop.f32.mrf.mxu1 }
 0x136   :  { %15303 = vst [vmem:[#allocation47_spill] sm:$0xff] %v10033_v14  ;;  %15304 = vst [vmem:[#allocation48_spill] sm:$0xff] %v10035_v19 }
 0x137   :  { %v10037_v20 = vpop.f32.mrf.mxu0  ;;  %v10039_v21 = vpop.f32.mrf.mxu1  ;;  %8627 = vmatmul.mubr.bf16.gmra.mxu1 %v9509_v24  ;;  %2066 = vmatmul.mubr.bf16.gmra.mxu0 %v10031_v13 }
 0x138   :  { %15305 = vst [vmem:[#allocation49_spill] sm:$0xff] %v10037_v20  ;;  %15306 = vst [vmem:[#allocation50_spill] sm:$0xff] %v10039_v21  ;;  %8630 = vmatprep.mubr.bf16.mxu1 %v9510_v29  ;;  %2075 = vmatprep.mubr.bf16.mxu0 %v15224_v0  ;;  %v9511_v29 = vld [vmem:[#allocation4 + $0x78] sm:$0xff]  }
 0x139   :  { %v10043_v2 = vpop.f32.mrf.mxu0  ;;  %v10045_v39 = vpop.f32.mrf.mxu1 }
 0x13a   :  { %15307 = vst [vmem:[#allocation51_spill] sm:$0xff] %v10043_v2  ;;  %15308 = vst [vmem:[#allocation52_spill] sm:$0xff] %v10045_v39 }
 0x13b   :  { %v10047_v59 = vpop.f32.mrf.mxu0  ;;  %v10049_v4 = vpop.f32.mrf.mxu1 }
 0x13c   :  { %15309 = vst [vmem:[#allocation53_spill] sm:$0xff] %v10047_v59  ;;  %15310 = vst [vmem:[#allocation54_spill] sm:$0xff] %v10049_v4 }
 0x13d   :  { %v10053_v58 = vpop.f32.mrf.mxu0  ;;  %v10055_v21 = vpop.f32.mrf.mxu1 }
 0x13e   :  { %15311 = vst [vmem:[#allocation55_spill] sm:$0xff] %v10053_v58  ;;  %15312 = vst [vmem:[#allocation56_spill] sm:$0xff] %v10055_v21  ;;  %v10072_v21 = vld [vmem:[#allocation2 + $0x40] sm:$0xff]  }
 0x13f   :  { %v10057_v24 = vpop.f32.mrf.mxu0  ;;  %v10059_v19 = vpop.f32.mrf.mxu1  ;;  %8631 = vmatmul.mubr.bf16.gmra.mxu1 %v9511_v29  ;;  %2076 = vmatmul.mubr.bf16.gmra.mxu0 %v10051_v6  ;;  %v8859_v29 = vld [vmem:[%s15214_s2 + $0x198] ss:$28 sps:$4 sm:$0xff]  }
 0x140   :  { %15313 = vst [vmem:[#allocation57_spill] sm:$0xff] %v10057_v24  ;;  %15314 = vst [vmem:[#allocation58_spill] sm:$0xff] %v10059_v19  ;;  %1812 = vmatprep.mubr.bf16.mxu1 %v15224_v0  ;;  %2085 = vmatprep.mubr.bf16.mxu0 %v15224_v0  ;;  %v8866_v0 = vld [vmem:[%s15214_s2 + $0x164] ss:$28 sps:$4 sm:$0xff]  }
 0x141   :  { %v10064_v39 = vpop.f32.mrf.mxu0  ;;  %v10066_v4 = vpop.f32.mrf.mxu1 }
 0x142   :  { %15315 = vst [vmem:[#allocation59_spill] sm:$0xff] %v10064_v39  ;;  %15316 = vst [vmem:[#allocation60_spill] sm:$0xff] %v10066_v4  ;;  %v10211_v39 = vld [vmem:[#allocation2 + $0x60] sm:$0xff]  }
 0x143   :  { %v10068_v10 = vpop.f32.mrf.mxu0  ;;  %v10070_v38 = vpop.f32.mrf.mxu1 }
 0x144   :  { %15317 = vst [vmem:[#allocation61_spill] sm:$0xff] %v10068_v10  ;;  %15318 = vst [vmem:[#allocation62_spill] sm:$0xff] %v10070_v38  ;;  %v15322_v38 = vmov 0  }
 0x145   :  { %v10077_v19 = vpop.f32.mrf.mxu0  ;;  %v10079_v55 = vpop.f32.mrf.mxu1 }
 0x146   :  { %15319 = vst [vmem:[#allocation63_spill] sm:$0xff] %v10077_v19  ;;  %15320 = vst [vmem:[#allocation64_spill] sm:$0xff] %v10079_v55 }
 0x147   :  { %v10084_v48 = vpop.f32.mrf.mxu1  ;;  %v10086_v4 = vpop.f32.mrf.mxu0  ;;  %1813 = vmatmul.mubr.bf16.vlgmr.msra.gmra.mxu1 %v9842_v31  ;;  %2086 = vmatmul.mubr.bf16.gmra.mxu0 %v10072_v21 }
 0x148   :  { %15321 = vst [vmem:[#allocation65_spill] sm:$0xff] %v10086_v4  ;;  %2167 = vmatpush1.bf16.msra.mxu1 %v8859_v29  ;;  %1822 = vmatprep.mubr.bf16.mxu1 %v15322_v38  ;;  %v8871_v4 = vld [vmem:[%s15214_s2 + $0x12c] ss:$28 sps:$4 sm:$0xff]  }
 0x149   :  { %v10094_v55 = vpop.f32.mrf.mxu1  ;;  %v10096_v23 = vpop.f32.mrf.mxu0  ;;  %2095 = vmatprep.mubr.bf16.mxu0 %v15322_v38  ;;  %2168 = vmatprep.subr.bf16.mxu1 %v8866_v0  ;;  %v8880_v0 = vld [vmem:[%s15214_s2 + $0xf4] ss:$28 sps:$4 sm:$0xff]  }
 0x14a   :  { %15323 = vst [vmem:[#allocation66_spill] sm:$0xff] %v10096_v23  ;;  %v8869_v23 = vld [vmem:[%s15214_s2 + $0x128] ss:$28 sps:$4 sm:$0xff]  }
 0x14b   :  { %v10102_v36 = vpop.f32.mrf.mxu1  ;;  %v10104_v29 = vpop.f32.mrf.mxu0 }
 0x14c   :  { %15324 = vst [vmem:[#allocation67_spill] sm:$0xff] %v10104_v29  ;;  %2169 = vmatpush1.bf16.msra.mxu1 %v8864_v50 }
 0x14d   :  { %v10108_v27 = vpop.f32.mrf.mxu1  ;;  %v10110_v8 = vpop.f32.mrf.mxu0  ;;  %2170 = vmatprep.subr.bf16.mxu1 %v8871_v4  ;;  %v8878_v4 = vld [vmem:[%s15214_s2 + $0xf0] ss:$28 sps:$4 sm:$0xff]  }
 0x14e   :  { %15325 = vst [vmem:[#allocation68_spill] sm:$0xff] %v10110_v8 }
 0x14f   :  { %v10118_v18 = vpop.f32.mrf.mxu1  ;;  %v10120_v12 = vpop.f32.mrf.mxu0  ;;  %1823 = vmatmul.mubr.bf16.gmra.mxu1 %v9873_v45  ;;  %2096 = vmatmul.mubr.bf16.gmra.mxu0 %v10106_v26 }
 0x150   :  { %15326 = vst [vmem:[#allocation69_spill] sm:$0xff] %v10120_v12  ;;  %1832 = vmatprep.mubr.bf16.mxu1 %v15322_v38  ;;  %2105 = vmatprep.mubr.bf16.mxu0 %v15322_v38  ;;  %v8888_v12 = vld [vmem:[%s15214_s2 + $0xbc] ss:$28 sps:$4 sm:$0xff]  }
 0x151   :  { %v10126_v50 = vpop.f32.mrf.mxu1  ;;  %v10128_v8 = vpop.f32.mrf.mxu0  ;;  %2171 = vmatpush1.bf16.msra.mxu1 %v8869_v23  ;;  %v8886_v23 = vld [vmem:[%s15214_s2 + $0xb8] ss:$28 sps:$4 sm:$0xff]  }
 0x152   :  { %15327 = vst [vmem:[#allocation70_spill] sm:$0xff] %v10128_v8  ;;  %2172 = vmatprep.subr.bf16.mxu1 %v8880_v0  ;;  %v8891_v0 = vld [vmem:[%s15214_s2 + $0x84] ss:$28 sps:$4 sm:$0xff]  }
 0x153   :  { %v10136_v29 = vpop.f32.mrf.mxu1  ;;  %v10138_v63 = vpop.f32.mrf.mxu0 }
 0x154   :  { %15328 = vst [vmem:[#allocation71_spill] sm:$0xff] %v10138_v63  ;;  %v8894_v63 = vld [vmem:[%s15214_s2 + $0x4c] ss:$28 sps:$4 sm:$0xff]  }
 0x155   :  { %v10142_v3 = vpop.f32.mrf.mxu1  ;;  %v10144_v57 = vpop.f32.mrf.mxu0  ;;  %2173 = vmatpush1.bf16.msra.mxu1 %v8878_v4  ;;  %v8909_v4 = vld [vmem:[%s15217_s5 + $0x74] ss:$8 sps:$4 sm:$0xff]  }
 0x156   :  { %15329 = vst [vmem:[#allocation72_spill] sm:$0xff] %v10144_v57  ;;  %2174 = vmatprep.subr.bf16.mxu1 %v8888_v12  ;;  %4249 = vmatprep.subr.bf16.mxu0 %v8909_v4 }
 0x157   :  { %v10152_v8 = vpop.f32.mrf.mxu1  ;;  %v10154_v61 = vpop.f32.mrf.mxu0  ;;  %1833 = vmatmul.mubr.bf16.gmra.mxu1 %v9911_v62  ;;  %2106 = vmatmul.mubr.bf16.gmra.mxu0 %v10140_v52 }
 0x158   :  { %15330 = vst [vmem:[#allocation73_spill] sm:$0xff] %v10154_v61  ;;  %1842 = vmatprep.mubr.bf16.mxu1 %v15322_v38  ;;  %2115 = vmatprep.mubr.bf16.mxu0 %v15322_v38  ;;  %v8889_v61 = vld [vmem:[%s15214_s2 + $0x80] ss:$28 sps:$4 sm:$0xff]  }
 0x159   :  { %v10163_v12 = vpop.f32.mrf.mxu1  ;;  %v10165_v57 = vpop.f32.mrf.mxu0  ;;  %2175 = vmatpush1.bf16.msra.mxu1 %v8886_v23  ;;  %v8892_v23 = vld [vmem:[%s15214_s2 + $0x48] ss:$28 sps:$4 sm:$0xff]  }
 0x15a   :  { %15331 = vst [vmem:[#allocation74_spill] sm:$0xff] %v10165_v57  ;;  %2176 = vmatprep.subr.bf16.mxu1 %v8891_v0  ;;  %v8897_v0 = vld [vmem:[%s15214_s2 + $0x14] ss:$28 sps:$4 sm:$0xff]  }
 0x15b   :  { %v10173_v35 = vpop.f32.mrf.mxu1  ;;  %v10175_v47 = vpop.f32.mrf.mxu0 }
 0x15c   :  { %15332 = vst [vmem:[#allocation75_spill] sm:$0xff] %v10175_v47 }
 0x15d   :  { %v10179_v44 = vpop.f32.mrf.mxu1  ;;  %v10181_v57 = vpop.f32.mrf.mxu0  ;;  %2177 = vmatpush1.bf16.msra.mxu1 %v8889_v61 }
 0x15e   :  { %15333 = vst [vmem:[#allocation76_spill] sm:$0xff] %v10181_v57  ;;  %2178 = vmatprep.subr.bf16.mxu1 %v8894_v63  ;;  %v8895_v63 = vld [vmem:[%s15214_s2 + $0x10] ss:$28 sps:$4 sm:$0xff]  }
 0x15f   :  { %v10189_v4 = vpop.f32.mrf.mxu1  ;;  %v10191_v24 = vpop.f32.mrf.mxu0  ;;  %1843 = vmatmul.mubr.bf16.gmra.mxu1 %v9950_v16  ;;  %2116 = vmatmul.mubr.bf16.gmra.mxu0 %v10177_v41 }
 0x160   :  { %15334 = vst [vmem:[#allocation77_spill] sm:$0xff] %v10191_v24  ;;  %1852 = vmatprep.mubr.bf16.mxu1 %v15322_v38  ;;  %2125 = vmatprep.mubr.bf16.mxu0 %v15322_v38  ;;  %v8900_v24 = vld [vmem:[%s15217_s5 + $0x174] ss:$8 sps:$4 sm:$0xff]  }
 0x161   :  { %v10197_v61 = vpop.f32.mrf.mxu1  ;;  %v10199_v47 = vpop.f32.mrf.mxu0  ;;  %2179 = vmatpush1.bf16.msra.mxu1 %v8892_v23 }
 0x162   :  { %15335 = vst [vmem:[#allocation78_spill] sm:$0xff] %v10199_v47  ;;  %2180 = vmatprep.subr.bf16.mxu1 %v8897_v0 }
 0x163   :  { %v10207_v57 = vpop.f32.mrf.mxu1  ;;  %v10209_v19 = vpop.f32.mrf.mxu0 }
 0x164   :  { %15336 = vst [vmem:[#allocation79_spill] sm:$0xff] %v10209_v19 }
 0x165   :  { %v10213_v10 = vpop.f32.mrf.mxu1  ;;  %v10215_v20 = vpop.f32.mrf.mxu0  ;;  %2181 = vmatpush1.bf16.msra.mxu1 %v8895_v63 }
 0x166   :  { %15337 = vst [vmem:[#allocation80_spill] sm:$0xff] %v10215_v20  ;;  %4442 = vmatprep.subr.bf16.mxu1 %v8900_v24  ;;  %v10233_v24 = vld [vmem:[#allocation2 + $0x68] sm:$0xff]  }
 0x167   :  { %v10217_v23 = vpop.f32.mrf.mxu1  ;;  %v10219_v47 = vpop.f32.mrf.mxu0  ;;  %1853 = vmatmul.mubr.bf16.gmra.mxu1 %v9990_v32  ;;  %2126 = vmatmul.mubr.bf16.gmra.mxu0 %v10211_v39 }
 0x168   :  { %15338 = vst [vmem:[#allocation81_spill] sm:$0xff] %v10219_v47  ;;  %1862 = vmatprep.mubr.bf16.mxu1 %v15322_v38  ;;  %2135 = vmatprep.mubr.bf16.mxu0 %v15322_v38 }
 0x169   :  { %v10225_v0 = vpop.f32.mrf.mxu1  ;;  %v10227_v19 = vpop.f32.mrf.mxu0 }
 0x16a   :  { %15339 = vst [vmem:[#allocation82_spill] sm:$0xff] %v10227_v19 }
 0x16b   :  { %v10229_v58 = vpop.f32.mrf.mxu1  ;;  %v10231_v63 = vpop.f32.mrf.mxu0 }
 0x16c   :  { %15340 = vst [vmem:[#allocation83_spill] sm:$0xff] %v10231_v63 }
 0x16d   :  { %v10235_v20 = vpop.f32.mrf.mxu1  ;;  %v10237_v47 = vpop.f32.mrf.mxu0 }
 0x16e   :  { %15341 = vst [vmem:[#allocation84_spill] sm:$0xff] %v10237_v47  ;;  %v10255_v47 = vld [vmem:[#allocation2 + $0x70] sm:$0xff]  }
 0x16f   :  { %v10239_v2 = vpop.f32.mrf.mxu1  ;;  %v10241_v59 = vpop.f32.mrf.mxu0  ;;  %1863 = vmatmul.mubr.bf16.gmra.mxu1 %v10011_v53  ;;  %2136 = vmatmul.mubr.bf16.gmra.mxu0 %v10233_v24 }
 0x170   :  { %15342 = vst [vmem:[#allocation85_spill] sm:$0xff] %v10239_v2  ;;  %15343 = vst [vmem:[#allocation86_spill] sm:$0xff] %v10241_v59  ;;  %1872 = vmatprep.mubr.bf16.mxu1 %v15322_v38  ;;  %2145 = vmatprep.mubr.bf16.mxu0 %v15322_v38 }
 0x171   :  { %v10247_v19 = vpop.f32.mrf.mxu1  ;;  %v10249_v63 = vpop.f32.mrf.mxu0 }
 0x172   :  { %15344 = vst [vmem:[#allocation87_spill] sm:$0xff] %v10247_v19  ;;  %15345 = vst [vmem:[#allocation88_spill] sm:$0xff] %v10249_v63 }
 0x173   :  { %v10251_v28 = vpop.f32.mrf.mxu1  ;;  %v10253_v14 = vpop.f32.mrf.mxu0 }
 0x174   :  { %15346 = vst [vmem:[#allocation89_spill] sm:$0xff] %v10251_v28  ;;  %15347 = vst [vmem:[#allocation90_spill] sm:$0xff] %v10253_v14 }
 0x175   :  { %v10257_v5 = vpop.f32.mrf.mxu1  ;;  %v10259_v59 = vpop.f32.mrf.mxu0 }
 0x176   :  { %15348 = vst [vmem:[#allocation91_spill] sm:$0xff] %v10257_v5  ;;  %15349 = vst [vmem:[#allocation92_spill] sm:$0xff] %v10259_v59  ;;  %v10277_v59 = vld [vmem:[#allocation2 + $0x78] sm:$0xff]  }
 0x177   :  { %v10261_v9 = vpop.f32.mrf.mxu1  ;;  %v10263_v37 = vpop.f32.mrf.mxu0  ;;  %1873 = vmatmul.mubr.bf16.gmra.mxu1 %v10031_v13  ;;  %2146 = vmatmul.mubr.bf16.gmra.mxu0 %v10255_v47 }
 0x178   :  { %15350 = vst [vmem:[#allocation93_spill] sm:$0xff] %v10261_v9  ;;  %15351 = vst [vmem:[#allocation94_spill] sm:$0xff] %v10263_v37  ;;  %1882 = vmatprep.mubr.bf16.mxu1 %v15322_v38  ;;  %2155 = vmatprep.mubr.bf16.mxu0 %v15322_v38 }
 0x179   :  { %v10269_v63 = vpop.f32.mrf.mxu1  ;;  %v10271_v14 = vpop.f32.mrf.mxu0 }
 0x17a   :  { %15352 = vst [vmem:[#allocation95_spill] sm:$0xff] %v10269_v63  ;;  %15353 = vst [vmem:[#allocation96_spill] sm:$0xff] %v10271_v14  ;;  %v8912_v63 = vld [vmem:[%s15217_s5 + $0x64] ss:$8 sps:$4 sm:$0xff]  }
 0x17b   :  { %v10273_v54 = vpop.f32.mrf.mxu1  ;;  %v10275_v49 = vpop.f32.mrf.mxu0 }
 0x17c   :  { %15354 = vst [vmem:[#allocation97_spill] sm:$0xff] %v10273_v54  ;;  %15355 = vst [vmem:[#allocation98_spill] sm:$0xff] %v10275_v49 }
 0x17d   :  { %v10279_v42 = vpop.f32.mrf.mxu1  ;;  %v10281_v37 = vpop.f32.mrf.mxu0 }
 0x17e   :  { %15356 = vst [vmem:[#allocation99_spill] sm:$0xff] %v10279_v42  ;;  %15357 = vst [vmem:[#allocation100_spill] sm:$0xff] %v10281_v37 }
 0x17f   :  { %v10283_v9 = vpop.f32.mrf.mxu1  ;;  %v10285_v5 = vpop.f32.mrf.mxu0  ;;  %1883 = vmatmul.mubr.bf16.gmra.mxu1 %v10051_v6  ;;  %2156 = vmatmul.mubr.bf16.gmra.mxu0 %v10277_v59 }
 0x180   :  { %15358 = vst [vmem:[#allocation101_spill] sm:$0xff] %v10283_v9  ;;  %15359 = vst [vmem:[#allocation102_spill] sm:$0xff] %v10285_v5  ;;  %1892 = vmatprep.mubr.bf16.mxu1 %v15322_v38  ;;  %8650 = vmatprep.mubr.bf16.mxu0 %v9842_v31  ;;  %v8907_v5 = vld [vmem:[%s15217_s5 + $0x70] ss:$8 sps:$4 sm:$0xff]  }
 0x181   :  { %v10291_v14 = vpop.f32.mrf.mxu1  ;;  %v10293_v49 = vpop.f32.mrf.mxu0 }
 0x182   :  { %15360 = vst [vmem:[#allocation103_spill] sm:$0xff] %v10291_v14  ;;  %15361 = vst [vmem:[#allocation104_spill] sm:$0xff] %v10293_v49 }
 0x183   :  { %v10295_v54 = vpop.f32.mrf.mxu1  ;;  %v10297_v42 = vpop.f32.mrf.mxu0 }
 0x184   :  { %15362 = vst [vmem:[#allocation105_spill] sm:$0xff] %v10295_v54  ;;  %15363 = vst [vmem:[#allocation106_spill] sm:$0xff] %v10297_v42 }
 0x185   :  { %v10299_v37 = vpop.f32.mrf.mxu1  ;;  %v10301_v9 = vpop.f32.mrf.mxu0 }
 0x186   :  { %15364 = vst [vmem:[#allocation107_spill] sm:$0xff] %v10299_v37  ;;  %15365 = vst [vmem:[#allocation108_spill] sm:$0xff] %v10301_v9  ;;  %v8910_v9 = vld [vmem:[%s15217_s5 + $0x60] ss:$8 sps:$4 sm:$0xff]  }
 0x187   :  { %v10309_v22 = vpop.f32.mrf.mxu1  ;;  %v10311_v14 = vpop.f32.mrf.mxu0  ;;  %1893 = vmatmul.mubr.bf16.gmra.mxu1 %v10072_v21  ;;  %8651 = vmatmul.mubr.bf16.vlgmr.msra.gmra.mxu0 %v9873_v45 }
 0x188   :  { %15366 = vst [vmem:[#allocation109_spill] sm:$0xff] %v10309_v22  ;;  %15367 = vst [vmem:[#allocation110_spill] sm:$0xff] %v10311_v14  ;;  %1902 = vmatprep.mubr.bf16.mxu1 %v15322_v38  ;;  %8654 = vmatprep.mubr.bf16.mxu0 %v9911_v62  ;;  %v8918_v14 = vld [vmem:[%s15217_s5 + $0x54] ss:$8 sps:$4 sm:$0xff]  }
 0x189   :  { %v10317_v42 = vpop.f32.mrf.mxu1  ;;  %v10319_v49 = vpop.f32.mrf.mxu0  ;;  %4250 = vmatpush1.bf16.msra.mxu0 %v8907_v5  ;;  %v8916_v5 = vld [vmem:[%s15217_s5 + $0x50] ss:$8 sps:$4 sm:$0xff]  }
 0x18a   :  { %15368 = vst [vmem:[#allocation111_spill] sm:$0xff] %v10317_v42  ;;  %15369 = vst [vmem:[#allocation112_spill] sm:$0xff] %v10319_v49  ;;  %4251 = vmatprep.subr.bf16.mxu0 %v8912_v63  ;;  %v8921_v63 = vld [vmem:[%s15217_s5 + $0x44] ss:$8 sps:$4 sm:$0xff]  }
 0x18b   :  { %v10327_v22 = vpop.f32.mrf.mxu1  ;;  %v10329_v37 = vpop.f32.mrf.mxu0 }
 0x18c   :  { %15370 = vst [vmem:[#allocation113_spill] sm:$0xff] %v10327_v22  ;;  %15371 = vst [vmem:[#allocation114_spill] sm:$0xff] %v10329_v37 }
 0x18d   :  { %v10331_v54 = vpop.f32.mrf.mxu1  ;;  %v10333_v33 = vpop.f32.mrf.mxu0  ;;  %4252 = vmatpush1.bf16.msra.mxu0 %v8910_v9 }
 0x18e   :  { %15372 = vst [vmem:[#allocation115_spill] sm:$0xff] %v10331_v54  ;;  %15373 = vst [vmem:[#allocation116_spill] sm:$0xff] %v10333_v33  ;;  %4253 = vmatprep.subr.bf16.mxu0 %v8918_v14  ;;  %v8919_v14 = vld [vmem:[%s15217_s5 + $0x40] ss:$8 sps:$4 sm:$0xff]  }
 0x18f   :  { %v10341_v49 = vpop.f32.mrf.mxu1  ;;  %v10343_v42 = vpop.f32.mrf.mxu0  ;;  %1903 = vmatmul.mubr.bf16.gmra.mxu1 %v10106_v26  ;;  %8655 = vmatmul.mubr.bf16.gmra.mxu0 %v9950_v16 }
 0x190   :  { %15374 = vst [vmem:[#allocation117_spill] sm:$0xff] %v10341_v49  ;;  %15375 = vst [vmem:[#allocation118_spill] sm:$0xff] %v10343_v42  ;;  %1912 = vmatprep.mubr.bf16.mxu1 %v15322_v38  ;;  %8658 = vmatprep.mubr.bf16.mxu0 %v9990_v32  ;;  %v8927_v42 = vld [vmem:[%s15217_s5 + $0x34] ss:$8 sps:$4 sm:$0xff]  }
 0x191   :  { %v10349_v9 = vpop.f32.mrf.mxu1  ;;  %v10351_v37 = vpop.f32.mrf.mxu0  ;;  %4254 = vmatpush1.bf16.msra.mxu0 %v8916_v5  ;;  %v8925_v5 = vld [vmem:[%s15217_s5 + $0x30] ss:$8 sps:$4 sm:$0xff]  }
 0x192   :  { %15376 = vst [vmem:[#allocation119_spill] sm:$0xff] %v10349_v9  ;;  %15377 = vst [vmem:[#allocation120_spill] sm:$0xff] %v10351_v37  ;;  %4255 = vmatprep.subr.bf16.mxu0 %v8921_v63  ;;  %v8930_v63 = vld [vmem:[%s15217_s5 + $0x24] ss:$8 sps:$4 sm:$0xff]  }
 0x193   :  { %v10359_v33 = vpop.f32.mrf.mxu1  ;;  %v10361_v54 = vpop.f32.mrf.mxu0 }
 0x194   :  { %15378 = vst [vmem:[#allocation121_spill] sm:$0xff] %v10359_v33  ;;  %15379 = vst [vmem:[#allocation122_spill] sm:$0xff] %v10361_v54 }
 0x195   :  { %v10363_v49 = vpop.f32.mrf.mxu1  ;;  %v10365_v22 = vpop.f32.mrf.mxu0  ;;  %4256 = vmatpush1.bf16.msra.mxu0 %v8919_v14 }
 0x196   :  { %15380 = vst [vmem:[#allocation123_spill] sm:$0xff] %v10363_v49  ;;  %15381 = vst [vmem:[#allocation124_spill] sm:$0xff] %v10365_v22  ;;  %4257 = vmatprep.subr.bf16.mxu0 %v8927_v42  ;;  %v8928_v42 = vld [vmem:[%s15217_s5 + $0x20] ss:$8 sps:$4 sm:$0xff]  }
 0x197   :  { %v10373_v37 = vpop.f32.mrf.mxu1  ;;  %v10375_v9 = vpop.f32.mrf.mxu0  ;;  %1913 = vmatmul.mubr.bf16.gmra.mxu1 %v10140_v52  ;;  %8659 = vmatmul.mubr.bf16.gmra.mxu0 %v10011_v53 }
 0x198   :  { %15382 = vst [vmem:[#allocation125_spill] sm:$0xff] %v10373_v37  ;;  %15383 = vst [vmem:[#allocation126_spill] sm:$0xff] %v10375_v9  ;;  %1922 = vmatprep.mubr.bf16.mxu1 %v15322_v38  ;;  %8662 = vmatprep.mubr.bf16.mxu0 %v10031_v13  ;;  %v8936_v9 = vld [vmem:[%s15217_s5 + $0x14] ss:$8 sps:$4 sm:$0xff]  }
 0x199   :  { %v10381_v14 = vpop.f32.mrf.mxu1  ;;  %v10383_v54 = vpop.f32.mrf.mxu0  ;;  %4258 = vmatpush1.bf16.msra.mxu0 %v8925_v5  ;;  %v8934_v5 = vld [vmem:[%s15217_s5 + $0x10] ss:$8 sps:$4 sm:$0xff]  }
 0x19a   :  { %15384 = vst [vmem:[#allocation127_spill] sm:$0xff] %v10381_v14  ;;  %15385 = vst [vmem:[#allocation128_spill] sm:$0xff] %v10383_v54  ;;  %4259 = vmatprep.subr.bf16.mxu0 %v8930_v63  ;;  %v8939_v63 = vld [vmem:[%s15217_s5 + $0x4] ss:$8 sps:$4 sm:$0xff]  }
 0x19b   :  { %v10391_v22 = vpop.f32.mrf.mxu1  ;;  %v10393_v37 = vpop.f32.mrf.mxu0 }
 0x19c   :  { %15386 = vst [vmem:[#allocation129_spill] sm:$0xff] %v10391_v22  ;;  %15387 = vst [vmem:[#allocation130_spill] sm:$0xff] %v10393_v37 }
 0x19d   :  { %v10395_v49 = vpop.f32.mrf.mxu1  ;;  %v10397_v33 = vpop.f32.mrf.mxu0  ;;  %4260 = vmatpush1.bf16.msra.mxu0 %v8928_v42 }
 0x19e   :  { %15388 = vst [vmem:[#allocation131_spill] sm:$0xff] %v10395_v49  ;;  %15389 = vst [vmem:[#allocation132_spill] sm:$0xff] %v10397_v33  ;;  %4261 = vmatprep.subr.bf16.mxu0 %v8936_v9  ;;  %v8937_v9 = vld [vmem:[%s15217_s5] ss:$8 sps:$4 sm:$0xff]  }
 0x19f   :  { %v10405_v54 = vpop.f32.mrf.mxu1  ;;  %v10407_v14 = vpop.f32.mrf.mxu0  ;;  %1923 = vmatmul.mubr.bf16.gmra.mxu1 %v10177_v41  ;;  %8663 = vmatmul.mubr.bf16.gmra.mxu0 %v10051_v6 }
 0x1a0   :  { %15390 = vst [vmem:[#allocation133_spill] sm:$0xff] %v10405_v54  ;;  %15391 = vst [vmem:[#allocation134_spill] sm:$0xff] %v10407_v14  ;;  %1932 = vmatprep.mubr.bf16.mxu1 %v15322_v38  ;;  %8666 = vmatprep.mubr.bf16.mxu0 %v10072_v21  ;;  %v8945_v14 = vld [vmem:[%s15217_s5 + $0xf4] ss:$8 sps:$4 sm:$0xff]  }
 0x1a1   :  { %v10413_v42 = vpop.f32.mrf.mxu1  ;;  %v10415_v37 = vpop.f32.mrf.mxu0  ;;  %4262 = vmatpush1.bf16.msra.mxu0 %v8934_v5  ;;  %v8943_v5 = vld [vmem:[%s15217_s5 + $0xf0] ss:$8 sps:$4 sm:$0xff]  }
 0x1a2   :  { %15392 = vst [vmem:[#allocation135_spill] sm:$0xff] %v10413_v42  ;;  %15393 = vst [vmem:[#allocation136_spill] sm:$0xff] %v10415_v37  ;;  %4263 = vmatprep.subr.bf16.mxu0 %v8939_v63  ;;  %v8948_v63 = vld [vmem:[%s15217_s5 + $0xe4] ss:$8 sps:$4 sm:$0xff]  }
 0x1a3   :  { %v10423_v33 = vpop.f32.mrf.mxu1  ;;  %v10425_v54 = vpop.f32.mrf.mxu0 }
 0x1a4   :  { %15394 = vst [vmem:[#allocation137_spill] sm:$0xff] %v10423_v33  ;;  %15395 = vst [vmem:[#allocation138_spill] sm:$0xff] %v10425_v54 }
 0x1a5   :  { %v10427_v49 = vpop.f32.mrf.mxu1  ;;  %v10429_v22 = vpop.f32.mrf.mxu0  ;;  %4264 = vmatpush1.bf16.msra.mxu0 %v8937_v9 }
 0x1a6   :  { %15396 = vst [vmem:[#allocation139_spill] sm:$0xff] %v10427_v49  ;;  %15397 = vst [vmem:[#allocation140_spill] sm:$0xff] %v10429_v22  ;;  %4265 = vmatprep.subr.bf16.mxu0 %v8945_v14  ;;  %v8946_v14 = vld [vmem:[%s15217_s5 + $0xe0] ss:$8 sps:$4 sm:$0xff]  }
 0x1a7   :  { %v10437_v37 = vpop.f32.mrf.mxu1  ;;  %v10439_v42 = vpop.f32.mrf.mxu0  ;;  %1933 = vmatmul.mubr.bf16.gmra.mxu1 %v10211_v39  ;;  %8667 = vmatmul.mubr.bf16.gmra.mxu0 %v10106_v26 }
 0x1a8   :  { %15398 = vst [vmem:[#allocation141_spill] sm:$0xff] %v10437_v37  ;;  %15399 = vst [vmem:[#allocation142_spill] sm:$0xff] %v10439_v42  ;;  %1942 = vmatprep.mubr.bf16.mxu1 %v15322_v38  ;;  %8670 = vmatprep.mubr.bf16.mxu0 %v10140_v52  ;;  %v8954_v42 = vld [vmem:[%s15217_s5 + $0xd4] ss:$8 sps:$4 sm:$0xff]  }
 0x1a9   :  { %v10445_v9 = vpop.f32.mrf.mxu1  ;;  %v10447_v54 = vpop.f32.mrf.mxu0  ;;  %4266 = vmatpush2.bf16.msra.mxu0 %v8943_v5  ;;  %v8952_v5 = vld [vmem:[%s15217_s5 + $0xd0] ss:$8 sps:$4 sm:$0xff]  }
 0x1aa   :  { %15400 = vst [vmem:[#allocation143_spill] sm:$0xff] %v10445_v9  ;;  %15401 = vst [vmem:[#allocation144_spill] sm:$0xff] %v10447_v54  ;;  %4267 = vmatprep.subr.bf16.mxu0 %v8948_v63  ;;  %v8957_v63 = vld [vmem:[%s15217_s5 + $0xc4] ss:$8 sps:$4 sm:$0xff]  }
 0x1ab   :  { %v10455_v22 = vpop.f32.mrf.mxu1  ;;  %v10457_v49 = vpop.f32.mrf.mxu0 }
 0x1ac   :  { %15402 = vst [vmem:[#allocation145_spill] sm:$0xff] %v10455_v22  ;;  %15403 = vst [vmem:[#allocation146_spill] sm:$0xff] %v10457_v49 }
 0x1ad   :  { %v10459_v37 = vpop.f32.mrf.mxu1  ;;  %v10461_v52 = vpop.f32.mrf.mxu0  ;;  %4268 = vmatpush2.bf16.msra.mxu0 %v8946_v14 }
 0x1ae   :  { %15404 = vst [vmem:[#allocation147_spill] sm:$0xff] %v10459_v37  ;;  %15405 = vst [vmem:[#allocation148_spill] sm:$0xff] %v10461_v52  ;;  %4269 = vmatprep.subr.bf16.mxu0 %v8954_v42  ;;  %v8955_v42 = vld [vmem:[%s15217_s5 + $0xc0] ss:$8 sps:$4 sm:$0xff]  }
 0x1af   :  { %v10469_v54 = vpop.f32.mrf.mxu1  ;;  %v10471_v9 = vpop.f32.mrf.mxu0  ;;  %1943 = vmatmul.mubr.bf16.gmra.mxu1 %v10233_v24  ;;  %8671 = vmatmul.mubr.bf16.gmra.mxu0 %v10177_v41 }
 0x1b0   :  { %15406 = vst [vmem:[#allocation149_spill] sm:$0xff] %v10469_v54  ;;  %15407 = vst [vmem:[#allocation150_spill] sm:$0xff] %v10471_v9  ;;  %1952 = vmatprep.mubr.bf16.mxu1 %v15322_v38  ;;  %8674 = vmatprep.mubr.bf16.mxu0 %v10211_v39  ;;  %v8963_v9 = vld [vmem:[%s15217_s5 + $0xb4] ss:$8 sps:$4 sm:$0xff]  }
 0x1b1   :  { %v10477_v14 = vpop.f32.mrf.mxu1  ;;  %v10479_v49 = vpop.f32.mrf.mxu0  ;;  %4270 = vmatpush2.bf16.msra.mxu0 %v8952_v5  ;;  %v8961_v5 = vld [vmem:[%s15217_s5 + $0xb0] ss:$8 sps:$4 sm:$0xff]  }
 0x1b2   :  { %15408 = vst [vmem:[#allocation151_spill] sm:$0xff] %v10477_v14  ;;  %15409 = vst [vmem:[#allocation152_spill] sm:$0xff] %v10479_v49  ;;  %4271 = vmatprep.subr.bf16.mxu0 %v8957_v63  ;;  %v8966_v63 = vld [vmem:[%s15217_s5 + $0xa4] ss:$8 sps:$4 sm:$0xff]  }
 0x1b3   :  { %v10487_v52 = vpop.f32.mrf.mxu1  ;;  %v10489_v41 = vpop.f32.mrf.mxu0 }
 0x1b4   :  { %15410 = vst [vmem:[#allocation153_spill] sm:$0xff] %v10487_v52  ;;  %15411 = vst [vmem:[#allocation154_spill] sm:$0xff] %v10489_v41 }
 0x1b5   :  { %v10491_v37 = vpop.f32.mrf.mxu1  ;;  %v10493_v39 = vpop.f32.mrf.mxu0  ;;  %4272 = vmatpush2.bf16.msra.mxu0 %v8955_v42 }
 0x1b6   :  { %15412 = vst [vmem:[#allocation155_spill] sm:$0xff] %v10491_v37  ;;  %15413 = vst [vmem:[#allocation156_spill] sm:$0xff] %v10493_v39  ;;  %4273 = vmatprep.subr.bf16.mxu0 %v8963_v9  ;;  %v8964_v9 = vld [vmem:[%s15217_s5 + $0xa0] ss:$8 sps:$4 sm:$0xff]  }
 0x1b7   :  { %v10501_v49 = vpop.f32.mrf.mxu1  ;;  %v10503_v14 = vpop.f32.mrf.mxu0  ;;  %1953 = vmatmul.mubr.bf16.gmra.mxu1 %v10255_v47  ;;  %8675 = vmatmul.mubr.bf16.gmra.mxu0 %v10233_v24 }
 0x1b8   :  { %15414 = vst [vmem:[#allocation157_spill] sm:$0xff] %v10501_v49  ;;  %15415 = vst [vmem:[#allocation158_spill] sm:$0xff] %v10503_v14  ;;  %1962 = vmatprep.mubr.bf16.mxu1 %v15322_v38  ;;  %8678 = vmatprep.mubr.bf16.mxu0 %v10255_v47  ;;  %v8972_v14 = vld [vmem:[%s15217_s5 + $0x94] ss:$8 sps:$4 sm:$0xff]  }
 0x1b9   :  { %v10509_v42 = vpop.f32.mrf.mxu1  ;;  %v10511_v41 = vpop.f32.mrf.mxu0  ;;  %4274 = vmatpush2.bf16.msra.mxu0 %v8961_v5  ;;  %v8970_v5 = vld [vmem:[%s15217_s5 + $0x90] ss:$8 sps:$4 sm:$0xff]  }
 0x1ba   :  { %15416 = vst [vmem:[#allocation159_spill] sm:$0xff] %v10509_v42  ;;  %15417 = vst [vmem:[#allocation160_spill] sm:$0xff] %v10511_v41  ;;  %4275 = vmatprep.subr.bf16.mxu0 %v8966_v63  ;;  %v8975_v63 = vld [vmem:[%s15217_s5 + $0x84] ss:$8 sps:$4 sm:$0xff]  }
 0x1bb   :  { %v10519_v39 = vpop.f32.mrf.mxu1  ;;  %v10521_v24 = vpop.f32.mrf.mxu0 }
 0x1bc   :  { %15418 = vst [vmem:[#allocation161_spill] sm:$0xff] %v10519_v39  ;;  %15419 = vst [vmem:[#allocation162_spill] sm:$0xff] %v10521_v24 }
 0x1bd   :  { %v10523_v49 = vpop.f32.mrf.mxu1  ;;  %v10525_v47 = vpop.f32.mrf.mxu0  ;;  %4276 = vmatpush2.bf16.msra.mxu0 %v8964_v9 }
 0x1be   :  { %15420 = vst [vmem:[#allocation163_spill] sm:$0xff] %v10523_v49  ;;  %15421 = vst [vmem:[#allocation164_spill] sm:$0xff] %v10525_v47  ;;  %4277 = vmatprep.subr.bf16.mxu0 %v8972_v14  ;;  %v8973_v14 = vld [vmem:[%s15217_s5 + $0x80] ss:$8 sps:$4 sm:$0xff]  }
 0x1bf   :  { %v10533_v41 = vpop.f32.mrf.mxu1  ;;  %v10535_v42 = vpop.f32.mrf.mxu0  ;;  %1963 = vmatmul.mubr.bf16.gmra.mxu1 %v10277_v59  ;;  %8679 = vmatmul.mubr.bf16.gmra.mxu0 %v10277_v59  ;;  %v8898_v59 = vld [vmem:[%s15217_s5 + $0x170] ss:$8 sps:$4 sm:$0xff]  }
 0x1c0   :  { %15422 = vst [vmem:[#allocation165_spill] sm:$0xff] %v10533_v41  ;;  %15423 = vst [vmem:[#allocation166_spill] sm:$0xff] %v10535_v42  ;;  %2198 = vmatprep.mubr.bf16.mxu1 %v15322_v38 }
 0x1c1   :  { %v10540_v9 = vpop.f32.mrf.mxu1  ;;  %v10542_v24 = vpop.f32.mrf.mxu0  ;;  %4278 = vmatpush2.bf16.msra.mxu0 %v8970_v5  ;;  %v8903_v5 = vld [vmem:[%s15217_s5 + $0x164] ss:$8 sps:$4 sm:$0xff]  }
 0x1c2   :  { %15424 = vst [vmem:[#allocation167_spill] sm:$0xff] %v10540_v9  ;;  %15425 = vst [vmem:[#allocation168_spill] sm:$0xff] %v10542_v24  ;;  %4279 = vmatprep.subr.bf16.mxu0 %v8975_v63 }
 0x1c3   :  { %v10547_v47 = vpop.f32.mrf.mxu1  ;;  %v10549_v49 = vpop.f32.mrf.mxu0 }
 0x1c4   :  { %15426 = vst [vmem:[#allocation169_spill] sm:$0xff] %v10547_v47  ;;  %15427 = vst [vmem:[#allocation170_spill] sm:$0xff] %v10549_v49  ;;  %v8901_v49 = vld [vmem:[%s15217_s5 + $0x160] ss:$8 sps:$4 sm:$0xff]  }
 0x1c5   :  { %v10554_v42 = vpop.f32.mrf.mxu1  ;;  %v10556_v41 = vpop.f32.mrf.mxu0  ;;  %4280 = vmatpush2.bf16.msra.mxu0 %v8973_v14  ;;  %v8906_v14 = vld [vmem:[%s15217_s5 + $0x154] ss:$8 sps:$4 sm:$0xff]  }
 0x1c6   :  { %15428 = vst [vmem:[#allocation171_spill] sm:$0xff] %v10554_v42  ;;  %15429 = vst [vmem:[#allocation172_spill] sm:$0xff] %v10556_v41 }
 0x1c7   :  { %v10561_v24 = vpop.f32.mrf.mxu1  ;;  %v10563_v63 = vpop.f32.mrf.mxu0  ;;  %2199 = vmatmul.mubr.bf16.vlgmr.msra.gmra.mxu1 %v9842_v31  ;;  %v8904_v31 = vld [vmem:[%s15217_s5 + $0x150] ss:$8 sps:$4 sm:$0xff]  }
 0x1c8   :  { %15430 = vst [vmem:[#allocation173_spill] sm:$0xff] %v10561_v24  ;;  %4443 = vmatpush1.bf16.msra.mxu1 %v8898_v59  ;;  %2208 = vmatprep.mubr.bf16.mxu1 %v15322_v38 }
 0x1c9   :  { %v10570_v42 = vpop.f32.mrf.mxu1  ;;  %v10572_v41 = vpop.f32.mrf.mxu0  ;;  %4444 = vmatprep.subr.bf16.mxu1 %v8903_v5  ;;  %v8915_v5 = vld [vmem:[%s15217_s5 + $0x144] ss:$8 sps:$4 sm:$0xff]  }
 0x1ca   :  { %15431 = vst [vmem:[#allocation174_spill] sm:$0xff] %v10570_v42 }
 0x1cb   :  { %v10577_v9 = vpop.f32.mrf.mxu1  ;;  %v10579_v24 = vpop.f32.mrf.mxu0 }
 0x1cc   :  { %15432 = vst [vmem:[#allocation175_spill] sm:$0xff] %v10577_v9  ;;  %4445 = vmatpush1.bf16.msra.mxu1 %v8901_v49  ;;  %v8913_v49 = vld [vmem:[%s15217_s5 + $0x140] ss:$8 sps:$4 sm:$0xff]  }
 0x1cd   :  { %v10584_v59 = vpop.f32.mrf.mxu1  ;;  %v10586_v47 = vpop.f32.mrf.mxu0  ;;  %4446 = vmatprep.subr.bf16.mxu1 %v8906_v14 }
 0x1ce   :  { %15433 = vst [vmem:[#allocation176_spill] sm:$0xff] %v10584_v59 }
 0x1cf   :  { %v10591_v42 = vpop.f32.mrf.mxu1  ;;  %v10593_v39 = vpop.f32.mrf.mxu0  ;;  %2209 = vmatmul.mubr.bf16.gmra.mxu1 %v9873_v45  ;;  %v8922_v45 = vld [vmem:[%s15217_s5 + $0x130] ss:$8 sps:$4 sm:$0xff]  }
 0x1d0   :  { %15434 = vst [vmem:[#allocation177_spill] sm:$0xff] %v10591_v42  ;;  %2218 = vmatprep.mubr.bf16.mxu1 %v15322_v38  ;;  %4447 = vmatpush1.bf16.msra.mxu1 %v8904_v31  ;;  %v8924_v42 = vld [vmem:[%s15217_s5 + $0x134] ss:$8 sps:$4 sm:$0xff]  }
 0x1d1   :  { %v10600_v59 = vpop.f32.mrf.mxu1  ;;  %v10602_v14 = vpop.f32.mrf.mxu0  ;;  %4448 = vmatprep.subr.bf16.mxu1 %v8915_v5  ;;  %v8933_v5 = vld [vmem:[%s15217_s5 + $0x124] ss:$8 sps:$4 sm:$0xff]  }
 0x1d2   :  { %15435 = vst [vmem:[#allocation178_spill] sm:$0xff] %v10600_v59 }
 0x1d3   :  { %v10607_v9 = vpop.f32.mrf.mxu1  ;;  %v10609_v37 = vpop.f32.mrf.mxu0 }
 0x1d4   :  { %15436 = vst [vmem:[#allocation179_spill] sm:$0xff] %v10607_v9  ;;  %4449 = vmatpush1.bf16.msra.mxu1 %v8913_v49  ;;  %v8996_v49 = vld [vmem:[%s15217_s5 + $0x274] ss:$8 sps:$4 sm:$0xff]  }
 0x1d5   :  { %v10614_v31 = vpop.f32.mrf.mxu1  ;;  %v10616_v52 = vpop.f32.mrf.mxu0  ;;  %4450 = vmatprep.subr.bf16.mxu1 %v8924_v42  ;;  %v8931_v42 = vld [vmem:[%s15217_s5 + $0x120] ss:$8 sps:$4 sm:$0xff]   ;;  %4635 = vmatprep.subr.bf16.mxu0 %v8996_v49 }
 0x1d6   :  { %15437 = vst [vmem:[#allocation180_spill] sm:$0xff] %v10614_v31 }
 0x1d7   :  { %v10621_v59 = vpop.f32.mrf.mxu1  ;;  %v10623_v54 = vpop.f32.mrf.mxu0  ;;  %2219 = vmatmul.mubr.bf16.gmra.mxu1 %v9911_v62  ;;  %v8942_v62 = vld [vmem:[%s15217_s5 + $0x114] ss:$8 sps:$4 sm:$0xff]  }
 0x1d8   :  { %15438 = vst [vmem:[#allocation181_spill] sm:$0xff] %v10621_v59  ;;  %2228 = vmatprep.mubr.bf16.mxu1 %v15322_v38  ;;  %4451 = vmatpush1.bf16.msra.mxu1 %v8922_v45  ;;  %v8940_v45 = vld [vmem:[%s15217_s5 + $0x110] ss:$8 sps:$4 sm:$0xff]  }
 0x1d9   :  { %v10633_v31 = vpop.f32.mrf.mxu1  ;;  %v10635_v9 = vpop.f32.mrf.mxu0  ;;  %4452 = vmatprep.subr.bf16.mxu1 %v8933_v5  ;;  %v8951_v5 = vld [vmem:[%s15217_s5 + $0x104] ss:$8 sps:$4 sm:$0xff]  }
 0x1da   :  { %15439 = vst [vmem:[#allocation182_spill] sm:$0xff] %v10633_v31 }
 0x1db   :  { %v10640_v59 = vpop.f32.mrf.mxu1  ;;  %v10642_v22 = vpop.f32.mrf.mxu0 }
 0x1dc   :  { %15440 = vst [vmem:[#allocation183_spill] sm:$0xff] %v10640_v59  ;;  %4453 = vmatpush1.bf16.msra.mxu1 %v8931_v42  ;;  %v8949_v42 = vld [vmem:[%s15217_s5 + $0x100] ss:$8 sps:$4 sm:$0xff]  }
 0x1dd   :  { %v10647_v33 = vpop.f32.mrf.mxu1  ;;  %v10649_v31 = vpop.f32.mrf.mxu0  ;;  %4454 = vmatprep.subr.bf16.mxu1 %v8942_v62 }
 0x1de   :  { %15441 = vst [vmem:[#allocation184_spill] sm:$0xff] %v10647_v33 }
 0x1df   :  { %v10654_v25 = vpop.f32.mrf.mxu1  ;;  %v10656_v49 = vpop.f32.mrf.mxu0  ;;  %2229 = vmatmul.mubr.bf16.gmra.mxu1 %v9950_v16  ;;  %v8958_v16 = vld [vmem:[%s15217_s5 + $0x1f0] ss:$8 sps:$4 sm:$0xff]  }
 0x1e0   :  { %15442 = vst [vmem:[#allocation185_spill] sm:$0xff] %v10654_v25  ;;  %2238 = vmatprep.mubr.bf16.mxu1 %v15322_v38  ;;  %4455 = vmatpush1.bf16.msra.mxu1 %v8940_v45  ;;  %v8960_v25 = vld [vmem:[%s15217_s5 + $0x1f4] ss:$8 sps:$4 sm:$0xff]  }
 0x1e1   :  { %v10663_v33 = vpop.f32.mrf.mxu1  ;;  %v10665_v62 = vpop.f32.mrf.mxu0  ;;  %4456 = vmatprep.subr.bf16.mxu1 %v8951_v5  ;;  %v8969_v5 = vld [vmem:[%s15217_s5 + $0x1e4] ss:$8 sps:$4 sm:$0xff]  }
 0x1e2   :  { %15443 = vst [vmem:[#allocation186_spill] sm:$0xff] %v10663_v33 }
 0x1e3   :  { %v10670_v59 = vpop.f32.mrf.mxu1  ;;  %v10672_v30 = vpop.f32.mrf.mxu0 }
 0x1e4   :  { %15444 = vst [vmem:[#allocation187_spill] sm:$0xff] %v10670_v59  ;;  %4457 = vmatpush1.bf16.msra.mxu1 %v8949_v42  ;;  %v8967_v42 = vld [vmem:[%s15217_s5 + $0x1e0] ss:$8 sps:$4 sm:$0xff]  }
 0x1e5   :  { %v10677_v45 = vpop.f32.mrf.mxu1  ;;  %v10679_v19 = vpop.f32.mrf.mxu0  ;;  %4458 = vmatprep.subr.bf16.mxu1 %v8960_v25 }
 0x1e6   :  { %15445 = vst [vmem:[#allocation188_spill] sm:$0xff] %v10677_v45 }
 0x1e7   :  { %v10684_v33 = vpop.f32.mrf.mxu1  ;;  %v10686_v28 = vpop.f32.mrf.mxu0  ;;  %2239 = vmatmul.mubr.bf16.gmra.mxu1 %v9990_v32  ;;  %v8976_v32 = vld [vmem:[%s15217_s5 + $0x1d0] ss:$8 sps:$4 sm:$0xff]  }
 0x1e8   :  { %15446 = vst [vmem:[#allocation189_spill] sm:$0xff] %v10684_v33  ;;  %2248 = vmatprep.mubr.bf16.mxu1 %v15322_v38  ;;  %4459 = vmatpush2.bf16.msra.mxu1 %v8958_v16  ;;  %v8978_v33 = vld [vmem:[%s15217_s5 + $0x1d4] ss:$8 sps:$4 sm:$0xff]  }
 0x1e9   :  { %v10693_v45 = vpop.f32.mrf.mxu1  ;;  %v10695_v25 = vpop.f32.mrf.mxu0  ;;  %4460 = vmatprep.subr.bf16.mxu1 %v8969_v5  ;;  %v8981_v5 = vld [vmem:[%s15217_s5 + $0x1c4] ss:$8 sps:$4 sm:$0xff]  }
 0x1ea   :  { %15447 = vst [vmem:[#allocation190_spill] sm:$0xff] %v10693_v45 }
 0x1eb   :  { %v10700_v59 = vpop.f32.mrf.mxu1  ;;  %v10702_v2 = vpop.f32.mrf.mxu0 }
 0x1ec   :  { %15448 = vst [vmem:[#allocation191_spill] sm:$0xff] %v10700_v59  ;;  %4461 = vmatpush2.bf16.msra.mxu1 %v8967_v42  ;;  %v8979_v42 = vld [vmem:[%s15217_s5 + $0x1c0] ss:$8 sps:$4 sm:$0xff]  }
 0x1ed   :  { %v10707_v16 = vpop.f32.mrf.mxu1  ;;  %v10709_v7 = vpop.f32.mrf.mxu0  ;;  %4462 = vmatprep.subr.bf16.mxu1 %v8978_v33 }
 0x1ee   :  { %15449 = vst [vmem:[#allocation192_spill] sm:$0xff] %v10707_v16  ;;  %v2522_v16 = vlaneseq }
 0x1ef   :  { %v10714_v45 = vpop.f32.mrf.mxu1  ;;  %v10716_v17 = vpop.f32.mrf.mxu0  ;;  %2249 = vmatmul.mubr.bf16.gmra.mxu1 %v10011_v53 }
 0x1f0   :  { %15450 = vst [vmem:[#allocation193_spill] sm:$0xff] %v10714_v45  ;;  %15451 = vst [vmem:[#allocation194_spill] sm:$0xff] %v10716_v17  ;;  %2258 = vmatprep.mubr.bf16.mxu1 %v15322_v38  ;;  %4463 = vmatpush2.bf16.msra.mxu1 %v8976_v32  ;;  %v8984_v45 = vld [vmem:[%s15217_s5 + $0x1b4] ss:$8 sps:$4 sm:$0xff]   ;;  %v8982_v32 = vld [vmem:[%s15217_s5 + $0x1b0] ss:$8 sps:$4 sm:$0xff]  }
 0x1f1   :  { %v10723_v59 = vpop.f32.mrf.mxu1  ;;  %v10725_v33 = vpop.f32.mrf.mxu0  ;;  %4464 = vmatprep.subr.bf16.mxu1 %v8981_v5  ;;  %v10737_v11 = vshrl.u32 %v2522_v16, 7  ;;  %v8987_v5 = vld [vmem:[%s15217_s5 + $0x1a4] ss:$8 sps:$4 sm:$0xff]   ;;  %v8985_v16 = vld [vmem:[%s15217_s5 + $0x1a0] ss:$8 sps:$4 sm:$0xff]  }
 0x1f2   :  { %15452 = vst [vmem:[#allocation195_spill] sm:$0xff] %v10723_v59  ;;  %15453 = vst [vmem:[#allocation196_spill] sm:$0xff] %v10725_v33 }
 0x1f3   :  { %v10730_v17 = vpop.f32.mrf.mxu1  ;;  %v10732_v53 = vpop.f32.mrf.mxu0  ;;  %15456 = vst [vmem:[#allocation199_spill] sm:$0xff] %v10737_v11 }
 0x1f4   :  { %15454 = vst [vmem:[#allocation197_spill] sm:$0xff] %v10730_v17  ;;  %15455 = vst [vmem:[#allocation198_spill] sm:$0xff] %v10732_v53  ;;  %4465 = vmatpush2.bf16.msra.mxu1 %v8979_v42  ;;  %v8988_v42 = vld [vmem:[%s15217_s5 + $0x190] ss:$8 sps:$4 sm:$0xff]  }
 0x1f5   :  { %v10739_v15 = vpop.f32.mrf.mxu1  ;;  %v10741_v59 = vpop.f32.mrf.mxu0  ;;  %4466 = vmatprep.subr.bf16.mxu1 %v8984_v45 }
 0x1f6   :  { %15457 = vst [vmem:[#allocation200_spill] sm:$0xff] %v10739_v15  ;;  %15458 = vst [vmem:[#allocation201_spill] sm:$0xff] %v10741_v59  ;;  %v15226_v59 = vsub.s32 3, %v10737_v11 }
 0x1f7   :  { %v10746_v33 = vpop.f32.mrf.mxu1  ;;  %v10748_v17 = vpop.f32.mrf.mxu0  ;;  %2259 = vmatmul.mubr.bf16.gmra.mxu1 %v10031_v13  ;;  %v10766_v13 = vld [vmem:[%s15216_s4] sm:$0xff] }
 0x1f8   :  { %15459 = vst [vmem:[#allocation202_spill] sm:$0xff] %v10746_v33  ;;  %15460 = vst [vmem:[#allocation203_spill] sm:$0xff] %v10748_v17  ;;  %2268 = vmatprep.mubr.bf16.mxu1 %v15322_v38  ;;  %4467 = vmatpush2.bf16.msra.mxu1 %v8982_v32  ;;  %v8990_v33 = vld [vmem:[%s15217_s5 + $0x194] ss:$8 sps:$4 sm:$0xff]  }
 0x1f9   :  { %v10756_v45 = vpop.f32.mrf.mxu1  ;;  %v10758_v15 = vpop.f32.mrf.mxu0  ;;  %4468 = vmatprep.subr.bf16.mxu1 %v8987_v5  ;;  %v2008_v5 = vadd.f32 %v10563_v63, %v10084_v48  ;;  %v2014_v48 = vadd.f32 %v10586_v47, %v10108_v27  ;;  %v10809_v27 = vrot.slane %v10766_v13, %v15226_v59 }
 0x1fa   :  { %15461 = vst [vmem:[#allocation204_spill] sm:$0xff] %v10756_v45  ;;  %15462 = vst [vmem:[#allocation205_spill] sm:$0xff] %v10758_v15  ;;  %v15465_v45 = vsub.s32 2, %v10737_v11 }
 0x1fb   :  { %v10768_v32 = vpop.f32.mrf.mxu1  ;;  %v10770_v17 = vpop.f32.mrf.mxu0 }
 0x1fc   :  { %15463 = vst [vmem:[#allocation206_spill] sm:$0xff] %v10768_v32  ;;  %15464 = vst [vmem:[#allocation207_spill] sm:$0xff] %v10770_v17  ;;  %4469 = vmatpush2.bf16.msra.mxu1 %v8985_v16  ;;  %v10780_v15 = vrot.slane %v10766_v13, %v15465_v45  ;;  %v2012_v32 = vadd.f32 %v10579_v24, %v10102_v36  ;;  %v8993_v17 = vld [vmem:[%s15217_s5 + $0x184] ss:$8 sps:$4 sm:$0xff]   ;;  %v8991_v36 = vld [vmem:[%s15217_s5 + $0x180] ss:$8 sps:$4 sm:$0xff]  }
 0x1fd   :  { %v10785_v53 = vpop.f32.mrf.mxu1  ;;  %v10787_v16 = vpop.f32.mrf.mxu0  ;;  %4470 = vmatprep.subr.bf16.mxu1 %v8990_v33  ;;  %v2010_v33 = vadd.f32 %v10572_v41, %v10094_v55  ;;  %v2567_v55 = vadd.f32 %v10809_v27, %v2014_v48  ;;  %v2020_v41 = vadd.f32 %v10602_v14, %v10126_v50  ;;  %v2024_v14 = vadd.f32 %v10616_v52, %v10142_v3 }
 0x1fe   :  { %15466 = vst [vmem:[#allocation208_spill] sm:$0xff] %v10785_v53  ;;  %v2559_v24 = vadd.f32 %v10780_v15, %v2008_v5  ;;  %v2566_v47 = vadd.f32 %v10780_v15, %v2012_v32  ;;  %v2018_v5 = vadd.f32 %v10593_v39, %v10118_v18  ;;  %v2022_v32 = vadd.f32 %v10609_v37, %v10136_v29 }
 0x1ff   :  { %v10794_v63 = vpop.f32.mrf.mxu1  ;;  %v10796_v45 = vpop.f32.mrf.mxu0  ;;  %2269 = vmatmul.mubr.bf16.gmra.mxu1 %v10051_v6  ;;  %v3015_v39 = vmul.f32 0.2, %v2567_v55  ;;  %v2574_v37 = vadd.f32 %v10809_v27, %v2020_v41  ;;  %vm2791_vm2 = vcmp.gt.f32.partialorder %v2567_v55, 0.0 }
 0x200   :  { %15467 = vst [vmem:[#allocation209_spill] sm:$0xff] %v10794_v63  ;;  %15468 = vst [vmem:[#allocation210_spill] sm:$0xff] %v10796_v45  ;;  %2278 = vmatprep.mubr.bf16.mxu1 %v15322_v38  ;;  %4471 = vmatpush2.bf16.msra.mxu1 %v8988_v42  ;;  %v8999_v42 = vld [vmem:[%s15217_s5 + $0x374] ss:$8 sps:$4 sm:$0xff]   ;;  %v2560_v63 = vadd.f32 %v10809_v27, %v2010_v33  ;;  %vm2783_vm0 = vcmp.gt.f32.partialorder %v2559_v24, 0.0  ;;  %vm2790_vm1 = vcmp.gt.f32.partialorder %v2566_v47, 0.0 }
 0x201   :  { %v10812_v6 = vpop.f32.mrf.mxu1  ;;  %v10814_v53 = vpop.f32.mrf.mxu0  ;;  %4472 = vmatprep.subr.bf16.mxu1 %v8993_v17  ;;  %v3007_v17 = vmul.f32 0.2, %v2559_v24  ;;  %v2573_v50 = vadd.f32 %v10780_v15, %v2018_v5  ;;  %v2580_v29 = vadd.f32 %v10780_v15, %v2022_v32  ;;  %v2032_v33 = vadd.f32 %v10642_v22, %v10173_v35 }
 0x202   :  { %15469 = vst [vmem:[#allocation211_spill] sm:$0xff] %v10812_v6  ;;  %15470 = vst [vmem:[#allocation212_spill] sm:$0xff] %v10814_v53  ;;  %v3014_v53 = vmul.f32 0.2, %v2566_v47  ;;  %v10849_v5 = vsub.s32 1, %v10737_v11  ;;  %vm2784_vm3 = vcmp.gt.f32.partialorder %v2560_v63, 0.0  ;;  %v2028_v22 = vadd.f32 %v10623_v54, %v10152_v8 }
 0x203   :  { %v10826_v59 = vpop.f32.mrf.mxu1  ;;  %v10828_v6 = vpop.f32.mrf.mxu0  ;;  %v10852_v41 = vsel %vm2783_vm0, %v2559_v24, %v3007_v17  ;;  %v3008_v3 = vmul.f32 0.2, %v2560_v63  ;;  %vm2797_vm4 = vcmp.gt.f32.partialorder %v2573_v50, 0.0  ;;  %v3021_v35 = vmul.f32 0.2, %v2573_v50 }
 0x204   :  { %15471 = vst [vmem:[#allocation213_spill] sm:$0xff] %v10826_v59  ;;  %4473 = vmatpush2.bf16.msra.mxu1 %v8991_v36  ;;  %15476 = vst [vmem:[#allocation218_spill] sm:$0xff] %v10849_v5  ;;  %v10855_v52 = vsel %vm2790_vm1, %v2566_v47, %v3014_v53  ;;  %v3022_v59 = vmul.f32 0.2, %v2574_v37  ;;  %v2581_v24 = vadd.f32 %v10809_v27, %v2024_v14  ;;  %vm2798_vm5 = vcmp.gt.f32.partialorder %v2574_v37, 0.0 }
 0x205   :  { %v10831_v45 = vpop.f32.mrf.mxu1  ;;  %v10833_v18 = vpop.f32.mrf.mxu0  ;;  %4828 = vmatprep.subr.bf16.mxu1 %v8999_v42  ;;  %v10846_v42 = vsub.s32 0, %v10737_v11  ;;  %v10867_v53 = vsel %vm2791_vm2, %v2567_v55, %v3015_v39  ;;  %vm2804_vm6 = vcmp.gt.f32.partialorder %v2580_v29, 0.0  ;;  %v2594_v47 = vadd.f32 %v10780_v15, %v2032_v33 }
 0x206   :  { %15472 = vst [vmem:[#allocation214_spill] sm:$0xff] %v10831_v45  ;;  %15473 = vst [vmem:[#allocation215_spill] sm:$0xff] %v10833_v18  ;;  %v2030_v45 = vadd.f32 %v10635_v9, %v10163_v12  ;;  %v2034_v8 = vadd.f32 %v10649_v31, %v10179_v44  ;;  %v10880_v9 = vrot.slane %v10766_v13, %v10849_v5  ;;  %v3029_v5 = vmul.f32 0.2, %v2581_v24 }
 0x207   :  { %v1814_v48 = vpop.f32.mrf.mxu1  ;;  %v10840_v36 = vpop.f32.mrf.mxu0  ;;  %2279 = vmatmul.mubr.bf16.gmra.mxu1 %v10072_v21  ;;  %15475 = vst [vmem:[#allocation217_spill] sm:$0xff] %v10846_v42  ;;  %v10876_v12 = vrot.slane %v10766_v13, %v10846_v42  ;;  %v10885_v14 = vsel %vm2784_vm3, %v2560_v63, %v3008_v3  ;;  %v10888_v33 = vsel %vm2797_vm4, %v2573_v50, %v3021_v35  ;;  %v3042_v3 = vmul.f32 0.2, %v2594_v47 }
 0x208   :  { %15474 = vst [vmem:[#allocation216_spill] sm:$0xff] %v10840_v36  ;;  %2288 = vmatprep.mubr.bf16.mxu1 %v15322_v38  ;;  %v3028_v36 = vmul.f32 0.2, %v2580_v29  ;;  %v2587_v44 = vadd.f32 %v10780_v15, %v2028_v22  ;;  %v2588_v31 = vadd.f32 %v10809_v27, %v2030_v45  ;;  %v10904_v50 = vsel %vm2798_vm5, %v2574_v37, %v3022_v59 }
 0x209   :  { %v1816_v21 = vpop.f32.mrf.mxu1  ;;  %v10857_v32 = vpop.f32.mrf.mxu0  ;;  %v2595_v45 = vadd.f32 %v10809_v27, %v2034_v8  ;;  %vm2805_vm7 = vcmp.gt.f32.partialorder %v2581_v24, 0.0  ;;  %vm2818_vm8 = vcmp.gt.f32.partialorder %v2594_v47, 0.0  ;;  %v2040_v8 = vadd.f32 %v10665_v62, %v10197_v61 }
 0x20a   :  { %v10894_v42 = vsel %vm2804_vm6, %v2580_v29, %v3028_v36  ;;  %vm2811_vm9 = vcmp.gt.f32.partialorder %v2587_v44, 0.0  ;;  %v3035_v59 = vmul.f32 0.2, %v2587_v44  ;;  %vm2812_vm10 = vcmp.gt.f32.partialorder %v2588_v31, 0.0 }
 0x20b   :  { %v1818_v17 = vpop.f32.mrf.mxu1  ;;  %v10864_v18 = vpop.f32.mrf.mxu0  ;;  %v3036_v37 = vmul.f32 0.2, %v2588_v31  ;;  %v1815_v54 = vadd.f32 %v1814_v48, %v9850_v34  ;;  %vm2819_vm11 = vcmp.gt.f32.partialorder %v2595_v45, 0.0 }
 0x20c   :  { %15477 = vst [vmem:[#allocation219_spill] sm:$0xff] %v10864_v18  ;;  %v2038_v18 = vadd.f32 %v10656_v49, %v10189_v4  ;;  %v1817_v4 = vadd.f32 %v1816_v21, %v9861_v40  ;;  %v1819_v49 = vadd.f32 %v1818_v17, %v9869_v43  ;;  %v10923_v43 = vsel %vm2805_vm7, %v2581_v24, %v3029_v5 }
 0x20d   :  { %v1820_v55 = vpop.f32.mrf.mxu1  ;;  %v10882_v39 = vpop.f32.mrf.mxu0  ;;  %v3043_v17 = vmul.f32 0.2, %v2595_v45  ;;  %v10938_v5 = vsel %vm2811_vm9, %v2587_v44, %v3035_v59  ;;  %v15483_v24 = vsub.s32 6, %v10737_v11 }
 0x20e   :  { %15478 = vst [vmem:[#allocation220_spill] sm:$0xff] %v10882_v39  ;;  %v1821_v36 = vadd.f32 %v1820_v55, %v9875_v46  ;;  %v10915_v22 = vadd.f32 %v10780_v15, %v2038_v18  ;;  %v10926_v46 = vsel %vm2818_vm8, %v2594_v47, %v3042_v3  ;;  %v2042_v55 = vadd.f32 %v10672_v30, %v10207_v57 }
 0x20f   :  { %v10898_v39 = vpop.f32.mrf.mxu1  ;;  %v10900_v63 = vpop.f32.mrf.mxu0  ;;  %2289 = vmatmul.mubr.bf16.gmra.mxu1 %v10106_v26  ;;  %v2558_v61 = vadd.f32 %v10880_v9, %v1817_v4  ;;  %v2564_v34 = vadd.f32 %v10876_v12, %v1819_v49  ;;  %15482 = vst [vmem:[#allocation224_spill] sm:$0xff] %v10938_v5  ;;  %v10943_v57 = vrot.slane %v10766_v13, %v15483_v24 }
 0x210   :  { %2298 = vmatprep.mubr.bf16.mxu1 %v15322_v38  ;;  %v2565_v62 = vadd.f32 %v10880_v9, %v1821_v36  ;;  %v10948_v47 = vsel %vm2812_vm10, %v2588_v31, %v3036_v37  ;;  %vm2825_vm12 = vcmp.gt.f32.partialorder %v10915_v22, 0.0  ;;  %v2602_v3 = vadd.f32 %v10809_v27, %v2040_v8  ;;  %v9512_v36 = vld [vmem:[#allocation2 + $0x50] sm:$0xff]  }
 0x211   :  { %v1826_v35 = vpop.f32.mrf.mxu1  ;;  %v10912_v26 = vpop.f32.mrf.mxu0  ;;  %15484 = vst [vmem:[#allocation225_spill] sm:$0xff] %v10943_v57  ;;  %v2557_v4 = vadd.f32 %v10876_v12, %v1815_v54  ;;  %v3049_v59 = vmul.f32 0.2, %v10915_v22  ;;  %v2608_v31 = vadd.f32 %v10780_v15, %v2042_v55  ;;  %v2044_v37 = vadd.f32 %v10679_v19, %v10213_v10 }
 0x212   :  { %15479 = vst [vmem:[#allocation221_spill] sm:$0xff] %v10912_v26  ;;  %v10965_v54 = vsel %vm2819_vm11, %v2595_v45, %v3043_v17  ;;  %v3006_v8 = vmul.f32 0.2, %v2558_v61  ;;  %v3012_v24 = vmul.f32 0.2, %v2564_v34  ;;  %vm2788_vm13 = vcmp.gt.f32.partialorder %v2564_v34, 0.0 }
 0x213   :  { %v1828_v40 = vpop.f32.mrf.mxu1  ;;  %v10920_v21 = vpop.f32.mrf.mxu0  ;;  %v3013_v18 = vmul.f32 0.2, %v2565_v62  ;;  %v1827_v55 = vadd.f32 %v1826_v35, %v9897_v56  ;;  %vm2789_vm14 = vcmp.gt.f32.partialorder %v2565_v62, 0.0  ;;  %vm2826_vm15 = vcmp.gt.f32.partialorder %v2602_v3, 0.0 }
 0x214   :  { %15480 = vst [vmem:[#allocation222_spill] sm:$0xff] %v10920_v21  ;;  %v3005_v10 = vmul.f32 0.2, %v2557_v4  ;;  %vm2782_vm0 = vcmp.gt.f32.partialorder %v2558_v61, 0.0  ;;  %v1825_v19 = vadd.f32 %v10898_v39, %v9888_v51  ;;  %v2048_v57 = vadd.f32 %v10686_v28, %v10217_v23 }
 0x215   :  { %v1830_v48 = vpop.f32.mrf.mxu1  ;;  %v10935_v29 = vpop.f32.mrf.mxu0  ;;  %vm2781_vm1 = vcmp.gt.f32.partialorder %v2557_v4, 0.0  ;;  %v10981_v56 = vadd.f32 %v10809_v27, %v2044_v37  ;;  %vm2832_vm2 = vcmp.gt.f32.partialorder %v2608_v31, 0.0  ;;  %v2572_v51 = vadd.f32 %v10880_v9, %v1827_v55 }
 0x216   :  { %15481 = vst [vmem:[#allocation223_spill] sm:$0xff] %v10935_v29  ;;  %v1831_v11 = vadd.f32 %v1830_v48, %v9913_v1  ;;  %v3236_v1 = vsel %vm2788_vm13, %v2564_v34, %v3012_v24  ;;  %v3237_v48 = vsel %vm2789_vm14, %v2565_v62, %v3013_v18  ;;  %v10992_v28 = vsel %vm2825_vm12, %v10915_v22, %v3049_v59  ;;  %v9513_v24 = vld [vmem:[#allocation2 + $0x58] sm:$0xff]   ;;  %v9002_v22 = vld [vmem:[%s15217_s5 + $0x264] ss:$8 sps:$4 sm:$0xff]  }
 0x217   :  { %v10953_v49 = vpop.f32.mrf.mxu1  ;;  %v10955_v44 = vpop.f32.mrf.mxu0  ;;  %2299 = vmatmul.mubr.bf16.gmra.mxu1 %v9512_v36  ;;  %v1829_v36 = vadd.f32 %v1828_v40, %v9907_v60  ;;  %v3050_v60 = vmul.f32 0.2, %v2602_v3  ;;  %v3056_v40 = vmul.f32 0.2, %v2608_v31  ;;  %15489 = vst [vmem:[#allocation230_spill] sm:$0xff] %v10992_v28  ;;  %v3229_v23 = vsel %vm2781_vm1, %v2557_v4, %v3005_v10  ;;  %v9515_v29 = vld [vmem:[#allocation2 + $0x68] sm:$0xff]  }
 0x218   :  { %15485 = vst [vmem:[#allocation226_spill] sm:$0xff] %v10955_v44  ;;  %2308 = vmatprep.mubr.bf16.mxu1 %v15322_v38  ;;  %v2579_v39 = vadd.f32 %v10880_v9, %v1831_v11  ;;  %v2571_v34 = vadd.f32 %v10876_v12, %v1825_v19  ;;  %v8994_v11 = vld [vmem:[%s15217_s5 + $0x270] ss:$8 sps:$4 sm:$0xff]   ;;  %v3057_v55 = vmul.f32 0.2, %v10981_v56  ;;  %vm2796_vm4 = vcmp.gt.f32.partialorder %v2572_v51, 0.0 }
 0x219   :  { %v10968_v30 = vpop.f32.mrf.mxu1  ;;  %v10970_v13 = vpop.f32.mrf.mxu0  ;;  %v2578_v35 = vadd.f32 %v10876_v12, %v1829_v36  ;;  %v11011_v59 = vsel %vm2826_vm15, %v2602_v3, %v3050_v60  ;;  %v11014_v36 = vsel %vm2832_vm2, %v2608_v31, %v3056_v40  ;;  %v2054_v31 = vadd.f32 %v10709_v7, %v10235_v20 }
 0x21a   :  { %15486 = vst [vmem:[#allocation227_spill] sm:$0xff] %v10970_v13  ;;  %15491 = vst [vmem:[#allocation232_spill] sm:$0xff] %v11011_v59  ;;  %v3027_v3 = vmul.f32 0.2, %v2579_v39  ;;  %v3019_v60 = vmul.f32 0.2, %v2571_v34 }
 0x21b   :  { %v1838_v45 = vpop.f32.mrf.mxu1  ;;  %v10976_v17 = vpop.f32.mrf.mxu0  ;;  %15492 = vst [vmem:[#allocation233_spill] sm:$0xff] %v11014_v36  ;;  %vm2802_vm3 = vcmp.gt.f32.partialorder %v2578_v35, 0.0  ;;  %vm2833_vm5 = vcmp.gt.f32.partialorder %v10981_v56, 0.0  ;;  %vm2795_vm6 = vcmp.gt.f32.partialorder %v2571_v34, 0.0  ;;  %vm2803_vm7 = vcmp.gt.f32.partialorder %v2579_v39, 0.0  ;;  %v15528_v59 = vld [vmem:[#allocation207_spill] sm:$0xff] }
 0x21c   :  { %15487 = vst [vmem:[#allocation228_spill] sm:$0xff] %v10976_v17  ;;  %v3230_v17 = vsel %vm2782_vm0, %v2558_v61, %v3006_v8  ;;  %v2050_v61 = vadd.f32 %v10695_v25, %v10225_v0  ;;  %v3453_v8 = vpack.c.bf16 %v3236_v1, %v3229_v23  ;;  %v11018_v0 = vadd.f32 %v10780_v15, %v2048_v57 }
 0x21d   :  { %v1840_v13 = vpop.f32.mrf.mxu1  ;;  %v10984_v44 = vpop.f32.mrf.mxu0  ;;  %v3454_v37 = vpack.c.bf16 %v3237_v48, %v3230_v17  ;;  %v3026_v25 = vmul.f32 0.2, %v2578_v35  ;;  %v2052_v17 = vadd.f32 %v10702_v2, %v10229_v58  ;;  %v3020_v1 = vmul.f32 0.2, %v2572_v51  ;;  %v9000_v48 = vld [vmem:[%s15217_s5 + $0x260] ss:$8 sps:$4 sm:$0xff]  }
 0x21e   :  { %15488 = vst [vmem:[#allocation229_spill] sm:$0xff] %v10984_v44  ;;  %v11037_v58 = vadd.f32 %v10809_v27, %v2050_v61  ;;  %v15495_v2 = vld [vmem:[#allocation21_spill] sm:$0xff]  ;;  %v9005_v61 = vld [vmem:[%s15217_s5 + $0x254] ss:$8 sps:$4 sm:$0xff]   ;;  %vm2839_vm8 = vcmp.gt.f32.partialorder %v11018_v0, 0.0 }
 0x21f   :  { %v10995_v18 = vpop.f32.mrf.mxu1  ;;  %v10997_v62 = vpop.f32.mrf.mxu0  ;;  %2309 = vmatmul.mubr.bf16.gmra.mxu1 %v9513_v24  ;;  %4281 = vmatprep.mubr.bf16.mxu0 %v3454_v37  ;;  %v1839_v23 = vadd.f32 %v1838_v45, %v15495_v2  ;;  %v3250_v20 = vsel %vm2802_vm3, %v2578_v35, %v3026_v25  ;;  %v15496_v37 = vld [vmem:[#allocation19_spill] sm:$0xff]  ;;  %v11052_v45 = vadd.f32 %v10780_v15, %v2052_v17  ;;  %v9514_v17 = vld [vmem:[#allocation2 + $0x60] sm:$0xff]  }
 0x220   :  { %15490 = vst [vmem:[#allocation231_spill] sm:$0xff] %v10997_v62  ;;  %2318 = vmatprep.mubr.bf16.mxu1 %v15322_v38  ;;  %4282 = vmatmul.mubr.bf16.vlgmr.msra.gmra.mxu0 %v3453_v8  ;;  %v1837_v24 = vadd.f32 %v10968_v30, %v15496_v37  ;;  %v3244_v35 = vsel %vm2796_vm4, %v2572_v51, %v3020_v1  ;;  %v3063_v30 = vmul.f32 0.2, %v11018_v0  ;;  %v15501_v51 = vld [vmem:[#allocation85_spill] sm:$0xff]  ;;  %vm2840_vm9 = vcmp.gt.f32.partialorder %v11037_v58, 0.0 }
 0x221   :  { %v11020_v10 = vpop.f32.mrf.mxu1  ;;  %v11022_v19 = vpop.f32.mrf.mxu0  ;;  %4636 = vmatpush1.bf16.msra.mxu0 %v8994_v11  ;;  %v15497_v11 = vld [vmem:[#allocation23_spill] sm:$0xff]  ;;  %v3251_v25 = vsel %vm2803_vm7, %v2579_v39, %v3027_v3  ;;  %v3243_v37 = vsel %vm2795_vm6, %v2571_v34, %v3019_v60  ;;  %v15502_v39 = vld [vmem:[#allocation194_spill] sm:$0xff]  ;;  %v2592_v3 = vadd.f32 %v10876_v12, %v1839_v23  ;;  %v11086_v23 = vsel %vm2833_vm5, %v10981_v56, %v3057_v55  ;;  %v15505_v55 = vld [vmem:[#allocation89_spill] sm:$0xff] }
 0x222   :  { %15493 = vst [vmem:[#allocation234_spill] sm:$0xff] %v11022_v19  ;;  %4637 = vmatprep.subr.bf16.mxu0 %v9002_v22  ;;  %v1841_v8 = vadd.f32 %v1840_v13, %v15497_v11  ;;  %v15499_v22 = vld [vmem:[#allocation17_spill] sm:$0xff]  ;;  %v11059_v13 = vadd.f32 %v10809_v27, %v2054_v31  ;;  %v3461_v11 = vpack.c.bf16 %v3251_v25, %v3244_v35  ;;  %vm2846_vm10 = vcmp.gt.f32.partialorder %v11052_v45, 0.0  ;;  %v15506_v25 = vld [vmem:[#allocation198_spill] sm:$0xff] }
 0x223   :  { %v11028_v57 = vpop.f32.mrf.mxu1  ;;  %v11030_v40 = vpop.f32.mrf.mxu0  ;;  %v1835_v2 = vadd.f32 %v10953_v49, %v15499_v22  ;;  %v9003_v49 = vld [vmem:[%s15217_s5 + $0x250] ss:$8 sps:$4 sm:$0xff]   ;;  %v2058_v1 = vadd.f32 %v15502_v39, %v15501_v51  ;;  %v3460_v34 = vpack.c.bf16 %v3250_v20, %v3243_v37  ;;  %v9011_v31 = vld [vmem:[%s15217_s5 + $0x244] ss:$8 sps:$4 sm:$0xff]   ;;  %v2586_v60 = vadd.f32 %v10880_v9, %v1837_v24  ;;  %15504 = vst [vmem:[#allocation17_spill] sm:$0xff] %v11086_v23 }
 0x224   :  { %15494 = vst [vmem:[#allocation235_spill] sm:$0xff] %v11030_v40  ;;  %4291 = vmatprep.mubr.bf16.mxu0 %v3461_v11  ;;  %v11090_v20 = vmul.f32 0.2, %v11037_v58  ;;  %v3071_v56 = vmul.f32 0.2, %v11059_v13  ;;  %v2062_v37 = vadd.f32 %v15506_v25, %v15505_v55  ;;  %v15507_v51 = vld [vmem:[#allocation87_spill] sm:$0xff] }
 0x225   :  { %v1850_v4 = vpop.f32.mrf.mxu1  ;;  %v11046_v19 = vpop.f32.mrf.mxu0  ;;  %4638 = vmatpush1.bf16.msra.mxu0 %v9000_v48  ;;  %v2593_v48 = vadd.f32 %v10880_v9, %v1841_v8  ;;  %v2585_v24 = vadd.f32 %v10876_v12, %v1835_v2  ;;  %v11097_v8 = vsel %vm2839_vm8, %v11018_v0, %v3063_v30  ;;  %v9009_v2 = vld [vmem:[%s15217_s5 + $0x240] ss:$8 sps:$4 sm:$0xff]   ;;  %v15508_v39 = vld [vmem:[#allocation196_spill] sm:$0xff]  ;;  %v3040_v30 = vmul.f32 0.2, %v2592_v3 }
 0x226   :  { %15498 = vst [vmem:[#allocation21_spill] sm:$0xff] %v11046_v19  ;;  %4639 = vmatprep.subr.bf16.mxu0 %v9005_v61  ;;  %v3070_v61 = vmul.f32 0.2, %v11052_v45  ;;  %v2060_v0 = vadd.f32 %v15508_v39, %v15507_v51  ;;  %vm2847_vm11 = vcmp.gt.f32.partialorder %v11059_v13, 0.0  ;;  %v9014_v55 = vld [vmem:[%s15217_s5 + $0x234] ss:$8 sps:$4 sm:$0xff]   ;;  %v2636_v62 = vadd.f32 %v10780_v15, %v2062_v37 }
 0x227   :  { %v11062_v7 = vpop.f32.mrf.mxu1  ;;  %v11064_v19 = vpop.f32.mrf.mxu0  ;;  %2319 = vmatmul.mubr.bf16.gmra.mxu1 %v9514_v17  ;;  %v2629_v17 = vadd.f32 %v10780_v15, %v2058_v1  ;;  %vm2816_vm12 = vcmp.gt.f32.partialorder %v2592_v3, 0.0  ;;  %v3041_v25 = vmul.f32 0.2, %v2593_v48  ;;  %v3033_v40 = vmul.f32 0.2, %v2585_v24  ;;  %v15511_v51 = vld [vmem:[#allocation27_spill] sm:$0xff] }
 0x228   :  { %15500 = vst [vmem:[#allocation19_spill] sm:$0xff] %v11064_v19  ;;  %2328 = vmatprep.mubr.bf16.mxu1 %v15322_v38  ;;  %4292 = vmatmul.mubr.bf16.gmra.mxu0 %v3460_v34  ;;  %vm2810_vm13 = vcmp.gt.f32.partialorder %v2586_v60, 0.0  ;;  %v1847_v39 = vadd.f32 %v11020_v10, %v15511_v51  ;;  %vm2809_vm14 = vcmp.gt.f32.partialorder %v2585_v24, 0.0  ;;  %v15513_v44 = vld [vmem:[#allocation25_spill] sm:$0xff]  ;;  %vm2817_vm15 = vcmp.gt.f32.partialorder %v2593_v48, 0.0 }
 0x229   :  { %v11079_v22 = vpop.f32.mrf.mxu1  ;;  %v11081_v35 = vpop.f32.mrf.mxu0  ;;  %4640 = vmatpush1.bf16.msra.mxu0 %v9003_v49  ;;  %v3034_v49 = vmul.f32 0.2, %v2586_v60  ;;  %v1845_v28 = vadd.f32 %v10995_v18, %v15513_v44  ;;  %vm2853_vm0 = vcmp.gt.f32.partialorder %v2629_v17, 0.0  ;;  %v3077_v10 = vmul.f32 0.2, %v2629_v17  ;;  %v15515_v44 = vld [vmem:[#allocation91_spill] sm:$0xff] }
 0x22a   :  { %15503 = vst [vmem:[#allocation23_spill] sm:$0xff] %v11081_v35  ;;  %4641 = vmatprep.subr.bf16.mxu0 %v9011_v31  ;;  %v15510_v35 = vld [vmem:[#allocation29_spill] sm:$0xff]  ;;  %v15512_v31 = vld [vmem:[#allocation31_spill] sm:$0xff]  ;;  %vm2860_vm1 = vcmp.gt.f32.partialorder %v2636_v62, 0.0 }
 0x22b   :  { %v11103_v11 = vpop.f32.mrf.mxu1  ;;  %v11111_v34 = vpop.f32.mrf.mxu0  ;;  %v1849_v19 = vadd.f32 %v11028_v57, %v15510_v35  ;;  %v9012_v57 = vld [vmem:[%s15217_s5 + $0x230] ss:$8 sps:$4 sm:$0xff]   ;;  %v3264_v35 = vsel %vm2816_vm12, %v2592_v3, %v3040_v30  ;;  %v15516_v18 = vld [vmem:[#allocation201_spill] sm:$0xff]  ;;  %v3258_v51 = vsel %vm2810_vm13, %v2586_v60, %v3034_v49  ;;  %v2600_v30 = vadd.f32 %v10880_v9, %v1847_v39 }
 0x22c   :  { %15509 = vst [vmem:[#allocation85_spill] sm:$0xff] %v11111_v34  ;;  %v1851_v34 = vadd.f32 %v1850_v4, %v15512_v31  ;;  %v11133_v4 = vadd.f32 %v10809_v27, %v2060_v0  ;;  %v3265_v31 = vsel %vm2817_vm15, %v2593_v48, %v3041_v25  ;;  %v9020_v3 = vld [vmem:[%s15217_s5 + $0x224] ss:$8 sps:$4 sm:$0xff]   ;;  %v3257_v0 = vsel %vm2809_vm14, %v2585_v24, %v3033_v40  ;;  %v9018_v49 = vld [vmem:[%s15217_s5 + $0x220] ss:$8 sps:$4 sm:$0xff]   ;;  %v15524_v48 = vld [vmem:[#allocation95_spill] sm:$0xff] }
 0x22d   :  { %v11119_v1 = vpop.f32.mrf.mxu1  ;;  %4642 = vmatpush1.bf16.msra.mxu0 %v9009_v2  ;;  %v11136_v37 = vpop.f32.mrf.mxu0  ;;  %v2606_v2 = vadd.f32 %v10876_v12, %v1849_v19  ;;  %v2599_v19 = vadd.f32 %v10876_v12, %v1845_v28  ;;  %v11163_v40 = vsel %vm2846_vm10, %v11052_v45, %v3070_v61  ;;  %v11171_v28 = vsel %vm2840_vm9, %v11037_v58, %v11090_v20  ;;  %v9023_v45 = vld [vmem:[%s15217_s5 + $0x214] ss:$8 sps:$4 sm:$0xff]   ;;  %v15518_v39 = vld [vmem:[#allocation93_spill] sm:$0xff] }
 0x22e   :  { %15514 = vst [vmem:[#allocation194_spill] sm:$0xff] %v11136_v37  ;;  %4643 = vmatprep.subr.bf16.mxu0 %v9014_v55  ;;  %v2607_v55 = vadd.f32 %v10880_v9, %v1851_v34  ;;  %v3468_v37 = vpack.c.bf16 %v3265_v31, %v3258_v51  ;;  %v11176_v34 = vsel %vm2847_vm11, %v11059_v13, %v3071_v56  ;;  %v3078_v25 = vmul.f32 0.2, %v11133_v4  ;;  %v9516_v31 = vld [vmem:[#allocation2 + $0x70] sm:$0xff]  }
 0x22f   :  { %v11127_v36 = vpop.f32.mrf.mxu1  ;;  %2329 = vmatmul.mubr.bf16.gmra.mxu1 %v9515_v29  ;;  %v2064_v29 = vadd.f32 %v15516_v18, %v15515_v44  ;;  %v3084_v44 = vmul.f32 0.2, %v2636_v62  ;;  %v3467_v18 = vpack.c.bf16 %v3264_v35, %v3257_v0  ;;  %v11165_v24 = vpop.f32.mrf.mxu0  ;;  %v11182_v61 = vsel %vm2853_vm0, %v2629_v17, %v3077_v10 }
 0x230   :  { %2338 = vmatprep.mubr.bf16.mxu1 %v15322_v38  ;;  %4301 = vmatprep.mubr.bf16.mxu0 %v3468_v37  ;;  %15517 = vst [vmem:[#allocation89_spill] sm:$0xff] %v11165_v24  ;;  %v3054_v37 = vmul.f32 0.2, %v2606_v2  ;;  %v3048_v20 = vmul.f32 0.2, %v2600_v30  ;;  %vm2830_vm2 = vcmp.gt.f32.partialorder %v2606_v2, 0.0 }
 0x231   :  { %v11144_v26 = vpop.f32.mrf.mxu1  ;;  %4644 = vmatpush1.bf16.msra.mxu0 %v9012_v57  ;;  %v15519_v57 = vld [vmem:[#allocation203_spill] sm:$0xff]  ;;  %v2637_v13 = vadd.f32 %v10809_v27, %v2064_v29  ;;  %v3055_v56 = vmul.f32 0.2, %v2607_v55  ;;  %vm2854_vm3 = vcmp.gt.f32.partialorder %v11133_v4, 0.0  ;;  %v11192_v17 = vsel %vm2860_vm1, %v2636_v62, %v3084_v44  ;;  %v15525_v24 = vld [vmem:[#allocation205_spill] sm:$0xff] }
 0x232   :  { %v2068_v35 = vadd.f32 %v15519_v57, %v15518_v39  ;;  %4302 = vmatmul.mubr.bf16.gmra.mxu0 %v3467_v18  ;;  %4645 = vmatprep.subr.bf16.mxu0 %v9020_v3  ;;  %v3047_v10 = vmul.f32 0.2, %v2599_v19  ;;  %vm2824_vm4 = vcmp.gt.f32.partialorder %v2600_v30, 0.0  ;;  %v9021_v3 = vld [vmem:[%s15217_s5 + $0x210] ss:$8 sps:$4 sm:$0xff]   ;;  %vm2823_vm5 = vcmp.gt.f32.partialorder %v2599_v19, 0.0  ;;  %v11205_v57 = vpop.f32.mrf.mxu0 }
 0x233   :  { %v11153_v60 = vpop.f32.mrf.mxu1  ;;  %v15520_v29 = vld [vmem:[#allocation35_spill] sm:$0xff]  ;;  %v15521_v18 = vld [vmem:[#allocation37_spill] sm:$0xff]  ;;  %15523 = vst [vmem:[#allocation198_spill] sm:$0xff] %v11205_v57  ;;  %vm2831_vm6 = vcmp.gt.f32.partialorder %v2607_v55, 0.0  ;;  %vm2861_vm7 = vcmp.gt.f32.partialorder %v2637_v13, 0.0 }
 0x234   :  { %v1857_v0 = vadd.f32 %v11079_v22, %v15520_v29  ;;  %v1859_v39 = vadd.f32 %v11103_v11, %v15521_v18  ;;  %v15522_v62 = vld [vmem:[#allocation39_spill] sm:$0xff]  ;;  %v2070_v22 = vadd.f32 %v15525_v24, %v15524_v48  ;;  %v3278_v29 = vsel %vm2830_vm2, %v2606_v2, %v3054_v37  ;;  %v15526_v18 = vld [vmem:[#allocation33_spill] sm:$0xff]  ;;  %v11231_v24 = vpop.f32.mrf.mxu0 }
 0x235   :  { %v11187_v58 = vpop.f32.mrf.mxu1  ;;  %4646 = vmatpush1.bf16.msra.mxu0 %v9018_v49  ;;  %v1861_v44 = vadd.f32 %v11119_v1, %v15522_v62  ;;  %v9026_v49 = vld [vmem:[%s15217_s5 + $0x204] ss:$8 sps:$4 sm:$0xff]   ;;  %v3085_v1 = vmul.f32 0.2, %v2637_v13  ;;  %v1855_v62 = vadd.f32 %v11062_v7, %v15526_v18  ;;  %v9024_v2 = vld [vmem:[%s15217_s5 + $0x200] ss:$8 sps:$4 sm:$0xff]  }
 0x236   :  { %4647 = vmatprep.subr.bf16.mxu0 %v9023_v45  ;;  %v3272_v45 = vsel %vm2824_vm4, %v2600_v30, %v3048_v20  ;;  %v15527_v57 = vld [vmem:[#allocation97_spill] sm:$0xff]  ;;  %v2614_v48 = vadd.f32 %v10880_v9, %v1857_v0  ;;  %v2620_v7 = vadd.f32 %v10876_v12, %v1859_v39  ;;  %v11245_v20 = vsel %vm2854_vm3, %v11133_v4, %v3078_v25 }
 0x237   :  { %v11194_v51 = vpop.f32.mrf.mxu1  ;;  %2339 = vmatmul.mubr.bf16.gmra.mxu1 %v9516_v31  ;;  %v2643_v31 = vadd.f32 %v10780_v15, %v2068_v35  ;;  %v2072_v23 = vadd.f32 %v15528_v59, %v15527_v57  ;;  %v3271_v35 = vsel %vm2823_vm5, %v2599_v19, %v3047_v10  ;;  %v2621_v30 = vadd.f32 %v10880_v9, %v1861_v44  ;;  %v15529_v44 = vld [vmem:[#allocation99_spill] sm:$0xff]  ;;  %v15530_v25 = vld [vmem:[#allocation101_spill] sm:$0xff]  ;;  %v15531_v57 = vld [vmem:[#allocation210_spill] sm:$0xff] }
 0x238   :  { %2348 = vmatprep.mubr.bf16.mxu1 %v15322_v38  ;;  %v3279_v38 = vsel %vm2831_vm6, %v2607_v55, %v3055_v56  ;;  %v3474_v55 = vpack.c.bf16 %v3278_v29, %v3271_v35  ;;  %v11254_v0 = vsel %vm2861_vm7, %v2637_v13, %v3085_v1  ;;  %v2074_v4 = vadd.f32 %v10787_v16, %v15529_v44  ;;  %v9030_v13 = vld [vmem:[%s15217_s5 + $0x2f0] ss:$8 sps:$4 sm:$0xff]   ;;  %v15532_v16 = vld [vmem:[#allocation45_spill] sm:$0xff]  ;;  %v11273_v35 = vpop.f32.mrf.mxu0 }
 0x239   :  { %v11215_v11 = vpop.f32.mrf.mxu1  ;;  %v3475_v21 = vpack.c.bf16 %v3279_v38, %v3272_v45  ;;  %4648 = vmatpush1.bf16.msra.mxu0 %v9021_v3  ;;  %v9032_v38 = vld [vmem:[%s15217_s5 + $0x2f4] ss:$8 sps:$4 sm:$0xff]   ;;  %v3091_v10 = vmul.f32 0.2, %v2643_v31  ;;  %v11250_v3 = vadd.f32 %v10809_v27, %v2070_v22  ;;  %vm2867_vm8 = vcmp.gt.f32.partialorder %v2643_v31, 0.0 }
 0x23a   :  { %4649 = vmatprep.subr.bf16.mxu0 %v9026_v49  ;;  %v11257_v39 = vadd.f32 %v10780_v15, %v2072_v23  ;;  %v2078_v49 = vadd.f32 %v15531_v57, %v15530_v25  ;;  %v9517_v22 = vld [vmem:[#allocation2 + $0x78] sm:$0xff]   ;;  %v9035_v23 = vld [vmem:[%s15217_s5 + $0x2e4] ss:$8 sps:$4 sm:$0xff]   ;;  %v3062_v1 = vmul.f32 0.2, %v2614_v48  ;;  %v1869_v45 = vadd.f32 %v11153_v60, %v15532_v16  ;;  %v15535_v25 = vld [vmem:[#allocation47_spill] sm:$0xff] }
 0x23b   :  { %v11223_v5 = vpop.f32.mrf.mxu1  ;;  %4311 = vmatprep.mubr.bf16.mxu0 %v3475_v21  ;;  %v2613_v21 = vadd.f32 %v10876_v12, %v1855_v62  ;;  %v3068_v18 = vmul.f32 0.2, %v2620_v7  ;;  %v3069_v62 = vmul.f32 0.2, %v2621_v30  ;;  %vm2844_vm9 = vcmp.gt.f32.partialorder %v2620_v7, 0.0  ;;  %v15536_v16 = vld [vmem:[#allocation41_spill] sm:$0xff] }
 0x23c   :  { %4312 = vmatmul.mubr.bf16.gmra.mxu0 %v3474_v55  ;;  %v15533_v55 = vpack.c.bf16 %v10867_v53, %v10885_v14  ;;  %v1871_v57 = vadd.f32 %v11187_v58, %v15535_v25  ;;  %vm2845_vm10 = vcmp.gt.f32.partialorder %v2621_v30, 0.0  ;;  %v11285_v56 = vsel %vm2867_vm8, %v2643_v31, %v3091_v10  ;;  %v11300_v25 = vpop.f32.mrf.mxu0  ;;  %v15547_v19 = vld [vmem:[#allocation55_spill] sm:$0xff] }
 0x23d   :  { %v11236_v59 = vpop.f32.mrf.mxu1  ;;  %4650 = vmatpush1.bf16.msra.mxu0 %v9024_v2  ;;  %v15534_v2 = vld [vmem:[#allocation43_spill] sm:$0xff]  ;;  %v3061_v60 = vmul.f32 0.2, %v2613_v21  ;;  %vm2838_vm11 = vcmp.gt.f32.partialorder %v2614_v48, 0.0  ;;  %v1865_v53 = vadd.f32 %v11127_v36, %v15536_v16  ;;  %vm2874_vm12 = vcmp.gt.f32.partialorder %v11257_v39, 0.0  ;;  %15539 = vst [vmem:[#allocation87_spill] sm:$0xff] %v11300_v25 }
 0x23e   :  { %4651 = vmatprep.subr.bf16.mxu0 %v9032_v38  ;;  %v1867_v44 = vadd.f32 %v11144_v26, %v15534_v2  ;;  %v2651_v14 = vadd.f32 %v10809_v27, %v2074_v4  ;;  %v15537_v38 = vld [vmem:[#allocation103_spill] sm:$0xff]  ;;  %v15538_v26 = vld [vmem:[#allocation212_spill] sm:$0xff]  ;;  %vm2837_vm13 = vcmp.gt.f32.partialorder %v2613_v21, 0.0  ;;  %v11296_v2 = vadd.f32 %v10780_v15, %v2078_v49 }
 0x23f   :  { %v11263_v29 = vpop.f32.mrf.mxu1  ;;  %2349 = vmatmul.mubr.bf16.gmra.mxu1 %v9517_v22  ;;  %v3292_v31 = vsel %vm2844_vm9, %v2620_v7, %v3068_v18  ;;  %v2634_v10 = vadd.f32 %v10876_v12, %v1869_v45  ;;  %v3293_v36 = vsel %vm2845_vm10, %v2621_v30, %v3069_v62  ;;  %v3098_v4 = vmul.f32 0.2, %v11257_v39  ;;  %v15540_v7 = vld [vmem:[#allocation105_spill] sm:$0xff]  ;;  %v8997_v62 = vld [vmem:[%s15217_s5 + $0x370] ss:$8 sps:$4 sm:$0xff]  }
 0x240   :  { %4474 = vmatprep.mubr.bf16.mxu1 %v15533_v55  ;;  %v2080_v55 = vadd.f32 %v15538_v26, %v15537_v38  ;;  %v2628_v16 = vadd.f32 %v10880_v9, %v1867_v44  ;;  %v2635_v38 = vadd.f32 %v10880_v9, %v1871_v57  ;;  %vm2868_vm14 = vcmp.gt.f32.partialorder %v11250_v3, 0.0  ;;  %v15550_v25 = vld [vmem:[#allocation215_spill] sm:$0xff] }
 0x241   :  { %v11282_v22 = vpop.f32.mrf.mxu1  ;;  %4652 = vmatpush2.bf16.msra.mxu0 %v9030_v13  ;;  %v3286_v13 = vsel %vm2838_vm11, %v2614_v48, %v3062_v1  ;;  %v2082_v49 = vadd.f32 %v10828_v6, %v15540_v7  ;;  %v3285_v18 = vsel %vm2837_vm13, %v2613_v21, %v3061_v60  ;;  %v2627_v30 = vadd.f32 %v10876_v12, %v1865_v53  ;;  %v9008_v48 = vld [vmem:[%s15217_s5 + $0x364] ss:$8 sps:$4 sm:$0xff]   ;;  %v9033_v1 = vld [vmem:[%s15217_s5 + $0x2e0] ss:$8 sps:$4 sm:$0xff]   ;;  %v9038_v53 = vld [vmem:[%s15217_s5 + $0x2d4] ss:$8 sps:$4 sm:$0xff]   ;;  %v11338_v7 = vpop.f32.mrf.mxu0 }
 0x242   :  { %4653 = vmatprep.subr.bf16.mxu0 %v9035_v23  ;;  %v3482_v23 = vpack.c.bf16 %v3293_v36, %v3286_v13  ;;  %v11324_v45 = vmul.f32 0.2, %v11250_v3  ;;  %v3099_v6 = vmul.f32 0.2, %v2651_v14  ;;  %v11327_v21 = vadd.f32 %v10809_v27, %v2080_v55  ;;  %15542 = vst [vmem:[#allocation196_spill] sm:$0xff] %v11338_v7 }
 0x243   :  { %v11293_v58 = vpop.f32.mrf.mxu1  ;;  %v3481_v44 = vpack.c.bf16 %v3292_v31, %v3285_v18  ;;  %v15541_v60 = vpack.c.bf16 %v10855_v52, %v10852_v41  ;;  %v3105_v36 = vmul.f32 0.2, %v11296_v2  ;;  %v3082_v13 = vmul.f32 0.2, %v2634_v10  ;;  %v9006_v31 = vld [vmem:[%s15217_s5 + $0x360] ss:$8 sps:$4 sm:$0xff]   ;;  %v11371_v37 = vpop.f32.mrf.mxu0 }
 0x244   :  { %4321 = vmatprep.mubr.bf16.mxu0 %v3482_v23  ;;  %v15543_v55 = vpack.c.bf16 %v10923_v43, %v10904_v50  ;;  %vm2875_vm15 = vcmp.gt.f32.partialorder %v2651_v14, 0.0  ;;  %v11351_v52 = vsel %vm2874_vm12, %v11257_v39, %v3098_v4  ;;  %v3076_v18 = vmul.f32 0.2, %v2628_v16  ;;  %v15544_v39 = vld [vmem:[#allocation53_spill] sm:$0xff]  ;;  %15546 = vst [vmem:[#allocation29_spill] sm:$0xff] %v11371_v37 }
 0x245   :  { %v11307_v26 = vpop.f32.mrf.mxu1  ;;  %vm2858_vm0 = vcmp.gt.f32.partialorder %v2634_v10, 0.0  ;;  %v3083_v23 = vmul.f32 0.2, %v2635_v38  ;;  %4322 = vmatmul.mubr.bf16.gmra.mxu0 %v3481_v44  ;;  %vm2881_vm1 = vcmp.gt.f32.partialorder %v11296_v2, 0.0  ;;  %v2664_v50 = vadd.f32 %v10780_v15, %v2082_v49 }
 0x246   :  { %v3075_v43 = vmul.f32 0.2, %v2627_v30  ;;  %vm2852_vm2 = vcmp.gt.f32.partialorder %v2628_v16, 0.0  ;;  %4654 = vmatpush2.bf16.msra.mxu0 %v9033_v1  ;;  %vm2882_vm3 = vcmp.gt.f32.partialorder %v11327_v21, 0.0  ;;  %vm2851_vm4 = vcmp.gt.f32.partialorder %v2627_v30, 0.0 }
 0x247   :  { %v11329_v57 = vpop.f32.mrf.mxu1  ;;  %4475 = vmatmul.mubr.bf16.vlgmr.msra.gmra.mxu1 %v15541_v60  ;;  %v1879_v4 = vadd.f32 %v11223_v5, %v15544_v39  ;;  %v11366_v41 = vsel %vm2875_vm15, %v2651_v14, %v3099_v6  ;;  %4655 = vmatprep.subr.bf16.mxu0 %v9038_v53  ;;  %v3306_v49 = vsel %vm2858_vm0, %v2634_v10, %v3082_v13  ;;  %vm2859_vm5 = vcmp.gt.f32.partialorder %v2635_v38, 0.0  ;;  %v15548_v39 = vld [vmem:[#allocation49_spill] sm:$0xff]  ;;  %v15549_v13 = vld [vmem:[#allocation107_spill] sm:$0xff] }
 0x248   :  { %4484 = vmatprep.mubr.bf16.mxu1 %v15543_v55  ;;  %4829 = vmatpush1.bf16.msra.mxu1 %v8997_v62  ;;  %v9036_v55 = vld [vmem:[%s15217_s5 + $0x2d0] ss:$8 sps:$4 sm:$0xff]   ;;  %v1881_v7 = vadd.f32 %v11236_v59, %v15547_v19  ;;  %v3106_v5 = vmul.f32 0.2, %v11327_v21  ;;  %v3300_v14 = vsel %vm2852_vm2, %v2628_v16, %v3076_v18  ;;  %v3307_v6 = vsel %vm2859_vm5, %v2635_v38, %v3083_v23  ;;  %v9017_v59 = vld [vmem:[%s15217_s5 + $0x354] ss:$8 sps:$4 sm:$0xff]  }
 0x249   :  { %v11353_v60 = vpop.f32.mrf.mxu1  ;;  %4830 = vmatprep.subr.bf16.mxu1 %v9008_v48  ;;  %v15545_v62 = vld [vmem:[#allocation51_spill] sm:$0xff]  ;;  %v1875_v48 = vadd.f32 %v11194_v51, %v15548_v39  ;;  %v3112_v10 = vmul.f32 0.2, %v2664_v50  ;;  %v3489_v37 = vpack.c.bf16 %v3307_v6, %v3300_v14  ;;  %vm2888_vm6 = vcmp.gt.f32.partialorder %v2664_v50, 0.0  ;;  %v15551_v51 = vld [vmem:[#allocation109_spill] sm:$0xff]  ;;  %v15552_v19 = vld [vmem:[#allocation216_spill] sm:$0xff]  ;;  %v11405_v39 = vpop.f32.mrf.mxu0 }
 0x24a   :  { %v1877_v1 = vadd.f32 %v11215_v11, %v15545_v62  ;;  %v2084_v11 = vadd.f32 %v15550_v25, %v15549_v13  ;;  %v3299_v62 = vsel %vm2851_vm4, %v2627_v30, %v3075_v43  ;;  %4656 = vmatpush2.bf16.msra.mxu0 %v9036_v55  ;;  %v2088_v16 = vadd.f32 %v15552_v19, %v15551_v51  ;;  %v9015_v30 = vld [vmem:[%s15217_s5 + $0x350] ss:$8 sps:$4 sm:$0xff]   ;;  %v9039_v14 = vld [vmem:[%s15217_s5 + $0x2c0] ss:$8 sps:$4 sm:$0xff]  }
 0x24b   :  { %v11363_v44 = vpop.f32.mrf.mxu1  ;;  %v2648_v38 = vadd.f32 %v10876_v12, %v1879_v4  ;;  %v3488_v18 = vpack.c.bf16 %v3306_v49, %v3299_v62  ;;  %v15553_v25 = vpack.c.bf16 %v10894_v42, %v10888_v33  ;;  %v15554_v43 = vld [vmem:[#allocation111_spill] sm:$0xff]  ;;  %v2649_v49 = vadd.f32 %v10880_v9, %v1881_v7  ;;  %15555 = vst [vmem:[#allocation27_spill] sm:$0xff] %v11405_v39  ;;  %v9029_v33 = vld [vmem:[%s15217_s5 + $0x344] ss:$8 sps:$4 sm:$0xff]  }
 0x24c   :  { %4831 = vmatpush1.bf16.msra.mxu1 %v9006_v31  ;;  %v9041_v31 = vld [vmem:[%s15217_s5 + $0x2c4] ss:$8 sps:$4 sm:$0xff]   ;;  %v2090_v55 = vadd.f32 %v10857_v32, %v15554_v43  ;;  %v2642_v4 = vadd.f32 %v10880_v9, %v1877_v1  ;;  %4331 = vmatprep.mubr.bf16.mxu0 %v3489_v37  ;;  %v15556_v42 = vpack.c.bf16 %v10965_v54, %v10948_v47  ;;  %v9047_v1 = vld [vmem:[%s15217_s5 + $0x2b4] ss:$8 sps:$4 sm:$0xff]  }
 0x24d   :  { %v11379_v53 = vpop.f32.mrf.mxu1  ;;  %v11419_v32 = vsel %vm2881_vm1, %v11296_v2, %v3105_v36  ;;  %v2641_v7 = vadd.f32 %v10876_v12, %v1875_v48  ;;  %4332 = vmatmul.mubr.bf16.gmra.mxu0 %v3488_v18  ;;  %v11428_v47 = vsel %vm2868_vm14, %v11250_v3, %v11324_v45  ;;  %v11436_v2 = vsel %vm2888_vm6, %v2664_v50, %v3112_v10  ;;  %v15560_v6 = vld [vmem:[#allocation113_spill] sm:$0xff]  ;;  %v15561_v13 = vld [vmem:[#allocation219_spill] sm:$0xff] }
 0x24e   :  { %15557 = vst [vmem:[#allocation31_spill] sm:$0xff] %v11419_v32  ;;  %15558 = vst [vmem:[#allocation25_spill] sm:$0xff] %v11436_v2  ;;  %v11439_v36 = vadd.f32 %v10809_v27, %v2084_v11  ;;  %4832 = vmatprep.subr.bf16.mxu1 %v9017_v59  ;;  %v11446_v3 = vsel %vm2882_vm3, %v11327_v21, %v3106_v5  ;;  %v11449_v45 = vadd.f32 %v10780_v15, %v2088_v16  ;;  %v15562_v50 = vld [vmem:[#allocation117_spill] sm:$0xff]  ;;  %v9044_v21 = vld [vmem:[%s15217_s5 + $0x334] ss:$8 sps:$4 sm:$0xff]  }
 0x24f   :  { %v11390_v23 = vpop.f32.mrf.mxu1  ;;  %4485 = vmatmul.mubr.bf16.gmra.mxu1 %v15553_v25  ;;  %15559 = vst [vmem:[#allocation91_spill] sm:$0xff] %v11446_v3  ;;  %v2092_v62 = vadd.f32 %v15561_v13, %v15560_v6  ;;  %v2098_v10 = vadd.f32 %v10900_v63, %v15562_v50  ;;  %v3096_v11 = vmul.f32 0.2, %v2648_v38  ;;  %v9027_v59 = vld [vmem:[%s15217_s5 + $0x340] ss:$8 sps:$4 sm:$0xff]   ;;  %4657 = vmatprep.subr.bf16.mxu0 %v9041_v31  ;;  %vm2872_vm7 = vcmp.gt.f32.partialorder %v2648_v38, 0.0  ;;  %v11466_v63 = vpop.f32.mrf.mxu0 }
 0x250   :  { %4494 = vmatprep.mubr.bf16.mxu1 %v15556_v42  ;;  %4833 = vmatpush1.bf16.msra.mxu1 %v9015_v30  ;;  %v11464_v5 = vadd.f32 %v10809_v27, %v2090_v55  ;;  %v3090_v19 = vmul.f32 0.2, %v2642_v4  ;;  %v3097_v16 = vmul.f32 0.2, %v2649_v49  ;;  %15564 = vst [vmem:[#allocation93_spill] sm:$0xff] %v11466_v63  ;;  %v15565_v18 = vld [vmem:[#allocation115_spill] sm:$0xff]  ;;  %v15596_v63 = vpack.c.bf16 %v11176_v34, %v11171_v28 }
 0x251   :  { %v11422_v37 = vpop.f32.mrf.mxu1  ;;  %4834 = vmatprep.subr.bf16.mxu1 %v9029_v33  ;;  %4658 = vmatpush2.bf16.msra.mxu0 %v9039_v14  ;;  %v15566_v25 = vld [vmem:[#allocation220_spill] sm:$0xff]  ;;  %v3089_v43 = vmul.f32 0.2, %v2641_v7  ;;  %vm2866_vm8 = vcmp.gt.f32.partialorder %v2642_v4, 0.0  ;;  %v15567_v31 = vld [vmem:[#allocation61_spill] sm:$0xff]  ;;  %vm2865_vm9 = vcmp.gt.f32.partialorder %v2641_v7, 0.0  ;;  %v11503_v32 = vpop.f32.mrf.mxu0 }
 0x252   :  { %15563 = vst [vmem:[#allocation201_spill] sm:$0xff] %v11464_v5  ;;  %v2094_v30 = vadd.f32 %v15566_v25, %v15565_v18  ;;  %v1889_v42 = vadd.f32 %v11293_v58, %v15567_v31  ;;  %v9045_v55 = vld [vmem:[%s15217_s5 + $0x2b0] ss:$8 sps:$4 sm:$0xff]   ;;  %4659 = vmatprep.subr.bf16.mxu0 %v9047_v1  ;;  %vm2873_vm10 = vcmp.gt.f32.partialorder %v2649_v49, 0.0  ;;  %v9050_v18 = vld [vmem:[%s15217_s5 + $0x2a4] ss:$8 sps:$4 sm:$0xff]   ;;  %v11485_v58 = vadd.f32 %v10780_v15, %v2092_v62 }
 0x253   :  { %v11455_v51 = vpop.f32.mrf.mxu1  ;;  %v15568_v13 = vld [vmem:[#allocation59_spill] sm:$0xff]  ;;  %v11488_v25 = vadd.f32 %v10780_v15, %v2098_v10  ;;  %v3320_v1 = vsel %vm2872_vm7, %v2648_v38, %v3096_v11  ;;  %v15570_v31 = vld [vmem:[#allocation57_spill] sm:$0xff]  ;;  %v15574_v62 = vld [vmem:[#allocation222_spill] sm:$0xff]  ;;  %15575 = vst [vmem:[#allocation203_spill] sm:$0xff] %v11503_v32  ;;  %v3314_v10 = vsel %vm2866_vm8, %v2642_v4, %v3090_v19  ;;  %v3321_v38 = vsel %vm2873_vm10, %v2649_v49, %v3097_v16 }
 0x254   :  { %v1887_v33 = vadd.f32 %v11282_v22, %v15568_v13  ;;  %v15569_v14 = vld [vmem:[#allocation63_spill] sm:$0xff]  ;;  %v1885_v54 = vadd.f32 %v11263_v29, %v15570_v31  ;;  %v15573_v48 = vld [vmem:[#allocation121_spill] sm:$0xff]  ;;  %v15577_v3 = vld [vmem:[#allocation232_spill] sm:$0xff]  ;;  %4835 = vmatpush1.bf16.msra.mxu1 %v9027_v59  ;;  %v3119_v31 = vmul.f32 0.2, %v11449_v45  ;;  %vm2895_vm11 = vcmp.gt.f32.partialorder %v11449_v45, 0.0 }
 0x255   :  { %v11472_v6 = vpop.f32.mrf.mxu1  ;;  %v1891_v50 = vadd.f32 %v11307_v26, %v15569_v14  ;;  %v15571_v26 = vld [vmem:[#allocation224_spill] sm:$0xff]  ;;  %v11499_v14 = vmul.f32 0.2, %v11439_v36  ;;  %v2102_v2 = vadd.f32 %v15574_v62, %v15573_v48  ;;  %v15576_v11 = vld [vmem:[#allocation17_spill] sm:$0xff]  ;;  %v2662_v48 = vadd.f32 %v10876_v12, %v1889_v42  ;;  %4836 = vmatprep.subr.bf16.mxu1 %v9044_v21  ;;  %4660 = vmatpush2.bf16.msra.mxu0 %v9045_v55  ;;  %v15580_v16 = vld [vmem:[#allocation119_spill] sm:$0xff] }
 0x256   :  { %v15572_v13 = vpack.c.bf16 %v10926_v46, %v15571_v26  ;;  %v15578_v29 = vpack.c.bf16 %v15576_v11, %v15577_v3  ;;  %v9042_v46 = vld [vmem:[%s15217_s5 + $0x330] ss:$8 sps:$4 sm:$0xff]   ;;  %v3313_v26 = vsel %vm2865_vm9, %v2641_v7, %v3089_v43  ;;  %v9048_v4 = vld [vmem:[%s15217_s5 + $0x2a0] ss:$8 sps:$4 sm:$0xff]   ;;  %v9059_v49 = vld [vmem:[%s15217_s5 + $0x324] ss:$8 sps:$4 sm:$0xff]   ;;  %v2656_v3 = vadd.f32 %v10880_v9, %v1887_v33  ;;  %4661 = vmatprep.subr.bf16.mxu0 %v9050_v18 }
 0x257   :  { %v11493_v22 = vpop.f32.mrf.mxu1  ;;  %v2663_v7 = vadd.f32 %v10880_v9, %v1891_v50  ;;  %v3495_v59 = vpack.c.bf16 %v3320_v1, %v3313_v26  ;;  %v9053_v21 = vld [vmem:[%s15217_s5 + $0x294] ss:$8 sps:$4 sm:$0xff]   ;;  %v11530_v19 = vmul.f32 0.2, %v11464_v5  ;;  %v15581_v43 = vld [vmem:[#allocation221_spill] sm:$0xff]  ;;  %v2655_v55 = vadd.f32 %v10876_v12, %v1885_v54 }
 0x258   :  { %4495 = vmatmul.mubr.bf16.gmra.mxu1 %v15572_v13  ;;  %v3496_v13 = vpack.c.bf16 %v3321_v38, %v3314_v10  ;;  %v2100_v42 = vadd.f32 %v15581_v43, %v15580_v16  ;;  %vm2889_vm12 = vcmp.gt.f32.partialorder %v11439_v36, 0.0  ;;  %v11539_v33 = vmul.f32 0.2, %v11485_v58  ;;  %v15582_v18 = vld [vmem:[#allocation123_spill] sm:$0xff]  ;;  %v15584_v11 = vld [vmem:[#allocation125_spill] sm:$0xff]  ;;  %v11548_v16 = vpop.f32.mrf.mxu0 }
 0x259   :  { %4504 = vmatprep.mubr.bf16.mxu1 %v15578_v29  ;;  %v11515_v62 = vpop.f32.mrf.mxu1  ;;  %15579 = vst [vmem:[#allocation35_spill] sm:$0xff] %v11530_v19  ;;  %v11542_v50 = vmul.f32 0.2, %v11488_v25  ;;  %v15583_v1 = vld [vmem:[#allocation223_spill] sm:$0xff]  ;;  %v15585_v29 = vld [vmem:[#allocation226_spill] sm:$0xff]  ;;  %15586 = vst [vmem:[#allocation37_spill] sm:$0xff] %v11548_v16  ;;  %4837 = vmatpush1.bf16.msra.mxu1 %v9042_v46  ;;  %v11559_v43 = vadd.f32 %v10809_v27, %v2094_v30 }
 0x25a   :  { %4341 = vmatprep.mubr.bf16.mxu0 %v3496_v13  ;;  %v2104_v38 = vadd.f32 %v15583_v1, %v15582_v18  ;;  %v2108_v26 = vadd.f32 %v15585_v29, %v15584_v11  ;;  %v9051_v54 = vld [vmem:[%s15217_s5 + $0x290] ss:$8 sps:$4 sm:$0xff]   ;;  %v11556_v13 = vsel %vm2895_vm11, %v11449_v45, %v3119_v31  ;;  %v11562_v18 = vadd.f32 %v10780_v15, %v2102_v2  ;;  %v9056_v46 = vld [vmem:[%s15217_s5 + $0x284] ss:$8 sps:$4 sm:$0xff]   ;;  %v11591_v16 = vpop.f32.mrf.mxu0 }
 0x25b   :  { %v11535_v10 = vpop.f32.mrf.mxu1  ;;  %4342 = vmatmul.mubr.bf16.gmra.mxu0 %v3495_v59  ;;  %15587 = vst [vmem:[#allocation39_spill] sm:$0xff] %v11556_v13  ;;  %v3110_v1 = vmul.f32 0.2, %v2662_v48  ;;  %v9057_v59 = vld [vmem:[%s15217_s5 + $0x320] ss:$8 sps:$4 sm:$0xff]   ;;  %4838 = vmatprep.subr.bf16.mxu1 %v9059_v49  ;;  %vm2902_vm13 = vcmp.gt.f32.partialorder %v11485_v58, 0.0  ;;  %v11575_v2 = vadd.f32 %v10809_v27, %v2100_v42 }
 0x25c   :  { %4662 = vmatpush2.bf16.msra.mxu0 %v9048_v4  ;;  %v3104_v45 = vmul.f32 0.2, %v2656_v3  ;;  %vm2886_vm14 = vcmp.gt.f32.partialorder %v2662_v48, 0.0  ;;  %v3111_v30 = vmul.f32 0.2, %v2663_v7  ;;  %vm2909_vm15 = vcmp.gt.f32.partialorder %v11488_v25, 0.0 }
 0x25d   :  { %v11564_v11 = vpop.f32.mrf.mxu1  ;;  %4663 = vmatprep.subr.bf16.mxu0 %v9053_v21  ;;  %15588 = vst [vmem:[#allocation95_spill] sm:$0xff] %v11575_v2  ;;  %v3103_v31 = vmul.f32 0.2, %v2655_v55  ;;  %vm2880_vm0 = vcmp.gt.f32.partialorder %v2656_v3, 0.0  ;;  %v15589_v29 = vld [vmem:[#allocation233_spill] sm:$0xff]  ;;  %v15590_v13 = vld [vmem:[#allocation230_spill] sm:$0xff]  ;;  %v11586_v5 = vadd.f32 %v10809_v27, %v2104_v38  ;;  %v2699_v21 = vadd.f32 %v10780_v15, %v2108_v26  ;;  %4839 = vmatpush1.bf16.msra.mxu1 %v9057_v59 }
 0x25e   :  { %v15591_v19 = vpack.c.bf16 %v15589_v29, %v15590_v13  ;;  %v9062_v49 = vld [vmem:[%s15217_s5 + $0x314] ss:$8 sps:$4 sm:$0xff]   ;;  %v15593_v32 = vld [vmem:[#allocation129_spill] sm:$0xff]  ;;  %vm2879_vm1 = vcmp.gt.f32.partialorder %v2655_v55, 0.0  ;;  %15595 = vst [vmem:[#allocation33_spill] sm:$0xff] %v11591_v16  ;;  %vm2916_vm2 = vcmp.gt.f32.partialorder %v11562_v18, 0.0  ;;  %v3328_v28 = vsel %vm2880_vm0, %v2656_v3, %v3104_v45  ;;  %v11621_v45 = vpop.f32.mrf.mxu0 }
 0x25f   :  { %v11577_v4 = vpop.f32.mrf.mxu1  ;;  %15592 = vst [vmem:[#allocation205_spill] sm:$0xff] %v11586_v5  ;;  %v15594_v42 = vld [vmem:[#allocation228_spill] sm:$0xff]  ;;  %v15597_v13 = vld [vmem:[#allocation11_spill] sm:$0xff]  ;;  %vm2887_vm3 = vcmp.gt.f32.partialorder %v2663_v7, 0.0  ;;  %4840 = vmatprep.subr.bf16.mxu1 %v9062_v49  ;;  %vm2923_vm4 = vcmp.gt.f32.partialorder %v2699_v21, 0.0 }
 0x260   :  { %4505 = vmatmul.mubr.bf16.gmra.mxu1 %v15591_v19  ;;  %v2112_v39 = vadd.f32 %v15594_v42, %v15593_v32  ;;  %v3334_v19 = vsel %vm2886_vm14, %v2662_v48, %v3110_v1  ;;  %v1899_v38 = vadd.f32 %v11363_v44, %v15597_v13  ;;  %4664 = vmatpush2.bf16.msra.mxu0 %v9051_v54  ;;  %v15598_v32 = vld [vmem:[#allocation10_spill] sm:$0xff]  ;;  %v15599_v42 = vld [vmem:[#allocation12_spill] sm:$0xff]  ;;  %v15600_v44 = vld [vmem:[#allocation9_spill] sm:$0xff] }
 0x261   :  { %4514 = vmatprep.mubr.bf16.mxu1 %v15596_v63  ;;  %v11600_v29 = vpop.f32.mrf.mxu1  ;;  %v1897_v26 = vadd.f32 %v11353_v60, %v15598_v32  ;;  %v1901_v16 = vadd.f32 %v11379_v53, %v15599_v42  ;;  %v3335_v34 = vsel %vm2887_vm3, %v2663_v7, %v3111_v30  ;;  %4665 = vmatprep.subr.bf16.mxu0 %v9056_v46  ;;  %v3140_v63 = vmul.f32 0.2, %v11562_v18  ;;  %v9054_v60 = vld [vmem:[%s15217_s5 + $0x280] ss:$8 sps:$4 sm:$0xff]   ;;  %v15601_v59 = vld [vmem:[#allocation127_spill] sm:$0xff] }
 0x262   :  { %v3327_v48 = vsel %vm2879_vm1, %v2655_v55, %v3103_v31  ;;  %v1895_v1 = vadd.f32 %v11329_v57, %v15600_v44  ;;  %v3503_v13 = vpack.c.bf16 %v3335_v34, %v3328_v28  ;;  %v3147_v53 = vmul.f32 0.2, %v2699_v21  ;;  %v15602_v3 = vld [vmem:[#allocation227_spill] sm:$0xff]  ;;  %v15613_v34 = vld [vmem:[#allocation229_spill] sm:$0xff] }
 0x263   :  { %v11611_v54 = vpop.f32.mrf.mxu1  ;;  %v2110_v7 = vadd.f32 %v15602_v3, %v15601_v59  ;;  %v11619_v46 = vadd.f32 %v10780_v15, %v2112_v39  ;;  %v3502_v55 = vpack.c.bf16 %v3334_v19, %v3327_v48  ;;  %v9060_v57 = vld [vmem:[%s15217_s5 + $0x310] ss:$8 sps:$4 sm:$0xff]   ;;  %v11627_v30 = vmul.f32 0.2, %v11559_v43  ;;  %v9065_v19 = vld [vmem:[%s15217_s5 + $0x304] ss:$8 sps:$4 sm:$0xff]   ;;  %v11681_v48 = vpop.f32.mrf.mxu0 }
 0x264   :  { %v2676_v31 = vadd.f32 %v10876_v12, %v1899_v38  ;;  %4351 = vmatprep.mubr.bf16.mxu0 %v3503_v13  ;;  %v11636_v39 = vsel %vm2889_vm12, %v11439_v36, %v11499_v14  ;;  %v11645_v32 = vsel %vm2902_vm13, %v11485_v58, %v11539_v33  ;;  %v11651_v38 = vsel %vm2909_vm15, %v11488_v25, %v11542_v50 }
 0x265   :  { %15603 = vst [vmem:[#allocation97_spill] sm:$0xff] %v11627_v30  ;;  %v11630_v49 = vpop.f32.mrf.mxu1  ;;  %15604 = vst [vmem:[#allocation207_spill] sm:$0xff] %v11645_v32  ;;  %v2670_v42 = vadd.f32 %v10880_v9, %v1897_v26  ;;  %v2677_v36 = vadd.f32 %v10880_v9, %v1901_v16  ;;  %4352 = vmatmul.mubr.bf16.gmra.mxu0 %v3502_v55  ;;  %v11656_v14 = vmul.f32 0.2, %v11575_v2  ;;  %v11664_v58 = vmul.f32 0.2, %v11586_v5 }
 0x266   :  { %15605 = vst [vmem:[#allocation99_spill] sm:$0xff] %v11651_v38  ;;  %v11661_v28 = vsel %vm2916_vm2, %v11562_v18, %v3140_v63  ;;  %v2669_v33 = vadd.f32 %v10876_v12, %v1895_v1  ;;  %v15609_v50 = vpack.c.bf16 %v11163_v40, %v11097_v8  ;;  %4666 = vmatpush2.bf16.msra.mxu0 %v9054_v60  ;;  %vm2930_vm5 = vcmp.gt.f32.partialorder %v11619_v46, 0.0  ;;  %v15612_v18 = vld [vmem:[#allocation131_spill] sm:$0xff]  ;;  %v9063_v8 = vld [vmem:[%s15217_s5 + $0x300] ss:$8 sps:$4 sm:$0xff]  }
 0x267   :  { %15606 = vst [vmem:[#allocation101_spill] sm:$0xff] %v11656_v14  ;;  %15607 = vst [vmem:[#allocation210_spill] sm:$0xff] %v11661_v28  ;;  %v11667_v25 = vpop.f32.mrf.mxu1  ;;  %v11673_v16 = vsel %vm2923_vm4, %v2699_v21, %v3147_v53  ;;  %v11676_v26 = vadd.f32 %v10809_v27, %v2110_v7  ;;  %v2114_v63 = vadd.f32 %v15613_v34, %v15612_v18  ;;  %4841 = vmatpush1.bf16.msra.mxu1 %v9060_v57  ;;  %v15615_v21 = vld [vmem:[#allocation133_spill] sm:$0xff]  ;;  %v15616_v1 = vld [vmem:[#allocation231_spill] sm:$0xff] }
 0x268   :  { %15608 = vst [vmem:[#allocation45_spill] sm:$0xff] %v11664_v58  ;;  %4515 = vmatmul.mubr.bf16.gmra.mxu1 %v15609_v50  ;;  %15610 = vst [vmem:[#allocation43_spill] sm:$0xff] %v11673_v16  ;;  %v15614_v44 = vpack.c.bf16 %v11254_v0, %v11245_v20  ;;  %v3154_v40 = vmul.f32 0.2, %v11619_v46  ;;  %v2118_v13 = vadd.f32 %v15616_v1, %v15615_v21  ;;  %v15617_v60 = vld [vmem:[#allocation137_spill] sm:$0xff]  ;;  %v15618_v53 = vld [vmem:[#allocation235_spill] sm:$0xff]  ;;  %4842 = vmatprep.subr.bf16.mxu1 %v9065_v19  ;;  %v11706_v19 = vpop.f32.mrf.mxu0 }
 0x269   :  { %15611 = vst [vmem:[#allocation47_spill] sm:$0xff] %v11676_v26  ;;  %v2122_v59 = vadd.f32 %v15618_v53, %v15617_v60  ;;  %v3124_v3 = vmul.f32 0.2, %v2676_v31  ;;  %v11694_v7 = vpop.f32.mrf.mxu1  ;;  %v3118_v55 = vmul.f32 0.2, %v2670_v42  ;;  %vm2900_vm6 = vcmp.gt.f32.partialorder %v2676_v31, 0.0 }
 0x26a   :  { %4524 = vmatprep.mubr.bf16.mxu1 %v15614_v44  ;;  %v3125_v20 = vmul.f32 0.2, %v2677_v36  ;;  %v15619_v0 = vld [vmem:[#allocation15_spill] sm:$0xff]  ;;  %v3117_v50 = vmul.f32 0.2, %v2669_v33  ;;  %vm2894_vm7 = vcmp.gt.f32.partialorder %v2670_v42, 0.0 }
 0x26b   :  { %v1909_v57 = vadd.f32 %v11455_v51, %v15619_v0  ;;  %v15620_v18 = vld [vmem:[#allocation14_spill] sm:$0xff]  ;;  %v15621_v44 = vld [vmem:[#allocation16_spill] sm:$0xff]  ;;  %v11702_v1 = vpop.f32.mrf.mxu1  ;;  %v15622_v60 = vld [vmem:[#allocation141_spill] sm:$0xff]  ;;  %vm2893_vm8 = vcmp.gt.f32.partialorder %v2669_v33, 0.0  ;;  %vm2901_vm9 = vcmp.gt.f32.partialorder %v2677_v36, 0.0  ;;  %4843 = vmatpush1.bf16.msra.mxu1 %v9063_v8  ;;  %v11711_v51 = vadd.f32 %v10780_v15, %v2118_v13 }
 0x26c   :  { %v1907_v34 = vadd.f32 %v11422_v37, %v15620_v18  ;;  %v1911_v21 = vadd.f32 %v11472_v6, %v15621_v44  ;;  %v15623_v53 = vld [vmem:[#allocation19_spill] sm:$0xff]  ;;  %v15624_v28 = vld [vmem:[#allocation13_spill] sm:$0xff]  ;;  %v15626_v0 = vld [vmem:[#allocation234_spill] sm:$0xff]  ;;  %v11716_v6 = vadd.f32 %v10780_v15, %v2122_v59  ;;  %v3348_v44 = vsel %vm2900_vm6, %v2676_v31, %v3124_v3 }
 0x26d   :  { %v2128_v16 = vadd.f32 %v15623_v53, %v15622_v60  ;;  %v1905_v38 = vadd.f32 %v11390_v23, %v15624_v28  ;;  %v15625_v37 = vld [vmem:[#allocation135_spill] sm:$0xff]  ;;  %v11719_v60 = vpop.f32.mrf.mxu1  ;;  %v15628_v58 = vld [vmem:[#allocation21_spill] sm:$0xff]  ;;  %v2690_v23 = vadd.f32 %v10876_v12, %v1909_v57  ;;  %v3342_v28 = vsel %vm2894_vm7, %v2670_v42, %v3118_v55  ;;  %v11736_v57 = vpop.f32.mrf.mxu0  ;;  %v15644_v30 = vld [vmem:[#allocation18_spill] sm:$0xff] }
 0x26e   :  { %v2120_v18 = vadd.f32 %v15626_v0, %v15625_v37  ;;  %v15627_v53 = vld [vmem:[#allocation139_spill] sm:$0xff]  ;;  %v3349_v8 = vsel %vm2901_vm9, %v2677_v36, %v3125_v20  ;;  %v3341_v13 = vsel %vm2893_vm8, %v2669_v33, %v3117_v50  ;;  %v2684_v5 = vadd.f32 %v10880_v9, %v1907_v34  ;;  %v15635_v50 = vld [vmem:[#allocation145_spill] sm:$0xff] }
 0x26f   :  { %v2124_v14 = vadd.f32 %v15628_v58, %v15627_v53  ;;  %v2691_v37 = vadd.f32 %v10880_v9, %v1911_v21  ;;  %v3510_v0 = vpack.c.bf16 %v3349_v8, %v3342_v28  ;;  %v11727_v59 = vpop.f32.mrf.mxu1  ;;  %v15629_v31 = vpack.c.bf16 %v11192_v17, %v11182_v61  ;;  %v15636_v34 = vld [vmem:[#allocation85_spill] sm:$0xff]  ;;  %v15643_v32 = vld [vmem:[#allocation23_spill] sm:$0xff] }
 0x270   :  { %v11733_v3 = vmul.f32 0.2, %v11676_v26  ;;  %v2727_v58 = vadd.f32 %v10780_v15, %v2128_v16  ;;  %v2683_v42 = vadd.f32 %v10876_v12, %v1905_v38  ;;  %v3509_v36 = vpack.c.bf16 %v3348_v44, %v3341_v13  ;;  %v11766_v44 = vpop.f32.mrf.mxu0  ;;  %v15637_v53 = vld [vmem:[#allocation149_spill] sm:$0xff]  ;;  %v15639_v13 = vld [vmem:[#allocation22_spill] sm:$0xff] }
 0x271   :  { %4525 = vmatmul.mubr.bf16.gmra.mxu1 %v15629_v31  ;;  %v15631_v33 = vpack.c.bf16 %v11366_v41, %v11428_v47  ;;  %v11745_v55 = vsel %vm2930_vm5, %v11619_v46, %v3154_v40  ;;  %v11748_v61 = vadd.f32 %v10809_v27, %v2114_v63  ;;  %vm2937_vm10 = vcmp.gt.f32.partialorder %v11711_v51, 0.0  ;;  %4361 = vmatprep.mubr.bf16.mxu0 %v3510_v0  ;;  %v11752_v16 = vpop.f32.mrf.mxu1  ;;  %v15638_v28 = vld [vmem:[#allocation89_spill] sm:$0xff] }
 0x272   :  { %15630 = vst [vmem:[#allocation41_spill] sm:$0xff] %v11733_v3  ;;  %15632 = vst [vmem:[#allocation103_spill] sm:$0xff] %v11745_v55  ;;  %v3161_v17 = vmul.f32 0.2, %v11711_v51  ;;  %v11755_v38 = vadd.f32 %v10809_v27, %v2120_v18  ;;  %vm2944_vm11 = vcmp.gt.f32.partialorder %v11716_v6, 0.0  ;;  %4362 = vmatmul.mubr.bf16.gmra.mxu0 %v3509_v36  ;;  %v11760_v46 = vadd.f32 %v10809_v27, %v2124_v14  ;;  %v15642_v3 = vld [vmem:[#allocation143_spill] sm:$0xff] }
 0x273   :  { %4534 = vmatprep.mubr.bf16.mxu1 %v15631_v33  ;;  %15633 = vst [vmem:[#allocation212_spill] sm:$0xff] %v11748_v61  ;;  %v3168_v41 = vmul.f32 0.2, %v11716_v6  ;;  %v3138_v47 = vmul.f32 0.2, %v2690_v23  ;;  %vm2914_vm12 = vcmp.gt.f32.partialorder %v2690_v23, 0.0  ;;  %v11762_v20 = vpop.f32.mrf.mxu1  ;;  %v2132_v21 = vadd.f32 %v15636_v34, %v15635_v50 }
 0x274   :  { %15634 = vst [vmem:[#allocation105_spill] sm:$0xff] %v11760_v46  ;;  %v3132_v63 = vmul.f32 0.2, %v2684_v5  ;;  %v3139_v40 = vmul.f32 0.2, %v2691_v37  ;;  %vm2951_vm13 = vcmp.gt.f32.partialorder %v2727_v58, 0.0  ;;  %v2138_v8 = vadd.f32 %v15638_v28, %v15637_v53 }
 0x275   :  { %v3131_v18 = vmul.f32 0.2, %v2683_v42  ;;  %vm2908_vm14 = vcmp.gt.f32.partialorder %v2684_v5, 0.0  ;;  %vm2907_vm15 = vcmp.gt.f32.partialorder %v2683_v42, 0.0  ;;  %v1919_v14 = vadd.f32 %v11535_v10, %v15639_v13  ;;  %v11772_v0 = vpop.f32.mrf.mxu1  ;;  %v15640_v33 = vld [vmem:[#allocation20_spill] sm:$0xff] }
 0x276   :  { %vm2915_vm0 = vcmp.gt.f32.partialorder %v2691_v37, 0.0  ;;  %v3175_v31 = vmul.f32 0.2, %v2727_v58  ;;  %v3362_v36 = vsel %vm2914_vm12, %v2690_v23, %v3138_v47  ;;  %v1917_v55 = vadd.f32 %v11515_v62, %v15640_v33  ;;  %v15641_v50 = vld [vmem:[#allocation24_spill] sm:$0xff]  ;;  %v15646_v62 = vld [vmem:[#allocation147_spill] sm:$0xff]  ;;  %v15647_v47 = vld [vmem:[#allocation194_spill] sm:$0xff] }
 0x277   :  { %v1921_v34 = vadd.f32 %v11564_v11, %v15641_v50  ;;  %v2130_v26 = vadd.f32 %v15643_v32, %v15642_v3  ;;  %v1915_v53 = vadd.f32 %v11493_v22, %v15644_v30  ;;  %v3356_v28 = vsel %vm2908_vm14, %v2684_v5, %v3132_v63  ;;  %v11782_v10 = vpop.f32.mrf.mxu1  ;;  %v11793_v32 = vpop.f32.mrf.mxu0 }
 0x278   :  { %v3363_v2 = vsel %vm2915_vm0, %v2691_v37, %v3139_v40  ;;  %v15645_v13 = vpack.c.bf16 %v11351_v52, %v11285_v56  ;;  %v11788_v23 = vadd.f32 %v10780_v15, %v2132_v21  ;;  %v2134_v11 = vadd.f32 %v15647_v47, %v15646_v62  ;;  %v15660_v47 = vld [vmem:[#allocation157_spill] sm:$0xff] }
 0x279   :  { %v3355_v33 = vsel %vm2907_vm15, %v2683_v42, %v3131_v18  ;;  %v3517_v3 = vpack.c.bf16 %v3363_v2, %v3356_v28  ;;  %v11796_v5 = vmul.f32 0.2, %v11748_v61  ;;  %v11799_v22 = vadd.f32 %v10780_v15, %v2138_v8  ;;  %v11802_v30 = vpop.f32.mrf.mxu1  ;;  %v15694_v61 = vld [vmem:[#allocation167_spill] sm:$0xff] }
 0x27a   :  { %4535 = vmatmul.mubr.bf16.gmra.mxu1 %v15645_v13  ;;  %v2704_v56 = vadd.f32 %v10876_v12, %v1919_v14  ;;  %v3516_v52 = vpack.c.bf16 %v3362_v36, %v3355_v33  ;;  %v11807_v37 = vsel %vm2937_vm10, %v11711_v51, %v3161_v17  ;;  %v11810_v42 = vmul.f32 0.2, %v11755_v38  ;;  %v15657_v14 = vld [vmem:[#allocation198_spill] sm:$0xff]  ;;  %v15658_v36 = vld [vmem:[#allocation153_spill] sm:$0xff] }
 0x27b   :  { %15648 = vst [vmem:[#allocation53_spill] sm:$0xff] %v11796_v5  ;;  %15649 = vst [vmem:[#allocation51_spill] sm:$0xff] %v11807_v37  ;;  %v2698_v2 = vadd.f32 %v10880_v9, %v1917_v55  ;;  %v2705_v63 = vadd.f32 %v10880_v9, %v1921_v34  ;;  %4371 = vmatprep.mubr.bf16.mxu0 %v3517_v3  ;;  %v11817_v40 = vsel %vm2944_vm11, %v11716_v6, %v3168_v41  ;;  %v11826_v17 = vpop.f32.mrf.mxu1  ;;  %v11836_v41 = vpop.f32.mrf.mxu0  ;;  %v15667_v37 = vld [vmem:[#allocation26_spill] sm:$0xff] }
 0x27c   :  { %15650 = vst [vmem:[#allocation55_spill] sm:$0xff] %v11810_v42  ;;  %15651 = vst [vmem:[#allocation49_spill] sm:$0xff] %v11817_v40  ;;  %v11820_v21 = vmul.f32 0.2, %v11760_v46  ;;  %v11823_v18 = vsel %vm2951_vm13, %v2727_v58, %v3175_v31  ;;  %v2697_v51 = vadd.f32 %v10876_v12, %v1915_v53  ;;  %4372 = vmatmul.mubr.bf16.gmra.mxu0 %v3516_v52  ;;  %vm2958_vm1 = vcmp.gt.f32.partialorder %v11788_v23, 0.0  ;;  %v15656_v58 = vld [vmem:[#allocation151_spill] sm:$0xff] }
 0x27d   :  { %15653 = vst [vmem:[#allocation215_spill] sm:$0xff] %v11823_v18  ;;  %v11829_v55 = vadd.f32 %v10809_v27, %v2130_v26  ;;  %v3182_v8 = vmul.f32 0.2, %v11788_v23  ;;  %v11834_v6 = vadd.f32 %v10809_v27, %v2134_v11  ;;  %vm2965_vm2 = vcmp.gt.f32.partialorder %v11799_v22, 0.0  ;;  %v11843_v26 = vpop.f32.mrf.mxu1  ;;  %v15659_v53 = vld [vmem:[#allocation155_spill] sm:$0xff]  ;;  %v15662_v52 = vld [vmem:[#allocation30_spill] sm:$0xff] }
 0x27e   :  { %15652 = vst [vmem:[#allocation107_spill] sm:$0xff] %v11820_v21  ;;  %v2140_v31 = vadd.f32 %v15657_v14, %v15656_v58  ;;  %v2142_v50 = vadd.f32 %v11231_v24, %v15658_v36  ;;  %v3152_v34 = vmul.f32 0.2, %v2704_v56  ;;  %v2144_v28 = vadd.f32 %v11273_v35, %v15659_v53  ;;  %v15661_v11 = vld [vmem:[#allocation87_spill] sm:$0xff]  ;;  %v11854_v36 = vpop.f32.mrf.mxu0  ;;  %v15664_v18 = vld [vmem:[#allocation28_spill] sm:$0xff]  ;;  %v15692_v5 = vld [vmem:[#allocation34_spill] sm:$0xff] }
 0x27f   :  { %15654 = vst [vmem:[#allocation109_spill] sm:$0xff] %v11829_v55  ;;  %15655 = vst [vmem:[#allocation216_spill] sm:$0xff] %v11834_v6  ;;  %v3146_v13 = vmul.f32 0.2, %v2698_v2  ;;  %vm2928_vm3 = vcmp.gt.f32.partialorder %v2704_v56, 0.0  ;;  %v2148_v33 = vadd.f32 %v15661_v11, %v15660_v47  ;;  %vm2922_vm4 = vcmp.gt.f32.partialorder %v2698_v2, 0.0  ;;  %v11851_v14 = vpop.f32.mrf.mxu1 }
 0x280   :  { %v3153_v62 = vmul.f32 0.2, %v2705_v63  ;;  %v3145_v3 = vmul.f32 0.2, %v2697_v51  ;;  %v1929_v58 = vadd.f32 %v11611_v54, %v15662_v52  ;;  %v3189_v24 = vmul.f32 0.2, %v11799_v22 }
 0x281   :  { %15663 = vst [vmem:[#allocation111_spill] sm:$0xff] %v11854_v36  ;;  %vm2921_vm5 = vcmp.gt.f32.partialorder %v2697_v51, 0.0  ;;  %v1927_v35 = vadd.f32 %v11600_v29, %v15664_v18  ;;  %v15665_v53 = vld [vmem:[#allocation32_spill] sm:$0xff]  ;;  %v11861_v47 = vadd.f32 %v10809_v27, %v2140_v31  ;;  %v3376_v11 = vsel %vm2928_vm3, %v2704_v56, %v3152_v34  ;;  %v11865_v52 = vpop.f32.mrf.mxu1  ;;  %v15695_v36 = vld [vmem:[#allocation203_spill] sm:$0xff] }
 0x282   :  { %v1931_v40 = vadd.f32 %v11630_v49, %v15665_v53  ;;  %v1925_v54 = vadd.f32 %v11577_v4, %v15667_v37  ;;  %vm2929_vm6 = vcmp.gt.f32.partialorder %v2705_v63, 0.0  ;;  %v11868_v21 = vadd.f32 %v10780_v15, %v2142_v50  ;;  %v11880_v37 = vpop.f32.mrf.mxu0 }
 0x283   :  { %15666 = vst [vmem:[#allocation113_spill] sm:$0xff] %v11861_v47  ;;  %v11871_v42 = vadd.f32 %v10809_v27, %v2144_v28  ;;  %v3370_v29 = vsel %vm2922_vm4, %v2698_v2, %v3146_v13  ;;  %v3377_v18 = vsel %vm2929_vm6, %v2705_v63, %v3153_v62  ;;  %v2755_v49 = vadd.f32 %v10780_v15, %v2148_v33  ;;  %v11875_v34 = vpop.f32.mrf.mxu1  ;;  %v15674_v13 = vld [vmem:[#allocation196_spill] sm:$0xff] }
 0x284   :  { %v3369_v53 = vsel %vm2921_vm5, %v2697_v51, %v3145_v3  ;;  %v2718_v31 = vadd.f32 %v10876_v12, %v1929_v58  ;;  %v3524_v56 = vpack.c.bf16 %v3377_v18, %v3370_v29  ;;  %v11878_v4 = vmul.f32 0.2, %v11829_v55  ;;  %15670 = vst [vmem:[#allocation115_spill] sm:$0xff] %v11880_v37  ;;  %v15673_v51 = vld [vmem:[#allocation159_spill] sm:$0xff] }
 0x285   :  { %15668 = vst [vmem:[#allocation219_spill] sm:$0xff] %v11871_v42  ;;  %v2712_v50 = vadd.f32 %v10880_v9, %v1927_v35  ;;  %v2719_v28 = vadd.f32 %v10880_v9, %v1931_v40  ;;  %v3523_v46 = vpack.c.bf16 %v3376_v11, %v3369_v53  ;;  %v11887_v2 = vsel %vm2958_vm1, %v11788_v23, %v3182_v8  ;;  %v11895_v3 = vpop.f32.mrf.mxu1  ;;  %v15678_v11 = vld [vmem:[#allocation161_spill] sm:$0xff]  ;;  %v15689_v37 = vld [vmem:[#allocation163_spill] sm:$0xff] }
 0x286   :  { %15669 = vst [vmem:[#allocation117_spill] sm:$0xff] %v11878_v4  ;;  %15671 = vst [vmem:[#allocation220_spill] sm:$0xff] %v11887_v2  ;;  %v11890_v63 = vmul.f32 0.2, %v11834_v6  ;;  %v2150_v62 = vadd.f32 %v15674_v13, %v15673_v51  ;;  %v2711_v33 = vadd.f32 %v10876_v12, %v1925_v54  ;;  %4381 = vmatprep.mubr.bf16.mxu0 %v3524_v56  ;;  %v11903_v58 = vmul.f32 0.2, %v11861_v47 }
 0x287   :  { %v11900_v40 = vsel %vm2965_vm2, %v11799_v22, %v3189_v24  ;;  %vm2972_vm7 = vcmp.gt.f32.partialorder %v11868_v21, 0.0  ;;  %v3196_v23 = vmul.f32 0.2, %v11868_v21  ;;  %4382 = vmatmul.mubr.bf16.gmra.mxu0 %v3523_v46  ;;  %v11908_v8 = vmul.f32 0.2, %v11871_v42  ;;  %v15679_v54 = vld [vmem:[#allocation29_spill] sm:$0xff]  ;;  %v11912_v53 = vpop.f32.mrf.mxu1  ;;  %v11914_v22 = vpop.f32.mrf.mxu0 }
 0x288   :  { %15672 = vst [vmem:[#allocation61_spill] sm:$0xff] %v11890_v63  ;;  %15675 = vst [vmem:[#allocation59_spill] sm:$0xff] %v11900_v40  ;;  %v3203_v35 = vmul.f32 0.2, %v2755_v49  ;;  %v2152_v29 = vadd.f32 %v15679_v54, %v15678_v11  ;;  %v3166_v18 = vmul.f32 0.2, %v2718_v31  ;;  %v11917_v51 = vadd.f32 %v10809_v27, %v2150_v62 }
 0x289   :  { %15676 = vst [vmem:[#allocation63_spill] sm:$0xff] %v11903_v58  ;;  %15677 = vst [vmem:[#allocation57_spill] sm:$0xff] %v11908_v8  ;;  %vm2979_vm8 = vcmp.gt.f32.partialorder %v2755_v49, 0.0  ;;  %v3160_v24 = vmul.f32 0.2, %v2712_v50  ;;  %vm2942_vm9 = vcmp.gt.f32.partialorder %v2718_v31, 0.0  ;;  %v11921_v2 = vpop.f32.mrf.mxu1 }
 0x28a   :  { %15680 = vst [vmem:[#allocation224_spill] sm:$0xff] %v11914_v22  ;;  %v3167_v56 = vmul.f32 0.2, %v2719_v28  ;;  %15681 = vst [vmem:[#allocation121_spill] sm:$0xff] %v11917_v51  ;;  %v15682_v46 = vld [vmem:[#allocation165_spill] sm:$0xff]  ;;  %vm2936_vm10 = vcmp.gt.f32.partialorder %v2712_v50, 0.0  ;;  %v11928_v4 = vadd.f32 %v10780_v15, %v2152_v29  ;;  %v3390_v62 = vsel %vm2942_vm9, %v2718_v31, %v3166_v18 }
 0x28b   :  { %v15683_v13 = vld [vmem:[#allocation93_spill] sm:$0xff]  ;;  %v3159_v58 = vmul.f32 0.2, %v2711_v33  ;;  %vm2935_vm11 = vcmp.gt.f32.partialorder %v2711_v33, 0.0  ;;  %v15686_v42 = vld [vmem:[#allocation38_spill] sm:$0xff]  ;;  %vm2943_vm12 = vcmp.gt.f32.partialorder %v2719_v28, 0.0  ;;  %v11934_v47 = vpop.f32.mrf.mxu1 }
 0x28c   :  { %v2158_v40 = vadd.f32 %v15683_v13, %v15682_v46  ;;  %v15684_v11 = vld [vmem:[#allocation169_spill] sm:$0xff]  ;;  %v1939_v22 = vadd.f32 %v11702_v1, %v15686_v42  ;;  %v15687_v63 = vld [vmem:[#allocation36_spill] sm:$0xff]  ;;  %v15690_v55 = vld [vmem:[#allocation27_spill] sm:$0xff]  ;;  %v1935_v1 = vadd.f32 %v11667_v25, %v15692_v5  ;;  %v3384_v42 = vsel %vm2936_vm10, %v2712_v50, %v3160_v24 }
 0x28d   :  { %v15685_v54 = vld [vmem:[#allocation37_spill] sm:$0xff]  ;;  %v1937_v6 = vadd.f32 %v11694_v7, %v15687_v63  ;;  %v15688_v46 = vld [vmem:[#allocation40_spill] sm:$0xff]  ;;  %v3391_v29 = vsel %vm2943_vm12, %v2719_v28, %v3167_v56  ;;  %v3383_v63 = vsel %vm2935_vm11, %v2711_v33, %v3159_v58  ;;  %v11958_v50 = vsel %vm2972_vm7, %v11868_v21, %v3196_v23 }
 0x28e   :  { %v2162_v8 = vadd.f32 %v15685_v54, %v15684_v11  ;;  %v1941_v13 = vadd.f32 %v11719_v60, %v15688_v46  ;;  %v2154_v11 = vadd.f32 %v15690_v55, %v15689_v37  ;;  %v11938_v54 = vpop.f32.mrf.mxu0  ;;  %v11943_v31 = vadd.f32 %v10780_v15, %v2158_v40  ;;  %v15693_v18 = vld [vmem:[#allocation173_spill] sm:$0xff]  ;;  %v11947_v46 = vpop.f32.mrf.mxu1  ;;  %15696 = vst [vmem:[#allocation17_spill] sm:$0xff] %v11958_v50 }
 0x28f   :  { %15691 = vst [vmem:[#allocation222_spill] sm:$0xff] %v11938_v54  ;;  %v2402_v7 = vadd.f32 %v11621_v45, %v15693_v18  ;;  %v3531_v60 = vpack.c.bf16 %v3391_v29, %v3384_v42  ;;  %v2160_v55 = vadd.f32 %v15695_v36, %v15694_v61  ;;  %v2732_v25 = vadd.f32 %v10876_v12, %v1939_v22  ;;  %v15701_v58 = vld [vmem:[#allocation33_spill] sm:$0xff] }
 0x290   :  { %v11952_v37 = vadd.f32 %v10780_v15, %v2162_v8  ;;  %v3530_v5 = vpack.c.bf16 %v3390_v62, %v3383_v63  ;;  %v11961_v45 = vsel %vm2979_vm8, %v2755_v49, %v3203_v35  ;;  %v2726_v28 = vadd.f32 %v10880_v9, %v1937_v6  ;;  %v11965_v61 = vpop.f32.mrf.mxu1  ;;  %v11972_v40 = vpop.f32.mrf.mxu0  ;;  %v15700_v6 = vld [vmem:[#allocation171_spill] sm:$0xff]  ;;  %v15702_v8 = vld [vmem:[#allocation225_spill] sm:$0xff] }
 0x291   :  { %15697 = vst [vmem:[#allocation232_spill] sm:$0xff] %v11961_v45  ;;  %v2733_v33 = vadd.f32 %v10880_v9, %v1941_v13  ;;  %4391 = vmatprep.mubr.bf16.mxu0 %v3531_v60  ;;  %v11968_v15 = vmul.f32 0.2, %v11917_v51  ;;  %vm2986_vm13 = vcmp.gt.f32.partialorder %v11928_v4, 0.0  ;;  %v3210_v36 = vmul.f32 0.2, %v11928_v4 }
 0x292   :  { %15699 = vst [vmem:[#allocation221_spill] sm:$0xff] %v11972_v40  ;;  %v2725_v21 = vadd.f32 %v10876_v12, %v1935_v1  ;;  %4392 = vmatmul.mubr.bf16.gmra.mxu0 %v3530_v5  ;;  %v11976_v49 = vadd.f32 %v10809_v27, %v2154_v11  ;;  %vm2993_vm14 = vcmp.gt.f32.partialorder %v11943_v31, 0.0  ;;  %v2164_v23 = vadd.f32 %v15701_v58, %v15700_v6  ;;  %v11982_v22 = vpop.f32.mrf.mxu1  ;;  %v15703_v13 = vld [vmem:[#allocation174_spill] sm:$0xff] }
 0x293   :  { %15698 = vst [vmem:[#allocation119_spill] sm:$0xff] %v11968_v15  ;;  %v2577_v35 = vadd.f32 %v15702_v8, %v2402_v7  ;;  %v3217_v24 = vmul.f32 0.2, %v11943_v31  ;;  %v11986_v56 = vadd.f32 %v10809_v27, %v2160_v55  ;;  %vm3000_vm15 = vcmp.gt.f32.partialorder %v11952_v37, 0.0  ;;  %v11994_v7 = vpop.f32.mrf.mxu0  ;;  %v15705_v60 = vld [vmem:[#allocation46_spill] sm:$0xff] }
 0x294   :  { %v3180_v62 = vmul.f32 0.2, %v2732_v25  ;;  %v2394_v11 = vadd.f32 %v11681_v48, %v15703_v13  ;;  %v3174_v1 = vmul.f32 0.2, %v2726_v28  ;;  %vm2956_vm0 = vcmp.gt.f32.partialorder %v2732_v25, 0.0  ;;  %v11991_v29 = vpop.f32.mrf.mxu1  ;;  %15704 = vst [vmem:[#allocation123_spill] sm:$0xff] %v11994_v7 }
 0x295   :  { %v3181_v42 = vmul.f32 0.2, %v2733_v33  ;;  %v3224_v18 = vmul.f32 0.2, %v11952_v37  ;;  %v3173_v63 = vmul.f32 0.2, %v2725_v21  ;;  %v1949_v55 = vadd.f32 %v11762_v20, %v15705_v60 }
 0x296   :  { %vm2950_vm1 = vcmp.gt.f32.partialorder %v2726_v28, 0.0  ;;  %v11999_v5 = vadd.f32 %v10809_v27, %v2164_v23  ;;  %v3025_v6 = vmul.f32 0.2, %v2577_v35  ;;  %vm2949_vm2 = vcmp.gt.f32.partialorder %v2725_v21, 0.0  ;;  %v15706_v48 = vld [vmem:[#allocation48_spill] sm:$0xff]  ;;  %v12003_v13 = vpop.f32.mrf.mxu1  ;;  %v15707_v40 = vld [vmem:[#allocation42_spill] sm:$0xff] }
 0x297   :  { %v1951_v58 = vadd.f32 %v11772_v0, %v15706_v48  ;;  %v3404_v45 = vsel %vm2956_vm0, %v2732_v25, %v3180_v62  ;;  %v1945_v54 = vadd.f32 %v11727_v59, %v15707_v40  ;;  %v15708_v7 = vld [vmem:[#allocation44_spill] sm:$0xff]  ;;  %vm2957_vm3 = vcmp.gt.f32.partialorder %v2733_v33, 0.0  ;;  %v15709_v60 = vld [vmem:[#allocation175_spill] sm:$0xff]  ;;  %v12014_v0 = vpop.f32.mrf.mxu0 }
 0x298   :  { %v1947_v15 = vadd.f32 %v11752_v16, %v15708_v7  ;;  %v2563_v20 = vadd.f32 %v15702_v8, %v2394_v11  ;;  %v2405_v27 = vadd.f32 %v11706_v19, %v15709_v60  ;;  %v3398_v23 = vsel %vm2950_vm1, %v2726_v28, %v3174_v1  ;;  %v12012_v51 = vpop.f32.mrf.mxu1  ;;  %15710 = vst [vmem:[#allocation223_spill] sm:$0xff] %v12014_v0  ;;  %v15711_v59 = vld [vmem:[#allocation91_spill] sm:$0xff]  ;;  %v15712_v16 = vld [vmem:[#allocation201_spill] sm:$0xff] }
 0x299   :  { %v3405_v50 = vsel %vm2957_vm3, %v2733_v33, %v3181_v42  ;;  %v3397_v48 = vsel %vm2949_vm2, %v2725_v21, %v3173_v63  ;;  %v2746_v25 = vadd.f32 %v10876_v12, %v1949_v55  ;;  %v3505_v40 = vpack.c.bf16 %v11636_v39, %v15711_v59  ;;  %v15716_v42 = vld [vmem:[#allocation176_spill] sm:$0xff]  ;;  %v12057_v63 = vpop.f32.mrf.mxu0  ;;  %v15726_v0 = vld [vmem:[#allocation25_spill] sm:$0xff] }
 0x29a   :  { %v3538_v62 = vpack.c.bf16 %v3405_v50, %v3398_v23  ;;  %vm2896_vm4 = vcmp.gt.f32.partialorder %v15712_v16, 0.0  ;;  %v12023_v11 = vsel %vm2986_vm13, %v11928_v4, %v3210_v36  ;;  %vm2801_vm5 = vcmp.gt.f32.partialorder %v2577_v35, 0.0  ;;  %v12026_v33 = vpop.f32.mrf.mxu1  ;;  %15718 = vst [vmem:[#allocation129_spill] sm:$0xff] %v12057_v63  ;;  %v15725_v63 = vld [vmem:[#allocation31_spill] sm:$0xff] }
 0x29b   :  { %v2747_v19 = vadd.f32 %v10880_v9, %v1951_v58  ;;  %v3537_v28 = vpack.c.bf16 %v3404_v45, %v3397_v48  ;;  %v12029_v21 = vmul.f32 0.2, %v11976_v49  ;;  %v12034_v39 = vsel %vm2993_vm14, %v11943_v31, %v3217_v24  ;;  %4544 = vmatprep.mubr.bf16.mxu1 %v3505_v40  ;;  %v15720_v48 = vld [vmem:[#allocation50_spill] sm:$0xff] }
 0x29c   :  { %15713 = vst [vmem:[#allocation125_spill] sm:$0xff] %v12034_v39  ;;  %v2739_v50 = vadd.f32 %v10876_v12, %v1945_v54  ;;  %v2740_v1 = vadd.f32 %v10880_v9, %v1947_v15  ;;  %4401 = vmatprep.mubr.bf16.mxu0 %v3538_v62  ;;  %v12039_v4 = vmul.f32 0.2, %v11986_v56  ;;  %v12044_v45 = vsel %vm3000_vm15, %v11952_v37, %v3224_v18  ;;  %v12051_v54 = vpop.f32.mrf.mxu1  ;;  %v15719_v37 = vld [vmem:[#allocation177_spill] sm:$0xff] }
 0x29d   :  { %15715 = vst [vmem:[#allocation233_spill] sm:$0xff] %v12044_v45  ;;  %v12047_v36 = vmul.f32 0.2, %v11999_v5  ;;  %v2397_v31 = vadd.f32 %v11736_v57, %v15716_v42  ;;  %4402 = vmatmul.mubr.bf16.gmra.mxu0 %v3537_v28  ;;  %v12054_v15 = vsel %vm2801_vm5, %v2577_v35, %v3025_v6  ;;  %v3011_v24 = vmul.f32 0.2, %v2563_v20  ;;  %v12072_v28 = vpop.f32.mrf.mxu0  ;;  %v15746_v39 = vld [vmem:[#allocation101_spill] sm:$0xff] }
 0x29e   :  { %15714 = vst [vmem:[#allocation226_spill] sm:$0xff] %v12039_v4  ;;  %15717 = vst [vmem:[#allocation230_spill] sm:$0xff] %v12054_v15  ;;  %v2584_v7 = vadd.f32 %v15702_v8, %v2405_v27  ;;  %v3194_v55 = vmul.f32 0.2, %v2746_v25  ;;  %vm2787_vm6 = vcmp.gt.f32.partialorder %v2563_v20, 0.0  ;;  %v2418_v18 = vadd.f32 %v11766_v44, %v15719_v37  ;;  %v12061_v60 = vpop.f32.mrf.mxu1  ;;  %v15721_v27 = vld [vmem:[#allocation54_spill] sm:$0xff] }
 0x29f   :  { %vm2970_vm7 = vcmp.gt.f32.partialorder %v2746_v25, 0.0  ;;  %v3195_v58 = vmul.f32 0.2, %v2747_v19  ;;  %v3187_v57 = vmul.f32 0.2, %v2739_v50  ;;  %v1955_v35 = vadd.f32 %v11782_v10, %v15720_v48  ;;  %15722 = vst [vmem:[#allocation228_spill] sm:$0xff] %v12072_v28 }
 0x2a0   :  { %v3188_v23 = vmul.f32 0.2, %v2740_v1  ;;  %vm2971_vm8 = vcmp.gt.f32.partialorder %v2747_v19, 0.0  ;;  %v2570_v6 = vadd.f32 %v15702_v8, %v2397_v31  ;;  %vm2963_vm9 = vcmp.gt.f32.partialorder %v2739_v50, 0.0  ;;  %v12068_v59 = vpop.f32.mrf.mxu1  ;;  %v15723_v37 = vld [vmem:[#allocation52_spill] sm:$0xff]  ;;  %v15747_v4 = vld [vmem:[#allocation45_spill] sm:$0xff] }
 0x2a1   :  { %vm2964_vm10 = vcmp.gt.f32.partialorder %v2740_v1, 0.0  ;;  %v1959_v62 = vadd.f32 %v11826_v17, %v15721_v27  ;;  %v12070_v44 = vsel %vm2787_vm6, %v2563_v20, %v3011_v24  ;;  %vm2808_vm11 = vcmp.gt.f32.partialorder %v2584_v7, 0.0  ;;  %v15724_v48 = vld [vmem:[#allocation56_spill] sm:$0xff] }
 0x2a2   :  { %v3032_v40 = vmul.f32 0.2, %v2584_v7  ;;  %v3418_v42 = vsel %vm2970_vm7, %v2746_v25, %v3194_v55  ;;  %v1957_v10 = vadd.f32 %v11802_v30, %v15723_v37  ;;  %v1961_v31 = vadd.f32 %v11843_v26, %v15724_v48  ;;  %v12081_v27 = vpop.f32.mrf.mxu1  ;;  %v15727_v30 = vld [vmem:[#allocation58_spill] sm:$0xff] }
 0x2a3   :  { %v3419_v15 = vsel %vm2971_vm8, %v2747_v19, %v3195_v58  ;;  %v3504_v17 = vpack.c.bf16 %v15726_v0, %v15725_v63  ;;  %v12084_v20 = vadd.f32 %v15702_v8, %v2418_v18  ;;  %v3411_v24 = vsel %vm2963_vm9, %v2739_v50, %v3187_v57  ;;  %v15728_v19 = vld [vmem:[#allocation95_spill] sm:$0xff]  ;;  %v12095_v63 = vpop.f32.mrf.mxu0  ;;  %v15731_v58 = vld [vmem:[#allocation97_spill] sm:$0xff] }
 0x2a4   :  { %v2753_v28 = vadd.f32 %v10876_v12, %v1955_v35  ;;  %v3412_v25 = vsel %vm2964_vm10, %v2740_v1, %v3188_v23  ;;  %v2760_v55 = vadd.f32 %v10876_v12, %v1959_v62  ;;  %v1965_v37 = vadd.f32 %v11851_v14, %v15727_v30  ;;  %v12092_v0 = vpop.f32.mrf.mxu1  ;;  %15729 = vst [vmem:[#allocation11_spill] sm:$0xff] %v12095_v63  ;;  %v15730_v18 = vld [vmem:[#allocation35_spill] sm:$0xff]  ;;  %v15732_v14 = vld [vmem:[#allocation60_spill] sm:$0xff] }
 0x2a5   :  { %v3545_v26 = vpack.c.bf16 %v3419_v15, %v3412_v25  ;;  %4545 = vmatmul.mubr.bf16.gmra.mxu1 %v3504_v17  ;;  %vm2903_vm12 = vcmp.gt.f32.partialorder %v11559_v43, 0.0  ;;  %vm2910_vm13 = vcmp.gt.f32.partialorder %v15728_v19, 0.0  ;;  %v3544_v50 = vpack.c.bf16 %v3418_v42, %v3411_v24  ;;  %v15733_v42 = vld [vmem:[#allocation178_spill] sm:$0xff]  ;;  %v15735_v25 = vld [vmem:[#allocation64_spill] sm:$0xff] }
 0x2a6   :  { %v3344_v1 = vsel %vm2896_vm4, %v15712_v16, %v15730_v18  ;;  %v3351_v57 = vsel %vm2903_vm12, %v11559_v43, %v15731_v58  ;;  %v1967_v15 = vadd.f32 %v11865_v52, %v15732_v14  ;;  %v3018_v23 = vmul.f32 0.2, %v2570_v6  ;;  %v12107_v17 = vpop.f32.mrf.mxu1  ;;  %v15734_v16 = vld [vmem:[#allocation62_spill] sm:$0xff] }
 0x2a7   :  { %v2754_v35 = vadd.f32 %v10880_v9, %v1957_v10  ;;  %v2761_v62 = vadd.f32 %v10880_v9, %v1961_v31  ;;  %4411 = vmatprep.mubr.bf16.mxu0 %v3545_v26  ;;  %v3512_v48 = vpack.c.bf16 %v3351_v57, %v3344_v1  ;;  %vm2794_vm14 = vcmp.gt.f32.partialorder %v2570_v6, 0.0  ;;  %v15738_v1 = vld [vmem:[#allocation199_spill] sm:$0xff] }
 0x2a8   :  { %v2410_v24 = vadd.f32 %v11793_v32, %v15733_v42  ;;  %4412 = vmatmul.mubr.bf16.gmra.mxu0 %v3544_v50  ;;  %v1969_v43 = vadd.f32 %v11875_v34, %v15734_v16  ;;  %v1971_v52 = vadd.f32 %v11895_v3, %v15735_v25  ;;  %v12116_v30 = vsel %vm2808_vm11, %v2584_v7, %v3032_v40  ;;  %v12121_v18 = vpop.f32.mrf.mxu1  ;;  %v12126_v50 = vpop.f32.mrf.mxu0  ;;  %v15739_v42 = vld [vmem:[#allocation47_spill] sm:$0xff] }
 0x2a9   :  { %15736 = vst [vmem:[#allocation10_spill] sm:$0xff] %v12116_v30  ;;  %v3201_v10 = vmul.f32 0.2, %v2753_v28  ;;  %v3208_v31 = vmul.f32 0.2, %v2760_v55  ;;  %v12119_v26 = vadd.f32 %v10876_v12, %v1965_v37  ;;  %4554 = vmatprep.mubr.bf16.mxu1 %v3512_v48  ;;  %15737 = vst [vmem:[#allocation12_spill] sm:$0xff] %v12126_v50  ;;  %v2768_v34 = vadd.f32 %v10880_v9, %v1967_v15 }
 0x2aa   :  { %v12124_v32 = vmul.f32 0.2, %v12084_v20  ;;  %vm2977_vm15 = vcmp.gt.f32.partialorder %v2753_v28, 0.0  ;;  %vm2984_vm0 = vcmp.gt.f32.partialorder %v2760_v55, 0.0  ;;  %v12130_v3 = vsel %vm2794_vm14, %v2570_v6, %v3018_v23  ;;  %v12133_v58 = vpop.f32.mrf.mxu1  ;;  %v12144_v23 = vpop.f32.mrf.mxu0  ;;  %v15741_v37 = vld [vmem:[#allocation65_spill] sm:$0xff] }
 0x2ab   :  { %v3202_v7 = vmul.f32 0.2, %v2754_v35  ;;  %v3209_v40 = vmul.f32 0.2, %v2761_v62  ;;  %v12136_v57 = vadd.f32 %v15702_v8, %v2410_v24  ;;  %vm2978_vm1 = vcmp.gt.f32.partialorder %v2754_v35, 0.0  ;;  %15740 = vst [vmem:[#allocation9_spill] sm:$0xff] %v12144_v23 }
 0x2ac   :  { %v2774_v14 = vadd.f32 %v10876_v12, %v1969_v43  ;;  %v2775_v48 = vadd.f32 %v10880_v9, %v1971_v52  ;;  %vm2924_vm2 = vcmp.gt.f32.partialorder %v15739_v42, 0.0  ;;  %v3425_v15 = vsel %vm2977_vm15, %v2753_v28, %v3201_v10  ;;  %v12142_v6 = vpop.f32.mrf.mxu1  ;;  %v9518_v9 = vld [vmem:[%s15216_s4] sm:$0xff]  ;;  %v15743_v10 = vld [vmem:[#allocation39_spill] sm:$0xff] }
 0x2ad   :  { %v3432_v16 = vsel %vm2984_vm0, %v2760_v55, %v3208_v31  ;;  %vm2991_vm3 = vcmp.gt.f32.partialorder %v12119_v26, 0.0  ;;  %vm2985_vm4 = vcmp.gt.f32.partialorder %v2761_v62, 0.0  ;;  %v3215_v25 = vmul.f32 0.2, %v12119_v26  ;;  %v15744_v31 = vld [vmem:[#allocation207_spill] sm:$0xff] }
 0x2ae   :  { %vm2992_vm5 = vcmp.gt.f32.partialorder %v2768_v34, 0.0  ;;  %v3216_v24 = vmul.f32 0.2, %v2768_v34  ;;  %v2201_v12 = vadd.f32 %v11912_v53, %v15741_v37  ;;  %v15742_v28 = vsub.s32 4, %v15738_v1  ;;  %v12159_v63 = vpop.f32.mrf.mxu1  ;;  %v15745_v53 = vld [vmem:[#allocation205_spill] sm:$0xff] }
 0x2af   :  { %v3426_v43 = vsel %vm2978_vm1, %v2754_v35, %v3202_v7  ;;  %v3433_v52 = vsel %vm2985_vm4, %v2761_v62, %v3209_v40  ;;  %v3511_v23 = vpack.c.bf16 %v15744_v31, %v15743_v10  ;;  %v3222_v50 = vmul.f32 0.2, %v2774_v14  ;;  %v15748_v62 = vld [vmem:[#allocation66_spill] sm:$0xff]  ;;  %v12172_v10 = vpop.f32.mrf.mxu0 }
 0x2b0   :  { %v12154_v55 = vrot.slane %v9518_v9, %v15742_v28  ;;  %v3223_v30 = vmul.f32 0.2, %v2775_v48  ;;  %v3552_v45 = vpack.c.bf16 %v3433_v52, %v3426_v43  ;;  %vm2917_vm6 = vcmp.gt.f32.partialorder %v15745_v53, 0.0  ;;  %v12170_v40 = vpop.f32.mrf.mxu1  ;;  %15749 = vst [vmem:[#allocation127_spill] sm:$0xff] %v12172_v10  ;;  %v15751_v52 = vld [vmem:[#allocation68_spill] sm:$0xff] }
 0x2b1   :  { %4555 = vmatmul.mubr.bf16.gmra.mxu1 %v3511_v23  ;;  %v3551_v37 = vpack.c.bf16 %v3432_v16, %v3425_v15  ;;  %v3358_v28 = vsel %vm2910_vm13, %v15728_v19, %v15746_v39  ;;  %v3365_v35 = vsel %vm2917_vm6, %v15745_v53, %v15747_v4  ;;  %v2203_v7 = vadd.f32 %v11921_v2, %v15748_v62  ;;  %v15750_v15 = vld [vmem:[#allocation67_spill] sm:$0xff] }
 0x2b2   :  { %4421 = vmatprep.mubr.bf16.mxu0 %v3552_v45  ;;  %v3519_v43 = vpack.c.bf16 %v3365_v35, %v3358_v28  ;;  %v15262_v23 = vsub.s32 5, %v15738_v1  ;;  %v2205_v16 = vadd.f32 %v11934_v47, %v15750_v15  ;;  %v2207_v39 = vadd.f32 %v11947_v46, %v15751_v52  ;;  %v15752_v19 = vld [vmem:[#allocation179_spill] sm:$0xff]  ;;  %v12184_v31 = vpop.f32.mrf.mxu1  ;;  %v15753_v45 = vld [vmem:[#allocation180_spill] sm:$0xff] }
 0x2b3   :  { %v12181_v4 = vadd.f32 %v11836_v41, %v15752_v19  ;;  %vm2998_vm7 = vcmp.gt.f32.partialorder %v2774_v14, 0.0  ;;  %v2561_v2 = vadd.f32 %v12154_v55, %v2201_v12  ;;  %4422 = vmatmul.mubr.bf16.gmra.mxu0 %v3551_v37  ;;  %vm2999_vm8 = vcmp.gt.f32.partialorder %v2775_v48, 0.0  ;;  %v15754_v53 = vld [vmem:[#allocation111_spill] sm:$0xff]  ;;  %v15755_v37 = vld [vmem:[#allocation69_spill] sm:$0xff]  ;;  %v15756_v15 = vld [vmem:[#allocation212_spill] sm:$0xff] }
 0x2b4   :  { %vm2938_vm9 = vcmp.gt.f32.partialorder %v11755_v38, 0.0  ;;  %v12189_v28 = vadd.f32 %v15754_v53, %v15753_v45  ;;  %4564 = vmatprep.mubr.bf16.mxu1 %v3519_v43  ;;  %v12193_v47 = vrot.slane %v9518_v9, %v15262_v23  ;;  %v3440_v41 = vsel %vm2992_vm5, %v2768_v34, %v3216_v24  ;;  %v12202_v52 = vpop.f32.mrf.mxu1  ;;  %v12204_v43 = vpop.f32.mrf.mxu0  ;;  %v15760_v24 = vld [vmem:[#allocation53_spill] sm:$0xff]  ;;  %v15765_v1 = vld [vmem:[#allocation72_spill] sm:$0xff] }
 0x2b5   :  { %v3447_v46 = vsel %vm2999_vm8, %v2775_v48, %v3223_v30  ;;  %v3439_v12 = vsel %vm2991_vm3, %v12119_v26, %v3215_v25  ;;  %v2211_v35 = vadd.f32 %v11965_v61, %v15755_v37  ;;  %vm2931_vm10 = vcmp.gt.f32.partialorder %v15756_v15, 0.0  ;;  %15757 = vst [vmem:[#allocation227_spill] sm:$0xff] %v12204_v43  ;;  %v15758_v48 = vld [vmem:[#allocation99_spill] sm:$0xff]  ;;  %v15759_v61 = vld [vmem:[#allocation210_spill] sm:$0xff] }
 0x2b6   :  { %v3559_v62 = vpack.c.bf16 %v3447_v46, %v3440_v41  ;;  %v3446_v9 = vsel %vm2998_vm7, %v2774_v14, %v3222_v50  ;;  %v2562_v19 = vadd.f32 %v12193_v47, %v2203_v7  ;;  %v2568_v30 = vadd.f32 %v12154_v55, %v2205_v16  ;;  %v12214_v53 = vpop.f32.mrf.mxu1  ;;  %v15761_v14 = vld [vmem:[#allocation41_spill] sm:$0xff]  ;;  %v15762_v37 = vld [vmem:[#allocation70_spill] sm:$0xff] }
 0x2b7   :  { %v2569_v34 = vadd.f32 %v12193_v47, %v2207_v39  ;;  %vm2785_vm11 = vcmp.gt.f32.partialorder %v2561_v2, 0.0  ;;  %v3009_v26 = vmul.f32 0.2, %v2561_v2  ;;  %v3518_v25 = vpack.c.bf16 %v15759_v61, %v15758_v48 }
 0x2b8   :  { %4431 = vmatprep.mubr.bf16.mxu0 %v3559_v62  ;;  %v3379_v45 = vsel %vm2931_vm10, %v15756_v15, %v15760_v24  ;;  %vm2786_vm12 = vcmp.gt.f32.partialorder %v2562_v19, 0.0  ;;  %v3010_v41 = vmul.f32 0.2, %v2562_v19  ;;  %v3372_v7 = vsel %vm2924_vm2, %v15739_v42, %v15761_v14  ;;  %v12223_v48 = vpop.f32.mrf.mxu1  ;;  %v12225_v15 = vpop.f32.mrf.mxu0  ;;  %v15764_v24 = vld [vmem:[#allocation71_spill] sm:$0xff]  ;;  %v15766_v42 = vld [vmem:[#allocation73_spill] sm:$0xff] }
 0x2b9   :  { %v3017_v50 = vmul.f32 0.2, %v2569_v34  ;;  %v2575_v16 = vadd.f32 %v12154_v55, %v2211_v35  ;;  %4565 = vmatmul.mubr.bf16.gmra.mxu1 %v3518_v25  ;;  %v3558_v39 = vpack.c.bf16 %v3446_v9, %v3439_v12  ;;  %v3526_v46 = vpack.c.bf16 %v3379_v45, %v3372_v7  ;;  %15763 = vst [vmem:[#allocation131_spill] sm:$0xff] %v12225_v15  ;;  %v15767_v25 = vld [vmem:[#allocation109_spill] sm:$0xff] }
 0x2ba   :  { %v2213_v62 = vadd.f32 %v11982_v22, %v15762_v37  ;;  %v3016_v61 = vmul.f32 0.2, %v2568_v30  ;;  %v2215_v23 = vadd.f32 %v11991_v29, %v15764_v24  ;;  %v2217_v43 = vadd.f32 %v12003_v13, %v15765_v1  ;;  %v12235_v9 = vpop.f32.mrf.mxu1  ;;  %v9068_v29 = vld [vmem:[%s15219_s7 + $0x74] ss:$8 sps:$4 sm:$0xff]   ;;  %v15768_v45 = vld [vmem:[#allocation105_spill] sm:$0xff] }
 0x2bb   :  { %v2221_v35 = vadd.f32 %v12012_v51, %v15766_v42  ;;  %vm2792_vm13 = vcmp.gt.f32.partialorder %v2568_v30, 0.0  ;;  %4432 = vmatmul.mubr.bf16.gmra.mxu0 %v3558_v39  ;;  %4574 = vmatprep.mubr.bf16.mxu1 %v3526_v46  ;;  %vm2793_vm14 = vcmp.gt.f32.partialorder %v2569_v34, 0.0  ;;  %v3234_v22 = vsel %vm2786_vm12, %v2562_v19, %v3010_v41  ;;  %v12250_v39 = vpop.f32.mrf.mxu0  ;;  %v15772_v24 = vld [vmem:[#allocation55_spill] sm:$0xff] }
 0x2bc   :  { %v2576_v12 = vadd.f32 %v12193_v47, %v2213_v62  ;;  %vm2952_vm15 = vcmp.gt.f32.partialorder %v15767_v25, 0.0  ;;  %v2582_v13 = vadd.f32 %v12154_v55, %v2215_v23  ;;  %v2583_v51 = vadd.f32 %v12193_v47, %v2217_v43  ;;  %v12248_v7 = vpop.f32.mrf.mxu1  ;;  %5449 = vmatprep.subr.bf16.mxu0 %v9068_v29  ;;  %15769 = vst [vmem:[#allocation229_spill] sm:$0xff] %v12250_v39  ;;  %v15775_v39 = vld [vmem:[#allocation76_spill] sm:$0xff] }
 0x2bd   :  { %v3241_v1 = vsel %vm2793_vm14, %v2569_v34, %v3017_v50  ;;  %vm2945_vm0 = vcmp.gt.f32.partialorder %v15768_v45, 0.0  ;;  %v12245_v14 = vmul.f32 0.2, %v12136_v57  ;;  %v3233_v19 = vsel %vm2785_vm11, %v2561_v2, %v3009_v26  ;;  %v15770_v34 = vld [vmem:[#allocation43_spill] sm:$0xff] }
 0x2be   :  { %vm2799_vm1 = vcmp.gt.f32.partialorder %v2575_v16, 0.0  ;;  %v3458_v41 = vpack.c.bf16 %v3241_v1, %v3234_v22  ;;  %v3240_v46 = vsel %vm2792_vm13, %v2568_v30, %v3016_v61  ;;  %v3023_v23 = vmul.f32 0.2, %v2575_v16  ;;  %v15771_v50 = vld [vmem:[#allocation103_spill] sm:$0xff]  ;;  %v15774_v22 = vld [vmem:[#allocation74_spill] sm:$0xff]  ;;  %v12266_v61 = vpop.f32.mrf.mxu1 }
 0x2bf   :  { %v12254_v43 = vadd.f32 %v12154_v55, %v2221_v35  ;;  %v3525_v37 = vpack.c.bf16 %v15771_v50, %v15770_v34  ;;  %v3024_v62 = vmul.f32 0.2, %v2576_v12  ;;  %v3386_v2 = vsel %vm2938_vm9, %v11755_v38, %v15772_v24  ;;  %v15773_v26 = vld [vmem:[#allocation107_spill] sm:$0xff]  ;;  %v12280_v24 = vpop.f32.mrf.mxu0 }
 0x2c0   :  { %4667 = vmatprep.mubr.bf16.mxu0 %v3458_v41  ;;  %v3393_v42 = vsel %vm2945_vm0, %v15768_v45, %v15773_v26  ;;  %v2223_v30 = vadd.f32 %v12026_v33, %v15774_v22  ;;  %v3030_v35 = vmul.f32 0.2, %v2582_v13  ;;  %v3031_v29 = vmul.f32 0.2, %v2583_v51  ;;  %v9066_v41 = vld [vmem:[%s15219_s7 + $0x70] ss:$8 sps:$4 sm:$0xff]   ;;  %v12274_v45 = vpop.f32.mrf.mxu1 }
 0x2c1   :  { %v3533_v1 = vpack.c.bf16 %v3393_v42, %v3386_v2  ;;  %v2227_v34 = vadd.f32 %v12061_v60, %v15775_v39  ;;  %v3457_v50 = vpack.c.bf16 %v3240_v46, %v3233_v19  ;;  %vm2800_vm2 = vcmp.gt.f32.partialorder %v2576_v12, 0.0  ;;  %4575 = vmatmul.mubr.bf16.gmra.mxu1 %v3525_v37  ;;  %15776 = vst [vmem:[#allocation133_spill] sm:$0xff] %v12280_v24  ;;  %v15777_v60 = vld [vmem:[#allocation75_spill] sm:$0xff]  ;;  %v9071_v19 = vld [vmem:[%s15219_s7 + $0x64] ss:$8 sps:$4 sm:$0xff]  }
 0x2c2   :  { %vm2806_vm3 = vcmp.gt.f32.partialorder %v2582_v13, 0.0  ;;  %v2590_v38 = vadd.f32 %v12193_v47, %v2223_v30  ;;  %v12278_v33 = vadd.f32 %v15702_v8, %v12181_v4  ;;  %v2225_v39 = vadd.f32 %v12051_v54, %v15777_v60  ;;  %v15778_v37 = vld [vmem:[#allocation181_spill] sm:$0xff]  ;;  %v15779_v4 = vld [vmem:[#allocation115_spill] sm:$0xff]  ;;  %v12296_v54 = vpop.f32.mrf.mxu1 }
 0x2c3   :  { %4584 = vmatprep.mubr.bf16.mxu1 %v3533_v1  ;;  %v2597_v2 = vadd.f32 %v12193_v47, %v2227_v34  ;;  %vm2807_vm4 = vcmp.gt.f32.partialorder %v2583_v51, 0.0  ;;  %v12290_v46 = vadd.f32 %v15702_v8, %v12189_v28  ;;  %v2434_v26 = vadd.f32 %v15779_v4, %v15778_v37  ;;  %4668 = vmatmul.mubr.bf16.vlgmr.msra.gmra.mxu0 %v3457_v50  ;;  %v15780_v22 = vld [vmem:[#allocation113_spill] sm:$0xff]  ;;  %v15782_v4 = vld [vmem:[#allocation216_spill] sm:$0xff] }
 0x2c4   :  { %v3247_v42 = vsel %vm2799_vm1, %v2575_v16, %v3023_v23  ;;  %vm2813_vm5 = vcmp.gt.f32.partialorder %v12254_v43, 0.0  ;;  %vm2966_vm6 = vcmp.gt.f32.partialorder %v15780_v22, 0.0  ;;  %v3254_v30 = vsel %vm2806_vm3, %v2582_v13, %v3030_v35  ;;  %v15781_v1 = vld [vmem:[#allocation77_spill] sm:$0xff]  ;;  %5450 = vmatpush1.bf16.msra.mxu0 %v9066_v41  ;;  %v12307_v15 = vpop.f32.mrf.mxu1  ;;  %v12309_v13 = vpop.f32.mrf.mxu0  ;;  %v15786_v41 = vld [vmem:[#allocation51_spill] sm:$0xff] }
 0x2c5   :  { %v2231_v34 = vadd.f32 %v12068_v59, %v15781_v1  ;;  %v3248_v28 = vsel %vm2800_vm2, %v2576_v12, %v3024_v62  ;;  %v3255_v60 = vsel %vm2807_vm4, %v2583_v51, %v3031_v29  ;;  %v9069_v16 = vld [vmem:[%s15219_s7 + $0x60] ss:$8 sps:$4 sm:$0xff]   ;;  %v3038_v23 = vmul.f32 0.2, %v2590_v38  ;;  %5451 = vmatprep.subr.bf16.mxu0 %v9071_v19  ;;  %15783 = vst [vmem:[#allocation231_spill] sm:$0xff] %v12309_v13  ;;  %v15789_v13 = vld [vmem:[#allocation80_spill] sm:$0xff] }
 0x2c6   :  { %v3045_v37 = vmul.f32 0.2, %v2597_v2  ;;  %v3465_v50 = vpack.c.bf16 %v3255_v60, %v3248_v28  ;;  %vm2959_vm7 = vcmp.gt.f32.partialorder %v15782_v4, 0.0  ;;  %vm2814_vm8 = vcmp.gt.f32.partialorder %v2590_v38, 0.0  ;;  %v15784_v12 = vld [vmem:[#allocation61_spill] sm:$0xff]  ;;  %v15785_v62 = vld [vmem:[#allocation78_spill] sm:$0xff]  ;;  %v12325_v24 = vpop.f32.mrf.mxu1 }
 0x2c7   :  { %v2596_v59 = vadd.f32 %v12154_v55, %v2225_v39  ;;  %v3407_v51 = vsel %vm2959_vm7, %v15782_v4, %v15784_v12  ;;  %v2233_v35 = vadd.f32 %v12081_v27, %v15785_v62  ;;  %v3037_v29 = vmul.f32 0.2, %v12254_v43  ;;  %v15787_v1 = vld [vmem:[#allocation49_spill] sm:$0xff]  ;;  %v15790_v12 = vld [vmem:[#allocation79_spill] sm:$0xff] }
 0x2c8   :  { %v3532_v28 = vpack.c.bf16 %v15787_v1, %v15786_v41  ;;  %4677 = vmatprep.mubr.bf16.mxu0 %v3465_v50  ;;  %v15788_v60 = vld [vmem:[#allocation117_spill] sm:$0xff]  ;;  %v2237_v39 = vadd.f32 %v12107_v17, %v15789_v13  ;;  %vm2829_vm9 = vcmp.gt.f32.partialorder %v12084_v20, 0.0  ;;  %vm2815_vm10 = vcmp.gt.f32.partialorder %v12136_v57, 0.0  ;;  %5452 = vmatpush1.bf16.msra.mxu0 %v9069_v16  ;;  %v12334_v41 = vpop.f32.mrf.mxu1  ;;  %v12336_v1 = vpop.f32.mrf.mxu0  ;;  %v15799_v16 = vld [vmem:[#allocation215_spill] sm:$0xff] }
 0x2c9   :  { %v3400_v19 = vsel %vm2952_vm15, %v15767_v25, %v15788_v60  ;;  %v3464_v4 = vpack.c.bf16 %v3254_v30, %v3247_v42  ;;  %v2235_v62 = vadd.f32 %v12092_v0, %v15790_v12  ;;  %vm2821_vm11 = vcmp.gt.f32.partialorder %v2597_v2, 0.0  ;;  %15791 = vst [vmem:[#allocation137_spill] sm:$0xff] %v12334_v41  ;;  %15792 = vst [vmem:[#allocation235_spill] sm:$0xff] %v12336_v1  ;;  %v15793_v30 = vld [vmem:[#allocation219_spill] sm:$0xff] }
 0x2ca   :  { %v3540_v27 = vpack.c.bf16 %v3407_v51, %v3400_v19  ;;  %4585 = vmatmul.mubr.bf16.gmra.mxu1 %v3532_v28  ;;  %v2604_v50 = vadd.f32 %v12193_v47, %v2233_v35  ;;  %v2611_v25 = vadd.f32 %v12193_v47, %v2237_v39  ;;  %v3262_v17 = vsel %vm2814_vm8, %v2590_v38, %v3038_v23  ;;  %v15794_v23 = vld [vmem:[#allocation121_spill] sm:$0xff]  ;;  %v9074_v19 = vld [vmem:[%s15219_s7 + $0x54] ss:$8 sps:$4 sm:$0xff]  }
 0x2cb   :  { %v3269_v13 = vsel %vm2821_vm11, %v2597_v2, %v3045_v37  ;;  %v3044_v60 = vmul.f32 0.2, %v2596_v59  ;;  %v12339_v42 = vadd.f32 %v12154_v55, %v2231_v34  ;;  %vm2973_vm12 = vcmp.gt.f32.partialorder %v15793_v30, 0.0  ;;  %4678 = vmatmul.mubr.bf16.gmra.mxu0 %v3464_v4  ;;  %v12346_v2 = vpop.f32.mrf.mxu1  ;;  %v9072_v34 = vld [vmem:[%s15219_s7 + $0x50] ss:$8 sps:$4 sm:$0xff]   ;;  %v15795_v4 = vld [vmem:[#allocation57_spill] sm:$0xff]  ;;  %5453 = vmatprep.subr.bf16.mxu0 %v9074_v19 }
 0x2cc   :  { %4594 = vmatprep.mubr.bf16.mxu1 %v3540_v27  ;;  %v3472_v0 = vpack.c.bf16 %v3269_v13, %v3262_v17  ;;  %vm2836_vm13 = vcmp.gt.f32.partialorder %v12278_v33, 0.0  ;;  %v3060_v38 = vmul.f32 0.2, %v12278_v33  ;;  %vm2820_vm14 = vcmp.gt.f32.partialorder %v2596_v59, 0.0  ;;  %v15801_v1 = vld [vmem:[#allocation63_spill] sm:$0xff]  ;;  %5454 = vmatpush1.bf16.msra.mxu0 %v9072_v34 }
 0x2cd   :  { %vm2980_vm15 = vcmp.gt.f32.partialorder %v15794_v23, 0.0  ;;  %v12353_v37 = vmul.f32 0.2, %v12290_v46  ;;  %v12356_v51 = vadd.f32 %v15702_v8, %v2434_v26  ;;  %v3261_v35 = vsel %vm2813_vm5, %v12254_v43, %v3037_v29  ;;  %v15796_v26 = vld [vmem:[#allocation82_spill] sm:$0xff]  ;;  %v12371_v13 = vpop.f32.mrf.mxu1  ;;  %v12373_v43 = vpop.f32.mrf.mxu0 }
 0x2ce   :  { %v3059_v28 = vmul.f32 0.2, %v2611_v25  ;;  %4687 = vmatprep.mubr.bf16.mxu0 %v3472_v0  ;;  %v3052_v39 = vmul.f32 0.2, %v2604_v50  ;;  %v2610_v27 = vadd.f32 %v12154_v55, %v2235_v62  ;;  %v3421_v12 = vsel %vm2973_vm12, %v15793_v30, %v15795_v4  ;;  %15797 = vst [vmem:[#allocation15_spill] sm:$0xff] %v12373_v43  ;;  %v15798_v0 = vld [vmem:[#allocation84_spill] sm:$0xff] }
 0x2cf   :  { %v2243_v17 = vadd.f32 %v12133_v58, %v15796_v26  ;;  %v3268_v29 = vsel %vm2820_vm14, %v2596_v59, %v3044_v60  ;;  %vm2827_vm0 = vcmp.gt.f32.partialorder %v12339_v42, 0.0  ;;  %vm2828_vm1 = vcmp.gt.f32.partialorder %v2604_v50, 0.0  ;;  %v15800_v30 = vld [vmem:[#allocation220_spill] sm:$0xff]  ;;  %v12387_v59 = vpop.f32.mrf.mxu1  ;;  %v15802_v60 = vld [vmem:[#allocation81_spill] sm:$0xff] }
 0x2d0   :  { %v2247_v62 = vadd.f32 %v12159_v63, %v15798_v0  ;;  %vm2822_vm2 = vcmp.gt.f32.partialorder %v12290_v46, 0.0  ;;  %v3539_v4 = vpack.c.bf16 %v15800_v30, %v15799_v16  ;;  %v3414_v58 = vsel %vm2966_vm6, %v15780_v22, %v15801_v1  ;;  %v15803_v30 = vld [vmem:[#allocation83_spill] sm:$0xff] }
 0x2d1   :  { %v2618_v26 = vadd.f32 %v12193_v47, %v2243_v17  ;;  %vm2835_vm3 = vcmp.gt.f32.partialorder %v2611_v25, 0.0  ;;  %v2241_v63 = vadd.f32 %v12121_v18, %v15802_v60  ;;  %v3547_v19 = vpack.c.bf16 %v3421_v12, %v3414_v58  ;;  %v12395_v1 = vpop.f32.mrf.mxu1  ;;  %v12397_v17 = vpop.f32.mrf.mxu0  ;;  %v15808_v60 = vld [vmem:[#allocation17_spill] sm:$0xff] }
 0x2d2   :  { %v2625_v0 = vadd.f32 %v12193_v47, %v2247_v62  ;;  %v3283_v43 = vsel %vm2835_vm3, %v2611_v25, %v3059_v28  ;;  %vm2834_vm4 = vcmp.gt.f32.partialorder %v2610_v27, 0.0  ;;  %4595 = vmatmul.mubr.bf16.gmra.mxu1 %v3539_v4  ;;  %v3471_v16 = vpack.c.bf16 %v3268_v29, %v3261_v35  ;;  %15804 = vst [vmem:[#allocation14_spill] sm:$0xff] %v12397_v17 }
 0x2d3   :  { %v2245_v10 = vadd.f32 %v12142_v6, %v15803_v30  ;;  %v3276_v22 = vsel %vm2828_vm1, %v2604_v50, %v3052_v39  ;;  %v3058_v34 = vmul.f32 0.2, %v2610_v27  ;;  %4604 = vmatprep.mubr.bf16.mxu1 %v3547_v19  ;;  %vm2987_vm5 = vcmp.gt.f32.partialorder %v11976_v49, 0.0  ;;  %v12417_v28 = vpop.f32.mrf.mxu1  ;;  %v12442_v58 = vpop.f32.mrf.mxu0 }
 0x2d4   :  { %v3073_v41 = vmul.f32 0.2, %v2625_v0  ;;  %v3479_v18 = vpack.c.bf16 %v3283_v43, %v3276_v22  ;;  %v12404_v25 = vsel %vm2829_vm9, %v12084_v20, %v12124_v32  ;;  %v12410_v6 = vsel %vm2815_vm10, %v12136_v57, %v12245_v14  ;;  %4688 = vmatmul.mubr.bf16.gmra.mxu0 %v3471_v16  ;;  %v9075_v20 = vld [vmem:[%s15219_s7 + $0x40] ss:$8 sps:$4 sm:$0xff]   ;;  %v9077_v32 = vld [vmem:[%s15219_s7 + $0x44] ss:$8 sps:$4 sm:$0xff]  }
 0x2d5   :  { %v12415_v50 = vsel %vm2836_vm13, %v12278_v33, %v3060_v38  ;;  %v3066_v35 = vmul.f32 0.2, %v2618_v26  ;;  %vm2994_vm6 = vcmp.gt.f32.partialorder %v11986_v56, 0.0  ;;  %v3051_v57 = vmul.f32 0.2, %v12339_v42  ;;  %v15805_v33 = vld [vmem:[#allocation88_spill] sm:$0xff]  ;;  %v12437_v62 = vpop.f32.mrf.mxu1  ;;  %5455 = vmatprep.subr.bf16.mxu0 %v9077_v32 }
 0x2d6   :  { %v2617_v14 = vadd.f32 %v12154_v55, %v2241_v63  ;;  %vm2842_vm7 = vcmp.gt.f32.partialorder %v2618_v26, 0.0  ;;  %4697 = vmatprep.mubr.bf16.mxu0 %v3479_v18  ;;  %v2253_v38 = vadd.f32 %v12184_v31, %v15805_v33  ;;  %v2624_v39 = vadd.f32 %v12154_v55, %v2245_v10  ;;  %v15806_v43 = vld [vmem:[#allocation92_spill] sm:$0xff]  ;;  %v15807_v10 = vld [vmem:[#allocation59_spill] sm:$0xff]  ;;  %5456 = vmatpush1.bf16.msra.mxu0 %v9075_v20  ;;  %v15810_v18 = vld [vmem:[#allocation182_spill] sm:$0xff] }
 0x2d7   :  { %v3435_v12 = vsel %vm2987_vm5, %v11976_v49, %v12029_v21  ;;  %v2257_v29 = vadd.f32 %v12214_v53, %v15806_v43  ;;  %vm2849_vm8 = vcmp.gt.f32.partialorder %v2625_v0, 0.0  ;;  %v12440_v4 = vmul.f32 0.2, %v12356_v51  ;;  %v15809_v49 = vld [vmem:[#allocation119_spill] sm:$0xff]  ;;  %v12454_v22 = vpop.f32.mrf.mxu1 }
 0x2d8   :  { %v3282_v31 = vsel %vm2834_vm4, %v2610_v27, %v3058_v34  ;;  %v3546_v63 = vpack.c.bf16 %v15808_v60, %v15807_v10  ;;  %v3297_v19 = vsel %vm2849_vm8, %v2625_v0, %v3073_v41  ;;  %v3428_v21 = vsel %vm2980_vm15, %v15794_v23, %v15809_v49  ;;  %v15811_v27 = vld [vmem:[#allocation224_spill] sm:$0xff] }
 0x2d9   :  { %v2632_v53 = vadd.f32 %v12193_v47, %v2253_v38  ;;  %v2639_v16 = vadd.f32 %v12193_v47, %v2257_v29  ;;  %v3290_v30 = vsel %vm2842_vm7, %v2618_v26, %v3066_v35  ;;  %v2426_v34 = vadd.f32 %v15811_v27, %v15810_v18  ;;  %v12461_v43 = vpop.f32.mrf.mxu1  ;;  %v12469_v35 = vpop.f32.mrf.mxu0  ;;  %v9080_v29 = vld [vmem:[%s15219_s7 + $0x34] ss:$8 sps:$4 sm:$0xff]  }
 0x2da   :  { %v3275_v41 = vsel %vm2827_vm0, %v12339_v42, %v3051_v57  ;;  %v3554_v0 = vpack.c.bf16 %v3435_v12, %v3428_v21  ;;  %v3486_v20 = vpack.c.bf16 %v3297_v19, %v3290_v30  ;;  %v3065_v32 = vmul.f32 0.2, %v2617_v14  ;;  %4605 = vmatmul.mubr.bf16.gmra.mxu1 %v3546_v63  ;;  %15812 = vst [vmem:[#allocation16_spill] sm:$0xff] %v12469_v35  ;;  %v15813_v42 = vld [vmem:[#allocation90_spill] sm:$0xff]  ;;  %v9078_v12 = vld [vmem:[%s15219_s7 + $0x30] ss:$8 sps:$4 sm:$0xff]  }
 0x2db   :  { %v3072_v33 = vmul.f32 0.2, %v2624_v39  ;;  %v3478_v23 = vpack.c.bf16 %v3282_v31, %v3275_v41  ;;  %v3087_v38 = vmul.f32 0.2, %v2639_v16  ;;  %v12467_v26 = vsel %vm2822_vm2, %v12290_v46, %v12353_v37  ;;  %v15814_v37 = vld [vmem:[#allocation96_spill] sm:$0xff]  ;;  %v12485_v60 = vpop.f32.mrf.mxu1  ;;  %v15816_v63 = vld [vmem:[#allocation183_spill] sm:$0xff]  ;;  %5457 = vmatprep.subr.bf16.mxu0 %v9080_v29 }
 0x2dc   :  { %vm2841_vm9 = vcmp.gt.f32.partialorder %v2617_v14, 0.0  ;;  %4614 = vmatprep.mubr.bf16.mxu1 %v3554_v0  ;;  %v2255_v57 = vadd.f32 %v12202_v52, %v15813_v42  ;;  %vm3001_vm10 = vcmp.gt.f32.partialorder %v11999_v5, 0.0  ;;  %vm2857_vm11 = vcmp.gt.f32.partialorder %v12356_v51, 0.0  ;;  %v15815_v10 = vld [vmem:[#allocation100_spill] sm:$0xff]  ;;  %v15817_v19 = vld [vmem:[#allocation222_spill] sm:$0xff]  ;;  %5458 = vmatpush1.bf16.msra.mxu0 %v9078_v12 }
 0x2dd   :  { %vm2848_vm12 = vcmp.gt.f32.partialorder %v2624_v39, 0.0  ;;  %4698 = vmatmul.mubr.bf16.gmra.mxu0 %v3478_v23  ;;  %v3080_v46 = vmul.f32 0.2, %v2632_v53  ;;  %v2263_v31 = vadd.f32 %v12235_v9, %v15814_v37  ;;  %v2267_v52 = vadd.f32 %v12266_v61, %v15815_v10  ;;  %v15818_v21 = vld [vmem:[#allocation86_spill] sm:$0xff]  ;;  %v12499_v41 = vpop.f32.mrf.mxu1  ;;  %v15819_v0 = vld [vmem:[#allocation184_spill] sm:$0xff] }
 0x2de   :  { %v2437_v49 = vadd.f32 %v15817_v19, %v15816_v63  ;;  %v2251_v30 = vadd.f32 %v12170_v40, %v15818_v21  ;;  %vm2856_vm13 = vcmp.gt.f32.partialorder %v2632_v53, 0.0  ;;  %4707 = vmatprep.mubr.bf16.mxu0 %v3486_v20  ;;  %vm2863_vm14 = vcmp.gt.f32.partialorder %v2639_v16, 0.0  ;;  %v15820_v40 = vld [vmem:[#allocation221_spill] sm:$0xff]  ;;  %v12503_v20 = vpop.f32.mrf.mxu0  ;;  %v15821_v37 = vld [vmem:[#allocation232_spill] sm:$0xff] }
 0x2df   :  { %v12492_v18 = vadd.f32 %v15702_v8, %v2426_v34  ;;  %v3449_v9 = vsel %vm3001_vm10, %v11999_v5, %v12047_v36  ;;  %v2653_v61 = vadd.f32 %v12193_v47, %v2267_v52  ;;  %v3311_v27 = vsel %vm2863_vm14, %v2639_v16, %v3087_v38  ;;  %v15822_v36 = vld [vmem:[#allocation226_spill] sm:$0xff]  ;;  %v12516_v10 = vpop.f32.mrf.mxu1 }
 0x2e0   :  { %v2429_v23 = vadd.f32 %v15820_v40, %v15819_v0  ;;  %v3289_v42 = vsel %vm2841_vm9, %v2617_v14, %v3065_v32  ;;  %v3296_v34 = vsel %vm2848_vm12, %v2624_v39, %v3072_v33  ;;  %v2638_v29 = vadd.f32 %v12154_v55, %v2255_v57  ;;  %v15823_v39 = vld [vmem:[#allocation98_spill] sm:$0xff] }
 0x2e1   :  { %v3553_v5 = vpack.c.bf16 %v12023_v11, %v15821_v37  ;;  %v3442_v16 = vsel %vm2994_vm6, %v11986_v56, %v15822_v36  ;;  %v2646_v38 = vadd.f32 %v12193_v47, %v2263_v31  ;;  %v3304_v12 = vsel %vm2856_vm13, %v2632_v53, %v3080_v46  ;;  %v15824_v56 = vld [vmem:[#allocation108_spill] sm:$0xff]  ;;  %v12526_v19 = vpop.f32.mrf.mxu1  ;;  %v12530_v46 = vpop.f32.mrf.mxu0  ;;  %v15829_v36 = vld [vmem:[#allocation185_spill] sm:$0xff] }
 0x2e2   :  { %v2631_v14 = vadd.f32 %v12154_v55, %v2251_v30  ;;  %v3561_v32 = vpack.c.bf16 %v3449_v9, %v3442_v16  ;;  %v2265_v33 = vadd.f32 %v12248_v7, %v15823_v39  ;;  %v3493_v57 = vpack.c.bf16 %v3311_v27, %v3304_v12  ;;  %15825 = vst [vmem:[#allocation141_spill] sm:$0xff] %v12530_v46  ;;  %v15826_v7 = vld [vmem:[#allocation94_spill] sm:$0xff]  ;;  %v15827_v9 = vld [vmem:[#allocation104_spill] sm:$0xff]  ;;  %v15830_v16 = vld [vmem:[#allocation123_spill] sm:$0xff] }
 0x2e3   :  { %v12522_v11 = vadd.f32 %v15702_v8, %v2437_v49  ;;  %4615 = vmatmul.mubr.bf16.gmra.mxu1 %v3553_v5  ;;  %v3485_v52 = vpack.c.bf16 %v3296_v34, %v3289_v42  ;;  %v3101_v63 = vmul.f32 0.2, %v2653_v61  ;;  %v2277_v31 = vadd.f32 %v12325_v24, %v15824_v56  ;;  %v12536_v27 = vpop.f32.mrf.mxu1  ;;  %v12540_v34 = vpop.f32.mrf.mxu0 }
 0x2e4   :  { %vm2843_vm15 = vcmp.gt.f32.partialorder %v12492_v18, 0.0  ;;  %v3067_v53 = vmul.f32 0.2, %v12492_v18  ;;  %v3086_v21 = vmul.f32 0.2, %v2638_v29  ;;  %4624 = vmatprep.mubr.bf16.mxu1 %v3561_v32  ;;  %vm2877_vm0 = vcmp.gt.f32.partialorder %v2653_v61, 0.0 }
 0x2e5   :  { %vm2862_vm1 = vcmp.gt.f32.partialorder %v2638_v29, 0.0  ;;  %v2261_v49 = vadd.f32 %v12223_v48, %v15826_v7  ;;  %4708 = vmatmul.mubr.bf16.gmra.mxu0 %v3485_v52  ;;  %v3094_v30 = vmul.f32 0.2, %v2646_v38  ;;  %v2273_v24 = vadd.f32 %v12296_v54, %v15827_v9  ;;  %v12545_v5 = vpop.f32.mrf.mxu1  ;;  %v12557_v39 = vpop.f32.mrf.mxu0 }
 0x2e6   :  { %v2626_v0 = vadd.f32 %v15702_v8, %v2429_v23  ;;  %v3079_v40 = vmul.f32 0.2, %v2631_v14  ;;  %vm2870_vm2 = vcmp.gt.f32.partialorder %v2646_v38, 0.0  ;;  %v2652_v42 = vadd.f32 %v12154_v55, %v2265_v33  ;;  %4717 = vmatprep.mubr.bf16.mxu0 %v3493_v57  ;;  %v9083_v33 = vld [vmem:[%s15219_s7 + $0x24] ss:$8 sps:$4 sm:$0xff]  }
 0x2e7   :  { %vm2864_vm3 = vcmp.gt.f32.partialorder %v12522_v11, 0.0  ;;  %vm2855_vm4 = vcmp.gt.f32.partialorder %v2631_v14, 0.0  ;;  %v2667_v48 = vadd.f32 %v12193_v47, %v2277_v31  ;;  %v3325_v37 = vsel %vm2877_vm0, %v2653_v61, %v3101_v63  ;;  %v9081_v61 = vld [vmem:[%s15219_s7 + $0x20] ss:$8 sps:$4 sm:$0xff]   ;;  %v12573_v9 = vpop.f32.mrf.mxu0  ;;  %5459 = vmatprep.subr.bf16.mxu0 %v9083_v33 }
 0x2e8   :  { %v12551_v54 = vsel %vm2857_vm11, %v12356_v51, %v12440_v4  ;;  %v3088_v23 = vmul.f32 0.2, %v12522_v11  ;;  %v2450_v12 = vadd.f32 %v15830_v16, %v15829_v36  ;;  %v3310_v32 = vsel %vm2862_vm1, %v2638_v29, %v3086_v21  ;;  %v15831_v4 = vld [vmem:[#allocation125_spill] sm:$0xff]  ;;  %v12570_v29 = vpop.f32.mrf.mxu1  ;;  %5460 = vmatpush1.bf16.msra.mxu0 %v9081_v61 }
 0x2e9   :  { %15828 = vst [vmem:[#allocation19_spill] sm:$0xff] %v12551_v54  ;;  %v2645_v51 = vadd.f32 %v12154_v55, %v2261_v49  ;;  %v15832_v57 = vld [vmem:[#allocation233_spill] sm:$0xff]  ;;  %v2660_v63 = vadd.f32 %v12193_v47, %v2273_v24  ;;  %v3318_v56 = vsel %vm2870_vm2, %v2646_v38, %v3094_v30  ;;  %vm2850_vm5 = vcmp.gt.f32.partialorder %v2626_v0, 0.0  ;;  %v15833_v49 = vld [vmem:[#allocation106_spill] sm:$0xff] }
 0x2ea   :  { %v3560_v52 = vpack.c.bf16 %v15832_v57, %v15831_v4  ;;  %v3303_v31 = vsel %vm2855_vm4, %v2631_v14, %v3079_v40  ;;  %v3100_v21 = vmul.f32 0.2, %v2652_v42  ;;  %v3500_v7 = vpack.c.bf16 %v3325_v37, %v3318_v56  ;;  %v15834_v57 = vld [vmem:[#allocation116_spill] sm:$0xff]  ;;  %v12579_v38 = vpop.f32.mrf.mxu1  ;;  %v12583_v40 = vpop.f32.mrf.mxu0 }
 0x2eb   :  { %v3492_v36 = vpack.c.bf16 %v3310_v32, %v3303_v31  ;;  %v2275_v16 = vadd.f32 %v12307_v15, %v15833_v49  ;;  %v3115_v4 = vmul.f32 0.2, %v2667_v48  ;;  %v2287_v24 = vadd.f32 %v12387_v59, %v15834_v57  ;;  %v15836_v32 = vld [vmem:[#allocation102_spill] sm:$0xff]  ;;  %v15839_v49 = vld [vmem:[#allocation223_spill] sm:$0xff] }
 0x2ec   :  { %4625 = vmatmul.mubr.bf16.gmra.mxu1 %v3560_v52  ;;  %v3074_v30 = vmul.f32 0.2, %v2626_v0  ;;  %v2661_v35 = vadd.f32 %v15702_v8, %v2450_v12  ;;  %vm2876_vm6 = vcmp.gt.f32.partialorder %v2652_v42, 0.0  ;;  %v15835_v14 = vmov 0   ;;  %v15837_v52 = vld [vmem:[#allocation112_spill] sm:$0xff]  ;;  %v12589_v56 = vpop.f32.mrf.mxu1  ;;  %v15838_v31 = vld [vmem:[#allocation186_spill] sm:$0xff]  ;;  %v12598_v61 = vpop.f32.mrf.mxu0 }
 0x2ed   :  { %4860 = vmatprep.mubr.bf16.mxu1 %v15835_v14  ;;  %vm2891_vm7 = vcmp.gt.f32.partialorder %v2667_v48, 0.0  ;;  %v3093_v37 = vmul.f32 0.2, %v2645_v51  ;;  %v2271_v15 = vadd.f32 %v12274_v45, %v15836_v32  ;;  %4718 = vmatmul.mubr.bf16.gmra.mxu0 %v3492_v36  ;;  %v3108_v33 = vmul.f32 0.2, %v2660_v63 }
 0x2ee   :  { %v2283_v59 = vadd.f32 %v12346_v2, %v15837_v52  ;;  %v12594_v12 = vsel %vm2843_vm15, %v12492_v18, %v3067_v53  ;;  %v2442_v57 = vadd.f32 %v15839_v49, %v15838_v31  ;;  %vm2869_vm8 = vcmp.gt.f32.partialorder %v2645_v51, 0.0  ;;  %4727 = vmatprep.mubr.bf16.mxu0 %v3500_v7  ;;  %v12604_v52 = vpop.f32.mrf.mxu1  ;;  %v15841_v31 = vld [vmem:[#allocation187_spill] sm:$0xff]  ;;  %v15842_v49 = vld [vmem:[#allocation129_spill] sm:$0xff] }
 0x2ef   :  { %vm2884_vm9 = vcmp.gt.f32.partialorder %v2660_v63, 0.0  ;;  %v3324_v45 = vsel %vm2876_vm6, %v2652_v42, %v3100_v21  ;;  %v2666_v36 = vadd.f32 %v12154_v55, %v2275_v16  ;;  %v2681_v2 = vadd.f32 %v12193_v47, %v2287_v24  ;;  %v12616_v21 = vpop.f32.mrf.mxu0 }
 0x2f0   :  { %v3339_v32 = vsel %vm2891_vm7, %v2667_v48, %v3115_v4  ;;  %v12609_v18 = vsel %vm2864_vm3, %v12522_v11, %v3088_v23  ;;  %v12612_v53 = vsel %vm2850_vm5, %v2626_v0, %v3074_v30  ;;  %v3109_v7 = vmul.f32 0.2, %v2661_v35  ;;  %v12621_v46 = vpop.f32.mrf.mxu1 }
 0x2f1   :  { %15840 = vst [vmem:[#allocation13_spill] sm:$0xff] %v12609_v18  ;;  %v2453_v42 = vadd.f32 %v15842_v49, %v15841_v31  ;;  %v3317_v16 = vsel %vm2869_vm8, %v2645_v51, %v3093_v37  ;;  %v2659_v24 = vadd.f32 %v12154_v55, %v2271_v15  ;;  %v2674_v48 = vadd.f32 %v12193_v47, %v2283_v59  ;;  %v12624_v30 = vpop.f32.mrf.mxu0  ;;  %v15844_v51 = vld [vmem:[#allocation114_spill] sm:$0xff]  ;;  %v15845_v59 = vld [vmem:[#allocation124_spill] sm:$0xff] }
 0x2f2   :  { %v3332_v4 = vsel %vm2884_vm9, %v2660_v63, %v3108_v33  ;;  %vm2885_vm10 = vcmp.gt.f32.partialorder %v2661_v35, 0.0  ;;  %v2647_v11 = vadd.f32 %v15702_v8, %v2442_v57  ;;  %v3499_v0 = vpack.c.bf16 %v3324_v45, %v3317_v16  ;;  %v12633_v33 = vpop.f32.mrf.mxu1  ;;  %v9086_v57 = vld [vmem:[%s15219_s7 + $0x14] ss:$8 sps:$4 sm:$0xff]  }
 0x2f3   :  { %v3507_v23 = vpack.c.bf16 %v3339_v32, %v3332_v4  ;;  %v3114_v17 = vmul.f32 0.2, %v2666_v36  ;;  %v15843_v31 = vpack.c.bf16 %v12130_v3, %v12070_v44  ;;  %v2285_v37 = vadd.f32 %v12371_v13, %v15844_v51  ;;  %15846 = vst [vmem:[#allocation135_spill] sm:$0xff] %v12633_v33  ;;  %v15847_v32 = vld [vmem:[#allocation188_spill] sm:$0xff]  ;;  %5461 = vmatprep.subr.bf16.mxu0 %v9086_v57 }
 0x2f4   :  { %v3129_v15 = vmul.f32 0.2, %v2681_v2  ;;  %v2297_v63 = vadd.f32 %v12454_v22, %v15845_v59  ;;  %v12639_v45 = vadd.f32 %v15702_v8, %v2453_v42  ;;  %v15848_v49 = vld [vmem:[#allocation228_spill] sm:$0xff]  ;;  %vm2890_vm11 = vcmp.gt.f32.partialorder %v2666_v36, 0.0  ;;  %v12654_v51 = vpop.f32.mrf.mxu1  ;;  %v15851_v59 = vld [vmem:[#allocation110_spill] sm:$0xff] }
 0x2f5   :  { %4861 = vmatmul.mubr.bf16.vlgmr.msra.gmra.mxu1 %v15843_v31  ;;  %v2445_v44 = vadd.f32 %v15848_v49, %v15847_v32  ;;  %vm2905_vm12 = vcmp.gt.f32.partialorder %v2681_v2, 0.0  ;;  %v9084_v3 = vld [vmem:[%s15219_s7 + $0x10] ss:$8 sps:$4 sm:$0xff]   ;;  %v12648_v13 = vsel %vm2885_vm10, %v2661_v35, %v3109_v7  ;;  %v3107_v22 = vmul.f32 0.2, %v2659_v24  ;;  %4728 = vmatmul.mubr.bf16.gmra.mxu0 %v3499_v0  ;;  %v12652_v31 = vpop.f32.mrf.mxu0  ;;  %v15852_v32 = vld [vmem:[#allocation137_spill] sm:$0xff] }
 0x2f6   :  { %4870 = vmatprep.mubr.bf16.mxu1 %v15835_v14  ;;  %15849 = vst [vmem:[#allocation234_spill] sm:$0xff] %v12648_v13  ;;  %v3122_v16 = vmul.f32 0.2, %v2674_v48  ;;  %v15850_v4 = vld [vmem:[#allocation120_spill] sm:$0xff]  ;;  %vm2871_vm13 = vcmp.gt.f32.partialorder %v2647_v11, 0.0  ;;  %vm2883_vm14 = vcmp.gt.f32.partialorder %v2659_v24, 0.0  ;;  %v2281_v49 = vadd.f32 %v15852_v32, %v15851_v59  ;;  %4737 = vmatprep.mubr.bf16.mxu0 %v3507_v23 }
 0x2f7   :  { %v2293_v42 = vadd.f32 %v12417_v28, %v15850_v4  ;;  %vm2898_vm15 = vcmp.gt.f32.partialorder %v2674_v48, 0.0  ;;  %v3338_v35 = vsel %vm2890_vm11, %v2666_v36, %v3114_v17  ;;  %v2680_v7 = vadd.f32 %v12154_v55, %v2285_v37  ;;  %v12662_v28 = vpop.f32.mrf.mxu1  ;;  %5462 = vmatpush1.bf16.msra.mxu0 %v9084_v3  ;;  %v15854_v17 = vld [vmem:[#allocation230_spill] sm:$0xff] }
 0x2f8   :  { %v2695_v0 = vadd.f32 %v12193_v47, %v2297_v63  ;;  %v3353_v13 = vsel %vm2905_vm12, %v2681_v2, %v3129_v15  ;;  %15853 = vst [vmem:[#allocation139_spill] sm:$0xff] %v12662_v28  ;;  %v3095_v4 = vmul.f32 0.2, %v2647_v11  ;;  %vm2892_vm0 = vcmp.gt.f32.partialorder %v12639_v45, 0.0  ;;  %v15855_v36 = vld [vmem:[#allocation10_spill] sm:$0xff]  ;;  %v12673_v15 = vpop.f32.mrf.mxu0 }
 0x2f9   :  { %v3116_v33 = vmul.f32 0.2, %v12639_v45  ;;  %v12667_v59 = vadd.f32 %v15702_v8, %v2445_v44  ;;  %v3331_v23 = vsel %vm2883_vm14, %v2659_v24, %v3107_v22  ;;  %v3466_v37 = vpack.c.bf16 %v15855_v36, %v15854_v17  ;;  %v12675_v57 = vpop.f32.mrf.mxu1  ;;  %v15856_v28 = vld [vmem:[#allocation118_spill] sm:$0xff] }
 0x2fa   :  { %v2688_v63 = vadd.f32 %v12193_v47, %v2293_v42  ;;  %v3346_v2 = vsel %vm2898_vm15, %v2674_v48, %v3122_v16  ;;  %v2673_v32 = vadd.f32 %v12154_v55, %v2281_v49  ;;  %v2291_v18 = vadd.f32 %v12395_v1, %v15856_v28  ;;  %v15857_v24 = vld [vmem:[#allocation122_spill] sm:$0xff]  ;;  %v15858_v42 = vld [vmem:[#allocation132_spill] sm:$0xff]  ;;  %v12684_v16 = vpop.f32.mrf.mxu0  ;;  %v15860_v1 = vld [vmem:[#allocation209_spill] sm:$0xff] }
 0x2fb   :  { %v3506_v44 = vpack.c.bf16 %v3338_v35, %v3331_v23  ;;  %v3514_v54 = vpack.c.bf16 %v3353_v13, %v3346_v2  ;;  %v3128_v3 = vmul.f32 0.2, %v2680_v7  ;;  %v2295_v22 = vadd.f32 %v12437_v62, %v15857_v24  ;;  %v12686_v36 = vpop.f32.mrf.mxu1  ;;  %v9087_v62 = vld [vmem:[%s15219_s7] ss:$8 sps:$4 sm:$0xff]   ;;  %v15861_v28 = vld [vmem:[#allocation128_spill] sm:$0xff] }
 0x2fc   :  { %v3143_v17 = vmul.f32 0.2, %v2695_v0  ;;  %v2307_v48 = vadd.f32 %v12516_v10, %v15858_v42  ;;  %15859 = vst [vmem:[#allocation21_spill] sm:$0xff] %v12686_v36  ;;  %v12689_v49 = vsel %vm2871_vm13, %v2647_v11, %v3095_v4  ;;  %vm2878_vm1 = vcmp.gt.f32.partialorder %v12667_v59, 0.0  ;;  %v9089_v10 = vld [vmem:[%s15219_s7 + $0x4] ss:$8 sps:$4 sm:$0xff]  }
 0x2fd   :  { %4871 = vmatmul.mubr.bf16.gmra.mxu1 %v3466_v37  ;;  %v2514_v13 = vadd.f32 %v12442_v58, %v15860_v1  ;;  %vm2919_vm2 = vcmp.gt.f32.partialorder %v2695_v0, 0.0  ;;  %v3102_v35 = vmul.f32 0.2, %v12667_v59  ;;  %vm2904_vm3 = vcmp.gt.f32.partialorder %v2680_v7, 0.0  ;;  %4738 = vmatmul.mubr.bf16.gmra.mxu0 %v3506_v44  ;;  %v12704_v58 = vpop.f32.mrf.mxu0  ;;  %v12706_v23 = vpop.f32.mrf.mxu1  ;;  %v15862_v37 = vld [vmem:[#allocation213_spill] sm:$0xff] }
 0x2fe   :  { %4880 = vmatprep.mubr.bf16.mxu1 %v15835_v14  ;;  %v3136_v11 = vmul.f32 0.2, %v2688_v63  ;;  %v2303_v4 = vadd.f32 %v12485_v60, %v15861_v28  ;;  %v2517_v2 = vadd.f32 %v12503_v20, %v15862_v37  ;;  %v3121_v24 = vmul.f32 0.2, %v2673_v32  ;;  %4747 = vmatprep.mubr.bf16.mxu0 %v3514_v54  ;;  %v15866_v54 = vld [vmem:[#allocation12_spill] sm:$0xff] }
 0x2ff   :  { %v2687_v42 = vadd.f32 %v12154_v55, %v2291_v18  ;;  %vm2912_vm4 = vcmp.gt.f32.partialorder %v2688_v63, 0.0  ;;  %5463 = vmatprep.subr.bf16.mxu0 %v9089_v10  ;;  %vm2897_vm5 = vcmp.gt.f32.partialorder %v2673_v32, 0.0  ;;  %v2694_v44 = vadd.f32 %v12154_v55, %v2295_v22  ;;  %v12714_v28 = vpop.f32.mrf.mxu0  ;;  %v12716_v36 = vpop.f32.mrf.mxu1  ;;  %v15865_v18 = vld [vmem:[#allocation190_spill] sm:$0xff] }
 0x300   :  { %v2709_v1 = vadd.f32 %v12193_v47, %v2307_v48  ;;  %v3367_v60 = vsel %vm2919_vm2, %v2695_v0, %v3143_v17  ;;  %15863 = vst [vmem:[#allocation145_spill] sm:$0xff] %v12714_v28  ;;  %5464 = vmatpush1.bf16.msra.mxu0 %v9087_v62  ;;  %v12721_v20 = vsel %vm2892_vm0, %v12639_v45, %v3116_v33  ;;  %v15867_v48 = vld [vmem:[#allocation126_spill] sm:$0xff] }
 0x301   :  { %15864 = vst [vmem:[#allocation85_spill] sm:$0xff] %v12721_v20  ;;  %v2458_v10 = vadd.f32 %v15866_v54, %v15865_v18  ;;  %v12726_v37 = vadd.f32 %v15702_v8, %v2514_v13  ;;  %v3352_v22 = vsel %vm2904_vm3, %v2680_v7, %v3128_v3  ;;  %v2301_v0 = vadd.f32 %v12461_v43, %v15867_v48  ;;  %v12735_v33 = vpop.f32.mrf.mxu1  ;;  %v12741_v7 = vpop.f32.mrf.mxu0 }
 0x302   :  { %v3473_v17 = vpack.c.bf16 %v12467_v26, %v12410_v6  ;;  %v2702_v62 = vadd.f32 %v12193_v47, %v2303_v4  ;;  %v3360_v28 = vsel %vm2912_vm4, %v2688_v63, %v3136_v11  ;;  %v12738_v45 = vadd.f32 %v15702_v8, %v2517_v2  ;;  %v15868_v6 = vld [vmem:[#allocation140_spill] sm:$0xff]  ;;  %v15870_v63 = vld [vmem:[#allocation189_spill] sm:$0xff]  ;;  %v15871_v11 = vld [vmem:[#allocation11_spill] sm:$0xff] }
 0x303   :  { %v3345_v13 = vsel %vm2897_vm5, %v2673_v32, %v3121_v24  ;;  %v3135_v18 = vmul.f32 0.2, %v2687_v42  ;;  %v3521_v54 = vpack.c.bf16 %v3367_v60, %v3360_v28  ;;  %v3142_v3 = vmul.f32 0.2, %v2694_v44  ;;  %v12745_v4 = vpop.f32.mrf.mxu1  ;;  %v15873_v2 = vld [vmem:[#allocation130_spill] sm:$0xff]  ;;  %v12754_v24 = vpop.f32.mrf.mxu0 }
 0x304   :  { %v3513_v43 = vpack.c.bf16 %v3352_v22, %v3345_v13  ;;  %v3157_v48 = vmul.f32 0.2, %v2709_v1  ;;  %v2317_v26 = vadd.f32 %v12570_v29, %v15868_v6  ;;  %15869 = vst [vmem:[#allocation149_spill] sm:$0xff] %v12745_v4  ;;  %v12749_v20 = vadd.f32 %v15871_v11, %v15870_v63  ;;  %v9090_v60 = vld [vmem:[%s15219_s7 + $0xf0] ss:$8 sps:$4 sm:$0xff]  }
 0x305   :  { %4881 = vmatmul.mubr.bf16.gmra.mxu1 %v3473_v17  ;;  %vm2911_vm6 = vcmp.gt.f32.partialorder %v2687_v42, 0.0  ;;  %v2305_v32 = vadd.f32 %v12499_v41, %v15873_v2  ;;  %vm2933_vm7 = vcmp.gt.f32.partialorder %v2709_v1, 0.0  ;;  %v9092_v29 = vld [vmem:[%s15219_s7 + $0xf4] ss:$8 sps:$4 sm:$0xff]   ;;  %vm2918_vm8 = vcmp.gt.f32.partialorder %v2694_v44, 0.0  ;;  %v12765_v13 = vpop.f32.mrf.mxu1  ;;  %v15878_v2 = vld [vmem:[#allocation9_spill] sm:$0xff] }
 0x306   :  { %15872 = vst [vmem:[#allocation89_spill] sm:$0xff] %v12749_v20  ;;  %4890 = vmatprep.mubr.bf16.mxu1 %v15835_v14  ;;  %v2701_v28 = vadd.f32 %v12154_v55, %v2301_v0  ;;  %4748 = vmatmul.mubr.bf16.gmra.mxu0 %v3513_v43  ;;  %v3150_v22 = vmul.f32 0.2, %v2702_v62  ;;  %v15874_v17 = vld [vmem:[#allocation136_spill] sm:$0xff]  ;;  %15875 = vst [vmem:[#allocation22_spill] sm:$0xff] %v12765_v13  ;;  %v12770_v6 = vsel %vm2878_vm1, %v12667_v59, %v3102_v35  ;;  %v15877_v11 = vld [vmem:[#allocation191_spill] sm:$0xff]  ;;  %v12777_v0 = vpop.f32.mrf.mxu0 }
 0x307   :  { %v2313_v41 = vadd.f32 %v12536_v27, %v15874_v17  ;;  %v12773_v63 = vadd.f32 %v15702_v8, %v2458_v10  ;;  %v2469_v20 = vadd.f32 %v15878_v2, %v15877_v11  ;;  %vm2926_vm9 = vcmp.gt.f32.partialorder %v2702_v62, 0.0  ;;  %4757 = vmatprep.mubr.bf16.mxu0 %v3521_v54  ;;  %15879 = vst [vmem:[#allocation24_spill] sm:$0xff] %v12777_v0  ;;  %v3677_v59 = vld [vmem:[%s15218_s6] sm:$0x3]  ;;  %v12788_v43 = vpop.f32.mrf.mxu1 }
 0x308   :  { %5465 = vmatprep.subr.bf16.mxu0 %v9092_v29  ;;  %v12780_v27 = vmul.f32 0.2, %v12726_v37  ;;  %vm3004_vm10 = vcmp.gt.f32.partialorder %v12738_v45, 0.0  ;;  %v2723_v35 = vadd.f32 %v12193_v47, %v2317_v26  ;;  %v3381_v10 = vsel %vm2933_vm7, %v2709_v1, %v3157_v48  ;;  %15880 = vst [vmem:[#allocation143_spill] sm:$0xff] %v12788_v43  ;;  %v12798_v1 = vpop.f32.mrf.mxu0  ;;  %v15882_v43 = vld [vmem:[#allocation217_spill] sm:$0xff] }
 0x309   :  { %15876 = vst [vmem:[#allocation20_spill] sm:$0xff] %v12773_v63  ;;  %5466 = vmatpush2.bf16.msra.mxu0 %v9090_v60  ;;  %v3228_v54 = vmul.f32 0.2, %v12738_v45  ;;  %v3359_v29 = vsel %vm2911_vm6, %v2687_v42, %v3135_v18  ;;  %v3366_v17 = vsel %vm2918_vm8, %v2694_v44, %v3142_v3  ;;  %v2708_v11 = vadd.f32 %v12154_v55, %v2305_v32  ;;  %v12800_v48 = vpop.f32.mrf.mxu1  ;;  %v15883_v42 = vld [vmem:[#allocation134_spill] sm:$0xff] }
 0x30a   :  { %vm2925_vm11 = vcmp.gt.f32.partialorder %v2701_v28, 0.0  ;;  %v3480_v2 = vpack.c.bf16 %v12415_v50, %v12404_v25  ;;  %v2716_v4 = vadd.f32 %v12193_v47, %v2313_v41  ;;  %v3374_v26 = vsel %vm2926_vm9, %v2702_v62, %v3150_v22  ;;  %15881 = vst [vmem:[#allocation23_spill] sm:$0xff] %v12798_v1  ;;  %v15884_v32 = vld [vmem:[#allocation138_spill] sm:$0xff]  ;;  %v15885_v41 = vld [vmem:[#allocation148_spill] sm:$0xff] }
 0x30b   :  { %v3149_v60 = vmul.f32 0.2, %v2701_v28  ;;  %v12803_v63 = vrot.slane %v3677_v59, %v15882_v43  ;;  %v2311_v44 = vadd.f32 %v12526_v19, %v15883_v42  ;;  %v3528_v18 = vpack.c.bf16 %v3381_v10, %v3374_v26  ;;  %v12811_v22 = vpop.f32.mrf.mxu1  ;;  %v15886_v43 = vld [vmem:[#allocation218_spill] sm:$0xff]  ;;  %v15888_v10 = vld [vmem:[#allocation127_spill] sm:$0xff] }
 0x30c   :  { %v3520_v3 = vpack.c.bf16 %v3366_v17, %v3359_v29  ;;  %v2315_v25 = vadd.f32 %v12545_v5, %v15884_v32  ;;  %v3171_v50 = vmul.f32 0.2, %v2723_v35  ;;  %v2327_v62 = vadd.f32 %v12621_v46, %v15885_v41  ;;  %v9093_v19 = vld [vmem:[%s15219_s7 + $0xe0] ss:$8 sps:$4 sm:$0xff]   ;;  %v15887_v5 = vld [vmem:[#allocation192_spill] sm:$0xff] }
 0x30d   :  { %4891 = vmatmul.mubr.bf16.gmra.mxu1 %v3480_v2  ;;  %v12814_v1 = vadd.f32 %v15702_v8, %v2469_v20  ;;  %v12817_v0 = vrot.slane %v3677_v59, %v15886_v43  ;;  %v3156_v13 = vmul.f32 0.2, %v2708_v11  ;;  %vm2947_vm12 = vcmp.gt.f32.partialorder %v2723_v35, 0.0  ;;  %v15889_v20 = vld [vmem:[#allocation144_spill] sm:$0xff]  ;;  %v12829_v59 = vpop.f32.mrf.mxu0  ;;  %v12831_v2 = vpop.f32.mrf.mxu1  ;;  %v9095_v26 = vld [vmem:[%s15219_s7 + $0xe4] ss:$8 sps:$4 sm:$0xff]  }
 0x30e   :  { %4900 = vmatprep.mubr.bf16.mxu1 %v15835_v14  ;;  %v12825_v29 = vadd.f32 %v15888_v10, %v15887_v5  ;;  %vm2932_vm13 = vcmp.gt.f32.partialorder %v2708_v11, 0.0  ;;  %4758 = vmatmul.mubr.bf16.gmra.mxu0 %v3520_v3  ;;  %v3164_v46 = vmul.f32 0.2, %v2716_v4  ;;  %v2323_v17 = vadd.f32 %v12589_v56, %v15889_v20 }
 0x30f   :  { %v12839_v42 = vsel %vm3004_vm10, %v12738_v45, %v3228_v54  ;;  %v3373_v32 = vsel %vm2925_vm11, %v2701_v28, %v3149_v60  ;;  %v2715_v3 = vadd.f32 %v12154_v55, %v2311_v44  ;;  %vm2940_vm14 = vcmp.gt.f32.partialorder %v2716_v4, 0.0  ;;  %4767 = vmatprep.mubr.bf16.mxu0 %v3528_v18  ;;  %v12848_v20 = vpop.f32.mrf.mxu0  ;;  %v12850_v43 = vpop.f32.mrf.mxu1  ;;  %5467 = vmatprep.subr.bf16.mxu0 %v9095_v26  ;;  %v15890_v54 = vld [vmem:[#allocation142_spill] sm:$0xff]  ;;  %v15892_v26 = vld [vmem:[#allocation156_spill] sm:$0xff] }
 0x310   :  { %v4284_v56 = vadd.f32 %v12540_v34, %v12803_v63  ;;  %v2722_v41 = vadd.f32 %v12154_v55, %v2315_v25  ;;  %v2737_v5 = vadd.f32 %v12193_v47, %v2327_v62  ;;  %v3395_v10 = vsel %vm2947_vm12, %v2723_v35, %v3171_v50  ;;  %5468 = vmatpush2.bf16.msra.mxu0 %v9093_v19  ;;  %v15891_v25 = vld [vmem:[#allocation146_spill] sm:$0xff] }
 0x311   :  { %v12854_v45 = vadd.f32 %v12557_v39, %v12817_v0  ;;  %v3380_v28 = vsel %vm2932_vm13, %v2708_v11, %v3156_v13  ;;  %v12859_v34 = vadd.f32 %v12573_v9, %v12803_v63  ;;  %v2321_v60 = vadd.f32 %v12579_v38, %v15890_v54  ;;  %v12871_v13 = vpop.f32.mrf.mxu0  ;;  %v12873_v11 = vpop.f32.mrf.mxu1 }
 0x312   :  { %v12865_v35 = vadd.f32 %v12583_v40, %v12817_v0  ;;  %v3487_v44 = vpack.c.bf16 %v12612_v53, %v12594_v12  ;;  %v2730_v39 = vadd.f32 %v12193_v47, %v2323_v17  ;;  %v3388_v18 = vsel %vm2940_vm14, %v2716_v4, %v3164_v46 }
 0x313   :  { %vm2939_vm15 = vcmp.gt.f32.partialorder %v2715_v3, 0.0  ;;  %v3163_v9 = vmul.f32 0.2, %v2715_v3  ;;  %v2325_v38 = vadd.f32 %v12604_v52, %v15891_v25  ;;  %v3535_v50 = vpack.c.bf16 %v3395_v10, %v3388_v18  ;;  %v12879_v53 = vpop.f32.mrf.mxu0  ;;  %v4486_v4 = vpop.f32.mrf.mxu1  ;;  %v15894_v10 = vld [vmem:[#allocation152_spill] sm:$0xff] }
 0x314   :  { %v3170_v62 = vmul.f32 0.2, %v2722_v41  ;;  %v3527_v40 = vpack.c.bf16 %v3380_v28, %v3373_v32  ;;  %v3185_v19 = vmul.f32 0.2, %v2737_v5  ;;  %v2337_v12 = vadd.f32 %v12675_v57, %v15892_v26  ;;  %15893 = vst [vmem:[#allocation18_spill] sm:$0xff] %v12879_v53 }
 0x315   :  { %4901 = vmatmul.mubr.bf16.gmra.mxu1 %v3487_v44  ;;  %v4294_v46 = vadd.f32 %v12598_v61, %v12803_v63  ;;  %vm2946_vm0 = vcmp.gt.f32.partialorder %v2722_v41, 0.0  ;;  %v12884_v17 = vadd.f32 %v12154_v55, %v2321_v60  ;;  %vm2961_vm1 = vcmp.gt.f32.partialorder %v2737_v5, 0.0  ;;  %v12894_v28 = vpop.f32.mrf.mxu0  ;;  %v4488_v54 = vpop.f32.mrf.mxu1  ;;  %v9096_v60 = vld [vmem:[%s15219_s7 + $0xd0] ss:$8 sps:$4 sm:$0xff]   ;;  %v9098_v44 = vld [vmem:[%s15219_s7 + $0xd4] ss:$8 sps:$4 sm:$0xff]  }
 0x316   :  { %4910 = vmatprep.mubr.bf16.mxu1 %v15835_v14  ;;  %vm2997_vm2 = vcmp.gt.f32.partialorder %v12726_v37, 0.0  ;;  %v4296_v52 = vadd.f32 %v12616_v21, %v12817_v0  ;;  %v4298_v57 = vadd.f32 %v12624_v30, %v12803_v63  ;;  %4768 = vmatmul.mubr.bf16.gmra.mxu0 %v3527_v40  ;;  %v3178_v32 = vmul.f32 0.2, %v2730_v39  ;;  %15895 = vst [vmem:[#allocation147_spill] sm:$0xff] %v12894_v28  ;;  %v15902_v28 = vld [vmem:[#allocation164_spill] sm:$0xff] }
 0x317   :  { %v2333_v61 = vadd.f32 %v12654_v51, %v15894_v10  ;;  %v3387_v21 = vsel %vm2939_vm15, %v2715_v3, %v3163_v9  ;;  %v4300_v30 = vadd.f32 %v12652_v31, %v12817_v0  ;;  %vm2954_vm3 = vcmp.gt.f32.partialorder %v2730_v39, 0.0  ;;  %4777 = vmatprep.mubr.bf16.mxu0 %v3535_v50  ;;  %v12909_v26 = vpop.f32.mrf.mxu0  ;;  %v4490_v53 = vpop.f32.mrf.mxu1  ;;  %5469 = vmatprep.subr.bf16.mxu0 %v9098_v44  ;;  %v15898_v9 = vld [vmem:[#allocation19_spill] sm:$0xff] }
 0x318   :  { %v2736_v18 = vadd.f32 %v12154_v55, %v2325_v38  ;;  %v3394_v51 = vsel %vm2946_vm0, %v2722_v41, %v3170_v62  ;;  %v2751_v25 = vadd.f32 %v12193_v47, %v2337_v12  ;;  %v3409_v40 = vsel %vm2961_vm1, %v2737_v5, %v3185_v19  ;;  %15896 = vst [vmem:[#allocation194_spill] sm:$0xff] %v12909_v26  ;;  %v15899_v5 = vld [vmem:[#allocation13_spill] sm:$0xff] }
 0x319   :  { %v12912_v10 = vadd.f32 %v12811_v22, %v4284_v56  ;;  %vm2953_vm4 = vcmp.gt.f32.partialorder %v12884_v17, 0.0  ;;  %v3177_v31 = vmul.f32 0.2, %v12884_v17  ;;  %v4304_v3 = vadd.f32 %v12673_v15, %v12803_v63  ;;  %5470 = vmatpush2.bf16.msra.mxu0 %v9096_v60  ;;  %v15900_v22 = vld [vmem:[#allocation154_spill] sm:$0xff]  ;;  %v15901_v56 = vld [vmem:[#allocation139_spill] sm:$0xff]  ;;  %v12926_v12 = vpop.f32.mrf.mxu0  ;;  %v4492_v44 = vpop.f32.mrf.mxu1 }
 0x31a   :  { %v4306_v41 = vadd.f32 %v12684_v16, %v12817_v0  ;;  %v3494_v38 = vpack.c.bf16 %v15899_v5, %v15898_v9  ;;  %v2744_v50 = vadd.f32 %v12193_v47, %v2333_v61  ;;  %v2335_v62 = vadd.f32 %v15901_v56, %v15900_v22  ;;  %v15903_v5 = vld [vmem:[#allocation150_spill] sm:$0xff]  ;;  %v15904_v22 = vld [vmem:[#allocation135_spill] sm:$0xff] }
 0x31b   :  { %15897 = vst [vmem:[#allocation151_spill] sm:$0xff] %v12912_v10  ;;  %v3402_v19 = vsel %vm2954_vm3, %v2730_v39, %v3178_v32  ;;  %v3184_v10 = vmul.f32 0.2, %v2736_v18  ;;  %v4308_v15 = vadd.f32 %v12704_v58, %v12803_v63  ;;  %v3534_v26 = vpack.c.bf16 %v3394_v51, %v3387_v21  ;;  %v4496_v32 = vpop.f32.mrf.mxu1  ;;  %v12943_v58 = vpop.f32.mrf.mxu0  ;;  %v15905_v21 = vld [vmem:[#allocation160_spill] sm:$0xff] }
 0x31c   :  { %v3542_v16 = vpack.c.bf16 %v3409_v40, %v3402_v19  ;;  %v3199_v60 = vmul.f32 0.2, %v2751_v25  ;;  %v2347_v9 = vadd.f32 %v12735_v33, %v15902_v28  ;;  %v12934_v61 = vadd.f32 %v12831_v2, %v12854_v45  ;;  %v9101_v2 = vld [vmem:[%s15219_s7 + $0xc4] ss:$8 sps:$4 sm:$0xff]  }
 0x31d   :  { %4911 = vmatmul.mubr.bf16.gmra.mxu1 %v3494_v38  ;;  %v12938_v39 = vadd.f32 %v12850_v43, %v12859_v34  ;;  %v2331_v56 = vadd.f32 %v15904_v22, %v15903_v5  ;;  %vm2975_vm5 = vcmp.gt.f32.partialorder %v2751_v25, 0.0  ;;  %v12947_v33 = vadd.f32 %v12873_v11, %v12865_v35  ;;  %v9099_v43 = vld [vmem:[%s15219_s7 + $0xc0] ss:$8 sps:$4 sm:$0xff]   ;;  %v4498_v11 = vpop.f32.mrf.mxu1  ;;  %5471 = vmatprep.subr.bf16.mxu0 %v9101_v2 }
 0x31e   :  { %4920 = vmatprep.mubr.bf16.mxu1 %v15835_v14  ;;  %v12949_v28 = vadd.f32 %v4486_v4, %v4294_v46  ;;  %vm2960_vm6 = vcmp.gt.f32.partialorder %v2736_v18, 0.0  ;;  %4778 = vmatmul.mubr.bf16.gmra.mxu0 %v3534_v26  ;;  %v3192_v45 = vmul.f32 0.2, %v2744_v50  ;;  %v12958_v34 = vadd.f32 %v12154_v55, %v2335_v62  ;;  %v15909_v22 = vld [vmem:[#allocation21_spill] sm:$0xff]  ;;  %v15911_v2 = vld [vmem:[#allocation22_spill] sm:$0xff] }
 0x31f   :  { %v2343_v35 = vadd.f32 %v12706_v23, %v15905_v21  ;;  %vm2968_vm7 = vcmp.gt.f32.partialorder %v2744_v50, 0.0  ;;  %4787 = vmatprep.mubr.bf16.mxu0 %v3542_v16  ;;  %v12962_v4 = vadd.f32 %v4488_v54, %v4296_v52  ;;  %v12964_v46 = vadd.f32 %v4490_v53, %v4298_v57  ;;  %v4500_v19 = vpop.f32.mrf.mxu1  ;;  %v12984_v57 = vpop.f32.mrf.mxu0  ;;  %5472 = vmatpush2.bf16.msra.mxu0 %v9099_v43  ;;  %v15910_v43 = vld [vmem:[#allocation168_spill] sm:$0xff] }
 0x320   :  { %v12966_v51 = vadd.f32 %v4492_v44, %v4300_v30  ;;  %v2765_v40 = vadd.f32 %v12193_v47, %v2347_v9  ;;  %v3423_v26 = vsel %vm2975_vm5, %v2751_v25, %v3199_v60  ;;  %v12970_v38 = vadd.f32 %v4496_v32, %v4304_v3 }
 0x321   :  { %v12972_v62 = vadd.f32 %v4498_v11, %v4306_v41  ;;  %v12978_v23 = vsel %vm2997_vm2, %v12726_v37, %v12780_v27  ;;  %v3401_v53 = vsel %vm2953_vm4, %v12884_v17, %v3177_v31  ;;  %v3408_v52 = vsel %vm2960_vm6, %v2736_v18, %v3184_v10  ;;  %v12992_v37 = vpop.f32.mrf.mxu1  ;;  %v13000_v41 = vpop.f32.mrf.mxu0  ;;  %v15912_v11 = vld [vmem:[#allocation24_spill] sm:$0xff]  ;;  %v15938_v27 = vld [vmem:[#allocation235_spill] sm:$0xff] }
 0x322   :  { %v12986_v54 = vadd.f32 %v4500_v19, %v4308_v15  ;;  %v3501_v30 = vpack.c.bf16 %v12770_v6, %v12689_v49  ;;  %v2758_v25 = vadd.f32 %v12193_v47, %v2343_v35  ;;  %v3416_v3 = vsel %vm2968_vm7, %v2744_v50, %v3192_v45  ;;  %v15906_v6 = vld [vmem:[#allocation162_spill] sm:$0xff]  ;;  %v15907_v15 = vld [vmem:[#allocation172_spill] sm:$0xff] }
 0x323   :  { %v2743_v17 = vadd.f32 %v12154_v55, %v2331_v56  ;;  %v4314_v18 = vadd.f32 %v12741_v7, %v12803_v63  ;;  %v3198_v10 = vmul.f32 0.2, %v12958_v34  ;;  %v3549_v31 = vpack.c.bf16 %v3423_v26, %v3416_v3  ;;  %v4506_v60 = vpop.f32.mrf.mxu1  ;;  %v13011_v32 = vpop.f32.mrf.mxu0 }
 0x324   :  { %v3541_v49 = vpack.c.bf16 %v3408_v52, %v3401_v53  ;;  %v2345_v50 = vadd.f32 %v12716_v36, %v15906_v6  ;;  %v3213_v44 = vmul.f32 0.2, %v2765_v40  ;;  %v2357_v16 = vadd.f32 %v12800_v48, %v15907_v15  ;;  %v9102_v36 = vld [vmem:[%s15219_s7 + $0xb0] ss:$8 sps:$4 sm:$0xff]   ;;  %v9104_v48 = vld [vmem:[%s15219_s7 + $0xb4] ss:$8 sps:$4 sm:$0xff]  }
 0x325   :  { %4921 = vmatmul.mubr.bf16.gmra.mxu1 %v3501_v30  ;;  %v2682_v9 = vadd.f32 %v15702_v8, %v12825_v29  ;;  %v4316_v7 = vadd.f32 %v12754_v24, %v12817_v0  ;;  %vm2989_vm8 = vcmp.gt.f32.partialorder %v2765_v40, 0.0  ;;  %v13013_v5 = vadd.f32 %v4506_v60, %v4314_v18  ;;  %v15908_v29 = vld [vmem:[#allocation158_spill] sm:$0xff]  ;;  %v4508_v21 = vpop.f32.mrf.mxu1  ;;  %v13028_v19 = vpop.f32.mrf.mxu0  ;;  %5473 = vmatprep.subr.bf16.mxu0 %v9104_v48  ;;  %v15915_v48 = vld [vmem:[#allocation85_spill] sm:$0xff] }
 0x326   :  { %4930 = vmatprep.mubr.bf16.mxu1 %v15835_v14  ;;  %vm2974_vm9 = vcmp.gt.f32.partialorder %v12958_v34, 0.0  ;;  %v2341_v24 = vadd.f32 %v15909_v22, %v15908_v29  ;;  %4788 = vmatmul.mubr.bf16.gmra.mxu0 %v3541_v49  ;;  %v3206_v56 = vmul.f32 0.2, %v2758_v25  ;;  %v2353_v45 = vadd.f32 %v15911_v2, %v15910_v43  ;;  %v15913_v49 = vld [vmem:[#allocation20_spill] sm:$0xff] }
 0x327   :  { %v3191_v35 = vmul.f32 0.2, %v2743_v17  ;;  %v4318_v26 = vadd.f32 %v15912_v11, %v12803_v63  ;;  %vm2982_vm10 = vcmp.gt.f32.partialorder %v2758_v25, 0.0  ;;  %4797 = vmatprep.mubr.bf16.mxu0 %v3549_v31  ;;  %v13030_v53 = vadd.f32 %v4508_v21, %v4316_v7  ;;  %v4510_v18 = vpop.f32.mrf.mxu1  ;;  %5474 = vmatpush2.bf16.msra.mxu0 %v9102_v36  ;;  %v15914_v7 = vld [vmem:[#allocation234_spill] sm:$0xff] }
 0x328   :  { %vm2967_vm11 = vcmp.gt.f32.partialorder %v2743_v17, 0.0  ;;  %v2764_v52 = vadd.f32 %v12154_v55, %v2345_v50  ;;  %v2779_v30 = vadd.f32 %v12193_v47, %v2357_v16  ;;  %v3437_v3 = vsel %vm2989_vm8, %v2765_v40, %v3213_v44  ;;  %v9107_v11 = vld [vmem:[%s15219_s7 + $0xa4] ss:$8 sps:$4 sm:$0xff]  }
 0x329   :  { %vm2899_vm12 = vcmp.gt.f32.partialorder %v15913_v49, 0.0  ;;  %v3130_v6 = vmul.f32 0.2, %v2682_v9  ;;  %v3422_v31 = vsel %vm2974_vm9, %v12958_v34, %v3198_v10  ;;  %v13039_v15 = vadd.f32 %v4510_v18, %v4318_v26  ;;  %v13046_v44 = vpop.f32.mrf.mxu1  ;;  %v13051_v10 = vpop.f32.mrf.mxu0  ;;  %5475 = vmatprep.subr.bf16.mxu0 %v9107_v11  ;;  %v15922_v11 = vld [vmem:[#allocation133_spill] sm:$0xff] }
 0x32a   :  { %v2757_v60 = vadd.f32 %v12154_v55, %v2341_v24  ;;  %v3508_v50 = vpack.c.bf16 %v15915_v48, %v15914_v7  ;;  %v2772_v16 = vadd.f32 %v12193_v47, %v2353_v45  ;;  %v3430_v40 = vsel %vm2982_vm10, %v2758_v25, %v3206_v56  ;;  %v15916_v56 = vld [vmem:[#allocation170_spill] sm:$0xff]  ;;  %v15917_v45 = vld [vmem:[#allocation143_spill] sm:$0xff]  ;;  %v15919_v48 = vld [vmem:[#allocation149_spill] sm:$0xff] }
 0x32b   :  { %vm2906_vm13 = vcmp.gt.f32.partialorder %v2682_v9, 0.0  ;;  %v3415_v36 = vsel %vm2967_vm11, %v2743_v17, %v3191_v35  ;;  %v4324_v29 = vadd.f32 %v12829_v59, %v12803_v63  ;;  %v3556_v34 = vpack.c.bf16 %v3437_v3, %v3430_v40  ;;  %v4516_v47 = vpop.f32.mrf.mxu1  ;;  %v13059_v59 = vpop.f32.mrf.mxu0  ;;  %v9105_v35 = vld [vmem:[%s15219_s7 + $0xa0] ss:$8 sps:$4 sm:$0xff]  }
 0x32c   :  { %v3123_v22 = vmul.f32 0.2, %v15913_v49  ;;  %v3212_v24 = vmul.f32 0.2, %v2764_v52  ;;  %v3548_v43 = vpack.c.bf16 %v3422_v31, %v3415_v36  ;;  %v3227_v2 = vmul.f32 0.2, %v2779_v30  ;;  %5476 = vmatpush2.bf16.msra.mxu0 %v9105_v35 }
 0x32d   :  { %4931 = vmatmul.mubr.bf16.gmra.mxu1 %v3508_v50  ;;  %v4326_v25 = vadd.f32 %v12848_v20, %v12817_v0  ;;  %v2355_v21 = vadd.f32 %v15917_v45, %v15916_v56  ;;  %vm3003_vm14 = vcmp.gt.f32.partialorder %v2779_v30, 0.0  ;;  %v13061_v17 = vadd.f32 %v4516_v47, %v4324_v29  ;;  %v4518_v18 = vpop.f32.mrf.mxu1  ;;  %v15918_v7 = vld [vmem:[#allocation166_spill] sm:$0xff]  ;;  %v13074_v40 = vpop.f32.mrf.mxu0  ;;  %v15920_v29 = vld [vmem:[#allocation89_spill] sm:$0xff]  ;;  %v15921_v45 = vld [vmem:[#allocation200_spill] sm:$0xff] }
 0x32e   :  { %4940 = vmatprep.mubr.bf16.mxu1 %v15835_v14  ;;  %v3354_v20 = vsel %vm2906_vm13, %v2682_v9, %v3130_v6  ;;  %v3205_v26 = vmul.f32 0.2, %v2757_v60  ;;  %vm2988_vm15 = vcmp.gt.f32.partialorder %v2764_v52, 0.0  ;;  %4798 = vmatmul.mubr.bf16.gmra.mxu0 %v3548_v43  ;;  %v3220_v3 = vmul.f32 0.2, %v2772_v16 }
 0x32f   :  { %v4328_v31 = vadd.f32 %v12871_v13, %v12803_v63  ;;  %v2351_v50 = vadd.f32 %v15919_v48, %v15918_v7  ;;  %vm2996_vm0 = vcmp.gt.f32.partialorder %v2772_v16, 0.0  ;;  %4807 = vmatprep.mubr.bf16.mxu0 %v3556_v34  ;;  %v13076_v36 = vadd.f32 %v4518_v18, %v4326_v25  ;;  %v4520_v43 = vpop.f32.mrf.mxu1 }
 0x330   :  { %v2689_v9 = vadd.f32 %v15702_v8, %v15920_v29  ;;  %vm2920_vm1 = vcmp.gt.f32.partialorder %v12814_v1, 0.0  ;;  %vm2981_vm2 = vcmp.gt.f32.partialorder %v2757_v60, 0.0  ;;  %v3451_v6 = vsel %vm3003_vm14, %v2779_v30, %v3227_v2 }
 0x331   :  { %v3347_v13 = vsel %vm2899_vm12, %v15913_v49, %v3123_v22  ;;  %v3436_v34 = vsel %vm2988_vm15, %v2764_v52, %v3212_v24  ;;  %v2778_v47 = vadd.f32 %v12154_v55, %v2355_v21  ;;  %v13087_v25 = vadd.f32 %v4520_v43, %v4328_v31  ;;  %v13093_v2 = vpop.f32.mrf.mxu1  ;;  %v15923_v49 = vld [vmem:[#allocation147_spill] sm:$0xff]  ;;  %v13098_v24 = vpop.f32.mrf.mxu0 }
 0x332   :  { %v3144_v56 = vmul.f32 0.2, %v12814_v1  ;;  %v2477_v18 = vadd.f32 %v15922_v11, %v15921_v45  ;;  %v3515_v7 = vpack.c.bf16 %v3354_v20, %v3347_v13  ;;  %v3444_v30 = vsel %vm2996_vm0, %v2772_v16, %v3220_v3  ;;  %15924 = vst [vmem:[#allocation198_spill] sm:$0xff] %v13098_v24  ;;  %v15925_v43 = vld [vmem:[#allocation195_spill] sm:$0xff]  ;;  %v15927_v16 = vld [vmem:[#allocation194_spill] sm:$0xff] }
 0x333   :  { %v3429_v35 = vsel %vm2981_vm2, %v2757_v60, %v3205_v26  ;;  %v2771_v48 = vadd.f32 %v12154_v55, %v2351_v50  ;;  %v4334_v52 = vadd.f32 %v15923_v49, %v12803_v63  ;;  %v3563_v22 = vpack.c.bf16 %v3451_v6, %v3444_v30  ;;  %v4526_v29 = vpop.f32.mrf.mxu1  ;;  %v15926_v45 = vld [vmem:[#allocation131_spill] sm:$0xff]  ;;  %v13119_v30 = vpop.f32.mrf.mxu0 }
 0x334   :  { %v3137_v21 = vmul.f32 0.2, %v2689_v9  ;;  %v3555_v31 = vpack.c.bf16 %v3436_v34, %v3429_v35  ;;  %v2474_v20 = vadd.f32 %v15926_v45, %v15925_v43  ;;  %v4336_v3 = vadd.f32 %v15927_v16, %v12817_v0  ;;  %v9108_v60 = vld [vmem:[%s15219_s7 + $0x90] ss:$8 sps:$4 sm:$0xff]   ;;  %v9110_v26 = vld [vmem:[%s15219_s7 + $0x94] ss:$8 sps:$4 sm:$0xff]  }
 0x335   :  { %4941 = vmatmul.mubr.bf16.gmra.mxu1 %v3515_v7  ;;  %v3226_v13 = vmul.f32 0.2, %v2778_v47  ;;  %v13105_v55 = vadd.f32 %v4526_v29, %v4334_v52  ;;  %vm2913_vm3 = vcmp.gt.f32.partialorder %v2689_v9, 0.0  ;;  %v3368_v50 = vsel %vm2920_vm1, %v12814_v1, %v3144_v56  ;;  %v4528_v6 = vpop.f32.mrf.mxu1  ;;  %5477 = vmatprep.subr.bf16.mxu0 %v9110_v26  ;;  %v15947_v24 = vld [vmem:[#allocation211_spill] sm:$0xff] }
 0x336   :  { %4950 = vmatprep.mubr.bf16.mxu1 %v15835_v14  ;;  %vm3002_vm4 = vcmp.gt.f32.partialorder %v2778_v47, 0.0  ;;  %4808 = vmatmul.mubr.bf16.gmra.mxu0 %v3555_v31  ;;  %v2710_v34 = vadd.f32 %v15702_v8, %v2477_v18  ;;  %v3219_v11 = vmul.f32 0.2, %v2771_v48  ;;  %v4338_v7 = vadd.f32 %v12926_v12, %v12803_v63  ;;  %v13124_v31 = vpop.f32.mrf.mxu0  ;;  %v15928_v12 = vld [vmem:[#allocation197_spill] sm:$0xff] }
 0x337   :  { %4817 = vmatprep.mubr.bf16.mxu0 %v3563_v22  ;;  %v13121_v35 = vadd.f32 %v4528_v6, %v4336_v3  ;;  %vm2995_vm5 = vcmp.gt.f32.partialorder %v2771_v48, 0.0  ;;  %v4530_v49 = vpop.f32.mrf.mxu1  ;;  %5478 = vmatpush2.bf16.msra.mxu0 %v9108_v60  ;;  %v3361_v52 = vsel %vm2913_vm3, %v2689_v9, %v3137_v21  ;;  %v2703_v1 = vadd.f32 %v15702_v8, %v2474_v20  ;;  %v15929_v22 = vld [vmem:[#allocation229_spill] sm:$0xff]  ;;  %v15931_v20 = vld [vmem:[#allocation227_spill] sm:$0xff] }
 0x338   :  { %v3450_v56 = vsel %vm3002_vm4, %v2778_v47, %v3226_v13  ;;  %v13126_v18 = vadd.f32 %v4530_v49, %v4338_v7  ;;  %v3522_v29 = vpack.c.bf16 %v3368_v50, %v3361_v52  ;;  %v2485_v45 = vadd.f32 %v15929_v22, %v15928_v12  ;;  %v13134_v60 = vpop.f32.mrf.mxu0  ;;  %v15930_v21 = vld [vmem:[#allocation193_spill] sm:$0xff] }
 0x339   :  { %v13128_v43 = vpop.f32.mrf.mxu1  ;;  %v3158_v16 = vmul.f32 0.2, %v2710_v34  ;;  %v3443_v3 = vsel %vm2995_vm5, %v2771_v48, %v3219_v11  ;;  %v4344_v26 = vadd.f32 %v12984_v57, %v12803_v63  ;;  %vm2934_vm6 = vcmp.gt.f32.partialorder %v2710_v34, 0.0 }
 0x33a   :  { %v3562_v9 = vpack.c.bf16 %v3450_v56, %v3443_v3  ;;  %v2482_v13 = vadd.f32 %v15931_v20, %v15930_v21  ;;  %v3151_v50 = vmul.f32 0.2, %v2703_v1  ;;  %v4346_v6 = vadd.f32 %v13000_v41, %v12817_v0  ;;  %v13141_v7 = vpop.f32.mrf.mxu0  ;;  %v9111_v41 = vld [vmem:[%s15219_s7 + $0x80] ss:$8 sps:$4 sm:$0xff]  }
 0x33b   :  { %v4536_v47 = vpop.f32.mrf.mxu1  ;;  %15932 = vst [vmem:[#allocation153_spill] sm:$0xff] %v13141_v7  ;;  %vm2927_vm7 = vcmp.gt.f32.partialorder %v2703_v1, 0.0  ;;  %v2724_v11 = vadd.f32 %v15702_v8, %v2485_v45  ;;  %v3382_v49 = vsel %vm2934_vm6, %v2710_v34, %v3158_v16  ;;  %v4348_v52 = vadd.f32 %v13011_v32, %v12803_v63 }
 0x33c   :  { %v13143_v48 = vadd.f32 %v4536_v47, %v4344_v26  ;;  %v13156_v12 = vpop.f32.mrf.mxu0  ;;  %v2717_v3 = vadd.f32 %v15702_v8, %v2482_v13  ;;  %v3375_v45 = vsel %vm2927_vm7, %v2703_v1, %v3151_v50  ;;  %v15936_v47 = vld [vmem:[#allocation14_spill] sm:$0xff] }
 0x33d   :  { %4951 = vmatmul.mubr.bf16.gmra.mxu1 %v3522_v29  ;;  %v4538_v57 = vpop.f32.mrf.mxu1  ;;  %v9113_v29 = vld [vmem:[%s15219_s7 + $0x84] ss:$8 sps:$4 sm:$0xff]   ;;  %v3529_v32 = vpack.c.bf16 %v3382_v49, %v3375_v45  ;;  %v3172_v26 = vmul.f32 0.2, %v2724_v11  ;;  %vm2948_vm8 = vcmp.gt.f32.partialorder %v2724_v11, 0.0  ;;  %v15941_v45 = vld [vmem:[#allocation15_spill] sm:$0xff] }
 0x33e   :  { %4960 = vmatprep.mubr.bf16.mxu1 %v15835_v14  ;;  %4818 = vmatmul.mubr.bf16.gmra.mxu0 %v3562_v9  ;;  %v13148_v56 = vadd.f32 %v4538_v57, %v4346_v6  ;;  %v13161_v16 = vpop.f32.mrf.mxu0  ;;  %v15935_v9 = vld [vmem:[#allocation208_spill] sm:$0xff]  ;;  %v3165_v6 = vmul.f32 0.2, %v2717_v3  ;;  %vm2941_vm9 = vcmp.gt.f32.partialorder %v2717_v3, 0.0 }
 0x33f   :  { %v4540_v22 = vpop.f32.mrf.mxu1  ;;  %5479 = vmatprep.subr.bf16.mxu0 %v9113_v29  ;;  %v2493_v21 = vadd.f32 %v15936_v47, %v15935_v9  ;;  %v15937_v57 = vld [vmem:[#allocation204_spill] sm:$0xff]  ;;  %v3396_v1 = vsel %vm2948_vm8, %v2724_v11, %v3172_v26 }
 0x340   :  { %15933 = vst [vmem:[#allocation155_spill] sm:$0xff] %v13148_v56  ;;  %v13159_v34 = vadd.f32 %v4540_v22, %v4348_v52  ;;  %5480 = vmatpush2.bf16.msra.mxu0 %v9111_v41  ;;  %v13165_v20 = vpop.f32.mrf.mxu0  ;;  %v2490_v13 = vadd.f32 %v15938_v27, %v15937_v57  ;;  %v3389_v52 = vsel %vm2941_vm9, %v2717_v3, %v3165_v6  ;;  %v15940_v22 = vld [vmem:[#allocation206_spill] sm:$0xff]  ;;  %v15943_v57 = vld [vmem:[#allocation231_spill] sm:$0xff] }
 0x341   :  { %v2738_v50 = vadd.f32 %v15702_v8, %v2493_v21  ;;  %v3536_v29 = vpack.c.bf16 %v3396_v1, %v3389_v52  ;;  %v15942_v27 = vld [vmem:[#allocation202_spill] sm:$0xff] }
 0x342   :  { %15934 = vst [vmem:[#allocation157_spill] sm:$0xff] %v13159_v34  ;;  %v13171_v49 = vpop.f32.mrf.mxu0  ;;  %v2731_v41 = vadd.f32 %v15702_v8, %v2490_v13  ;;  %v2498_v7 = vadd.f32 %v15943_v57, %v15942_v27  ;;  %v15946_v27 = vld [vmem:[#allocation141_spill] sm:$0xff]  ;;  %v15948_v34 = vld [vmem:[#allocation16_spill] sm:$0xff] }
 0x343   :  { %15939 = vst [vmem:[#allocation87_spill] sm:$0xff] %v13171_v49  ;;  %v3186_v9 = vmul.f32 0.2, %v2738_v50  ;;  %vm2962_vm10 = vcmp.gt.f32.partialorder %v2738_v50, 0.0  ;;  %v2506_v56 = vadd.f32 %v15948_v34, %v15947_v24 }
 0x344   :  { %v3179_v11 = vmul.f32 0.2, %v2731_v41  ;;  %vm2955_vm11 = vcmp.gt.f32.partialorder %v2731_v41, 0.0  ;;  %v2745_v13 = vadd.f32 %v15702_v8, %v2498_v7 }
 0x345   :  { %4961 = vmatmul.mubr.bf16.gmra.mxu1 %v3529_v32  ;;  %v2501_v32 = vadd.f32 %v15941_v45, %v15940_v22  ;;  %v3410_v21 = vsel %vm2962_vm10, %v2738_v50, %v3186_v9  ;;  %v15945_v45 = vld [vmem:[#allocation214_spill] sm:$0xff] }
 0x346   :  { %4970 = vmatprep.mubr.bf16.mxu1 %v15835_v14  ;;  %v3403_v1 = vsel %vm2955_vm11, %v2731_v41, %v3179_v11  ;;  %v2509_v57 = vadd.f32 %v15946_v27, %v15945_v45  ;;  %v3193_v49 = vmul.f32 0.2, %v2745_v13  ;;  %vm2969_vm13 = vcmp.gt.f32.partialorder %v2745_v13, 0.0 }
 0x347   :  { %v13176_v47 = vpop.f32.mrf.mxu0  ;;  %v2752_v3 = vadd.f32 %v15702_v8, %v2501_v32  ;;  %v2759_v11 = vadd.f32 %v15702_v8, %v2506_v56  ;;  %v13211_v56 = vpop.f32.mrf.mxu1 }
 0x348   :  { %v2766_v41 = vadd.f32 %v15702_v8, %v2509_v57  ;;  %v3417_v9 = vsel %vm2969_vm13, %v2745_v13, %v3193_v49  ;;  %15950 = vst [vmem:[#allocation32_spill] sm:$0xff] %v13211_v56  ;;  %v4354_v13 = vadd.f32 %v13051_v10, %v12803_v63 }
 0x349   :  { %v13181_v26 = vpop.f32.mrf.mxu0  ;;  %v3200_v22 = vmul.f32 0.2, %v2752_v3  ;;  %vm2976_vm12 = vcmp.gt.f32.partialorder %v2752_v3, 0.0  ;;  %v3207_v34 = vmul.f32 0.2, %v2759_v11  ;;  %vm2983_vm15 = vcmp.gt.f32.partialorder %v2759_v11, 0.0 }
 0x34a   :  { %vm2990_vm14 = vcmp.gt.f32.partialorder %v2766_v41, 0.0 }
 0x34b   :  { %v13184_v6 = vpop.f32.mrf.mxu0  ;;  %v3424_v7 = vsel %vm2976_vm12, %v2752_v3, %v3200_v22  ;;  %v3431_v45 = vsel %vm2983_vm15, %v2759_v11, %v3207_v34 }
 0x34d   :  { %4971 = vmatmul.mubr.bf16.gmra.mxu1 %v3536_v29  ;;  %v13187_v52 = vpop.f32.mrf.mxu0  ;;  %v3543_v29 = vpack.c.bf16 %v3410_v21, %v3403_v1  ;;  %v3550_v1 = vpack.c.bf16 %v3424_v7, %v3417_v9 }
 0x34e   :  { %4980 = vmatprep.mubr.bf16.mxu1 %v15835_v14  ;;  %15944 = vst [vmem:[#allocation30_spill] sm:$0xff] %v13187_v52 }
 0x352   :  { %v13194_v50 = vpop.f32.mrf.mxu0 }
 0x354   :  { %v13197_v32 = vpop.f32.mrf.mxu0 }
 0x355   :  { %4981 = vmatmul.mubr.bf16.gmra.mxu1 %v3543_v29  ;;  %v3214_v29 = vmul.f32 0.2, %v2766_v41 }
 0x356   :  { %4990 = vmatprep.mubr.bf16.mxu1 %v15835_v14  ;;  %v13200_v21 = vpop.f32.mrf.mxu0 }
 0x357   :  { %v3438_v3 = vsel %vm2990_vm14, %v2766_v41, %v3214_v29  ;;  %v4356_v41 = vadd.f32 %v13059_v59, %v12817_v0 }
 0x358   :  { %v13202_v24 = vpop.f32.mrf.mxu0  ;;  %v3557_v27 = vpack.c.bf16 %v3438_v3, %v3431_v45 }
 0x359   :  { %15949 = vst [vmem:[#allocation28_spill] sm:$0xff] %v13202_v24 }
 0x35d   :  { %4991 = vmatmul.mubr.bf16.gmra.mxu1 %v3550_v1  ;;  %v13205_v22 = vpop.f32.mrf.mxu0  ;;  %v4358_v1 = vadd.f32 %v13074_v40, %v12803_v63  ;;  %v4364_v40 = vadd.f32 %v13119_v30, %v12803_v63 }
 0x35e   :  { %5000 = vmatprep.mubr.bf16.mxu1 %v15835_v14 }
 0x35f   :  { %v13207_v49 = vpop.f32.mrf.mxu0 }
 0x361   :  { %v13209_v8 = vpop.f32.mrf.mxu0 }
 0x363   :  { %v13216_v57 = vpop.f32.mrf.mxu0 }
 0x364   :  { %15951 = vst [vmem:[#allocation26_spill] sm:$0xff] %v13216_v57 }
 0x365   :  { %5001 = vmatmul.mubr.bf16.gmra.mxu1 %v3557_v27  ;;  %v4546_v7 = vpop.f32.mrf.mxu1 }
 0x366   :  { %5010 = vmatprep.mubr.bf16.mxu1 %v15835_v14  ;;  %v13220_v9 = vadd.f32 %v4546_v7, %v4354_v13  ;;  %v15954_v14 = vpack.c.bf16 %v12839_v42, %v12978_v23 }
 0x367   :  { %v4548_v11 = vpop.f32.mrf.mxu1 }
 0x368   :  { %15952 = vst [vmem:[#allocation159_spill] sm:$0xff] %v13220_v9  ;;  %v13224_v29 = vpop.f32.mrf.mxu0  ;;  %v13226_v34 = vadd.f32 %v4548_v11, %v4356_v41  ;;  %v4366_v41 = vadd.f32 %v13124_v31, %v12817_v0  ;;  %v4374_v31 = vadd.f32 %v13156_v12, %v12803_v63 }
 0x369   :  { %v4550_v10 = vpop.f32.mrf.mxu1 }
 0x36a   :  { %15953 = vst [vmem:[#allocation196_spill] sm:$0xff] %v13226_v34  ;;  %v13231_v3 = vpop.f32.mrf.mxu0  ;;  %v13233_v45 = vadd.f32 %v4550_v10, %v4358_v1  ;;  %v4368_v1 = vadd.f32 %v13134_v60, %v12803_v63  ;;  %v4376_v60 = vadd.f32 %v13161_v16, %v12817_v0  ;;  %v4384_v16 = vadd.f32 %v13176_v47, %v12803_v63 }
 0x36b   :  { %v13237_v27 = vpop.f32.mrf.mxu1 }
 0x36c   :  { %15955 = vst [vmem:[#allocation161_spill] sm:$0xff] %v13233_v45  ;;  %v13235_v59 = vpop.f32.mrf.mxu0  ;;  %15956 = vst [vmem:[#allocation29_spill] sm:$0xff] %v13237_v27 }
 0x36d   :  { %5011 = vmatmul.mubr.bf16.gmra.mxu1 %v15954_v14 }
 0x36e   :  { %v13239_v13 = vpop.f32.mrf.mxu0 }
 0x36f   :  { %15957 = vst [vmem:[#allocation165_spill] sm:$0xff] %v13239_v13 }
 0x371   :  { %v4556_v7 = vpop.f32.mrf.mxu1 }
 0x372   :  { %v13245_v42 = vadd.f32 %v4556_v7, %v4364_v40 }
 0x373   :  { %v13247_v23 = vpop.f32.mrf.mxu0  ;;  %v4558_v11 = vpop.f32.mrf.mxu1 }
 0x374   :  { %15958 = vst [vmem:[#allocation93_spill] sm:$0xff] %v13245_v42  ;;  %v13251_v14 = vadd.f32 %v4558_v11, %v4366_v41 }
 0x375   :  { %v13253_v10 = vpop.f32.mrf.mxu0  ;;  %v4560_v13 = vpop.f32.mrf.mxu1 }
 0x376   :  { %15959 = vst [vmem:[#allocation169_spill] sm:$0xff] %v13251_v14  ;;  %v13255_v57 = vadd.f32 %v4560_v13, %v4368_v1  ;;  %v4378_v13 = vadd.f32 %v13165_v20, %v12803_v63  ;;  %v4386_v20 = vadd.f32 %v13181_v26, %v12817_v0  ;;  %v4394_v26 = vadd.f32 %v13194_v50, %v12803_v63 }
 0x377   :  { %v13257_v30 = vpop.f32.mrf.mxu0  ;;  %v13259_v24 = vpop.f32.mrf.mxu1 }
 0x378   :  { %15960 = vst [vmem:[#allocation37_spill] sm:$0xff] %v13255_v57  ;;  %15961 = vst [vmem:[#allocation38_spill] sm:$0xff] %v13259_v24 }
 0x379   :  { %v13263_v40 = vpop.f32.mrf.mxu0  ;;  %v4566_v7 = vpop.f32.mrf.mxu1 }
 0x37a   :  { %15962 = vst [vmem:[#allocation36_spill] sm:$0xff] %v13263_v40  ;;  %v13267_v41 = vadd.f32 %v4566_v7, %v4374_v31 }
 0x37b   :  { %v13269_v11 = vpop.f32.mrf.mxu0  ;;  %v4568_v52 = vpop.f32.mrf.mxu1 }
 0x37c   :  { %15963 = vst [vmem:[#allocation40_spill] sm:$0xff] %v13267_v41  ;;  %v13273_v1 = vadd.f32 %v4568_v52, %v4376_v60 }
 0x37d   :  { %v13275_v57 = vpop.f32.mrf.mxu0  ;;  %v4570_v24 = vpop.f32.mrf.mxu1 }
 0x37e   :  { %15964 = vst [vmem:[#allocation163_spill] sm:$0xff] %v13273_v1  ;;  %v13277_v12 = vadd.f32 %v4570_v24, %v4378_v13  ;;  %v4388_v24 = vadd.f32 %v13184_v6, %v12803_v63  ;;  %v4396_v6 = vadd.f32 %v13197_v32, %v12817_v0  ;;  %v4404_v32 = vadd.f32 %v13205_v22, %v12803_v63 }
 0x37f   :  { %v13279_v40 = vpop.f32.mrf.mxu0  ;;  %v13281_v14 = vpop.f32.mrf.mxu1 }
 0x380   :  { %15965 = vst [vmem:[#allocation27_spill] sm:$0xff] %v13277_v12  ;;  %15966 = vst [vmem:[#allocation34_spill] sm:$0xff] %v13281_v14 }
 0x381   :  { %v13285_v31 = vpop.f32.mrf.mxu0  ;;  %v4576_v7 = vpop.f32.mrf.mxu1 }
 0x382   :  { %15967 = vst [vmem:[#allocation173_spill] sm:$0xff] %v13285_v31  ;;  %v13289_v52 = vadd.f32 %v4576_v7, %v4384_v16 }
 0x383   :  { %v13291_v60 = vpop.f32.mrf.mxu0  ;;  %v4578_v1 = vpop.f32.mrf.mxu1 }
 0x384   :  { %15968 = vst [vmem:[#allocation167_spill] sm:$0xff] %v13289_v52  ;;  %v13295_v13 = vadd.f32 %v4578_v1, %v4386_v20 }
 0x385   :  { %v13297_v12 = vpop.f32.mrf.mxu0  ;;  %v4580_v14 = vpop.f32.mrf.mxu1 }
 0x386   :  { %15969 = vst [vmem:[#allocation203_spill] sm:$0xff] %v13295_v13  ;;  %v13299_v47 = vadd.f32 %v4580_v14, %v4388_v24  ;;  %v4398_v14 = vadd.f32 %v13200_v21, %v12803_v63  ;;  %v4406_v21 = vadd.f32 %v13207_v49, %v12817_v0  ;;  %v9117_v49 = vld [vmem:[%s15221_s9 + $0x188] ss:$28 sps:$4 sm:$0xff]  }
 0x387   :  { %v13301_v31 = vpop.f32.mrf.mxu0  ;;  %v13303_v41 = vpop.f32.mrf.mxu1 }
 0x388   :  { %15970 = vst [vmem:[#allocation171_spill] sm:$0xff] %v13299_v47  ;;  %15971 = vst [vmem:[#allocation33_spill] sm:$0xff] %v13303_v41 }
 0x389   :  { %v13307_v16 = vpop.f32.mrf.mxu0 }
 0x38a   :  { %v4586_v7 = vpop.f32.mrf.mxu1 }
 0x38b   :  { %v13311_v1 = vadd.f32 %v4586_v7, %v4394_v26  ;;  %v13313_v20 = vpop.f32.mrf.mxu0 }
 0x38c   :  { %v4588_v13 = vpop.f32.mrf.mxu1 }
 0x38d   :  { %15972 = vst [vmem:[#allocation225_spill] sm:$0xff] %v13311_v1  ;;  %v13317_v24 = vadd.f32 %v4588_v13, %v4396_v6  ;;  %v13319_v47 = vpop.f32.mrf.mxu0 }
 0x38e   :  { %v4590_v41 = vpop.f32.mrf.mxu1 }
 0x38f   :  { %15973 = vst [vmem:[#allocation174_spill] sm:$0xff] %v13317_v24  ;;  %v13321_v50 = vadd.f32 %v4590_v41, %v4398_v14  ;;  %v13323_v52 = vpop.f32.mrf.mxu0  ;;  %v9116_v41 = vld [vmem:[%s15221_s9 + $0x194] ss:$28 sps:$4 sm:$0xff]   ;;  %v4408_v14 = vadd.f32 %v13209_v8, %v12803_v63  ;;  %v4414_v8 = vadd.f32 %v13224_v29, %v12803_v63 }
 0x390   :  { %v13325_v42 = vpop.f32.mrf.mxu1  ;;  %6800 = vmatprep.subr.bf16.mxu0 %v9116_v41 }
 0x391   :  { %15974 = vst [vmem:[#allocation46_spill] sm:$0xff] %v13321_v50  ;;  %15975 = vst [vmem:[#allocation48_spill] sm:$0xff] %v13325_v42  ;;  %v13329_v26 = vpop.f32.mrf.mxu0 }
 0x392   :  { %v4596_v7 = vpop.f32.mrf.mxu1 }
 0x393   :  { %v13333_v13 = vadd.f32 %v4596_v7, %v4404_v32  ;;  %v9119_v32 = vld [vmem:[%s15221_s9 + $0x18c] ss:$28 sps:$4 sm:$0xff]  }
 0x394   :  { %v13335_v6 = vpop.f32.mrf.mxu0  ;;  %v4598_v24 = vpop.f32.mrf.mxu1  ;;  %6607 = vmatprep.subr.bf16.mxu1 %v9119_v32 }
 0x395   :  { %15976 = vst [vmem:[#allocation42_spill] sm:$0xff] %v13333_v13  ;;  %v13342_v50 = vadd.f32 %v4598_v24, %v4406_v21  ;;  %6608 = vmatpush1.bf16.msra.mxu1 %v9117_v49  ;;  %v4416_v21 = vadd.f32 %v13231_v3, %v12817_v0  ;;  %v9123_v49 = vld [vmem:[%s15221_s9 + $0x150] ss:$28 sps:$4 sm:$0xff]  }
 0x396   :  { %v13344_v22 = vpop.f32.mrf.mxu0  ;;  %v4600_v42 = vpop.f32.mrf.mxu1  ;;  %v9125_v3 = vld [vmem:[%s15221_s9 + $0x154] ss:$28 sps:$4 sm:$0xff]  }
 0x397   :  { %15977 = vst [vmem:[#allocation44_spill] sm:$0xff] %v13342_v50  ;;  %v13346_v1 = vadd.f32 %v4600_v42, %v4408_v14  ;;  %v4418_v50 = vadd.f32 %v13235_v59, %v12803_v63  ;;  %v4424_v59 = vadd.f32 %v13247_v23, %v12803_v63  ;;  %6609 = vmatprep.subr.bf16.mxu1 %v9125_v3 }
 0x398   :  { %v13354_v7 = vpop.f32.mrf.mxu0  ;;  %v13356_v13 = vpop.f32.mrf.mxu1 }
 0x399   :  { %15978 = vst [vmem:[#allocation175_spill] sm:$0xff] %v13346_v1  ;;  %15979 = vst [vmem:[#allocation91_spill] sm:$0xff] %v13356_v13  ;;  %6610 = vmatpush1.bf16.msra.mxu1 %v9123_v49  ;;  %v9129_v49 = vld [vmem:[%s15221_s9 + $0x118] ss:$28 sps:$4 sm:$0xff]  }
 0x39a   :  { %v13360_v24 = vpop.f32.mrf.mxu0  ;;  %v4606_v42 = vpop.f32.mrf.mxu1 }
 0x39b   :  { %v13364_v41 = vadd.f32 %v4606_v42, %v4414_v8 }
 0x39c   :  { %v4608_v1 = vpop.f32.mrf.mxu1 }
 0x39d   :  { %15980 = vst [vmem:[#allocation201_spill] sm:$0xff] %v13364_v41  ;;  %v13366_v14 = vpop.f32.mrf.mxu0  ;;  %v13370_v13 = vadd.f32 %v4608_v1, %v4416_v21  ;;  %v4426_v21 = vadd.f32 %v13253_v10, %v12817_v0  ;;  %v4428_v41 = vadd.f32 %v13257_v30, %v12803_v63  ;;  %v9131_v10 = vld [vmem:[%s15221_s9 + $0x11c] ss:$28 sps:$4 sm:$0xff]   ;;  %v4434_v30 = vadd.f32 %v13269_v11, %v12803_v63 }
 0x39e   :  { %v4610_v29 = vpop.f32.mrf.mxu1  ;;  %6611 = vmatprep.subr.bf16.mxu1 %v9131_v10 }
 0x39f   :  { %15981 = vst [vmem:[#allocation176_spill] sm:$0xff] %v13370_v13  ;;  %v13372_v45 = vpop.f32.mrf.mxu0  ;;  %v13374_v32 = vadd.f32 %v4610_v29, %v4418_v50  ;;  %6612 = vmatpush1.bf16.msra.mxu1 %v9129_v49  ;;  %v9135_v49 = vld [vmem:[%s15221_s9 + $0xe0] ss:$28 sps:$4 sm:$0xff]  }
 0x3a0   :  { %v13384_v42 = vpop.f32.mrf.mxu1 }
 0x3a1   :  { %15982 = vst [vmem:[#allocation177_spill] sm:$0xff] %v13374_v32  ;;  %v13382_v8 = vpop.f32.mrf.mxu0  ;;  %15983 = vst [vmem:[#allocation50_spill] sm:$0xff] %v13384_v42 }
 0x3a3   :  { %v13388_v1 = vpop.f32.mrf.mxu0  ;;  %v4616_v50 = vpop.f32.mrf.mxu1 }
 0x3a4   :  { %v13392_v29 = vadd.f32 %v4616_v50, %v4424_v59 }
 0x3a5   :  { %v13394_v32 = vpop.f32.mrf.mxu0  ;;  %v4618_v13 = vpop.f32.mrf.mxu1 }
 0x3a6   :  { %15984 = vst [vmem:[#allocation54_spill] sm:$0xff] %v13392_v29  ;;  %v13398_v42 = vadd.f32 %v4618_v13, %v4426_v21  ;;  %v4436_v21 = vadd.f32 %v13275_v57, %v12817_v0  ;;  %v4438_v29 = vadd.f32 %v13279_v40, %v12803_v63  ;;  %v9137_v57 = vld [vmem:[%s15221_s9 + $0xe4] ss:$28 sps:$4 sm:$0xff]   ;;  %v15992_v63 = vld [vmem:[#allocation151_spill] sm:$0xff] }
 0x3a7   :  { %v13400_v27 = vpop.f32.mrf.mxu0  ;;  %v4620_v23 = vpop.f32.mrf.mxu1  ;;  %6613 = vmatprep.subr.bf16.mxu1 %v9137_v57  ;;  %v4670_v40 = vadd.f32 %v13291_v60, %v15992_v63  ;;  %v9143_v60 = vld [vmem:[%s15221_s9 + $0xac] ss:$28 sps:$4 sm:$0xff]   ;;  %v4674_v57 = vadd.f32 %v13301_v31, %v12938_v39 }
 0x3a8   :  { %15985 = vst [vmem:[#allocation52_spill] sm:$0xff] %v13398_v42  ;;  %v13402_v3 = vadd.f32 %v4620_v23, %v4428_v41  ;;  %6614 = vmatpush1.bf16.msra.mxu1 %v9135_v49 }
 0x3a9   :  { %v13410_v59 = vpop.f32.mrf.mxu0  ;;  %v13412_v50 = vpop.f32.mrf.mxu1  ;;  %6615 = vmatprep.subr.bf16.mxu1 %v9143_v60 }
 0x3aa   :  { %15986 = vst [vmem:[#allocation56_spill] sm:$0xff] %v13402_v3  ;;  %15987 = vst [vmem:[#allocation31_spill] sm:$0xff] %v13412_v50 }
 0x3ab   :  { %v13416_v13 = vpop.f32.mrf.mxu0 }
 0x3ac   :  { %v4626_v41 = vpop.f32.mrf.mxu1 }
 0x3ad   :  { %v13420_v23 = vadd.f32 %v4626_v41, %v4434_v30  ;;  %v13422_v3 = vpop.f32.mrf.mxu0 }
 0x3ae   :  { %v4628_v42 = vpop.f32.mrf.mxu1 }
 0x3af   :  { %15988 = vst [vmem:[#allocation25_spill] sm:$0xff] %v13420_v23  ;;  %v13426_v50 = vadd.f32 %v4628_v42, %v4436_v21  ;;  %v13428_v34 = vpop.f32.mrf.mxu0  ;;  %v4672_v21 = vadd.f32 %v13297_v12, %v12934_v61  ;;  %v9141_v23 = vld [vmem:[%s15221_s9 + $0xa8] ss:$28 sps:$4 sm:$0xff]   ;;  %v4676_v61 = vadd.f32 %v13307_v16, %v12947_v33  ;;  %v9147_v33 = vld [vmem:[%s15221_s9 + $0x70] ss:$28 sps:$4 sm:$0xff]  }
 0x3b0   :  { %v4630_v11 = vpop.f32.mrf.mxu1  ;;  %6616 = vmatpush1.bf16.msra.mxu1 %v9141_v23 }
 0x3b1   :  { %15989 = vst [vmem:[#allocation58_spill] sm:$0xff] %v13426_v50  ;;  %v13430_v10 = vadd.f32 %v4630_v11, %v4438_v29  ;;  %v13438_v30 = vpop.f32.mrf.mxu0 }
 0x3b2   :  { %v13440_v41 = vpop.f32.mrf.mxu1 }
 0x3b3   :  { %15990 = vst [vmem:[#allocation95_spill] sm:$0xff] %v13430_v10  ;;  %15991 = vst [vmem:[#allocation35_spill] sm:$0xff] %v13440_v41  ;;  %v13444_v42 = vpop.f32.mrf.mxu0 }
 0x3b5   :  { %v4862_v29 = vpop.f32.mrf.mxu1  ;;  %v13448_v10 = vpop.f32.mrf.mxu0 }
 0x3b6   :  { %v4863_v11 = vadd.f32 %v4862_v29, %v4670_v40  ;;  %15993 = vst [vmem:[#allocation97_spill] sm:$0xff] %v13448_v10 }
 0x3b7   :  { %v4864_v50 = vpop.f32.mrf.mxu1  ;;  %v13458_v49 = vpop.f32.mrf.mxu0 }
 0x3b8   :  { %v4865_v41 = vadd.f32 %v4864_v50, %v4672_v21  ;;  %15994 = vst [vmem:[#allocation60_spill] sm:$0xff] %v13458_v49  ;;  %v5085_v12 = vmul.f32 0.2, %v4863_v11  ;;  %v4680_v50 = vadd.f32 %v13313_v20, %v12949_v28  ;;  %vm5021_vm0 = vcmp.gt.f32.partialorder %v4863_v11, 0.0  ;;  %v9149_v28 = vld [vmem:[%s15221_s9 + $0x74] ss:$28 sps:$4 sm:$0xff]  }
 0x3b9   :  { %v4866_v63 = vpop.f32.mrf.mxu1  ;;  %v13462_v29 = vpop.f32.mrf.mxu0  ;;  %6617 = vmatprep.subr.bf16.mxu1 %v9149_v28 }
 0x3ba   :  { %v4867_v40 = vadd.f32 %v4866_v63, %v4674_v57  ;;  %15995 = vst [vmem:[#allocation178_spill] sm:$0xff] %v13462_v29  ;;  %v5086_v21 = vmul.f32 0.2, %v4865_v41  ;;  %vm5022_vm2 = vcmp.gt.f32.partialorder %v4865_v41, 0.0  ;;  %v5149_v20 = vsel %vm5021_vm0, %v4863_v11, %v5085_v12  ;;  %6618 = vmatpush1.bf16.msra.mxu1 %v9147_v33  ;;  %v9153_v11 = vld [vmem:[%s15221_s9 + $0x38] ss:$28 sps:$4 sm:$0xff]  }
 0x3bb   :  { %v4868_v9 = vpop.f32.mrf.mxu1  ;;  %v13466_v31 = vpop.f32.mrf.mxu0 }
 0x3bc   :  { %v4869_v56 = vadd.f32 %v4868_v9, %v4676_v61  ;;  %vm5023_vm1 = vcmp.gt.f32.partialorder %v4867_v40, 0.0  ;;  %v5087_v39 = vmul.f32 0.2, %v4867_v40  ;;  %15996 = vst [vmem:[#allocation62_spill] sm:$0xff] %v13466_v31  ;;  %v4682_v9 = vadd.f32 %v13319_v47, %v12962_v4 }
 0x3bd   :  { %v4872_v49 = vpop.f32.mrf.mxu1  ;;  %v13476_v57 = vpop.f32.mrf.mxu0  ;;  %v4684_v61 = vadd.f32 %v13323_v52, %v12964_v46  ;;  %v5150_v4 = vsel %vm5022_vm2, %v4865_v41, %v5086_v21  ;;  %v4686_v46 = vadd.f32 %v13329_v26, %v12966_v51  ;;  %v9122_v51 = vld [vmem:[%s15221_s9 + $0x15c] ss:$28 sps:$4 sm:$0xff]  }
 0x3be   :  { %vm5024_vm3 = vcmp.gt.f32.partialorder %v4869_v56, 0.0  ;;  %v5088_v16 = vmul.f32 0.2, %v4869_v56  ;;  %v4873_v60 = vadd.f32 %v4872_v49, %v4680_v50  ;;  %v5151_v23 = vsel %vm5023_vm1, %v4867_v40, %v5087_v39  ;;  %v9155_v49 = vld [vmem:[%s15221_s9 + $0x3c] ss:$28 sps:$4 sm:$0xff]  }
 0x3bf   :  { %v4874_v63 = vpop.f32.mrf.mxu1  ;;  %v5213_v31 = vpack.c.bf16 %v5151_v23, %v5149_v20  ;;  %v13483_v29 = vpop.f32.mrf.mxu0  ;;  %v9114_v39 = vld [vmem:[%s15221_s9 + $0x190] ss:$28 sps:$4 sm:$0xff]   ;;  %6619 = vmatprep.subr.bf16.mxu1 %v9155_v49  ;;  %v4692_v20 = vadd.f32 %v13344_v22, %v12972_v62  ;;  %v9159_v49 = vld [vmem:[%s15221_s9] ss:$28 sps:$4 sm:$0xff]  }
 0x3c0   :  { %v4875_v50 = vadd.f32 %v4874_v63, %v4682_v9  ;;  %v5152_v47 = vsel %vm5024_vm3, %v4869_v56, %v5088_v16  ;;  %v5089_v52 = vmul.f32 0.2, %v4873_v60  ;;  %v9161_v56 = vld [vmem:[%s15221_s9 + $0x4] ss:$28 sps:$4 sm:$0xff]   ;;  %vm5025_vm4 = vcmp.gt.f32.partialorder %v4873_v60, 0.0  ;;  %6620 = vmatpush1.bf16.msra.mxu1 %v9153_v11 }
 0x3c1   :  { %v4876_v10 = vpop.f32.mrf.mxu1  ;;  %v5214_v40 = vpack.c.bf16 %v5152_v47, %v5150_v4  ;;  %v13498_v41 = vpop.f32.mrf.mxu0  ;;  %v15997_v16 = vld [vmem:[#allocation145_spill] sm:$0xff]  ;;  %v4690_v9 = vadd.f32 %v13335_v6, %v12970_v38  ;;  %6621 = vmatprep.subr.bf16.mxu1 %v9161_v56  ;;  %v9167_v62 = vld [vmem:[%s15221_s9 + $0x34c] ss:$28 sps:$4 sm:$0xff]  }
 0x3c2   :  { %v4877_v12 = vadd.f32 %v4876_v10, %v4684_v61  ;;  %v5090_v26 = vmul.f32 0.2, %v4875_v50  ;;  %v4310_v28 = vadd.f32 %v15997_v16, %v12817_v0  ;;  %vm5026_vm6 = vcmp.gt.f32.partialorder %v4875_v50, 0.0  ;;  %v9120_v61 = vld [vmem:[%s15221_s9 + $0x158] ss:$28 sps:$4 sm:$0xff]  }
 0x3c3   :  { %v4878_v21 = vpop.f32.mrf.mxu1  ;;  %5481 = vmatprep.mubr.bf16.mxu0 %v5214_v40  ;;  %v13509_v23 = vpop.f32.mrf.mxu0  ;;  %v5153_v4 = vsel %vm5025_vm4, %v4873_v60, %v5089_v52  ;;  %v9128_v60 = vld [vmem:[%s15221_s9 + $0x124] ss:$28 sps:$4 sm:$0xff]   ;;  %v4694_v52 = vadd.f32 %v13354_v7, %v12986_v54  ;;  %v9173_v7 = vld [vmem:[%s15221_s9 + $0x314] ss:$28 sps:$4 sm:$0xff]  }
 0x3c4   :  { %vm5027_vm5 = vcmp.gt.f32.partialorder %v4877_v12, 0.0  ;;  %v5091_v10 = vmul.f32 0.2, %v4877_v12  ;;  %v4879_v33 = vadd.f32 %v4878_v21, %v4686_v46  ;;  %5482 = vmatmul.mubr.bf16.vlgmr.msra.gmra.mxu0 %v5213_v31  ;;  %v4503_v22 = vadd.f32 %v12992_v37, %v4310_v28  ;;  %6622 = vmatpush1.bf16.msra.mxu1 %v9159_v49  ;;  %v9126_v54 = vld [vmem:[%s15221_s9 + $0x120] ss:$28 sps:$4 sm:$0xff]  }
 0x3c5   :  { %v4882_v63 = vpop.f32.mrf.mxu1  ;;  %6801 = vmatpush1.bf16.msra.mxu0 %v9114_v39  ;;  %v5154_v40 = vsel %vm5026_vm6, %v4875_v50, %v5090_v26  ;;  %6623 = vmatprep.subr.bf16.mxu1 %v9167_v62  ;;  %v4700_v49 = vadd.f32 %v13366_v14, %v13013_v5  ;;  %v9132_v62 = vld [vmem:[%s15221_s9 + $0xe8] ss:$28 sps:$4 sm:$0xff]  }
 0x3c6   :  { %v5155_v38 = vsel %vm5027_vm5, %v4877_v12, %v5091_v10  ;;  %vm5028_vm7 = vcmp.gt.f32.partialorder %v4879_v33, 0.0  ;;  %v5092_v6 = vmul.f32 0.2, %v4879_v33  ;;  %v4883_v47 = vadd.f32 %v4882_v63, %v4690_v9  ;;  %v13522_v11 = vpop.f32.mrf.mxu0  ;;  %6802 = vmatprep.subr.bf16.mxu0 %v9122_v51  ;;  %v9165_v51 = vld [vmem:[%s15221_s9 + $0x348] ss:$28 sps:$4 sm:$0xff]   ;;  %v15998_v63 = vld [vmem:[#allocation23_spill] sm:$0xff] }
 0x3c7   :  { %v5215_v31 = vpack.c.bf16 %v5155_v38, %v5153_v4  ;;  %v4884_v46 = vpop.f32.mrf.mxu1  ;;  %v4696_v10 = vadd.f32 %v13360_v24, %v4503_v22  ;;  %v9134_v24 = vld [vmem:[%s15221_s9 + $0xec] ss:$28 sps:$4 sm:$0xff]   ;;  %v4702_v4 = vadd.f32 %v13372_v45, %v13030_v53  ;;  %v9179_v53 = vld [vmem:[%s15221_s9 + $0x2dc] ss:$28 sps:$4 sm:$0xff]  }
 0x3c8   :  { %v4885_v12 = vadd.f32 %v4884_v46, %v4692_v20  ;;  %v5156_v39 = vsel %vm5028_vm7, %v4879_v33, %v5092_v6  ;;  %v13530_v56 = vpop.f32.mrf.mxu0  ;;  %v5093_v16 = vmul.f32 0.2, %v4883_v47  ;;  %vm5029_vm8 = vcmp.gt.f32.partialorder %v4883_v47, 0.0  ;;  %6624 = vmatpush2.bf16.msra.mxu1 %v9165_v51  ;;  %v9171_v22 = vld [vmem:[%s15221_s9 + $0x310] ss:$28 sps:$4 sm:$0xff]  }
 0x3c9   :  { %v4886_v37 = vpop.f32.mrf.mxu1  ;;  %v5216_v21 = vpack.c.bf16 %v5156_v39, %v5154_v40  ;;  %6803 = vmatpush1.bf16.msra.mxu0 %v9120_v61  ;;  %v4320_v61 = vadd.f32 %v15998_v63, %v12817_v0  ;;  %6625 = vmatprep.subr.bf16.mxu1 %v9173_v7  ;;  %v4704_v39 = vadd.f32 %v13382_v8, %v13039_v15  ;;  %v9138_v15 = vld [vmem:[%s15221_s9 + $0xb0] ss:$28 sps:$4 sm:$0xff]   ;;  %v9185_v8 = vld [vmem:[%s15221_s9 + $0x2a4] ss:$28 sps:$4 sm:$0xff]  }
 0x3ca   :  { %v4887_v28 = vadd.f32 %v4886_v37, %v4694_v52  ;;  %v13542_v50 = vpop.f32.mrf.mxu0  ;;  %6804 = vmatprep.subr.bf16.mxu0 %v9128_v60  ;;  %v5094_v33 = vmul.f32 0.2, %v4885_v12  ;;  %vm5030_vm10 = vcmp.gt.f32.partialorder %v4885_v12, 0.0  ;;  %v5157_v46 = vsel %vm5029_vm8, %v4883_v47, %v5093_v16  ;;  %v9140_v47 = vld [vmem:[%s15221_s9 + $0xb4] ss:$28 sps:$4 sm:$0xff]   ;;  %v15999_v63 = vld [vmem:[#allocation18_spill] sm:$0xff] }
 0x3cb   :  { %v4888_v26 = vpop.f32.mrf.mxu1  ;;  %5491 = vmatprep.mubr.bf16.mxu0 %v5216_v21  ;;  %v4513_v45 = vadd.f32 %v13046_v44, %v4320_v61  ;;  %v4330_v61 = vadd.f32 %v15999_v63, %v12817_v0  ;;  %v9195_v63 = vld [vmem:[%s15221_s9 + $0x230] ss:$28 sps:$4 sm:$0xff]  }
 0x3cc   :  { %vm5031_vm9 = vcmp.gt.f32.partialorder %v4887_v28, 0.0  ;;  %v5095_v9 = vmul.f32 0.2, %v4887_v28  ;;  %v4889_v20 = vadd.f32 %v4888_v26, %v4696_v10  ;;  %v13553_v38 = vpop.f32.mrf.mxu0  ;;  %5492 = vmatmul.mubr.bf16.gmra.mxu0 %v5215_v31  ;;  %v5158_v21 = vsel %vm5030_vm10, %v4885_v12, %v5094_v33  ;;  %6626 = vmatpush2.bf16.msra.mxu1 %v9171_v22  ;;  %v9144_v22 = vld [vmem:[%s15221_s9 + $0x78] ss:$28 sps:$4 sm:$0xff]  }
 0x3cd   :  { %v4892_v6 = vpop.f32.mrf.mxu1  ;;  %6805 = vmatpush1.bf16.msra.mxu0 %v9126_v54  ;;  %v4706_v54 = vadd.f32 %v13388_v1, %v4513_v45  ;;  %6627 = vmatprep.subr.bf16.mxu1 %v9179_v53  ;;  %v9146_v1 = vld [vmem:[%s15221_s9 + $0x7c] ss:$28 sps:$4 sm:$0xff]  }
 0x3ce   :  { %v5159_v5 = vsel %vm5031_vm9, %v4887_v28, %v5095_v9  ;;  %vm5032_vm11 = vcmp.gt.f32.partialorder %v4889_v20, 0.0  ;;  %v5096_v14 = vmul.f32 0.2, %v4889_v20  ;;  %v4893_v60 = vadd.f32 %v4892_v6, %v4700_v49  ;;  %v13566_v52 = vpop.f32.mrf.mxu0  ;;  %6806 = vmatprep.subr.bf16.mxu0 %v9134_v24  ;;  %v9177_v28 = vld [vmem:[%s15221_s9 + $0x2d8] ss:$28 sps:$4 sm:$0xff]  }
 0x3cf   :  { %v5217_v31 = vpack.c.bf16 %v5159_v5, %v5157_v46  ;;  %v4894_v40 = vpop.f32.mrf.mxu1  ;;  %v4710_v49 = vadd.f32 %v13394_v32, %v13061_v17  ;;  %v9183_v46 = vld [vmem:[%s15221_s9 + $0x2a0] ss:$28 sps:$4 sm:$0xff]  }
 0x3d0   :  { %v4895_v37 = vadd.f32 %v4894_v40, %v4702_v4  ;;  %v5160_v51 = vsel %vm5032_vm11, %v4889_v20, %v5096_v14  ;;  %v13574_v10 = vpop.f32.mrf.mxu0  ;;  %v5097_v7 = vmul.f32 0.2, %v4893_v60  ;;  %vm5033_vm12 = vcmp.gt.f32.partialorder %v4893_v60, 0.0  ;;  %6628 = vmatpush2.bf16.msra.mxu1 %v9177_v28 }
 0x3d1   :  { %v4896_v44 = vpop.f32.mrf.mxu1  ;;  %v5218_v16 = vpack.c.bf16 %v5160_v51, %v5158_v21  ;;  %6807 = vmatpush1.bf16.msra.mxu0 %v9132_v62  ;;  %v4712_v4 = vadd.f32 %v13400_v27, %v13076_v36  ;;  %6629 = vmatprep.subr.bf16.mxu1 %v9185_v8  ;;  %v9191_v36 = vld [vmem:[%s15221_s9 + $0x26c] ss:$28 sps:$4 sm:$0xff]   ;;  %v4523_v27 = vadd.f32 %v13093_v2, %v4330_v61 }
 0x3d2   :  { %v4897_v26 = vadd.f32 %v4896_v44, %v4704_v39  ;;  %v13586_v12 = vpop.f32.mrf.mxu0  ;;  %6808 = vmatprep.subr.bf16.mxu0 %v9140_v47  ;;  %v5098_v33 = vmul.f32 0.2, %v4895_v37  ;;  %vm5034_vm14 = vcmp.gt.f32.partialorder %v4895_v37, 0.0  ;;  %v5161_v5 = vsel %vm5033_vm12, %v4893_v60, %v5097_v7  ;;  %v9152_v60 = vld [vmem:[%s15221_s9 + $0x44] ss:$28 sps:$4 sm:$0xff]  }
 0x3d3   :  { %v4898_v24 = vpop.f32.mrf.mxu1  ;;  %5501 = vmatprep.mubr.bf16.mxu0 %v5218_v16  ;;  %v4714_v40 = vadd.f32 %v13410_v59, %v13087_v25  ;;  %v9189_v16 = vld [vmem:[%s15221_s9 + $0x268] ss:$28 sps:$4 sm:$0xff]   ;;  %v4716_v28 = vadd.f32 %v13416_v13, %v4523_v27  ;;  %v9150_v25 = vld [vmem:[%s15221_s9 + $0x40] ss:$28 sps:$4 sm:$0xff]   ;;  %v9197_v59 = vld [vmem:[%s15221_s9 + $0x234] ss:$28 sps:$4 sm:$0xff]  }
 0x3d4   :  { %vm5035_vm13 = vcmp.gt.f32.partialorder %v4897_v26, 0.0  ;;  %v5099_v9 = vmul.f32 0.2, %v4897_v26  ;;  %v4899_v20 = vadd.f32 %v4898_v24, %v4706_v54  ;;  %v13597_v6 = vpop.f32.mrf.mxu0  ;;  %5502 = vmatmul.mubr.bf16.gmra.mxu0 %v5217_v31  ;;  %v5162_v39 = vsel %vm5034_vm14, %v4895_v37, %v5098_v33  ;;  %6630 = vmatpush2.bf16.msra.mxu1 %v9183_v46  ;;  %v9158_v13 = vld [vmem:[%s15221_s9 + $0xc] ss:$28 sps:$4 sm:$0xff]  }
 0x3d5   :  { %v4902_v62 = vpop.f32.mrf.mxu1  ;;  %6809 = vmatpush1.bf16.msra.mxu0 %v9138_v15  ;;  %6631 = vmatprep.subr.bf16.mxu1 %v9191_v36  ;;  %v4720_v33 = vadd.f32 %v13422_v3, %v13105_v55  ;;  %v4724_v46 = vadd.f32 %v13438_v30, %v13126_v18  ;;  %v9170_v30 = vld [vmem:[%s15221_s9 + $0x31c] ss:$28 sps:$4 sm:$0xff]  }
 0x3d6   :  { %v5163_v17 = vsel %vm5035_vm13, %v4897_v26, %v5099_v9  ;;  %vm5036_vm15 = vcmp.gt.f32.partialorder %v4899_v20, 0.0  ;;  %v5100_v32 = vmul.f32 0.2, %v4899_v20  ;;  %v4903_v53 = vadd.f32 %v4902_v62, %v4710_v49  ;;  %v13610_v45 = vpop.f32.mrf.mxu0  ;;  %6810 = vmatprep.subr.bf16.mxu0 %v9146_v1 }
 0x3d7   :  { %v5219_v14 = vpack.c.bf16 %v5163_v17, %v5161_v5  ;;  %v4904_v31 = vpop.f32.mrf.mxu1  ;;  %v4340_v1 = vadd.f32 %v12943_v58, %v12817_v0  ;;  %v4722_v9 = vadd.f32 %v13428_v34, %v13121_v35  ;;  %v9156_v58 = vld [vmem:[%s15221_s9 + $0x8] ss:$28 sps:$4 sm:$0xff]  }
 0x3d8   :  { %v4905_v47 = vadd.f32 %v4904_v31, %v4712_v4  ;;  %v5164_v21 = vsel %vm5036_vm15, %v4899_v20, %v5100_v32  ;;  %v13618_v51 = vpop.f32.mrf.mxu0  ;;  %v5101_v54 = vmul.f32 0.2, %v4903_v53  ;;  %vm5037_vm0 = vcmp.gt.f32.partialorder %v4903_v53, 0.0  ;;  %6632 = vmatpush2.bf16.msra.mxu1 %v9189_v16  ;;  %v9162_v31 = vld [vmem:[%s15221_s9 + $0x350] ss:$28 sps:$4 sm:$0xff]   ;;  %v16002_v16 = vld [vmem:[#allocation60_spill] sm:$0xff] }
 0x3d9   :  { %v4906_v2 = vpop.f32.mrf.mxu1  ;;  %v5220_v44 = vpack.c.bf16 %v5164_v21, %v5162_v39  ;;  %6811 = vmatpush1.bf16.msra.mxu0 %v9144_v22  ;;  %6633 = vmatprep.subr.bf16.mxu1 %v9197_v59  ;;  %v4533_v55 = vadd.f32 %v13128_v43, %v4340_v1  ;;  %v9164_v22 = vld [vmem:[%s15221_s9 + $0x354] ss:$28 sps:$4 sm:$0xff]   ;;  %v4350_v39 = vadd.f32 %v13028_v19, %v12817_v0  ;;  %v16000_v21 = vld [vmem:[#allocation97_spill] sm:$0xff]  ;;  %v16003_v19 = vld [vmem:[#allocation32_spill] sm:$0xff] }
 0x3da   :  { %v4907_v7 = vadd.f32 %v4906_v2, %v4714_v40  ;;  %v13630_v37 = vpop.f32.mrf.mxu0  ;;  %6812 = vmatprep.subr.bf16.mxu0 %v9152_v60  ;;  %v5102_v15 = vmul.f32 0.2, %v4905_v47  ;;  %vm5038_vm2 = vcmp.gt.f32.partialorder %v4905_v47, 0.0  ;;  %v5165_v61 = vsel %vm5037_vm0, %v4903_v53, %v5101_v54  ;;  %v9176_v1 = vld [vmem:[%s15221_s9 + $0x2e4] ss:$28 sps:$4 sm:$0xff]  }
 0x3db   :  { %v4908_v26 = vpop.f32.mrf.mxu1  ;;  %5511 = vmatprep.mubr.bf16.mxu0 %v5220_v44  ;;  %v4726_v43 = vadd.f32 %v13444_v42, %v4533_v55  ;;  %v4730_v2 = vadd.f32 %v16000_v21, %v13143_v48  ;;  %v16001_v44 = vld [vmem:[#allocation155_spill] sm:$0xff]  ;;  %v16006_v55 = vld [vmem:[#allocation62_spill] sm:$0xff] }
 0x3dc   :  { %vm5039_vm1 = vcmp.gt.f32.partialorder %v4907_v7, 0.0  ;;  %v5103_v8 = vmul.f32 0.2, %v4907_v7  ;;  %v4909_v24 = vadd.f32 %v4908_v26, %v4716_v28  ;;  %5512 = vmatmul.mubr.bf16.gmra.mxu0 %v5219_v14  ;;  %v13649_v34 = vpop.f32.mrf.mxu0  ;;  %v5166_v17 = vsel %vm5038_vm2, %v4905_v47, %v5102_v15  ;;  %6634 = vmatpush2.bf16.msra.mxu1 %v9195_v63  ;;  %v9168_v26 = vld [vmem:[%s15221_s9 + $0x318] ss:$28 sps:$4 sm:$0xff]  }
 0x3dd   :  { %v4912_v20 = vpop.f32.mrf.mxu1  ;;  %6813 = vmatpush1.bf16.msra.mxu0 %v9150_v25  ;;  %v4732_v28 = vadd.f32 %v16002_v16, %v16001_v44  ;;  %v9180_v21 = vld [vmem:[%s15221_s9 + $0x2a8] ss:$28 sps:$4 sm:$0xff]  }
 0x3de   :  { %v5167_v49 = vsel %vm5039_vm1, %v4907_v7, %v5103_v8  ;;  %vm5040_vm3 = vcmp.gt.f32.partialorder %v4909_v24, 0.0  ;;  %v5104_v4 = vmul.f32 0.2, %v4909_v24  ;;  %v4913_v3 = vadd.f32 %v4912_v20, %v4720_v33  ;;  %6814 = vmatprep.subr.bf16.mxu0 %v9158_v13  ;;  %v13661_v60 = vpop.f32.mrf.mxu0  ;;  %v16004_v33 = vld [vmem:[#allocation157_spill] sm:$0xff] }
 0x3df   :  { %v5221_v35 = vpack.c.bf16 %v5167_v49, %v5165_v61  ;;  %v4914_v62 = vpop.f32.mrf.mxu1  ;;  %v4543_v13 = vadd.f32 %v16003_v19, %v4350_v39 }
 0x3e0   :  { %v4915_v5 = vadd.f32 %v4914_v62, %v4722_v9  ;;  %v5168_v32 = vsel %vm5040_vm3, %v4909_v24, %v5104_v4  ;;  %v5105_v14 = vmul.f32 0.2, %v4913_v3  ;;  %vm5041_vm4 = vcmp.gt.f32.partialorder %v4913_v3, 0.0  ;;  %v13677_v15 = vpop.f32.mrf.mxu0  ;;  %v16005_v9 = vld [vmem:[#allocation178_spill] sm:$0xff] }
 0x3e1   :  { %v4916_v36 = vpop.f32.mrf.mxu1  ;;  %v5222_v27 = vpack.c.bf16 %v5168_v32, %v5166_v17  ;;  %6815 = vmatpush1.bf16.msra.mxu0 %v9156_v58  ;;  %v4734_v20 = vadd.f32 %v16005_v9, %v16004_v33  ;;  %v9186_v33 = vld [vmem:[%s15221_s9 + $0x270] ss:$28 sps:$4 sm:$0xff]  }
 0x3e2   :  { %v4917_v53 = vadd.f32 %v4916_v36, %v4724_v46  ;;  %6816 = vmatprep.subr.bf16.mxu0 %v9164_v22  ;;  %v5106_v40 = vmul.f32 0.2, %v4915_v5  ;;  %vm5042_vm6 = vcmp.gt.f32.partialorder %v4915_v5, 0.0  ;;  %v5169_v7 = vsel %vm5041_vm4, %v4913_v3, %v5105_v14  ;;  %v9174_v22 = vld [vmem:[%s15221_s9 + $0x2e0] ss:$28 sps:$4 sm:$0xff]   ;;  %v13689_v46 = vpop.f32.mrf.mxu0 }
 0x3e3   :  { %v4918_v18 = vpop.f32.mrf.mxu1  ;;  %5521 = vmatprep.mubr.bf16.mxu0 %v5222_v27 }
 0x3e4   :  { %vm5043_vm5 = vcmp.gt.f32.partialorder %v4917_v53, 0.0  ;;  %v5107_v42 = vmul.f32 0.2, %v4917_v53  ;;  %v4919_v47 = vadd.f32 %v4918_v18, %v4726_v43  ;;  %5522 = vmatmul.mubr.bf16.gmra.mxu0 %v5221_v35  ;;  %v5170_v61 = vsel %vm5042_vm6, %v4915_v5, %v5106_v40  ;;  %v9182_v5 = vld [vmem:[%s15221_s9 + $0x2ac] ss:$28 sps:$4 sm:$0xff]   ;;  %v16009_v18 = vld [vmem:[#allocation196_spill] sm:$0xff]  ;;  %v13704_v16 = vpop.f32.mrf.mxu0 }
 0x3e5   :  { %v4922_v54 = vpop.f32.mrf.mxu1  ;;  %6817 = vmatpush2.bf16.msra.mxu0 %v9162_v31  ;;  %v4736_v35 = vadd.f32 %v16006_v55, %v4543_v13  ;;  %v16007_v43 = vld [vmem:[#allocation198_spill] sm:$0xff] }
 0x3e6   :  { %v5171_v25 = vsel %vm5043_vm5, %v4917_v53, %v5107_v42  ;;  %vm5044_vm7 = vcmp.gt.f32.partialorder %v4919_v47, 0.0  ;;  %v5108_v59 = vmul.f32 0.2, %v4919_v47  ;;  %v4923_v8 = vadd.f32 %v4922_v54, %v4730_v2  ;;  %6818 = vmatprep.subr.bf16.mxu0 %v9170_v30  ;;  %v16008_v53 = vld [vmem:[#allocation159_spill] sm:$0xff]  ;;  %v16010_v2 = vld [vmem:[#allocation29_spill] sm:$0xff]  ;;  %v13716_v9 = vpop.f32.mrf.mxu0 }
 0x3e7   :  { %v5223_v48 = vpack.c.bf16 %v5171_v25, %v5169_v7  ;;  %v4924_v24 = vpop.f32.mrf.mxu1  ;;  %v4360_v14 = vadd.f32 %v16007_v43, %v12817_v0  ;;  %v4740_v31 = vadd.f32 %v13476_v57, %v16008_v53  ;;  %v4742_v30 = vadd.f32 %v13483_v29, %v16009_v18  ;;  %v9188_v29 = vld [vmem:[%s15221_s9 + $0x274] ss:$28 sps:$4 sm:$0xff]   ;;  %v16011_v7 = vld [vmem:[#allocation161_spill] sm:$0xff] }
 0x3e8   :  { %v4925_v63 = vadd.f32 %v4924_v24, %v4732_v28  ;;  %v5172_v49 = vsel %vm5044_vm7, %v4919_v47, %v5108_v59  ;;  %v5109_v3 = vmul.f32 0.2, %v4923_v8  ;;  %vm5045_vm8 = vcmp.gt.f32.partialorder %v4923_v8, 0.0  ;;  %v13731_v43 = vpop.f32.mrf.mxu0 }
 0x3e9   :  { %v4926_v4 = vpop.f32.mrf.mxu1  ;;  %v5224_v58 = vpack.c.bf16 %v5172_v49, %v5170_v61  ;;  %6819 = vmatpush2.bf16.msra.mxu0 %v9168_v26  ;;  %v4553_v44 = vadd.f32 %v16010_v2, %v4360_v14  ;;  %v4744_v25 = vadd.f32 %v13498_v41, %v16011_v7  ;;  %v9194_v41 = vld [vmem:[%s15221_s9 + $0x23c] ss:$28 sps:$4 sm:$0xff]   ;;  %v16012_v49 = vld [vmem:[#allocation153_spill] sm:$0xff] }
 0x3ea   :  { %v4927_v62 = vadd.f32 %v4926_v4, %v4734_v20  ;;  %6820 = vmatprep.subr.bf16.mxu0 %v9176_v1  ;;  %v5110_v32 = vmul.f32 0.2, %v4925_v63  ;;  %vm5046_vm10 = vcmp.gt.f32.partialorder %v4925_v63, 0.0  ;;  %v5173_v42 = vsel %vm5045_vm8, %v4923_v8, %v5109_v3 }
 0x3eb   :  { %v4928_v17 = vpop.f32.mrf.mxu1  ;;  %5531 = vmatprep.mubr.bf16.mxu0 %v5224_v58  ;;  %v4746_v8 = vadd.f32 %v13509_v23, %v4553_v44  ;;  %v4370_v4 = vadd.f32 %v16012_v49, %v12817_v0  ;;  %v16013_v58 = vld [vmem:[#allocation93_spill] sm:$0xff]  ;;  %v16021_v49 = vld [vmem:[#allocation27_spill] sm:$0xff] }
 0x3ec   :  { %vm5047_vm9 = vcmp.gt.f32.partialorder %v4927_v62, 0.0  ;;  %v5111_v36 = vmul.f32 0.2, %v4927_v62  ;;  %v4929_v27 = vadd.f32 %v4928_v17, %v4736_v35  ;;  %5532 = vmatmul.mubr.bf16.gmra.mxu0 %v5223_v48  ;;  %v5174_v26 = vsel %vm5046_vm10, %v4925_v63, %v5110_v32  ;;  %v16014_v35 = vld [vmem:[#allocation169_spill] sm:$0xff]  ;;  %v9192_v32 = vld [vmem:[%s15221_s9 + $0x238] ss:$28 sps:$4 sm:$0xff]  }
 0x3ed   :  { %v4932_v40 = vpop.f32.mrf.mxu1  ;;  %6821 = vmatpush2.bf16.msra.mxu0 %v9174_v22  ;;  %v4750_v55 = vadd.f32 %v13522_v11, %v16013_v58  ;;  %v4752_v3 = vadd.f32 %v13530_v56, %v16014_v35  ;;  %v9200_v56 = vld [vmem:[%s15221_s9 + $0x204] ss:$28 sps:$4 sm:$0xff]  }
 0x3ee   :  { %v5175_v47 = vsel %vm5047_vm9, %v4927_v62, %v5111_v36  ;;  %vm5048_vm11 = vcmp.gt.f32.partialorder %v4929_v27, 0.0  ;;  %v5112_v39 = vmul.f32 0.2, %v4929_v27  ;;  %v4933_v28 = vadd.f32 %v4932_v40, %v4740_v31  ;;  %6822 = vmatprep.subr.bf16.mxu0 %v9182_v5  ;;  %v16015_v36 = vld [vmem:[#allocation38_spill] sm:$0xff]  ;;  %v16016_v31 = vld [vmem:[#allocation37_spill] sm:$0xff] }
 0x3ef   :  { %v5225_v57 = vpack.c.bf16 %v5175_v47, %v5173_v42  ;;  %v4934_v54 = vpop.f32.mrf.mxu1  ;;  %v4754_v18 = vadd.f32 %v13542_v50, %v16016_v31 }
 0x3f0   :  { %v4935_v59 = vadd.f32 %v4934_v54, %v4742_v30  ;;  %v5176_v19 = vsel %vm5048_vm11, %v4929_v27, %v5112_v39  ;;  %v5113_v24 = vmul.f32 0.2, %v4933_v28  ;;  %vm5049_vm12 = vcmp.gt.f32.partialorder %v4933_v28, 0.0 }
 0x3f1   :  { %v4936_v13 = vpop.f32.mrf.mxu1  ;;  %v5226_v48 = vpack.c.bf16 %v5176_v19, %v5174_v26  ;;  %6823 = vmatpush2.bf16.msra.mxu0 %v9180_v21  ;;  %v4563_v27 = vadd.f32 %v16015_v36, %v4370_v4  ;;  %v16019_v19 = vld [vmem:[#allocation163_spill] sm:$0xff] }
 0x3f2   :  { %v4937_v1 = vadd.f32 %v4936_v13, %v4744_v25  ;;  %6824 = vmatprep.subr.bf16.mxu0 %v9188_v29  ;;  %v5114_v63 = vmul.f32 0.2, %v4935_v59  ;;  %vm5050_vm14 = vcmp.gt.f32.partialorder %v4935_v59, 0.0  ;;  %v5177_v22 = vsel %vm5049_vm12, %v4933_v28, %v5113_v24  ;;  %v13743_v28 = vpop.f32.mrf.mxu0  ;;  %v16017_v25 = vld [vmem:[#allocation87_spill] sm:$0xff] }
 0x3f3   :  { %v4938_v20 = vpop.f32.mrf.mxu1  ;;  %5541 = vmatprep.mubr.bf16.mxu0 %v5226_v48  ;;  %v4756_v21 = vadd.f32 %v13553_v38, %v4563_v27  ;;  %v4380_v38 = vadd.f32 %v16017_v25, %v12817_v0  ;;  %v4762_v13 = vadd.f32 %v13574_v10, %v16019_v19  ;;  %v16027_v19 = vld [vmem:[#allocation225_spill] sm:$0xff] }
 0x3f4   :  { %vm5051_vm13 = vcmp.gt.f32.partialorder %v4937_v1, 0.0  ;;  %v5115_v23 = vmul.f32 0.2, %v4937_v1  ;;  %v4939_v61 = vadd.f32 %v4938_v20, %v4746_v8  ;;  %5542 = vmatmul.mubr.bf16.gmra.mxu0 %v5225_v57  ;;  %v5178_v40 = vsel %vm5050_vm14, %v4935_v59, %v5114_v63  ;;  %v9198_v57 = vld [vmem:[%s15221_s9 + $0x200] ss:$28 sps:$4 sm:$0xff]  }
 0x3f5   :  { %v4942_v62 = vpop.f32.mrf.mxu1  ;;  %6825 = vmatpush2.bf16.msra.mxu0 %v9186_v33  ;;  %v16018_v59 = vld [vmem:[#allocation40_spill] sm:$0xff]  ;;  %v16020_v33 = vld [vmem:[#allocation34_spill] sm:$0xff] }
 0x3f6   :  { %v5179_v17 = vsel %vm5051_vm13, %v4937_v1, %v5115_v23  ;;  %vm5052_vm15 = vcmp.gt.f32.partialorder %v4939_v61, 0.0  ;;  %v5116_v5 = vmul.f32 0.2, %v4939_v61  ;;  %v4943_v14 = vadd.f32 %v4942_v62, %v4750_v55  ;;  %6826 = vmatprep.subr.bf16.mxu0 %v9194_v41  ;;  %v13752_v41 = vpop.f32.mrf.mxu0 }
 0x3f7   :  { %v5227_v11 = vpack.c.bf16 %v5179_v17, %v5177_v22  ;;  %v4944_v53 = vpop.f32.mrf.mxu1  ;;  %v4760_v26 = vadd.f32 %v13566_v52, %v16018_v59  ;;  %v4573_v20 = vadd.f32 %v16020_v33, %v4380_v38  ;;  %v4764_v52 = vadd.f32 %v13586_v12, %v16021_v49  ;;  %v16022_v12 = vld [vmem:[#allocation30_spill] sm:$0xff]  ;;  %v16028_v33 = vld [vmem:[#allocation28_spill] sm:$0xff] }
 0x3f8   :  { %v4945_v30 = vadd.f32 %v4944_v53, %v4752_v3  ;;  %v5180_v42 = vsel %vm5052_vm15, %v4939_v61, %v5116_v5  ;;  %v5117_v2 = vmul.f32 0.2, %v4943_v14  ;;  %vm5053_vm0 = vcmp.gt.f32.partialorder %v4943_v14, 0.0  ;;  %v13757_v17 = vpop.f32.mrf.mxu0 }
 0x3f9   :  { %v4946_v47 = vpop.f32.mrf.mxu1  ;;  %v5228_v39 = vpack.c.bf16 %v5180_v42, %v5178_v40  ;;  %6827 = vmatpush2.bf16.msra.mxu0 %v9192_v32  ;;  %v4766_v3 = vadd.f32 %v13597_v6, %v4573_v20  ;;  %v16025_v42 = vld [vmem:[#allocation33_spill] sm:$0xff]  ;;  %v4400_v20 = vadd.f32 %v16028_v33, %v12817_v0 }
 0x3fa   :  { %v4947_v44 = vadd.f32 %v4946_v47, %v4754_v18  ;;  %6828 = vmatprep.subr.bf16.mxu0 %v9200_v56  ;;  %v5118_v50 = vmul.f32 0.2, %v4945_v30  ;;  %vm5054_vm2 = vcmp.gt.f32.partialorder %v4945_v30, 0.0  ;;  %v5181_v8 = vsel %vm5053_vm0, %v4943_v14, %v5117_v2  ;;  %v16023_v14 = vld [vmem:[#allocation167_spill] sm:$0xff] }
 0x3fb   :  { %v4948_v54 = vpop.f32.mrf.mxu1  ;;  %5551 = vmatprep.mubr.bf16.mxu0 %v5228_v39  ;;  %v4770_v53 = vadd.f32 %v13610_v45, %v16023_v14  ;;  %v16024_v56 = vld [vmem:[#allocation203_spill] sm:$0xff]  ;;  %v13766_v39 = vpop.f32.mrf.mxu0  ;;  %v9206_v14 = vld [vmem:[%s15221_s9 + $0x1cc] ss:$28 sps:$4 sm:$0xff]  }
 0x3fc   :  { %vm5055_vm1 = vcmp.gt.f32.partialorder %v4947_v44, 0.0  ;;  %v5119_v29 = vmul.f32 0.2, %v4947_v44  ;;  %v4949_v7 = vadd.f32 %v4948_v54, %v4756_v21  ;;  %5552 = vmatmul.mubr.bf16.gmra.mxu0 %v5227_v11  ;;  %v5182_v10 = vsel %vm5054_vm2, %v4945_v30, %v5118_v50 }
 0x3fd   :  { %v4952_v48 = vpop.f32.mrf.mxu1  ;;  %6829 = vmatpush2.bf16.msra.mxu0 %v9198_v57  ;;  %v4390_v11 = vadd.f32 %v16022_v12, %v12817_v0  ;;  %v4772_v6 = vadd.f32 %v13618_v51, %v16024_v56  ;;  %v16026_v57 = vld [vmem:[#allocation171_spill] sm:$0xff] }
 0x3fe   :  { %v5183_v24 = vsel %vm5055_vm1, %v4947_v44, %v5119_v29  ;;  %vm5056_vm3 = vcmp.gt.f32.partialorder %v4949_v7, 0.0  ;;  %v5120_v1 = vmul.f32 0.2, %v4949_v7  ;;  %v4953_v23 = vadd.f32 %v4952_v48, %v4760_v26  ;;  %v9201_v26 = vld [vmem:[%s15221_s9 + $0x1f8] ss:$28 sps:$4 sm:$0xff]   ;;  %v13776_v48 = vpop.f32.mrf.mxu0  ;;  %6830 = vmatprep.subr.bf16.mxu0 %v9206_v14 }
 0x3ff   :  { %v5229_v63 = vpack.c.bf16 %v5183_v24, %v5181_v8  ;;  %v4954_v61 = vpop.f32.mrf.mxu1  ;;  %v4583_v47 = vadd.f32 %v16025_v42, %v4390_v11  ;;  %v4774_v45 = vadd.f32 %v13630_v37, %v16026_v57  ;;  %v9203_v8 = vld [vmem:[%s15221_s9 + $0x1fc] ss:$28 sps:$4 sm:$0xff]   ;;  %v9204_v11 = vld [vmem:[%s15221_s9 + $0x1c8] ss:$28 sps:$4 sm:$0xff]  }
 0x400   :  { %v4955_v4 = vadd.f32 %v4954_v61, %v4762_v13  ;;  %v5184_v58 = vsel %vm5056_vm3, %v4949_v7, %v5120_v1  ;;  %v5121_v62 = vmul.f32 0.2, %v4953_v23  ;;  %vm5057_vm4 = vcmp.gt.f32.partialorder %v4953_v23, 0.0  ;;  %6635 = vmatprep.subr.bf16.mxu1 %v9203_v8 }
 0x401   :  { %v4956_v55 = vpop.f32.mrf.mxu1  ;;  %v5230_v35 = vpack.c.bf16 %v5184_v58, %v5182_v10  ;;  %v4776_v38 = vadd.f32 %v13649_v34, %v4583_v47  ;;  %v4780_v13 = vadd.f32 %v13661_v60, %v16027_v19  ;;  %6636 = vmatpush2.bf16.msra.mxu1 %v9201_v26  ;;  %v16030_v10 = vld [vmem:[#allocation48_spill] sm:$0xff]  ;;  %6831 = vmatpush2.bf16.msra.mxu0 %v9204_v11  ;;  %v16036_v26 = vld [vmem:[#allocation175_spill] sm:$0xff]  ;;  %v16041_v11 = vld [vmem:[#allocation177_spill] sm:$0xff] }
 0x402   :  { %v4957_v22 = vadd.f32 %v4956_v55, %v4764_v52  ;;  %v5122_v32 = vmul.f32 0.2, %v4955_v4  ;;  %vm5058_vm6 = vcmp.gt.f32.partialorder %v4955_v4, 0.0  ;;  %v5185_v18 = vsel %vm5057_vm4, %v4953_v23, %v5121_v62  ;;  %v13786_v55 = vpop.f32.mrf.mxu0  ;;  %v16031_v62 = vld [vmem:[#allocation46_spill] sm:$0xff] }
 0x403   :  { %v4958_v5 = vpop.f32.mrf.mxu1  ;;  %5561 = vmatprep.mubr.bf16.mxu0 %v5230_v35  ;;  %v4593_v58 = vadd.f32 %v16030_v10, %v4400_v20  ;;  %v4794_v19 = vadd.f32 %v13743_v28, %v16036_v26  ;;  %v9214_v28 = vld [vmem:[%s15221_s9 + $0x19c] ss:$28 sps:$4 sm:$0xff]   ;;  %v16038_v10 = vld [vmem:[#allocation165_spill] sm:$0xff]  ;;  %v4804_v14 = vadd.f32 %v13776_v48, %v16041_v11 }
 0x404   :  { %vm5059_vm5 = vcmp.gt.f32.partialorder %v4957_v22, 0.0  ;;  %v5123_v36 = vmul.f32 0.2, %v4957_v22  ;;  %v4959_v27 = vadd.f32 %v4958_v5, %v4766_v3  ;;  %5562 = vmatmul.mubr.bf16.gmra.mxu0 %v5229_v63  ;;  %v5186_v50 = vsel %vm5058_vm6, %v4955_v4, %v5122_v32  ;;  %v16029_v63 = vld [vmem:[#allocation174_spill] sm:$0xff] }
 0x405   :  { %v4962_v31 = vpop.f32.mrf.mxu1  ;;  %v4782_v23 = vadd.f32 %v13677_v15, %v16029_v63  ;;  %v16037_v63 = vld [vmem:[#allocation201_spill] sm:$0xff] }
 0x406   :  { %v5187_v30 = vsel %vm5059_vm5, %v4957_v22, %v5123_v36  ;;  %vm5060_vm7 = vcmp.gt.f32.partialorder %v4959_v27, 0.0  ;;  %v5124_v40 = vmul.f32 0.2, %v4959_v27  ;;  %v4963_v2 = vadd.f32 %v4962_v31, %v4770_v53 }
 0x407   :  { %v5231_v21 = vpack.c.bf16 %v5187_v30, %v5185_v18  ;;  %v4964_v44 = vpop.f32.mrf.mxu1  ;;  %v4784_v22 = vadd.f32 %v13689_v46, %v16031_v62  ;;  %v4786_v53 = vadd.f32 %v13704_v16, %v4593_v58  ;;  %v9207_v46 = vld [vmem:[%s15221_s9 + $0x1c0] ss:$28 sps:$4 sm:$0xff]   ;;  %v13802_v18 = vpop.f32.mrf.mxu0 }
 0x408   :  { %v4965_v54 = vadd.f32 %v4964_v44, %v4772_v6  ;;  %v5188_v51 = vsel %vm5060_vm7, %v4959_v27, %v5124_v40  ;;  %v5125_v29 = vmul.f32 0.2, %v4963_v2  ;;  %vm5061_vm8 = vcmp.gt.f32.partialorder %v4963_v2, 0.0  ;;  %v16032_v6 = vld [vmem:[#allocation42_spill] sm:$0xff]  ;;  %v9209_v40 = vld [vmem:[%s15221_s9 + $0x1c4] ss:$28 sps:$4 sm:$0xff]  }
 0x409   :  { %v4966_v7 = vpop.f32.mrf.mxu1  ;;  %v5232_v25 = vpack.c.bf16 %v5188_v51, %v5186_v50  ;;  %v4790_v31 = vadd.f32 %v13716_v9, %v16032_v6  ;;  %v16034_v44 = vld [vmem:[#allocation44_spill] sm:$0xff]  ;;  %6637 = vmatprep.subr.bf16.mxu1 %v9209_v40 }
 0x40a   :  { %v4967_v59 = vadd.f32 %v4966_v7, %v4774_v45  ;;  %v5126_v24 = vmul.f32 0.2, %v4965_v54  ;;  %v5189_v61 = vsel %vm5061_vm8, %v4963_v2, %v5125_v29  ;;  %vm5062_vm10 = vcmp.gt.f32.partialorder %v4965_v54, 0.0  ;;  %6638 = vmatpush2.bf16.msra.mxu1 %v9207_v46  ;;  %v16035_v29 = vld [vmem:[#allocation91_spill] sm:$0xff]  ;;  %v16039_v58 = vld [vmem:[#allocation176_spill] sm:$0xff] }
 0x40b   :  { %v4968_v37 = vpop.f32.mrf.mxu1  ;;  %5571 = vmatprep.mubr.bf16.mxu0 %v5232_v25  ;;  %v4792_v9 = vadd.f32 %v13731_v43, %v16034_v44  ;;  %v4811_v25 = vpop.f32.mrf.mxu0  ;;  %6993 = vmatprep.subr.bf16.mxu1 %v9214_v28 }
 0x40c   :  { %vm5063_vm9 = vcmp.gt.f32.partialorder %v4967_v59, 0.0  ;;  %v5127_v34 = vmul.f32 0.2, %v4967_v59  ;;  %v4969_v1 = vadd.f32 %v4968_v37, %v4776_v38  ;;  %5572 = vmatmul.mubr.bf16.gmra.mxu0 %v5231_v21  ;;  %v5190_v5 = vsel %vm5062_vm10, %v4965_v54, %v5126_v24  ;;  %v16033_v21 = vld [vmem:[#allocation26_spill] sm:$0xff] }
 0x40d   :  { %v4972_v60 = vpop.f32.mrf.mxu1  ;;  %v4410_v2 = vadd.f32 %v16033_v21, %v12817_v0 }
 0x40e   :  { %v5191_v49 = vsel %vm5063_vm9, %v4967_v59, %v5127_v34  ;;  %vm5064_vm11 = vcmp.gt.f32.partialorder %v4969_v1, 0.0  ;;  %v5128_v52 = vmul.f32 0.2, %v4969_v1  ;;  %v4973_v4 = vadd.f32 %v4972_v60, %v4780_v13 }
 0x40f   :  { %v5233_v35 = vpack.c.bf16 %v5191_v49, %v5189_v61  ;;  %v4974_v3 = vpop.f32.mrf.mxu1  ;;  %v4603_v7 = vadd.f32 %v16035_v29, %v4410_v2  ;;  %v4813_v61 = vpop.f32.mrf.mxu0 }
 0x410   :  { %v4975_v15 = vadd.f32 %v4974_v3, %v4782_v23  ;;  %v5192_v32 = vsel %vm5064_vm11, %v4969_v1, %v5128_v52  ;;  %v5129_v36 = vmul.f32 0.2, %v4973_v4  ;;  %vm5065_vm12 = vcmp.gt.f32.partialorder %v4973_v4, 0.0  ;;  %v9210_v1 = vld [vmem:[%s15221_s9 + $0x360] ss:$28 sps:$4 sm:$0xff]  }
 0x411   :  { %v4976_v27 = vpop.f32.mrf.mxu1  ;;  %v5234_v12 = vpack.c.bf16 %v5192_v32, %v5190_v5  ;;  %v4796_v33 = vadd.f32 %v13752_v41, %v4603_v7  ;;  %v4800_v23 = vadd.f32 %v13757_v17, %v16037_v63  ;;  %8474 = vmatprep.subr.bf16.mxu0 %v9210_v1  ;;  %v4420_v41 = vadd.f32 %v16038_v10, %v12817_v0  ;;  %v16040_v5 = vld [vmem:[#allocation50_spill] sm:$0xff]  ;;  %v16045_v7 = vld [vmem:[#allocation31_spill] sm:$0xff]  ;;  %v16047_v63 = vld [vmem:[#allocation25_spill] sm:$0xff] }
 0x412   :  { %v4977_v56 = vadd.f32 %v4976_v27, %v4784_v22  ;;  %v5130_v42 = vmul.f32 0.2, %v4975_v15  ;;  %v5193_v57 = vsel %vm5065_vm12, %v4973_v4, %v5129_v36  ;;  %vm5066_vm14 = vcmp.gt.f32.partialorder %v4975_v15, 0.0  ;;  %v4815_v36 = vpop.f32.mrf.mxu0 }
 0x413   :  { %v4978_v30 = vpop.f32.mrf.mxu1  ;;  %5581 = vmatprep.mubr.bf16.mxu0 %v5234_v12  ;;  %v4613_v32 = vadd.f32 %v16040_v5, %v4420_v41  ;;  %v16049_v41 = vld [vmem:[#allocation58_spill] sm:$0xff] }
 0x414   :  { %vm5067_vm13 = vcmp.gt.f32.partialorder %v4977_v56, 0.0  ;;  %v5131_v16 = vmul.f32 0.2, %v4977_v56  ;;  %v4979_v47 = vadd.f32 %v4978_v30, %v4786_v53  ;;  %5582 = vmatmul.mubr.bf16.gmra.mxu0 %v5233_v35  ;;  %v5194_v13 = vsel %vm5066_vm14, %v4975_v15, %v5130_v42  ;;  %v16042_v42 = vld [vmem:[#allocation54_spill] sm:$0xff] }
 0x415   :  { %v4982_v45 = vpop.f32.mrf.mxu1  ;;  %v4802_v35 = vadd.f32 %v13766_v39, %v16039_v58  ;;  %v4806_v30 = vadd.f32 %v13786_v55, %v4613_v32 }
 0x416   :  { %v5195_v54 = vsel %vm5067_vm13, %v4977_v56, %v5131_v16  ;;  %vm5068_vm15 = vcmp.gt.f32.partialorder %v4979_v47, 0.0  ;;  %v5132_v50 = vmul.f32 0.2, %v4979_v47  ;;  %v4983_v51 = vadd.f32 %v4982_v45, %v4790_v31  ;;  %v16044_v45 = vld [vmem:[#allocation52_spill] sm:$0xff] }
 0x417   :  { %v5235_v38 = vpack.c.bf16 %v5195_v54, %v5193_v57  ;;  %v4984_v59 = vpop.f32.mrf.mxu1  ;;  %v4810_v16 = vadd.f32 %v13802_v18, %v16042_v42  ;;  %v4812_v54 = vadd.f32 %v4811_v25, %v16044_v45  ;;  %v5277_v45 = vld [vmem:[%s15220_s8] sm:$0x3] }
 0x418   :  { %v4985_v43 = vadd.f32 %v4984_v59, %v4792_v9  ;;  %v5196_v37 = vsel %vm5068_vm15, %v4979_v47, %v5132_v50  ;;  %v5133_v8 = vmul.f32 0.2, %v4983_v51  ;;  %vm5069_vm0 = vcmp.gt.f32.partialorder %v4983_v51, 0.0  ;;  %v4819_v47 = vpop.f32.mrf.mxu0  ;;  %v16043_v9 = vld [vmem:[#allocation36_spill] sm:$0xff] }
 0x419   :  { %v4986_v24 = vpop.f32.mrf.mxu1  ;;  %v5236_v34 = vpack.c.bf16 %v5196_v37, %v5194_v13  ;;  %v4430_v57 = vadd.f32 %v16043_v9, %v12817_v0 }
 0x41a   :  { %v4987_v20 = vadd.f32 %v4986_v24, %v4794_v19  ;;  %v5134_v49 = vmul.f32 0.2, %v4985_v43  ;;  %v5197_v3 = vsel %vm5069_vm0, %v4983_v51, %v5133_v8  ;;  %vm5070_vm2 = vcmp.gt.f32.partialorder %v4985_v43, 0.0  ;;  %v4821_v59 = vpop.f32.mrf.mxu0 }
 0x41b   :  { %v4988_v60 = vpop.f32.mrf.mxu1  ;;  %5591 = vmatprep.mubr.bf16.mxu0 %v5236_v34  ;;  %v4822_v58 = vadd.f32 %v4821_v59, %v16049_v41  ;;  %v9217_v41 = vld [vmem:[%s15221_s9 + $0x164] ss:$28 sps:$4 sm:$0xff]  }
 0x41c   :  { %vm5071_vm1 = vcmp.gt.f32.partialorder %v4987_v20, 0.0  ;;  %v5135_v52 = vmul.f32 0.2, %v4987_v20  ;;  %v4989_v4 = vadd.f32 %v4988_v60, %v4796_v33  ;;  %5592 = vmatmul.mubr.bf16.gmra.mxu0 %v5235_v38  ;;  %v5198_v56 = vsel %vm5070_vm2, %v4985_v43, %v5134_v49  ;;  %v16046_v43 = vld [vmem:[#allocation56_spill] sm:$0xff]  ;;  %v4823_v60 = vpop.f32.mrf.mxu0 }
 0x41d   :  { %v4992_v17 = vpop.f32.mrf.mxu1  ;;  %v4623_v38 = vadd.f32 %v16045_v7, %v4430_v57  ;;  %v4814_v13 = vadd.f32 %v4813_v61, %v16046_v43  ;;  %v16048_v61 = vld [vmem:[#allocation173_spill] sm:$0xff] }
 0x41e   :  { %v5199_v62 = vsel %vm5071_vm1, %v4987_v20, %v5135_v52  ;;  %vm5072_vm3 = vcmp.gt.f32.partialorder %v4989_v4, 0.0  ;;  %v5136_v22 = vmul.f32 0.2, %v4989_v4  ;;  %v4993_v15 = vadd.f32 %v4992_v17, %v4800_v23  ;;  %v4825_v32 = vpop.f32.mrf.mxu0 }
 0x41f   :  { %v5237_v27 = vpack.c.bf16 %v5199_v62, %v5197_v3  ;;  %v4994_v12 = vpop.f32.mrf.mxu1  ;;  %v4816_v33 = vadd.f32 %v4815_v36, %v4623_v38  ;;  %v4820_v23 = vadd.f32 %v4819_v47, %v16047_v63  ;;  %v4440_v10 = vadd.f32 %v16048_v61, %v12817_v0 }
 0x420   :  { %v4995_v53 = vadd.f32 %v4994_v12, %v4802_v35  ;;  %v5200_v39 = vsel %vm5072_vm3, %v4989_v4, %v5136_v22  ;;  %v5137_v46 = vmul.f32 0.2, %v4993_v15  ;;  %vm5073_vm4 = vcmp.gt.f32.partialorder %v4993_v15, 0.0  ;;  %v16051_v12 = vld [vmem:[#allocation95_spill] sm:$0xff] }
 0x421   :  { %v4996_v6 = vpop.f32.mrf.mxu1  ;;  %v5238_v31 = vpack.c.bf16 %v5200_v39, %v5198_v56  ;;  %v4824_v11 = vadd.f32 %v4823_v60, %v16051_v12  ;;  %v9226_v12 = vld [vmem:[%s15221_s9 + $0x2f0] ss:$28 sps:$4 sm:$0xff]  }
 0x422   :  { %v4997_v40 = vadd.f32 %v4996_v6, %v4804_v14  ;;  %v5138_v2 = vmul.f32 0.2, %v4995_v53  ;;  %v5201_v50 = vsel %vm5073_vm4, %v4993_v15, %v5137_v46  ;;  %vm5074_vm6 = vcmp.gt.f32.partialorder %v4995_v53, 0.0  ;;  %v16050_v15 = vld [vmem:[#allocation35_spill] sm:$0xff] }
 0x423   :  { %v4998_v21 = vpop.f32.mrf.mxu1  ;;  %5601 = vmatprep.mubr.bf16.mxu0 %v5238_v31  ;;  %v4633_v5 = vadd.f32 %v16050_v15, %v4440_v10 }
 0x424   :  { %vm5075_vm5 = vcmp.gt.f32.partialorder %v4997_v40, 0.0  ;;  %v5139_v44 = vmul.f32 0.2, %v4997_v40  ;;  %v4999_v48 = vadd.f32 %v4998_v21, %v4806_v30  ;;  %5602 = vmatmul.mubr.bf16.gmra.mxu0 %v5237_v27  ;;  %v5202_v8 = vsel %vm5074_vm6, %v4995_v53, %v5138_v2 }
 0x425   :  { %v5002_v55 = vpop.f32.mrf.mxu1  ;;  %v4826_v46 = vadd.f32 %v4825_v32, %v4633_v5 }
 0x426   :  { %v5203_v51 = vsel %vm5075_vm5, %v4997_v40, %v5139_v44  ;;  %vm5076_vm7 = vcmp.gt.f32.partialorder %v4999_v48, 0.0  ;;  %v5140_v29 = vmul.f32 0.2, %v4999_v48  ;;  %v5003_v18 = vadd.f32 %v5002_v55, %v4810_v16  ;;  %v16053_v55 = vld [vmem:[#allocation217_spill] sm:$0xff] }
 0x427   :  { %v5239_v26 = vpack.c.bf16 %v5203_v51, %v5201_v50  ;;  %v5004_v19 = vpop.f32.mrf.mxu1  ;;  %v13852_v51 = vrot.slane %v5277_v45, %v16053_v55 }
 0x428   :  { %v5005_v37 = vadd.f32 %v5004_v19, %v4812_v54  ;;  %v5204_v24 = vsel %vm5076_vm7, %v4999_v48, %v5140_v29  ;;  %v5141_v34 = vmul.f32 0.2, %v5003_v18  ;;  %vm5077_vm8 = vcmp.gt.f32.partialorder %v5003_v18, 0.0  ;;  %v16052_v54 = vld [vmem:[#allocation218_spill] sm:$0xff] }
 0x429   :  { %v5006_v25 = vpop.f32.mrf.mxu1  ;;  %v5240_v1 = vpack.c.bf16 %v5204_v24, %v5202_v8  ;;  %v13849_v50 = vrot.slane %v5277_v45, %v16052_v54  ;;  %v9230_v45 = vld [vmem:[%s15221_s9 + $0xbc] ss:$28 sps:$4 sm:$0xff]  }
 0x42a   :  { %v5007_v20 = vadd.f32 %v5006_v25, %v4814_v13  ;;  %v5142_v49 = vmul.f32 0.2, %v5005_v37  ;;  %v5205_v35 = vsel %vm5077_vm8, %v5003_v18, %v5141_v34  ;;  %vm5078_vm10 = vcmp.gt.f32.partialorder %v5005_v37, 0.0 }
 0x42b   :  { %v5008_v28 = vpop.f32.mrf.mxu1  ;;  %5611 = vmatprep.mubr.bf16.mxu0 %v5240_v1 }
 0x42c   :  { %vm5079_vm9 = vcmp.gt.f32.partialorder %v5007_v20, 0.0  ;;  %v5143_v52 = vmul.f32 0.2, %v5007_v20  ;;  %v5009_v4 = vadd.f32 %v5008_v28, %v4816_v33  ;;  %5612 = vmatmul.mubr.bf16.gmra.mxu0 %v5239_v26  ;;  %v5206_v53 = vsel %vm5078_vm10, %v5005_v37, %v5142_v49 }
 0x42d   :  { %v5012_v3 = vpop.f32.mrf.mxu1 }
 0x42e   :  { %v5207_v17 = vsel %vm5079_vm9, %v5007_v20, %v5143_v52  ;;  %vm5080_vm11 = vcmp.gt.f32.partialorder %v5009_v4, 0.0  ;;  %v5144_v62 = vmul.f32 0.2, %v5009_v4  ;;  %v5013_v22 = vadd.f32 %v5012_v3, %v4820_v23  ;;  %v9211_v52 = vld [vmem:[%s15221_s9 + $0x1a0] ss:$28 sps:$4 sm:$0xff]  }
 0x42f   :  { %v5241_v36 = vpack.c.bf16 %v5207_v17, %v5205_v35  ;;  %v5014_v27 = vpop.f32.mrf.mxu1  ;;  %v9215_v3 = vld [vmem:[%s15221_s9 + $0x160] ss:$28 sps:$4 sm:$0xff]   ;;  %v9219_v17 = vld [vmem:[%s15221_s9 + $0x168] ss:$28 sps:$4 sm:$0xff]  }
 0x430   :  { %v5015_v14 = vadd.f32 %v5014_v27, %v4822_v58  ;;  %v5208_v0 = vsel %vm5080_vm11, %v5009_v4, %v5144_v62  ;;  %v5145_v6 = vmul.f32 0.2, %v5013_v22  ;;  %vm5081_vm12 = vcmp.gt.f32.partialorder %v5013_v22, 0.0  ;;  %v9212_v4 = vld [vmem:[%s15221_s9 + $0x198] ss:$28 sps:$4 sm:$0xff]  }
 0x431   :  { %v5016_v56 = vpop.f32.mrf.mxu1  ;;  %v5242_v39 = vpack.c.bf16 %v5208_v0, %v5206_v53  ;;  %v9218_v58 = vld [vmem:[%s15221_s9 + $0x328] ss:$28 sps:$4 sm:$0xff]  }
 0x432   :  { %v5017_v31 = vadd.f32 %v5016_v56, %v4824_v11  ;;  %v5146_v40 = vmul.f32 0.2, %v5015_v14  ;;  %vm5082_vm14 = vcmp.gt.f32.partialorder %v5015_v14, 0.0  ;;  %v5209_v47 = vsel %vm5081_vm12, %v5013_v22, %v5145_v6 }
 0x433   :  { %v5018_v30 = vpop.f32.mrf.mxu1  ;;  %5621 = vmatprep.mubr.bf16.mxu0 %v5242_v39 }
 0x434   :  { %vm5083_vm13 = vcmp.gt.f32.partialorder %v5017_v31, 0.0  ;;  %v5147_v42 = vmul.f32 0.2, %v5017_v31  ;;  %v5019_v16 = vadd.f32 %v5018_v30, %v4826_v46  ;;  %5622 = vmatmul.mubr.bf16.gmra.mxu0 %v5241_v36  ;;  %v5210_v48 = vsel %vm5082_vm14, %v5015_v14, %v5146_v40  ;;  %v9222_v36 = vld [vmem:[%s15221_s9 + $0x12c] ss:$28 sps:$4 sm:$0xff]  }
 0x435   :  { %v9220_v30 = vld [vmem:[%s15221_s9 + $0x128] ss:$28 sps:$4 sm:$0xff]   ;;  %v9227_v40 = vld [vmem:[%s15221_s9 + $0x130] ss:$28 sps:$4 sm:$0xff]  }
 0x436   :  { %v5211_v21 = vsel %vm5083_vm13, %v5017_v31, %v5147_v42  ;;  %vm5084_vm15 = vcmp.gt.f32.partialorder %v5019_v16, 0.0  ;;  %v5148_v2 = vmul.f32 0.2, %v5019_v16 }
 0x437   :  { %v5243_v44 = vpack.c.bf16 %v5211_v21, %v5209_v47  ;;  %v9225_v47 = vld [vmem:[%s15221_s9 + $0xf4] ss:$28 sps:$4 sm:$0xff]  }
 0x438   :  { %v5212_v9 = vsel %vm5084_vm15, %v5019_v16, %v5148_v2  ;;  %v9234_v21 = vld [vmem:[%s15221_s9 + $0x2b8] ss:$28 sps:$4 sm:$0xff]  }
 0x439   :  { %v5244_v57 = vpack.c.bf16 %v5212_v9, %v5210_v48 }
 0x43b   :  { %5631 = vmatprep.mubr.bf16.mxu0 %v5244_v57 }
 0x43c   :  { %5632 = vmatmul.mubr.bf16.gmra.mxu0 %v5243_v44  ;;  %v9223_v44 = vld [vmem:[%s15221_s9 + $0xf0] ss:$28 sps:$4 sm:$0xff]  }
 0x484   :  { %v5483_v29 = vpop.f32.mrf.mxu0 }
 0x485   :  { %v5484_v38 = vadd.f32 %v5483_v29, %v13852_v51 }
 0x486   :  { %v5485_v18 = vpop.f32.mrf.mxu0 }
 0x487   :  { %v5486_v7 = vadd.f32 %v5485_v18, %v13849_v50  ;;  %v5706_v8 = vmul.f32 0.2, %v5484_v38  ;;  %vm5642_vm2 = vcmp.gt.f32.partialorder %v5484_v38, 0.0 }
 0x488   :  { %v5487_v59 = vpop.f32.mrf.mxu0 }
 0x489   :  { %v5488_v26 = vadd.f32 %v5487_v59, %v13852_v51  ;;  %v5707_v43 = vmul.f32 0.2, %v5486_v7  ;;  %vm5643_vm1 = vcmp.gt.f32.partialorder %v5486_v7, 0.0  ;;  %v5770_v23 = vsel %vm5642_vm2, %v5484_v38, %v5706_v8  ;;  %v9242_v59 = vld [vmem:[%s15221_s9 + $0x280] ss:$28 sps:$4 sm:$0xff]  }
 0x48a   :  { %v5489_v19 = vpop.f32.mrf.mxu0 }
 0x48b   :  { %vm5644_vm0 = vcmp.gt.f32.partialorder %v5488_v26, 0.0  ;;  %v5708_v13 = vmul.f32 0.2, %v5488_v26  ;;  %v5490_v37 = vadd.f32 %v5489_v19, %v13849_v50  ;;  %v5771_v33 = vsel %vm5643_vm1, %v5486_v7, %v5707_v43  ;;  %v9235_v7 = vld [vmem:[%s15221_s9 + $0xf8] ss:$28 sps:$4 sm:$0xff]  }
 0x48c   :  { %v5493_v24 = vpop.f32.mrf.mxu0 }
 0x48d   :  { %vm5645_vm3 = vcmp.gt.f32.partialorder %v5490_v37, 0.0  ;;  %v5709_v34 = vmul.f32 0.2, %v5490_v37  ;;  %v5772_v25 = vsel %vm5644_vm0, %v5488_v26, %v5708_v13  ;;  %v5494_v28 = vadd.f32 %v5493_v24, %v13852_v51 }
 0x48e   :  { %v5495_v1 = vpop.f32.mrf.mxu0  ;;  %v13868_v61 = vpack.c.bf16 %v5772_v25, %v5770_v23  ;;  %v9233_v23 = vld [vmem:[%s15221_s9 + $0x84] ss:$28 sps:$4 sm:$0xff]  }
 0x48f   :  { %v5773_v20 = vsel %vm5645_vm3, %v5490_v37, %v5709_v34  ;;  %v5496_v63 = vadd.f32 %v5495_v1, %v13849_v50  ;;  %v5710_v5 = vmul.f32 0.2, %v5494_v28  ;;  %vm5646_vm6 = vcmp.gt.f32.partialorder %v5494_v28, 0.0  ;;  %v9228_v1 = vld [vmem:[%s15221_s9 + $0xb8] ss:$28 sps:$4 sm:$0xff]  }
 0x490   :  { %v13859_v60 = vpack.c.bf16 %v5773_v20, %v5771_v33  ;;  %v5497_v49 = vpop.f32.mrf.mxu0  ;;  %v9243_v33 = vld [vmem:[%s15221_s9 + $0xc0] ss:$28 sps:$4 sm:$0xff]  }
 0x491   :  { %v5498_v10 = vadd.f32 %v5497_v49, %v13852_v51  ;;  %v5711_v62 = vmul.f32 0.2, %v5496_v63  ;;  %vm5647_vm5 = vcmp.gt.f32.partialorder %v5496_v63, 0.0  ;;  %v5774_v39 = vsel %vm5646_vm6, %v5494_v28, %v5710_v5  ;;  %v9250_v28 = vld [vmem:[%s15221_s9 + $0x248] ss:$28 sps:$4 sm:$0xff]  }
 0x492   :  { %v5499_v35 = vpop.f32.mrf.mxu0  ;;  %6639 = vmatprep.mubr.bf16.mxu1 %v13859_v60  ;;  %6832 = vmatprep.mubr.bf16.mxu0 %v13859_v60 }
 0x493   :  { %vm5648_vm4 = vcmp.gt.f32.partialorder %v5498_v10, 0.0  ;;  %v5712_v22 = vmul.f32 0.2, %v5498_v10  ;;  %v5500_v15 = vadd.f32 %v5499_v35, %v13849_v50  ;;  %6640 = vmatmul.mubr.bf16.vlgmr.msra.gmra.mxu1 %v13868_v61  ;;  %6833 = vmatmul.mubr.bf16.vlgmr.msra.gmra.mxu0 %v13868_v61  ;;  %v5775_v53 = vsel %vm5647_vm5, %v5496_v63, %v5711_v62 }
 0x494   :  { %v5503_v32 = vpop.f32.mrf.mxu0  ;;  %8475 = vmatpush3.bf16.msra.mxu0 %v9211_v52  ;;  %6994 = vmatpush1.bf16.msra.mxu1 %v9212_v4  ;;  %v9231_v52 = vld [vmem:[%s15221_s9 + $0x80] ss:$28 sps:$4 sm:$0xff]  }
 0x495   :  { %vm5649_vm7 = vcmp.gt.f32.partialorder %v5500_v15, 0.0  ;;  %v5713_v27 = vmul.f32 0.2, %v5500_v15  ;;  %6995 = vmatprep.subr.bf16.mxu1 %v9217_v41  ;;  %8476 = vmatprep.subr.bf16.mxu0 %v9218_v58  ;;  %v5776_v11 = vsel %vm5648_vm4, %v5498_v10, %v5712_v22  ;;  %v5504_v6 = vadd.f32 %v5503_v32, %v13852_v51  ;;  %v9238_v58 = vld [vmem:[%s15221_s9 + $0x4c] ss:$28 sps:$4 sm:$0xff]  }
 0x496   :  { %v5505_v14 = vpop.f32.mrf.mxu0  ;;  %v13905_v42 = vpack.c.bf16 %v5776_v11, %v5774_v39  ;;  %v9258_v22 = vld [vmem:[%s15221_s9 + $0x210] ss:$28 sps:$4 sm:$0xff]  }
 0x497   :  { %v5777_v0 = vsel %vm5649_vm7, %v5500_v15, %v5713_v27  ;;  %v5506_v56 = vadd.f32 %v5505_v14, %v13849_v50  ;;  %v5714_v29 = vmul.f32 0.2, %v5504_v6  ;;  %vm5650_vm10 = vcmp.gt.f32.partialorder %v5504_v6, 0.0 }
 0x498   :  { %v13896_v46 = vpack.c.bf16 %v5777_v0, %v5775_v53  ;;  %v5507_v31 = vpop.f32.mrf.mxu0  ;;  %6996 = vmatpush1.bf16.msra.mxu1 %v9215_v3  ;;  %8477 = vmatpush3.bf16.msra.mxu0 %v9219_v17  ;;  %v9251_v17 = vld [vmem:[%s15221_s9 + $0x88] ss:$28 sps:$4 sm:$0xff]  }
 0x499   :  { %v5508_v16 = vadd.f32 %v5507_v31, %v13852_v51  ;;  %6997 = vmatprep.subr.bf16.mxu1 %v9222_v36  ;;  %8478 = vmatprep.subr.bf16.mxu0 %v9226_v12  ;;  %v5715_v48 = vmul.f32 0.2, %v5506_v56  ;;  %vm5651_vm9 = vcmp.gt.f32.partialorder %v5506_v56, 0.0  ;;  %v5778_v8 = vsel %vm5650_vm10, %v5504_v6, %v5714_v29  ;;  %v9236_v0 = vld [vmem:[%s15221_s9 + $0x48] ss:$28 sps:$4 sm:$0xff]  }
 0x49a   :  { %v5509_v2 = vpop.f32.mrf.mxu0  ;;  %6649 = vmatprep.mubr.bf16.mxu1 %v13896_v46  ;;  %6842 = vmatprep.mubr.bf16.mxu0 %v13896_v46  ;;  %v9241_v31 = vld [vmem:[%s15221_s9 + $0x14] ss:$28 sps:$4 sm:$0xff]  }
 0x49b   :  { %vm5652_vm8 = vcmp.gt.f32.partialorder %v5508_v16, 0.0  ;;  %v5716_v9 = vmul.f32 0.2, %v5508_v16  ;;  %v5510_v57 = vadd.f32 %v5509_v2, %v13849_v50  ;;  %6650 = vmatmul.mubr.bf16.gmra.mxu1 %v13905_v42  ;;  %6843 = vmatmul.mubr.bf16.gmra.mxu0 %v13905_v42  ;;  %v5779_v43 = vsel %vm5651_vm9, %v5506_v56, %v5715_v48  ;;  %v9259_v56 = vld [vmem:[%s15221_s9 + $0x50] ss:$28 sps:$4 sm:$0xff]  }
 0x49c   :  { %v5513_v18 = vpop.f32.mrf.mxu0  ;;  %6998 = vmatpush1.bf16.msra.mxu1 %v9220_v30  ;;  %8479 = vmatpush3.bf16.msra.mxu0 %v9227_v40  ;;  %v9266_v30 = vld [vmem:[%s15221_s9 + $0x1d8] ss:$28 sps:$4 sm:$0xff]  }
 0x49d   :  { %vm5653_vm11 = vcmp.gt.f32.partialorder %v5510_v57, 0.0  ;;  %v5717_v38 = vmul.f32 0.2, %v5510_v57  ;;  %6999 = vmatprep.subr.bf16.mxu1 %v9225_v47  ;;  %8480 = vmatprep.subr.bf16.mxu0 %v9234_v21  ;;  %v5780_v26 = vsel %vm5652_vm8, %v5508_v16, %v5716_v9  ;;  %v5514_v34 = vadd.f32 %v5513_v18, %v13852_v51  ;;  %v9239_v16 = vld [vmem:[%s15221_s9 + $0x10] ss:$28 sps:$4 sm:$0xff]  }
 0x49e   :  { %v5515_v19 = vpop.f32.mrf.mxu0  ;;  %v13942_v20 = vpack.c.bf16 %v5780_v26, %v5778_v8  ;;  %v9267_v9 = vld [vmem:[%s15221_s9 + $0x18] ss:$28 sps:$4 sm:$0xff]  }
 0x49f   :  { %v5781_v13 = vsel %vm5653_vm11, %v5510_v57, %v5717_v38  ;;  %v5516_v37 = vadd.f32 %v5515_v19, %v13849_v50  ;;  %v5718_v35 = vmul.f32 0.2, %v5514_v34  ;;  %vm5654_vm14 = vcmp.gt.f32.partialorder %v5514_v34, 0.0 }
 0x4a0   :  { %v13933_v24 = vpack.c.bf16 %v5781_v13, %v5779_v43  ;;  %v5517_v25 = vpop.f32.mrf.mxu0  ;;  %7000 = vmatpush1.bf16.msra.mxu1 %v9223_v44  ;;  %8481 = vmatpush3.bf16.msra.mxu0 %v9235_v7 }
 0x4a1   :  { %v5518_v63 = vadd.f32 %v5517_v25, %v13852_v51  ;;  %7001 = vmatprep.subr.bf16.mxu1 %v9230_v45  ;;  %8482 = vmatprep.subr.bf16.mxu0 %v9242_v59  ;;  %v5719_v4 = vmul.f32 0.2, %v5516_v37  ;;  %vm5655_vm13 = vcmp.gt.f32.partialorder %v5516_v37, 0.0  ;;  %v5782_v12 = vsel %vm5654_vm14, %v5514_v34, %v5718_v35  ;;  %v9246_v45 = vld [vmem:[%s15221_s9 + $0x35c] ss:$28 sps:$4 sm:$0xff]  }
 0x4a2   :  { %v5519_v49 = vpop.f32.mrf.mxu0  ;;  %6659 = vmatprep.mubr.bf16.mxu1 %v13933_v24  ;;  %6852 = vmatprep.mubr.bf16.mxu0 %v13933_v24  ;;  %v9249_v25 = vld [vmem:[%s15221_s9 + $0x324] ss:$28 sps:$4 sm:$0xff]  }
 0x4a3   :  { %vm5656_vm12 = vcmp.gt.f32.partialorder %v5518_v63, 0.0  ;;  %v5720_v10 = vmul.f32 0.2, %v5518_v63  ;;  %v5520_v41 = vadd.f32 %v5519_v49, %v13849_v50  ;;  %6660 = vmatmul.mubr.bf16.gmra.mxu1 %v13942_v20  ;;  %6853 = vmatmul.mubr.bf16.gmra.mxu0 %v13942_v20  ;;  %v5783_v32 = vsel %vm5655_vm13, %v5516_v37, %v5719_v4  ;;  %v9244_v37 = vld [vmem:[%s15221_s9 + $0x358] ss:$28 sps:$4 sm:$0xff]  }
 0x4a4   :  { %v5523_v3 = vpop.f32.mrf.mxu0  ;;  %7002 = vmatpush1.bf16.msra.mxu1 %v9228_v1  ;;  %8483 = vmatpush3.bf16.msra.mxu0 %v9243_v33 }
 0x4a5   :  { %vm5657_vm15 = vcmp.gt.f32.partialorder %v5520_v41, 0.0  ;;  %v5721_v62 = vmul.f32 0.2, %v5520_v41  ;;  %7003 = vmatprep.subr.bf16.mxu1 %v9233_v23  ;;  %8484 = vmatprep.subr.bf16.mxu0 %v9250_v28  ;;  %v5784_v15 = vsel %vm5656_vm12, %v5518_v63, %v5720_v10  ;;  %v5524_v14 = vadd.f32 %v5523_v3, %v13852_v51  ;;  %v9254_v10 = vld [vmem:[%s15221_s9 + $0x2ec] ss:$28 sps:$4 sm:$0xff]  }
 0x4a6   :  { %v5525_v5 = vpop.f32.mrf.mxu0  ;;  %v13979_v39 = vpack.c.bf16 %v5784_v15, %v5782_v12  ;;  %v9257_v12 = vld [vmem:[%s15221_s9 + $0x2b4] ss:$28 sps:$4 sm:$0xff]  }
 0x4a7   :  { %v5785_v36 = vsel %vm5657_vm15, %v5520_v41, %v5721_v62  ;;  %v5526_v27 = vadd.f32 %v5525_v5, %v13849_v50  ;;  %v5722_v44 = vmul.f32 0.2, %v5524_v14  ;;  %vm5658_vm2 = vcmp.gt.f32.partialorder %v5524_v14, 0.0 }
 0x4a8   :  { %v13970_v11 = vpack.c.bf16 %v5785_v36, %v5783_v32  ;;  %v5527_v53 = vpop.f32.mrf.mxu0  ;;  %7004 = vmatpush1.bf16.msra.mxu1 %v9231_v52  ;;  %8485 = vmatpush3.bf16.msra.mxu0 %v9251_v17  ;;  %v9247_v52 = vld [vmem:[%s15221_s9 + $0x320] ss:$28 sps:$4 sm:$0xff]   ;;  %v9252_v32 = vld [vmem:[%s15221_s9 + $0x2e8] ss:$28 sps:$4 sm:$0xff]  }
 0x4a9   :  { %v5528_v6 = vadd.f32 %v5527_v53, %v13852_v51  ;;  %7005 = vmatprep.subr.bf16.mxu1 %v9238_v58  ;;  %8486 = vmatprep.subr.bf16.mxu0 %v9258_v22  ;;  %v5723_v47 = vmul.f32 0.2, %v5526_v27  ;;  %vm5659_vm1 = vcmp.gt.f32.partialorder %v5526_v27, 0.0  ;;  %v5786_v26 = vsel %vm5658_vm2, %v5524_v14, %v5722_v44 }
 0x4aa   :  { %v5529_v40 = vpop.f32.mrf.mxu0  ;;  %6669 = vmatprep.mubr.bf16.mxu1 %v13970_v11  ;;  %6862 = vmatprep.mubr.bf16.mxu0 %v13970_v11 }
 0x4ab   :  { %vm5660_vm0 = vcmp.gt.f32.partialorder %v5528_v6, 0.0  ;;  %v5724_v21 = vmul.f32 0.2, %v5528_v6  ;;  %v5530_v2 = vadd.f32 %v5529_v40, %v13849_v50  ;;  %6670 = vmatmul.mubr.bf16.gmra.mxu1 %v13979_v39  ;;  %6863 = vmatmul.mubr.bf16.gmra.mxu0 %v13979_v39  ;;  %v5787_v7 = vsel %vm5659_vm1, %v5526_v27, %v5723_v47 }
 0x4ac   :  { %v5533_v48 = vpop.f32.mrf.mxu0  ;;  %7006 = vmatpush1.bf16.msra.mxu1 %v9236_v0  ;;  %8487 = vmatpush3.bf16.msra.mxu0 %v9259_v56 }
 0x4ad   :  { %vm5661_vm3 = vcmp.gt.f32.partialorder %v5530_v2, 0.0  ;;  %v5725_v57 = vmul.f32 0.2, %v5530_v2  ;;  %7007 = vmatprep.subr.bf16.mxu1 %v9241_v31  ;;  %8488 = vmatprep.subr.bf16.mxu0 %v9266_v30  ;;  %v5788_v29 = vsel %vm5660_vm0, %v5528_v6, %v5724_v21  ;;  %v5534_v43 = vadd.f32 %v5533_v48, %v13852_v51  ;;  %v9255_v30 = vld [vmem:[%s15221_s9 + $0x2b0] ss:$28 sps:$4 sm:$0xff]  }
 0x4ae   :  { %v5535_v18 = vpop.f32.mrf.mxu0  ;;  %v14010_v8 = vpack.c.bf16 %v5788_v29, %v5786_v26 }
 0x4af   :  { %v5789_v38 = vsel %vm5661_vm3, %v5530_v2, %v5725_v57  ;;  %v5536_v59 = vadd.f32 %v5535_v18, %v13849_v50  ;;  %v5726_v28 = vmul.f32 0.2, %v5534_v43  ;;  %vm5662_vm6 = vcmp.gt.f32.partialorder %v5534_v43, 0.0  ;;  %v9260_v18 = vld [vmem:[%s15221_s9 + $0x278] ss:$28 sps:$4 sm:$0xff]  }
 0x4b0   :  { %v14004_v19 = vpack.c.bf16 %v5789_v38, %v5787_v7  ;;  %v5537_v13 = vpop.f32.mrf.mxu0  ;;  %7008 = vmatpush1.bf16.msra.mxu1 %v9239_v16  ;;  %8489 = vmatpush3.bf16.msra.mxu0 %v9267_v9  ;;  %v9262_v16 = vld [vmem:[%s15221_s9 + $0x27c] ss:$28 sps:$4 sm:$0xff]  }
 0x4b1   :  { %v5538_v34 = vadd.f32 %v5537_v13, %v13852_v51  ;;  %7009 = vmatprep.subr.bf16.mxu1 %v9246_v45  ;;  %v5727_v33 = vmul.f32 0.2, %v5536_v59  ;;  %vm5663_vm5 = vcmp.gt.f32.partialorder %v5536_v59, 0.0  ;;  %v5790_v62 = vsel %vm5662_vm6, %v5534_v43, %v5726_v28 }
 0x4b2   :  { %v5539_v1 = vpop.f32.mrf.mxu0  ;;  %6679 = vmatprep.mubr.bf16.mxu1 %v14004_v19  ;;  %6872 = vmatprep.mubr.bf16.mxu0 %v14004_v19 }
 0x4b3   :  { %vm5664_vm4 = vcmp.gt.f32.partialorder %v5538_v34, 0.0  ;;  %v5728_v63 = vmul.f32 0.2, %v5538_v34  ;;  %v5540_v23 = vadd.f32 %v5539_v1, %v13849_v50  ;;  %6680 = vmatmul.mubr.bf16.gmra.mxu1 %v14010_v8  ;;  %6873 = vmatmul.mubr.bf16.gmra.mxu0 %v14010_v8  ;;  %v5791_v35 = vsel %vm5663_vm5, %v5536_v59, %v5727_v33  ;;  %v9265_v59 = vld [vmem:[%s15221_s9 + $0x244] ss:$28 sps:$4 sm:$0xff]  }
 0x4b4   :  { %v5543_v49 = vpop.f32.mrf.mxu0  ;;  %7010 = vmatpush2.bf16.msra.mxu1 %v9244_v37  ;;  %v9263_v1 = vld [vmem:[%s15221_s9 + $0x240] ss:$28 sps:$4 sm:$0xff]  }
 0x4b5   :  { %vm5665_vm7 = vcmp.gt.f32.partialorder %v5540_v23, 0.0  ;;  %v5729_v4 = vmul.f32 0.2, %v5540_v23  ;;  %7011 = vmatprep.subr.bf16.mxu1 %v9249_v25  ;;  %v5792_v41 = vsel %vm5664_vm4, %v5538_v34, %v5728_v63  ;;  %v5544_v15 = vadd.f32 %v5543_v49, %v13852_v51  ;;  %v9270_v63 = vld [vmem:[%s15221_s9 + $0x20c] ss:$28 sps:$4 sm:$0xff]  }
 0x4b6   :  { %v5545_v58 = vpop.f32.mrf.mxu0  ;;  %v14034_v36 = vpack.c.bf16 %v5792_v41, %v5790_v62 }
 0x4b7   :  { %v5793_v3 = vsel %vm5665_vm7, %v5540_v23, %v5729_v4  ;;  %v5546_v17 = vadd.f32 %v5545_v58, %v13849_v50  ;;  %v5730_v6 = vmul.f32 0.2, %v5544_v15  ;;  %vm5666_vm10 = vcmp.gt.f32.partialorder %v5544_v15, 0.0 }
 0x4b8   :  { %v14028_v22 = vpack.c.bf16 %v5793_v3, %v5791_v35  ;;  %v5547_v5 = vpop.f32.mrf.mxu0  ;;  %7012 = vmatpush2.bf16.msra.mxu1 %v9247_v52  ;;  %v9268_v3 = vld [vmem:[%s15221_s9 + $0x208] ss:$28 sps:$4 sm:$0xff]  }
 0x4b9   :  { %v5548_v27 = vadd.f32 %v5547_v5, %v13852_v51  ;;  %7013 = vmatprep.subr.bf16.mxu1 %v9254_v10  ;;  %v5731_v53 = vmul.f32 0.2, %v5546_v17  ;;  %vm5667_vm9 = vcmp.gt.f32.partialorder %v5546_v17, 0.0  ;;  %v5794_v9 = vsel %vm5666_vm10, %v5544_v15, %v5730_v6  ;;  %v9273_v15 = vld [vmem:[%s15221_s9 + $0x1d4] ss:$28 sps:$4 sm:$0xff]  }
 0x4ba   :  { %v5549_v14 = vpop.f32.mrf.mxu0  ;;  %6689 = vmatprep.mubr.bf16.mxu1 %v14028_v22  ;;  %6882 = vmatprep.mubr.bf16.mxu0 %v14028_v22 }
 0x4bb   :  { %vm5668_vm8 = vcmp.gt.f32.partialorder %v5548_v27, 0.0  ;;  %v5732_v0 = vmul.f32 0.2, %v5548_v27  ;;  %v5550_v56 = vadd.f32 %v5549_v14, %v13849_v50  ;;  %6690 = vmatmul.mubr.bf16.gmra.mxu1 %v14034_v36  ;;  %6883 = vmatmul.mubr.bf16.gmra.mxu0 %v14034_v36  ;;  %v5795_v2 = vsel %vm5667_vm9, %v5546_v17, %v5731_v53 }
 0x4bc   :  { %v5553_v31 = vpop.f32.mrf.mxu0  ;;  %7014 = vmatpush2.bf16.msra.mxu1 %v9252_v32 }
 0x4bd   :  { %vm5669_vm11 = vcmp.gt.f32.partialorder %v5550_v56, 0.0  ;;  %v5733_v40 = vmul.f32 0.2, %v5550_v56  ;;  %7015 = vmatprep.subr.bf16.mxu1 %v9257_v12  ;;  %v5796_v47 = vsel %vm5668_vm8, %v5548_v27, %v5732_v0  ;;  %v5554_v45 = vadd.f32 %v5553_v31, %v13852_v51  ;;  %v9271_v0 = vld [vmem:[%s15221_s9 + $0x1d0] ss:$28 sps:$4 sm:$0xff]  }
 0x4be   :  { %v5555_v21 = vpop.f32.mrf.mxu0  ;;  %v14058_v7 = vpack.c.bf16 %v5796_v47, %v5794_v9 }
 0x4bf   :  { %v5797_v44 = vsel %vm5669_vm11, %v5550_v56, %v5733_v40  ;;  %v5556_v48 = vadd.f32 %v5555_v21, %v13849_v50  ;;  %v5734_v34 = vmul.f32 0.2, %v5554_v45  ;;  %vm5670_vm14 = vcmp.gt.f32.partialorder %v5554_v45, 0.0 }
 0x4c0   :  { %v14052_v57 = vpack.c.bf16 %v5797_v44, %v5795_v2  ;;  %v5557_v29 = vpop.f32.mrf.mxu0  ;;  %7016 = vmatpush2.bf16.msra.mxu1 %v9255_v30 }
 0x4c1   :  { %v5558_v38 = vadd.f32 %v5557_v29, %v13852_v51  ;;  %7017 = vmatprep.subr.bf16.mxu1 %v9262_v16  ;;  %v5735_v43 = vmul.f32 0.2, %v5556_v48  ;;  %vm5671_vm13 = vcmp.gt.f32.partialorder %v5556_v48, 0.0  ;;  %v5798_v10 = vsel %vm5670_vm14, %v5554_v45, %v5734_v34 }
 0x4c2   :  { %v5559_v26 = vpop.f32.mrf.mxu0  ;;  %6699 = vmatprep.mubr.bf16.mxu1 %v14052_v57  ;;  %6892 = vmatprep.mubr.bf16.mxu0 %v14052_v57 }
 0x4c3   :  { %vm5672_vm12 = vcmp.gt.f32.partialorder %v5558_v38, 0.0  ;;  %v5736_v13 = vmul.f32 0.2, %v5558_v38  ;;  %v5560_v37 = vadd.f32 %v5559_v26, %v13849_v50  ;;  %6700 = vmatmul.mubr.bf16.gmra.mxu1 %v14058_v7  ;;  %6893 = vmatmul.mubr.bf16.gmra.mxu0 %v14058_v7  ;;  %v5799_v49 = vsel %vm5671_vm13, %v5556_v48, %v5735_v43 }
 0x4c4   :  { %v5563_v25 = vpop.f32.mrf.mxu0  ;;  %7018 = vmatpush2.bf16.msra.mxu1 %v9260_v18 }
 0x4c5   :  { %vm5673_vm15 = vcmp.gt.f32.partialorder %v5560_v37, 0.0  ;;  %v5737_v33 = vmul.f32 0.2, %v5560_v37  ;;  %7019 = vmatprep.subr.bf16.mxu1 %v9265_v59  ;;  %v5800_v23 = vsel %vm5672_vm12, %v5558_v38, %v5736_v13  ;;  %v5564_v58 = vadd.f32 %v5563_v25, %v13852_v51 }
 0x4c6   :  { %v5565_v28 = vpop.f32.mrf.mxu0  ;;  %v14082_v17 = vpack.c.bf16 %v5800_v23, %v5798_v10 }
 0x4c7   :  { %v5801_v52 = vsel %vm5673_vm15, %v5560_v37, %v5737_v33  ;;  %v5566_v4 = vadd.f32 %v5565_v28, %v13849_v50  ;;  %v5738_v14 = vmul.f32 0.2, %v5564_v58  ;;  %vm5674_vm2 = vcmp.gt.f32.partialorder %v5564_v58, 0.0 }
 0x4c8   :  { %v14076_v41 = vpack.c.bf16 %v5801_v52, %v5799_v49  ;;  %v5567_v35 = vpop.f32.mrf.mxu0  ;;  %7020 = vmatpush2.bf16.msra.mxu1 %v9263_v1 }
 0x4c9   :  { %v5568_v62 = vadd.f32 %v5567_v35, %v13852_v51  ;;  %7021 = vmatprep.subr.bf16.mxu1 %v9270_v63  ;;  %v5739_v32 = vmul.f32 0.2, %v5566_v4  ;;  %vm5675_vm1 = vcmp.gt.f32.partialorder %v5566_v4, 0.0  ;;  %v5802_v47 = vsel %vm5674_vm2, %v5564_v58, %v5738_v14 }
 0x4ca   :  { %v5569_v5 = vpop.f32.mrf.mxu0  ;;  %6709 = vmatprep.mubr.bf16.mxu1 %v14076_v41  ;;  %6902 = vmatprep.mubr.bf16.mxu0 %v14076_v41 }
 0x4cb   :  { %vm5676_vm0 = vcmp.gt.f32.partialorder %v5568_v62, 0.0  ;;  %v5740_v27 = vmul.f32 0.2, %v5568_v62  ;;  %v5570_v12 = vadd.f32 %v5569_v5, %v13849_v50  ;;  %6710 = vmatmul.mubr.bf16.gmra.mxu1 %v14082_v17  ;;  %6903 = vmatmul.mubr.bf16.gmra.mxu0 %v14082_v17  ;;  %v5803_v30 = vsel %vm5675_vm1, %v5566_v4, %v5739_v32 }
 0x4cc   :  { %v5573_v53 = vpop.f32.mrf.mxu0  ;;  %7022 = vmatpush2.bf16.msra.mxu1 %v9268_v3 }
 0x4cd   :  { %vm5677_vm3 = vcmp.gt.f32.partialorder %v5570_v12, 0.0  ;;  %v5741_v56 = vmul.f32 0.2, %v5570_v12  ;;  %7023 = vmatprep.subr.bf16.mxu1 %v9273_v15  ;;  %v5804_v6 = vsel %vm5676_vm0, %v5568_v62, %v5740_v27  ;;  %v5574_v2 = vadd.f32 %v5573_v53, %v13852_v51 }
 0x4ce   :  { %v5575_v31 = vpop.f32.mrf.mxu0  ;;  %v14100_v48 = vpack.c.bf16 %v5804_v6, %v5802_v47 }
 0x4cf   :  { %v5805_v40 = vsel %vm5677_vm3, %v5570_v12, %v5741_v56  ;;  %v5576_v16 = vadd.f32 %v5575_v31, %v13849_v50  ;;  %v5742_v59 = vmul.f32 0.2, %v5574_v2  ;;  %vm5678_vm6 = vcmp.gt.f32.partialorder %v5574_v2, 0.0 }
 0x4d0   :  { %v14097_v21 = vpack.c.bf16 %v5805_v40, %v5803_v30  ;;  %v5577_v44 = vpop.f32.mrf.mxu0  ;;  %7024 = vmatpush2.bf16.msra.mxu1 %v9271_v0 }
 0x4d1   :  { %v5578_v9 = vadd.f32 %v5577_v44, %v13852_v51  ;;  %v5743_v29 = vmul.f32 0.2, %v5576_v16  ;;  %vm5679_vm5 = vcmp.gt.f32.partialorder %v5576_v16, 0.0  ;;  %v5806_v33 = vsel %vm5678_vm6, %v5574_v2, %v5742_v59 }
 0x4d2   :  { %v5579_v45 = vpop.f32.mrf.mxu0  ;;  %6719 = vmatprep.mubr.bf16.mxu1 %v14097_v21  ;;  %6912 = vmatprep.mubr.bf16.mxu0 %v14097_v21 }
 0x4d3   :  { %vm5680_vm4 = vcmp.gt.f32.partialorder %v5578_v9, 0.0  ;;  %v5744_v18 = vmul.f32 0.2, %v5578_v9  ;;  %v5580_v38 = vadd.f32 %v5579_v45, %v13849_v50  ;;  %6720 = vmatmul.mubr.bf16.gmra.mxu1 %v14100_v48  ;;  %6913 = vmatmul.mubr.bf16.gmra.mxu0 %v14100_v48  ;;  %v5807_v34 = vsel %vm5679_vm5, %v5576_v16, %v5743_v29 }
 0x4d4   :  { %v5583_v26 = vpop.f32.mrf.mxu0 }
 0x4d5   :  { %vm5681_vm7 = vcmp.gt.f32.partialorder %v5580_v38, 0.0  ;;  %v5745_v43 = vmul.f32 0.2, %v5580_v38  ;;  %v5808_v13 = vsel %vm5680_vm4, %v5578_v9, %v5744_v18  ;;  %v5584_v23 = vadd.f32 %v5583_v26, %v13852_v51 }
 0x4d6   :  { %v5585_v37 = vpop.f32.mrf.mxu0  ;;  %v14112_v49 = vpack.c.bf16 %v5808_v13, %v5806_v33 }
 0x4d7   :  { %v5809_v25 = vsel %vm5681_vm7, %v5580_v38, %v5745_v43  ;;  %v5586_v1 = vadd.f32 %v5585_v37, %v13849_v50  ;;  %v5746_v3 = vmul.f32 0.2, %v5584_v23  ;;  %vm5682_vm10 = vcmp.gt.f32.partialorder %v5584_v23, 0.0 }
 0x4d8   :  { %v14109_v63 = vpack.c.bf16 %v5809_v25, %v5807_v34  ;;  %v5587_v28 = vpop.f32.mrf.mxu0 }
 0x4d9   :  { %v5588_v52 = vadd.f32 %v5587_v28, %v13852_v51  ;;  %v5747_v10 = vmul.f32 0.2, %v5586_v1  ;;  %vm5683_vm9 = vcmp.gt.f32.partialorder %v5586_v1, 0.0  ;;  %v5810_v53 = vsel %vm5682_vm10, %v5584_v23, %v5746_v3 }
 0x4da   :  { %v5589_v4 = vpop.f32.mrf.mxu0  ;;  %6729 = vmatprep.mubr.bf16.mxu1 %v14109_v63  ;;  %6922 = vmatprep.mubr.bf16.mxu0 %v14109_v63 }
 0x4db   :  { %vm5684_vm8 = vcmp.gt.f32.partialorder %v5588_v52, 0.0  ;;  %v5748_v58 = vmul.f32 0.2, %v5588_v52  ;;  %v5590_v35 = vadd.f32 %v5589_v4, %v13849_v50  ;;  %6730 = vmatmul.mubr.bf16.gmra.mxu1 %v14112_v49  ;;  %6923 = vmatmul.mubr.bf16.gmra.mxu0 %v14112_v49  ;;  %v5811_v27 = vsel %vm5683_vm9, %v5586_v1, %v5747_v10 }
 0x4dc   :  { %v5593_v62 = vpop.f32.mrf.mxu0 }
 0x4dd   :  { %vm5685_vm11 = vcmp.gt.f32.partialorder %v5590_v35, 0.0  ;;  %v5749_v15 = vmul.f32 0.2, %v5590_v35  ;;  %v5812_v5 = vsel %vm5684_vm8, %v5588_v52, %v5748_v58  ;;  %v5594_v56 = vadd.f32 %v5593_v62, %v13852_v51 }
 0x4de   :  { %v5595_v32 = vpop.f32.mrf.mxu0  ;;  %v14124_v31 = vpack.c.bf16 %v5812_v5, %v5810_v53 }
 0x4df   :  { %v5813_v12 = vsel %vm5685_vm11, %v5590_v35, %v5749_v15  ;;  %v5596_v14 = vadd.f32 %v5595_v32, %v13849_v50  ;;  %v5750_v44 = vmul.f32 0.2, %v5594_v56  ;;  %vm5686_vm14 = vcmp.gt.f32.partialorder %v5594_v56, 0.0 }
 0x4e0   :  { %v14121_v0 = vpack.c.bf16 %v5813_v12, %v5811_v27  ;;  %v5597_v6 = vpop.f32.mrf.mxu0 }
 0x4e1   :  { %v5598_v30 = vadd.f32 %v5597_v6, %v13852_v51  ;;  %v5751_v16 = vmul.f32 0.2, %v5596_v14  ;;  %vm5687_vm13 = vcmp.gt.f32.partialorder %v5596_v14, 0.0  ;;  %v5814_v43 = vsel %vm5686_vm14, %v5594_v56, %v5750_v44 }
 0x4e2   :  { %v5599_v40 = vpop.f32.mrf.mxu0  ;;  %6739 = vmatprep.mubr.bf16.mxu1 %v14121_v0  ;;  %6932 = vmatprep.mubr.bf16.mxu0 %v14121_v0 }
 0x4e3   :  { %vm5688_vm12 = vcmp.gt.f32.partialorder %v5598_v30, 0.0  ;;  %v5752_v47 = vmul.f32 0.2, %v5598_v30  ;;  %v5600_v2 = vadd.f32 %v5599_v40, %v13849_v50  ;;  %6740 = vmatmul.mubr.bf16.gmra.mxu1 %v14124_v31  ;;  %6933 = vmatmul.mubr.bf16.gmra.mxu0 %v14124_v31  ;;  %v5815_v38 = vsel %vm5687_vm13, %v5596_v14, %v5751_v16 }
 0x4e4   :  { %v5603_v9 = vpop.f32.mrf.mxu0 }
 0x4e5   :  { %vm5689_vm15 = vcmp.gt.f32.partialorder %v5600_v2, 0.0  ;;  %v5753_v45 = vmul.f32 0.2, %v5600_v2  ;;  %v5816_v29 = vsel %vm5688_vm12, %v5598_v30, %v5752_v47  ;;  %v5604_v37 = vadd.f32 %v5603_v9, %v13852_v51 }
 0x4e6   :  { %v5605_v18 = vpop.f32.mrf.mxu0  ;;  %v14136_v25 = vpack.c.bf16 %v5816_v29, %v5814_v43 }
 0x4e7   :  { %v5817_v59 = vsel %vm5689_vm15, %v5600_v2, %v5753_v45  ;;  %v5606_v26 = vadd.f32 %v5605_v18, %v13849_v50  ;;  %v5754_v4 = vmul.f32 0.2, %v5604_v37  ;;  %vm5690_vm2 = vcmp.gt.f32.partialorder %v5604_v37, 0.0 }
 0x4e8   :  { %v14133_v13 = vpack.c.bf16 %v5817_v59, %v5815_v38  ;;  %v5607_v34 = vpop.f32.mrf.mxu0 }
 0x4e9   :  { %v5608_v1 = vadd.f32 %v5607_v34, %v13852_v51  ;;  %v5755_v23 = vmul.f32 0.2, %v5606_v26  ;;  %vm5691_vm1 = vcmp.gt.f32.partialorder %v5606_v26, 0.0  ;;  %v5818_v32 = vsel %vm5690_vm2, %v5604_v37, %v5754_v4 }
 0x4ea   :  { %v5609_v33 = vpop.f32.mrf.mxu0  ;;  %6749 = vmatprep.mubr.bf16.mxu1 %v14133_v13  ;;  %6942 = vmatprep.mubr.bf16.mxu0 %v14133_v13 }
 0x4eb   :  { %vm5692_vm0 = vcmp.gt.f32.partialorder %v5608_v1, 0.0  ;;  %v5756_v28 = vmul.f32 0.2, %v5608_v1  ;;  %v5610_v52 = vadd.f32 %v5609_v33, %v13849_v50  ;;  %6750 = vmatmul.mubr.bf16.gmra.mxu1 %v14136_v25  ;;  %6943 = vmatmul.mubr.bf16.gmra.mxu0 %v14136_v25  ;;  %v5819_v62 = vsel %vm5691_vm1, %v5606_v26, %v5755_v23 }
 0x4ec   :  { %v5613_v10 = vpop.f32.mrf.mxu0 }
 0x4ed   :  { %vm5693_vm3 = vcmp.gt.f32.partialorder %v5610_v52, 0.0  ;;  %v5757_v58 = vmul.f32 0.2, %v5610_v52  ;;  %v5820_v35 = vsel %vm5692_vm0, %v5608_v1, %v5756_v28  ;;  %v5614_v12 = vadd.f32 %v5613_v10, %v13852_v51 }
 0x4ee   :  { %v5615_v3 = vpop.f32.mrf.mxu0  ;;  %v14148_v53 = vpack.c.bf16 %v5820_v35, %v5818_v32  ;;  %vm7801_vm0 = vcmask 130048  }
 0x4ef   :  { %v5821_v15 = vsel %vm5693_vm3, %v5610_v52, %v5757_v58  ;;  %v5616_v5 = vadd.f32 %v5615_v3, %v13849_v50  ;;  %v5758_v47 = vmul.f32 0.2, %v5614_v12  ;;  %vm5694_vm6 = vcmp.gt.f32.partialorder %v5614_v12, 0.0 }
 0x4f0   :  { %v14145_v27 = vpack.c.bf16 %v5821_v15, %v5819_v62  ;;  %v5617_v14 = vpop.f32.mrf.mxu0 }
 0x4f1   :  { %v5618_v56 = vadd.f32 %v5617_v14, %v13852_v51  ;;  %v5759_v30 = vmul.f32 0.2, %v5616_v5  ;;  %vm5695_vm5 = vcmp.gt.f32.partialorder %v5616_v5, 0.0  ;;  %v5822_v59 = vsel %vm5694_vm6, %v5614_v12, %v5758_v47 }
 0x4f2   :  { %v5619_v6 = vpop.f32.mrf.mxu0  ;;  %6759 = vmatprep.mubr.bf16.mxu1 %v14145_v27  ;;  %6952 = vmatprep.mubr.bf16.mxu0 %v14145_v27 }
 0x4f3   :  { %vm5696_vm4 = vcmp.gt.f32.partialorder %v5618_v56, 0.0  ;;  %v5760_v40 = vmul.f32 0.2, %v5618_v56  ;;  %v5620_v16 = vadd.f32 %v5619_v6, %v13849_v50  ;;  %6760 = vmatmul.mubr.bf16.gmra.mxu1 %v14148_v53  ;;  %6953 = vmatmul.mubr.bf16.gmra.mxu0 %v14148_v53  ;;  %v5823_v29 = vsel %vm5695_vm5, %v5616_v5, %v5759_v30 }
 0x4f4   :  { %v5623_v2 = vpop.f32.mrf.mxu0 }
 0x4f5   :  { %vm5697_vm7 = vcmp.gt.f32.partialorder %v5620_v16, 0.0  ;;  %v5761_v44 = vmul.f32 0.2, %v5620_v16  ;;  %v5824_v9 = vsel %vm5696_vm4, %v5618_v56, %v5760_v40  ;;  %v5624_v43 = vadd.f32 %v5623_v2, %v13852_v51 }
 0x4f6   :  { %v5625_v45 = vpop.f32.mrf.mxu0  ;;  %v14160_v34 = vpack.c.bf16 %v5824_v9, %v5822_v59 }
 0x4f7   :  { %v5825_v18 = vsel %vm5697_vm7, %v5620_v16, %v5761_v44  ;;  %v5626_v38 = vadd.f32 %v5625_v45, %v13849_v50  ;;  %v5762_v4 = vmul.f32 0.2, %v5624_v43  ;;  %vm5698_vm10 = vcmp.gt.f32.partialorder %v5624_v43, 0.0 }
 0x4f8   :  { %v14157_v26 = vpack.c.bf16 %v5825_v18, %v5823_v29  ;;  %v5627_v37 = vpop.f32.mrf.mxu0 }
 0x4f9   :  { %v5628_v1 = vadd.f32 %v5627_v37, %v13852_v51  ;;  %v5763_v23 = vmul.f32 0.2, %v5626_v38  ;;  %vm5699_vm9 = vcmp.gt.f32.partialorder %v5626_v38, 0.0  ;;  %v5826_v32 = vsel %vm5698_vm10, %v5624_v43, %v5762_v4 }
 0x4fa   :  { %v5629_v33 = vpop.f32.mrf.mxu0  ;;  %6769 = vmatprep.mubr.bf16.mxu1 %v14157_v26  ;;  %6962 = vmatprep.mubr.bf16.mxu0 %v14157_v26 }
 0x4fb   :  { %vm5700_vm8 = vcmp.gt.f32.partialorder %v5628_v1, 0.0  ;;  %v5764_v28 = vmul.f32 0.2, %v5628_v1  ;;  %v5630_v52 = vadd.f32 %v5629_v33, %v13849_v50  ;;  %6770 = vmatmul.mubr.bf16.gmra.mxu1 %v14160_v34  ;;  %6963 = vmatmul.mubr.bf16.gmra.mxu0 %v14160_v34  ;;  %v5827_v62 = vsel %vm5699_vm9, %v5626_v38, %v5763_v23 }
 0x4fc   :  { %v5633_v10 = vpop.f32.mrf.mxu0 }
 0x4fd   :  { %vm5701_vm11 = vcmp.gt.f32.partialorder %v5630_v52, 0.0  ;;  %v5765_v58 = vmul.f32 0.2, %v5630_v52  ;;  %v5828_v35 = vsel %vm5700_vm8, %v5628_v1, %v5764_v28  ;;  %v5634_v14 = vadd.f32 %v5633_v10, %v13852_v51 }
 0x4fe   :  { %v5635_v3 = vpop.f32.mrf.mxu0  ;;  %v14172_v6 = vpack.c.bf16 %v5828_v35, %v5826_v32 }
 0x4ff   :  { %v5829_v15 = vsel %vm5701_vm11, %v5630_v52, %v5765_v58  ;;  %v5636_v5 = vadd.f32 %v5635_v3, %v13849_v50  ;;  %v5766_v44 = vmul.f32 0.2, %v5634_v14  ;;  %vm5702_vm14 = vcmp.gt.f32.partialorder %v5634_v14, 0.0 }
 0x500   :  { %v14169_v12 = vpack.c.bf16 %v5829_v15, %v5827_v62  ;;  %v5637_v56 = vpop.f32.mrf.mxu0 }
 0x501   :  { %v5638_v30 = vadd.f32 %v5637_v56, %v13852_v51  ;;  %v5767_v16 = vmul.f32 0.2, %v5636_v5  ;;  %vm5703_vm13 = vcmp.gt.f32.partialorder %v5636_v5, 0.0  ;;  %v5830_v18 = vsel %vm5702_vm14, %v5634_v14, %v5766_v44 }
 0x502   :  { %v5639_v40 = vpop.f32.mrf.mxu0  ;;  %6779 = vmatprep.mubr.bf16.mxu1 %v14169_v12  ;;  %6972 = vmatprep.mubr.bf16.mxu0 %v14169_v12 }
 0x503   :  { %vm5704_vm12 = vcmp.gt.f32.partialorder %v5638_v30, 0.0  ;;  %v5768_v47 = vmul.f32 0.2, %v5638_v30  ;;  %v5640_v2 = vadd.f32 %v5639_v40, %v13849_v50  ;;  %6780 = vmatmul.mubr.bf16.gmra.mxu1 %v14172_v6  ;;  %6973 = vmatmul.mubr.bf16.gmra.mxu0 %v14172_v6  ;;  %v5831_v45 = vsel %vm5703_vm13, %v5636_v5, %v5767_v16  ;;  %v5994_v50 = vld [vmem:[%s15222_s10] sm:$0x7f] }
 0x505   :  { %vm5705_vm15 = vcmp.gt.f32.partialorder %v5640_v2, 0.0  ;;  %v5769_v9 = vmul.f32 0.2, %v5640_v2  ;;  %v5832_v51 = vsel %vm5704_vm12, %v5638_v30, %v5768_v47 }
 0x506   :  { %v14182_v59 = vpack.c.bf16 %v5832_v51, %v5830_v18 }
 0x507   :  { %v5833_v29 = vsel %vm5705_vm15, %v5640_v2, %v5769_v9 }
 0x508   :  { %v14180_v38 = vpack.c.bf16 %v5833_v29, %v5831_v45 }
 0x50a   :  { %6789 = vmatprep.mubr.bf16.mxu1 %v14180_v38  ;;  %6982 = vmatprep.mubr.bf16.mxu0 %v14180_v38 }
 0x50b   :  { %6790 = vmatmul.mubr.bf16.gmra.mxu1 %v14182_v59  ;;  %6983 = vmatmul.mubr.bf16.gmra.mxu0 %v14182_v59 }
 0x50c   :  { %7025 = vmatprep.mubr.bf16.mxu1 %v13859_v60  ;;  %7218 = vmatprep.mubr.bf16.mxu0 %v13859_v60 }
 0x513   :  { %7026 = vmatmul.mubr.bf16.vlgmr.msra.gmra.mxu1 %v13868_v61  ;;  %7219 = vmatmul.mubr.bf16.vlgmr.msra.gmra.mxu0 %v13868_v61 }
 0x514   :  { %7035 = vmatprep.mubr.bf16.mxu1 %v13896_v46  ;;  %7226 = vmatprep.mubr.bf16.mxu0 %v13896_v46  ;;  %v14228_v46 = vrot.slane %v5994_v50, %v16053_v55 }
 0x51b   :  { %7036 = vmatmul.mubr.bf16.gmra.mxu1 %v13905_v42  ;;  %7227 = vmatmul.mubr.bf16.gmra.mxu0 %v13905_v42  ;;  %v16054_v42 = vld [vmem:[#allocation199_spill] sm:$0xff] }
 0x51c   :  { %7045 = vmatprep.mubr.bf16.mxu1 %v13933_v24  ;;  %7234 = vmatprep.mubr.bf16.mxu0 %v13933_v24  ;;  %v16055_v24 = vsub.s32 2, %v16054_v42 }
 0x523   :  { %7046 = vmatmul.mubr.bf16.gmra.mxu1 %v13942_v20  ;;  %7235 = vmatmul.mubr.bf16.gmra.mxu0 %v13942_v20  ;;  %v14232_v20 = vrot.slane %v5994_v50, %v16055_v24 }
 0x524   :  { %7055 = vmatprep.mubr.bf16.mxu1 %v13970_v11  ;;  %7242 = vmatprep.mubr.bf16.mxu0 %v13970_v11  ;;  %v14237_v11 = vrot.slane %v5994_v50, %v16052_v54 }
 0x52b   :  { %7056 = vmatmul.mubr.bf16.gmra.mxu1 %v13979_v39  ;;  %7243 = vmatmul.mubr.bf16.gmra.mxu0 %v13979_v39 }
 0x52c   :  { %7065 = vmatprep.mubr.bf16.mxu1 %v14004_v19  ;;  %7250 = vmatprep.mubr.bf16.mxu0 %v14004_v19  ;;  %v16056_v19 = vsub.s32 3, %v16054_v42 }
 0x533   :  { %7066 = vmatmul.mubr.bf16.gmra.mxu1 %v14010_v8  ;;  %7251 = vmatmul.mubr.bf16.gmra.mxu0 %v14010_v8  ;;  %v14241_v8 = vrot.slane %v5994_v50, %v16056_v19 }
 0x534   :  { %7075 = vmatprep.mubr.bf16.mxu1 %v14028_v22  ;;  %7258 = vmatprep.mubr.bf16.mxu0 %v14028_v22 }
 0x53b   :  { %7076 = vmatmul.mubr.bf16.gmra.mxu1 %v14034_v36  ;;  %7259 = vmatmul.mubr.bf16.gmra.mxu0 %v14034_v36 }
 0x53c   :  { %7085 = vmatprep.mubr.bf16.mxu1 %v14052_v57  ;;  %7266 = vmatprep.mubr.bf16.mxu0 %v14052_v57 }
 0x543   :  { %7086 = vmatmul.mubr.bf16.gmra.mxu1 %v14058_v7  ;;  %7267 = vmatmul.mubr.bf16.gmra.mxu0 %v14058_v7 }
 0x544   :  { %7095 = vmatprep.mubr.bf16.mxu1 %v14076_v41  ;;  %7274 = vmatprep.mubr.bf16.mxu0 %v14076_v41 }
 0x54b   :  { %7096 = vmatmul.mubr.bf16.gmra.mxu1 %v14082_v17  ;;  %7275 = vmatmul.mubr.bf16.gmra.mxu0 %v14082_v17 }
 0x54c   :  { %7105 = vmatprep.mubr.bf16.mxu1 %v14097_v21  ;;  %7282 = vmatprep.mubr.bf16.mxu0 %v14097_v21 }
 0x553   :  { %v6641_v60 = vpop.f32.mrf.mxu1  ;;  %v6834_v61 = vpop.f32.mrf.mxu0  ;;  %7106 = vmatmul.mubr.bf16.gmra.mxu1 %v14100_v48  ;;  %7283 = vmatmul.mubr.bf16.gmra.mxu0 %v14100_v48 }
 0x554   :  { %7115 = vmatprep.mubr.bf16.mxu1 %v14109_v63  ;;  %7290 = vmatprep.mubr.bf16.mxu0 %v14109_v63  ;;  %v6642_v57 = vadd.f32 %v6641_v60, %v14228_v46  ;;  %v6835_v7 = vadd.f32 %v6834_v61, %v14232_v20 }
 0x555   :  { %v6643_v39 = vpop.f32.mrf.mxu1  ;;  %v6836_v22 = vpop.f32.mrf.mxu0 }
 0x556   :  { %v6644_v21 = vadd.f32 %v6643_v39, %v14237_v11  ;;  %v6837_v54 = vadd.f32 %v6836_v22, %v14241_v8 }
 0x557   :  { %v6645_v36 = vpop.f32.mrf.mxu1  ;;  %v6838_v55 = vpop.f32.mrf.mxu0 }
 0x558   :  { %v6646_v41 = vadd.f32 %v6645_v36, %v14228_v46  ;;  %v6839_v17 = vadd.f32 %v6838_v55, %v14232_v20 }
 0x559   :  { %v6647_v48 = vpop.f32.mrf.mxu1  ;;  %v6840_v63 = vpop.f32.mrf.mxu0 }
 0x55a   :  { %v7347_v43 = vpack.c.bf16 %v6646_v41, %v6642_v57  ;;  %v7349_v37 = vpack.c.bf16 %v6839_v17, %v6835_v7  ;;  %v6648_v1 = vadd.f32 %v6647_v48, %v14237_v11  ;;  %v6841_v33 = vadd.f32 %v6840_v63, %v14241_v8 }
 0x55b   :  { %v6651_v23 = vpop.f32.mrf.mxu1  ;;  %v6844_v28 = vpop.f32.mrf.mxu0  ;;  %7116 = vmatmul.mubr.bf16.gmra.mxu1 %v14112_v49  ;;  %7291 = vmatmul.mubr.bf16.gmra.mxu0 %v14112_v49 }
 0x55c   :  { %9274 = vtanh.bf16 %v7347_v43  ;;  %v7348_v52 = vpack.c.bf16 %v6648_v1, %v6644_v21  ;;  %v7350_v4 = vpack.c.bf16 %v6841_v33, %v6837_v54  ;;  %7125 = vmatprep.mubr.bf16.mxu1 %v14121_v0  ;;  %7298 = vmatprep.mubr.bf16.mxu0 %v14121_v0  ;;  %v6652_v62 = vadd.f32 %v6651_v23, %v14228_v46 }
 0x55d   :  { %9276 = vtanh.bf16 %v7349_v37  ;;  %v6653_v10 = vpop.f32.mrf.mxu1  ;;  %v6846_v58 = vpop.f32.mrf.mxu0  ;;  %v6845_v15 = vadd.f32 %v6844_v28, %v14232_v20 }
 0x55e   :  { %9278 = vtanh.bf16 %v7348_v52  ;;  %v6654_v32 = vadd.f32 %v6653_v10, %v14237_v11  ;;  %v6847_v14 = vadd.f32 %v6846_v58, %v14241_v8 }
 0x55f   :  { %9280 = vtanh.bf16 %v7350_v4  ;;  %v6655_v35 = vpop.f32.mrf.mxu1  ;;  %v6848_v3 = vpop.f32.mrf.mxu0 }
 0x560   :  { %v6656_v49 = vadd.f32 %v6655_v35, %v14228_v46  ;;  %v6849_v5 = vadd.f32 %v6848_v3, %v14232_v20 }
 0x561   :  { %v6657_v0 = vpop.f32.mrf.mxu1  ;;  %v6850_v56 = vpop.f32.mrf.mxu0 }
 0x562   :  { %v7354_v30 = vpack.c.bf16 %v6656_v49, %v6652_v62  ;;  %v7356_v40 = vpack.c.bf16 %v6849_v5, %v6845_v15  ;;  %v6658_v16 = vadd.f32 %v6657_v0, %v14237_v11  ;;  %v6851_v47 = vadd.f32 %v6850_v56, %v14241_v8 }
 0x563   :  { %v6661_v2 = vpop.f32.mrf.mxu1  ;;  %v6854_v44 = vpop.f32.mrf.mxu0  ;;  %7126 = vmatmul.mubr.bf16.gmra.mxu1 %v14124_v31  ;;  %7299 = vmatmul.mubr.bf16.gmra.mxu0 %v14124_v31 }
 0x564   :  { %9282 = vtanh.bf16 %v7354_v30  ;;  %v7355_v9 = vpack.c.bf16 %v6658_v16, %v6654_v32  ;;  %v7357_v51 = vpack.c.bf16 %v6851_v47, %v6847_v14  ;;  %7135 = vmatprep.mubr.bf16.mxu1 %v14133_v13  ;;  %7306 = vmatprep.mubr.bf16.mxu0 %v14133_v13  ;;  %v6662_v60 = vadd.f32 %v6661_v2, %v14228_v46 }
 0x565   :  { %9284 = vtanh.bf16 %v7356_v40  ;;  %v6663_v45 = vpop.f32.mrf.mxu1  ;;  %v6856_v29 = vpop.f32.mrf.mxu0  ;;  %v6855_v61 = vadd.f32 %v6854_v44, %v14232_v20 }
 0x566   :  { %9286 = vtanh.bf16 %v7355_v9  ;;  %v6664_v39 = vadd.f32 %v6663_v45, %v14237_v11  ;;  %v6857_v54 = vadd.f32 %v6856_v29, %v14241_v8 }
 0x567   :  { %9288 = vtanh.bf16 %v7357_v51  ;;  %v6665_v18 = vpop.f32.mrf.mxu1  ;;  %v6858_v50 = vpop.f32.mrf.mxu0 }
 0x568   :  { %v6666_v31 = vadd.f32 %v6665_v18, %v14228_v46  ;;  %v6859_v24 = vadd.f32 %v6858_v50, %v14232_v20 }
 0x569   :  { %v6667_v19 = vpop.f32.mrf.mxu1  ;;  %v6860_v22 = vpop.f32.mrf.mxu0 }
 0x56a   :  { %v9275_v13 = vpop.eup %9274  ;;  %v7361_v36 = vpack.c.bf16 %v6666_v31, %v6662_v60  ;;  %v7363_v55 = vpack.c.bf16 %v6859_v24, %v6855_v61  ;;  %v6668_v57 = vadd.f32 %v6667_v19, %v14237_v11  ;;  %v6861_v7 = vadd.f32 %v6860_v22, %v14241_v8 }
 0x56b   :  { %v9277_v41 = vpop.eup %9276  ;;  %v7571_v17 = vunpack.c.l.bf16 %v9275_v13  ;;  %v7578_v21 = vunpack.c.h.bf16 %v9275_v13  ;;  %v6671_v48 = vpop.f32.mrf.mxu1  ;;  %7136 = vmatmul.mubr.bf16.gmra.mxu1 %v14136_v25  ;;  %7307 = vmatmul.mubr.bf16.gmra.mxu0 %v14136_v25 }
 0x56c   :  { %v6864_v63 = vpop.f32.mrf.mxu0  ;;  %v9279_v43 = vpop.eup %9278  ;;  %v7573_v37 = vunpack.c.l.bf16 %v9277_v41  ;;  %v7580_v1 = vunpack.c.h.bf16 %v9277_v41  ;;  %9290 = vtanh.bf16 %v7361_v36  ;;  %v7362_v33 = vpack.c.bf16 %v6668_v57, %v6664_v39  ;;  %7145 = vmatprep.mubr.bf16.mxu1 %v14145_v27  ;;  %7314 = vmatprep.mubr.bf16.mxu0 %v14145_v27 }
 0x56d   :  { %v9281_v23 = vpop.eup %9280  ;;  %7795 = vst [vmem:[%s15223_s11] sm:$0xff] %v7571_v17  ;;  %7803 = vst [vmem:[%s15223_s11 + $0x38] sm:$0xff] %v7578_v21  ;;  %v7572_v28 = vunpack.c.l.bf16 %v9279_v43  ;;  %v7579_v25 = vunpack.c.h.bf16 %v9279_v43  ;;  %9292 = vtanh.bf16 %v7363_v55  ;;  %v7364_v52 = vpack.c.bf16 %v6861_v7, %v6857_v54  ;;  %v6673_v4 = vpop.f32.mrf.mxu1 }
 0x56e   :  { %v6866_v10 = vpop.f32.mrf.mxu0  ;;  %7797 = vst [vmem:[%s15223_s11 + $0x10] sm:$0xff] %v7573_v37  ;;  %7805 = vst [vmem:[%s15223_s11 + $0x48] sm:$0xff] %v7580_v1  ;;  %v7574_v27 = vunpack.c.l.bf16 %v9281_v23  ;;  %v7581_v58 = vunpack.c.h.bf16 %v9281_v23  ;;  %9294 = vtanh.bf16 %v7362_v33  ;;  %v6672_v62 = vadd.f32 %v6671_v48, %v14228_v46 }
 0x56f   :  { %7796 = vst [vmem:[%s15223_s11 + $0x8] sm:$0xff] %v7572_v28  ;;  %7804 = vst [vmem:[%s15223_s11 + $0x40] sm:$0xff] %v7579_v25  ;;  %9296 = vtanh.bf16 %v7364_v52  ;;  %v6675_v35 = vpop.f32.mrf.mxu1  ;;  %v6865_v15 = vadd.f32 %v6864_v63, %v14232_v20  ;;  %v6674_v32 = vadd.f32 %v6673_v4, %v14237_v11  ;;  %v6867_v51 = vadd.f32 %v6866_v10, %v14241_v8 }
 0x570   :  { %v6868_v3 = vpop.f32.mrf.mxu0  ;;  %7798 = vst [vmem:[%s15223_s11 + $0x18] sm:$0xff] %v7574_v27  ;;  %7806 = vst [vmem:[%s15223_s11 + $0x50] sm:$0xff] %v7581_v58  ;;  %v6676_v49 = vadd.f32 %v6675_v35, %v14228_v46 }
 0x571   :  { %v6869_v5 = vadd.f32 %v6868_v3, %v14232_v20  ;;  %v6677_v14 = vpop.f32.mrf.mxu1 }
 0x572   :  { %v6870_v0 = vpop.f32.mrf.mxu0  ;;  %v9283_v56 = vpop.eup %9282  ;;  %v7368_v30 = vpack.c.bf16 %v6676_v49, %v6672_v62  ;;  %v6678_v16 = vadd.f32 %v6677_v14, %v14237_v11 }
 0x573   :  { %v7370_v40 = vpack.c.bf16 %v6869_v5, %v6865_v15  ;;  %v6871_v47 = vadd.f32 %v6870_v0, %v14241_v8  ;;  %v9285_v2 = vpop.eup %9284  ;;  %v7585_v44 = vunpack.c.l.bf16 %v9283_v56  ;;  %v7592_v9 = vunpack.c.h.bf16 %v9283_v56  ;;  %v6681_v45 = vpop.f32.mrf.mxu1  ;;  %7146 = vmatmul.mubr.bf16.gmra.mxu1 %v14148_v53  ;;  %7315 = vmatmul.mubr.bf16.gmra.mxu0 %v14148_v53 }
 0x574   :  { %v6874_v29 = vpop.f32.mrf.mxu0  ;;  %v9287_v18 = vpop.eup %9286  ;;  %v7587_v50 = vunpack.c.l.bf16 %v9285_v2  ;;  %v7594_v60 = vunpack.c.h.bf16 %v9285_v2  ;;  %9298 = vtanh.bf16 %v7368_v30  ;;  %v7369_v61 = vpack.c.bf16 %v6678_v16, %v6674_v32  ;;  %7155 = vmatprep.mubr.bf16.mxu1 %v14157_v26  ;;  %7322 = vmatprep.mubr.bf16.mxu0 %v14157_v26 }
 0x575   :  { %v9289_v31 = vpop.eup %9288  ;;  %7810 = vst [vmem:[%s15223_s11 + $0x70] sm:$0xff] %v7585_v44  ;;  %7817 = vst [vmem:[%s15223_s11 + $0xa8] sm:$0xff] %v7592_v9  ;;  %v7586_v24 = vunpack.c.l.bf16 %v9287_v18  ;;  %v7593_v53 = vunpack.c.h.bf16 %v9287_v18  ;;  %9300 = vtanh.bf16 %v7370_v40  ;;  %v7371_v39 = vpack.c.bf16 %v6871_v47, %v6867_v51  ;;  %v6683_v19 = vpop.f32.mrf.mxu1 }
 0x576   :  { %v6876_v22 = vpop.f32.mrf.mxu0  ;;  %7812 = vst [vmem:[%s15223_s11 + $0x80] sm:$0xff] %v7587_v50  ;;  %7819 = vst [vmem:[%s15223_s11 + $0xb8] sm:$0xff] %v7594_v60  ;;  %v7588_v26 = vunpack.c.l.bf16 %v9289_v31  ;;  %v7595_v13 = vunpack.c.h.bf16 %v9289_v31  ;;  %9302 = vtanh.bf16 %v7369_v61  ;;  %v6682_v57 = vadd.f32 %v6681_v45, %v14228_v46 }
 0x577   :  { %7811 = vst [vmem:[%s15223_s11 + $0x78] sm:$0xff] %v7586_v24  ;;  %7818 = vst [vmem:[%s15223_s11 + $0xb0] sm:$0xff] %v7593_v53  ;;  %9304 = vtanh.bf16 %v7371_v39  ;;  %v6685_v36 = vpop.f32.mrf.mxu1  ;;  %v6875_v7 = vadd.f32 %v6874_v29, %v14232_v20  ;;  %v6684_v21 = vadd.f32 %v6683_v19, %v14237_v11  ;;  %v6877_v52 = vadd.f32 %v6876_v22, %v14241_v8 }
 0x578   :  { %v6878_v55 = vpop.f32.mrf.mxu0  ;;  %7813 = vst [vmem:[%s15223_s11 + $0x88] sm:$0xff] %v7588_v26  ;;  %7820 = vst [vmem:[%s15223_s11 + $0xc0] sm:$0xff] %v7595_v13  ;;  %v6686_v41 = vadd.f32 %v6685_v36, %v14228_v46 }
 0x579   :  { %v6879_v17 = vadd.f32 %v6878_v55, %v14232_v20  ;;  %v6687_v54 = vpop.f32.mrf.mxu1 }
 0x57a   :  { %v6880_v48 = vpop.f32.mrf.mxu0  ;;  %v9291_v63 = vpop.eup %9290  ;;  %v7375_v43 = vpack.c.bf16 %v6686_v41, %v6682_v57  ;;  %v6688_v1 = vadd.f32 %v6687_v54, %v14237_v11 }
 0x57b   :  { %v7377_v37 = vpack.c.bf16 %v6879_v17, %v6875_v7  ;;  %v6881_v33 = vadd.f32 %v6880_v48, %v14241_v8  ;;  %v9293_v23 = vpop.eup %9292  ;;  %v7599_v28 = vunpack.c.l.bf16 %v9291_v63  ;;  %v7606_v25 = vunpack.c.h.bf16 %v9291_v63  ;;  %v6691_v4 = vpop.f32.mrf.mxu1  ;;  %7156 = vmatmul.mubr.bf16.gmra.mxu1 %v14160_v34  ;;  %7323 = vmatmul.mubr.bf16.gmra.mxu0 %v14160_v34 }
 0x57c   :  { %v6884_v10 = vpop.f32.mrf.mxu0  ;;  %v9295_v27 = vpop.eup %9294  ;;  %v7601_v58 = vunpack.c.l.bf16 %v9293_v23  ;;  %v7608_v35 = vunpack.c.h.bf16 %v9293_v23  ;;  %9306 = vtanh.bf16 %v7375_v43  ;;  %v7376_v3 = vpack.c.bf16 %v6688_v1, %v6684_v21  ;;  %7165 = vmatprep.mubr.bf16.mxu1 %v14169_v12  ;;  %7330 = vmatprep.mubr.bf16.mxu0 %v14169_v12 }
 0x57d   :  { %v9297_v62 = vpop.eup %9296  ;;  %7824 = vst [vmem:[%s15223_s11 + $0xe0] sm:$0xff] %v7599_v28  ;;  %7831 = vst [vmem:[%s15223_s11 + $0x118] sm:$0xff] %v7606_v25  ;;  %v7600_v15 = vunpack.c.l.bf16 %v9295_v27  ;;  %v7607_v34 = vunpack.c.h.bf16 %v9295_v27  ;;  %9308 = vtanh.bf16 %v7377_v37  ;;  %v7378_v49 = vpack.c.bf16 %v6881_v33, %v6877_v52  ;;  %v6693_v5 = vpop.f32.mrf.mxu1 }
 0x57e   :  { %v6886_v32 = vpop.f32.mrf.mxu0  ;;  %7826 = vst [vmem:[%s15223_s11 + $0xf0] sm:$0xff] %v7601_v58  ;;  %7833 = vst [vmem:[%s15223_s11 + $0x128] sm:$0xff] %v7608_v35  ;;  %v7602_v12 = vunpack.c.l.bf16 %v9297_v62  ;;  %v7609_v14 = vunpack.c.h.bf16 %v9297_v62  ;;  %9310 = vtanh.bf16 %v7376_v3  ;;  %v6692_v30 = vadd.f32 %v6691_v4, %v14228_v46 }
 0x57f   :  { %7825 = vst [vmem:[%s15223_s11 + $0xe8] sm:$0xff] %v7600_v15  ;;  %7832 = vst [vmem:[%s15223_s11 + $0x120] sm:$0xff] %v7607_v34  ;;  %9312 = vtanh.bf16 %v7378_v49  ;;  %v6695_v0 = vpop.f32.mrf.mxu1  ;;  %v6885_v40 = vadd.f32 %v6884_v10, %v14232_v20  ;;  %v6694_v2 = vadd.f32 %v6693_v5, %v14237_v11  ;;  %v6887_v24 = vadd.f32 %v6886_v32, %v14241_v8 }
 0x580   :  { %v6888_v56 = vpop.f32.mrf.mxu0  ;;  %7827 = vst [vmem:[%s15223_s11 + $0xf8] sm:$0xff] %v7602_v12  ;;  %7834 = vst [vmem:[%s15223_s11 + $0x130] sm:$0xff] %v7609_v14  ;;  %v6696_v16 = vadd.f32 %v6695_v0, %v14228_v46 }
 0x581   :  { %v6889_v47 = vadd.f32 %v6888_v56, %v14232_v20  ;;  %v6697_v44 = vpop.f32.mrf.mxu1 }
 0x582   :  { %v6890_v9 = vpop.f32.mrf.mxu0  ;;  %v9299_v51 = vpop.eup %9298  ;;  %v7382_v45 = vpack.c.bf16 %v6696_v16, %v6692_v30  ;;  %v6698_v18 = vadd.f32 %v6697_v44, %v14237_v11 }
 0x583   :  { %v7384_v29 = vpack.c.bf16 %v6889_v47, %v6885_v40  ;;  %v6891_v50 = vadd.f32 %v6890_v9, %v14241_v8  ;;  %v9301_v60 = vpop.eup %9300  ;;  %v7613_v61 = vunpack.c.l.bf16 %v9299_v51  ;;  %v7620_v31 = vunpack.c.h.bf16 %v9299_v51  ;;  %v6701_v53 = vpop.f32.mrf.mxu1  ;;  %7166 = vmatmul.mubr.bf16.gmra.mxu1 %v14172_v6  ;;  %7331 = vmatmul.mubr.bf16.gmra.mxu0 %v14172_v6 }
 0x584   :  { %v6894_v39 = vpop.f32.mrf.mxu0  ;;  %v9303_v19 = vpop.eup %9302  ;;  %v7615_v22 = vunpack.c.l.bf16 %v9301_v60  ;;  %v7622_v26 = vunpack.c.h.bf16 %v9301_v60  ;;  %9314 = vtanh.bf16 %v7382_v45  ;;  %v7383_v13 = vpack.c.bf16 %v6698_v18, %v6694_v2  ;;  %7175 = vmatprep.mubr.bf16.mxu1 %v14180_v38  ;;  %7338 = vmatprep.mubr.bf16.mxu0 %v14180_v38 }
 0x585   :  { %v9305_v36 = vpop.eup %9304  ;;  %7838 = vst [vmem:[%s15223_s11 + $0x150] sm:$0xff] %v7613_v61  ;;  %7845 = vst [vmem:[%s15223_s11 + $0x188] sm:$0xff] %v7620_v31  ;;  %v7614_v55 = vunpack.c.l.bf16 %v9303_v19  ;;  %v7621_v6 = vunpack.c.h.bf16 %v9303_v19  ;;  %9316 = vtanh.bf16 %v7384_v29  ;;  %v7385_v57 = vpack.c.bf16 %v6891_v50, %v6887_v24  ;;  %v6703_v7 = vpop.f32.mrf.mxu1 }
 0x586   :  { %v6896_v41 = vpop.f32.mrf.mxu0  ;;  %7840 = vst [vmem:[%s15223_s11 + $0x160] sm:$0xff] %v7615_v22  ;;  %7847 = vst [vmem:[%s15223_s11 + $0x198] sm:$0xff] %v7622_v26  ;;  %v7616_v38 = vunpack.c.l.bf16 %v9305_v36  ;;  %v7623_v17 = vunpack.c.h.bf16 %v9305_v36  ;;  %9318 = vtanh.bf16 %v7383_v13  ;;  %v6702_v48 = vadd.f32 %v6701_v53, %v14228_v46 }
 0x587   :  { %7839 = vst [vmem:[%s15223_s11 + $0x158] sm:$0xff] %v7614_v55  ;;  %7846 = vst [vmem:[%s15223_s11 + $0x190] sm:$0xff] %v7621_v6  ;;  %9320 = vtanh.bf16 %v7385_v57  ;;  %v6705_v21 = vpop.f32.mrf.mxu1  ;;  %v6895_v63 = vadd.f32 %v6894_v39, %v14232_v20  ;;  %v6704_v1 = vadd.f32 %v6703_v7, %v14237_v11  ;;  %v6897_v3 = vadd.f32 %v6896_v41, %v14241_v8 }
 0x588   :  { %v6898_v54 = vpop.f32.mrf.mxu0  ;;  %7841 = vst [vmem:[%s15223_s11 + $0x168] sm:$0xff] %v7616_v38  ;;  %7848 = vst [vmem:[%s15223_s11 + $0x1a0] sm:$0xff] %v7623_v17  ;;  %v6706_v43 = vadd.f32 %v6705_v21, %v14228_v46 }
 0x589   :  { %v6899_v37 = vadd.f32 %v6898_v54, %v14232_v20  ;;  %v6707_v33 = vpop.f32.mrf.mxu1 }
 0x58a   :  { %v6900_v23 = vpop.f32.mrf.mxu0  ;;  %v9307_v28 = vpop.eup %9306  ;;  %v7389_v25 = vpack.c.bf16 %v6706_v43, %v6702_v48  ;;  %v6708_v4 = vadd.f32 %v6707_v33, %v14237_v11 }
 0x58b   :  { %v7391_v52 = vpack.c.bf16 %v6899_v37, %v6895_v63  ;;  %v6901_v10 = vadd.f32 %v6900_v23, %v14241_v8  ;;  %v9309_v27 = vpop.eup %9308  ;;  %v7627_v58 = vunpack.c.l.bf16 %v9307_v28  ;;  %v7634_v35 = vunpack.c.h.bf16 %v9307_v28  ;;  %v6711_v62 = vpop.f32.mrf.mxu1  ;;  %7176 = vmatmul.mubr.bf16.gmra.mxu1 %v14182_v59  ;;  %7339 = vmatmul.mubr.bf16.gmra.mxu0 %v14182_v59 }
 0x58c   :  { %v6904_v15 = vpop.f32.mrf.mxu0  ;;  %v9311_v34 = vpop.eup %9310  ;;  %v7629_v49 = vunpack.c.l.bf16 %v9309_v27  ;;  %v7636_v5 = vunpack.c.h.bf16 %v9309_v27  ;;  %9322 = vtanh.bf16 %v7389_v25  ;;  %v7390_v32 = vpack.c.bf16 %v6708_v4, %v6704_v1 }
 0x58d   :  { %v9313_v12 = vpop.eup %9312  ;;  %7852 = vst [vmem:[%s15223_s11 + $0x1c0] sm:$0xff] %v7627_v58  ;;  %7859 = vst [vmem:[%s15223_s11 + $0x1f8] sm:$0xff] %v7634_v35  ;;  %v7628_v14 = vunpack.c.l.bf16 %v9311_v34  ;;  %v7635_v0 = vunpack.c.h.bf16 %v9311_v34  ;;  %9324 = vtanh.bf16 %v7391_v52  ;;  %v7392_v56 = vpack.c.bf16 %v6901_v10, %v6897_v3  ;;  %v6713_v30 = vpop.f32.mrf.mxu1 }
 0x58e   :  { %v6906_v59 = vpop.f32.mrf.mxu0  ;;  %7854 = vst [vmem:[%s15223_s11 + $0x1d0] sm:$0xff] %v7629_v49  ;;  %7861 = vst [vmem:[%s15223_s11 + $0x208] sm:$0xff] %v7636_v5  ;;  %v7630_v40 = vunpack.c.l.bf16 %v9313_v12  ;;  %v7637_v16 = vunpack.c.h.bf16 %v9313_v12  ;;  %9326 = vtanh.bf16 %v7390_v32  ;;  %v6712_v44 = vadd.f32 %v6711_v62, %v14228_v46 }
 0x58f   :  { %7853 = vst [vmem:[%s15223_s11 + $0x1c8] sm:$0xff] %v7628_v14  ;;  %7860 = vst [vmem:[%s15223_s11 + $0x200] sm:$0xff] %v7635_v0  ;;  %9328 = vtanh.bf16 %v7392_v56  ;;  %v6715_v47 = vpop.f32.mrf.mxu1  ;;  %v6905_v9 = vadd.f32 %v6904_v15, %v14232_v20  ;;  %v6714_v29 = vadd.f32 %v6713_v30, %v14237_v11  ;;  %v6907_v26 = vadd.f32 %v6906_v59, %v14241_v8 }
 0x590   :  { %v6908_v2 = vpop.f32.mrf.mxu0  ;;  %7855 = vst [vmem:[%s15223_s11 + $0x1d8] sm:$0xff] %v7630_v40  ;;  %7862 = vst [vmem:[%s15223_s11 + $0x210] sm:$0xff] %v7637_v16  ;;  %v6716_v51 = vadd.f32 %v6715_v47, %v14228_v46 }
 0x591   :  { %v6909_v45 = vadd.f32 %v6908_v2, %v14232_v20  ;;  %v6717_v18 = vpop.f32.mrf.mxu1 }
 0x592   :  { %v6910_v50 = vpop.f32.mrf.mxu0  ;;  %v9315_v60 = vpop.eup %9314  ;;  %v7396_v61 = vpack.c.bf16 %v6716_v51, %v6712_v44  ;;  %v6718_v24 = vadd.f32 %v6717_v18, %v14237_v11 }
 0x593   :  { %v7398_v31 = vpack.c.bf16 %v6909_v45, %v6905_v9  ;;  %v6911_v53 = vadd.f32 %v6910_v50, %v14241_v8  ;;  %v9317_v39 = vpop.eup %9316  ;;  %v7641_v19 = vunpack.c.l.bf16 %v9315_v60  ;;  %v7648_v22 = vunpack.c.h.bf16 %v9315_v60  ;;  %v6721_v13 = vpop.f32.mrf.mxu1 }
 0x594   :  { %v6914_v36 = vpop.f32.mrf.mxu0  ;;  %v9319_v55 = vpop.eup %9318  ;;  %v7643_v6 = vunpack.c.l.bf16 %v9317_v39  ;;  %v7650_v57 = vunpack.c.h.bf16 %v9317_v39  ;;  %9330 = vtanh.bf16 %v7396_v61  ;;  %v7397_v7 = vpack.c.bf16 %v6718_v24, %v6714_v29 }
 0x595   :  { %v9321_v41 = vpop.eup %9320  ;;  %7866 = vst [vmem:[%s15223_s11 + $0x230] sm:$0xff] %v7641_v19  ;;  %7873 = vst [vmem:[%s15223_s11 + $0x268] sm:$0xff] %v7648_v22  ;;  %v7642_v38 = vunpack.c.l.bf16 %v9319_v55  ;;  %v7649_v17 = vunpack.c.h.bf16 %v9319_v55  ;;  %9332 = vtanh.bf16 %v7398_v31  ;;  %v7399_v21 = vpack.c.bf16 %v6911_v53, %v6907_v26  ;;  %v6723_v54 = vpop.f32.mrf.mxu1 }
 0x596   :  { %v6916_v48 = vpop.f32.mrf.mxu0  ;;  %7868 = vst [vmem:[%s15223_s11 + $0x240] sm:$0xff] %v7643_v6  ;;  %7875 = vst [vmem:[%s15223_s11 + $0x278] sm:$0xff] %v7650_v57  ;;  %v7644_v63 = vunpack.c.l.bf16 %v9321_v41  ;;  %v7651_v43 = vunpack.c.h.bf16 %v9321_v41  ;;  %9334 = vtanh.bf16 %v7397_v7  ;;  %v6722_v33 = vadd.f32 %v6721_v13, %v14228_v46 }
 0x597   :  { %7867 = vst [vmem:[%s15223_s11 + $0x238] sm:$0xff] %v7642_v38  ;;  %7874 = vst [vmem:[%s15223_s11 + $0x270] sm:$0xff] %v7649_v17  ;;  %9336 = vtanh.bf16 %v7399_v21  ;;  %v6725_v37 = vpop.f32.mrf.mxu1  ;;  %v6915_v23 = vadd.f32 %v6914_v36, %v14232_v20  ;;  %v6724_v52 = vadd.f32 %v6723_v54, %v14237_v11  ;;  %v6917_v5 = vadd.f32 %v6916_v48, %v14241_v8 }
 0x598   :  { %v6918_v1 = vpop.f32.mrf.mxu0  ;;  %7869 = vst [vmem:[%s15223_s11 + $0x248] sm:$0xff] %v7644_v63  ;;  %7876 = vst [vmem:[%s15223_s11 + $0x280] sm:$0xff] %v7651_v43  ;;  %v6726_v28 = vadd.f32 %v6725_v37, %v14228_v46 }
 0x599   :  { %v6919_v25 = vadd.f32 %v6918_v1, %v14232_v20  ;;  %v6727_v4 = vpop.f32.mrf.mxu1 }
 0x59a   :  { %v6920_v10 = vpop.f32.mrf.mxu0  ;;  %v9323_v27 = vpop.eup %9322  ;;  %v7403_v58 = vpack.c.bf16 %v6726_v28, %v6722_v33  ;;  %v6728_v3 = vadd.f32 %v6727_v4, %v14237_v11 }
 0x59b   :  { %v7405_v35 = vpack.c.bf16 %v6919_v25, %v6915_v23  ;;  %v6921_v62 = vadd.f32 %v6920_v10, %v14241_v8  ;;  %v9325_v15 = vpop.eup %9324  ;;  %v7655_v34 = vunpack.c.l.bf16 %v9323_v27  ;;  %v7662_v49 = vunpack.c.h.bf16 %v9323_v27  ;;  %v6731_v32 = vpop.f32.mrf.mxu1 }
 0x59c   :  { %v6924_v12 = vpop.f32.mrf.mxu0  ;;  %v9327_v14 = vpop.eup %9326  ;;  %v7657_v0 = vunpack.c.l.bf16 %v9325_v15  ;;  %v7664_v56 = vunpack.c.h.bf16 %v9325_v15  ;;  %9338 = vtanh.bf16 %v7403_v58  ;;  %v7404_v30 = vpack.c.bf16 %v6728_v3, %v6724_v52 }
 0x59d   :  { %v9329_v59 = vpop.eup %9328  ;;  %7880 = vst [vmem:[%s15223_s11 + $0x2a0] sm:$0xff] %v7655_v34  ;;  %7887 = vst [vmem:[%s15223_s11 + $0x2d8] sm:$0xff] %v7662_v49  ;;  %v7656_v40 = vunpack.c.l.bf16 %v9327_v14  ;;  %v7663_v16 = vunpack.c.h.bf16 %v9327_v14  ;;  %9340 = vtanh.bf16 %v7405_v35  ;;  %v7406_v47 = vpack.c.bf16 %v6921_v62, %v6917_v5  ;;  %v6733_v2 = vpop.f32.mrf.mxu1 }
 0x59e   :  { %v6926_v44 = vpop.f32.mrf.mxu0  ;;  %7882 = vst [vmem:[%s15223_s11 + $0x2b0] sm:$0xff] %v7657_v0  ;;  %7889 = vst [vmem:[%s15223_s11 + $0x2e8] sm:$0xff] %v7664_v56  ;;  %v7658_v9 = vunpack.c.l.bf16 %v9329_v59  ;;  %v7665_v51 = vunpack.c.h.bf16 %v9329_v59  ;;  %9342 = vtanh.bf16 %v7404_v30  ;;  %v6732_v18 = vadd.f32 %v6731_v32, %v14228_v46 }
 0x59f   :  { %7881 = vst [vmem:[%s15223_s11 + $0x2a8] sm:$0xff] %v7656_v40  ;;  %7888 = vst [vmem:[%s15223_s11 + $0x2e0] sm:$0xff] %v7663_v16  ;;  %9344 = vtanh.bf16 %v7406_v47  ;;  %v6735_v45 = vpop.f32.mrf.mxu1  ;;  %v6925_v50 = vadd.f32 %v6924_v12, %v14232_v20  ;;  %v6734_v31 = vadd.f32 %v6733_v2, %v14237_v11  ;;  %v6927_v57 = vadd.f32 %v6926_v44, %v14241_v8 }
 0x5a0   :  { %v6928_v29 = vpop.f32.mrf.mxu0  ;;  %7883 = vst [vmem:[%s15223_s11 + $0x2b8] sm:$0xff] %v7658_v9  ;;  %7890 = vst [vmem:[%s15223_s11 + $0x2f0] sm:$0xff] %v7665_v51  ;;  %v6736_v60 = vadd.f32 %v6735_v45, %v14228_v46 }
 0x5a1   :  { %v6929_v61 = vadd.f32 %v6928_v29, %v14232_v20  ;;  %v6737_v24 = vpop.f32.mrf.mxu1 }
 0x5a2   :  { %v6930_v53 = vpop.f32.mrf.mxu0  ;;  %v9331_v39 = vpop.eup %9330  ;;  %v7410_v19 = vpack.c.bf16 %v6736_v60, %v6732_v18  ;;  %v6738_v26 = vadd.f32 %v6737_v24, %v14237_v11 }
 0x5a3   :  { %v7412_v22 = vpack.c.bf16 %v6929_v61, %v6925_v50  ;;  %v6931_v13 = vadd.f32 %v6930_v53, %v14241_v8  ;;  %v9333_v36 = vpop.eup %9332  ;;  %v7669_v55 = vunpack.c.l.bf16 %v9331_v39  ;;  %v7676_v6 = vunpack.c.h.bf16 %v9331_v39  ;;  %v6741_v7 = vpop.f32.mrf.mxu1 }
 0x5a4   :  { %v6934_v41 = vpop.f32.mrf.mxu0  ;;  %v9335_v38 = vpop.eup %9334  ;;  %v7671_v17 = vunpack.c.l.bf16 %v9333_v36  ;;  %v7678_v21 = vunpack.c.h.bf16 %v9333_v36  ;;  %9346 = vtanh.bf16 %v7410_v19  ;;  %v7411_v54 = vpack.c.bf16 %v6738_v26, %v6734_v31 }
 0x5a5   :  { %v9337_v48 = vpop.eup %9336  ;;  %7894 = vst [vmem:[%s15223_s11 + $0x310] sm:$0xff] %v7669_v55  ;;  %7901 = vst [vmem:[%s15223_s11 + $0x348] sm:$0xff] %v7676_v6  ;;  %v7670_v63 = vunpack.c.l.bf16 %v9335_v38  ;;  %v7677_v43 = vunpack.c.h.bf16 %v9335_v38  ;;  %9348 = vtanh.bf16 %v7412_v22  ;;  %v7413_v37 = vpack.c.bf16 %v6931_v13, %v6927_v57  ;;  %v6743_v1 = vpop.f32.mrf.mxu1 }
 0x5a6   :  { %v6936_v33 = vpop.f32.mrf.mxu0  ;;  %7896 = vst [vmem:[%s15223_s11 + $0x320] sm:$0xff] %v7671_v17  ;;  %7903 = vst [vmem:[%s15223_s11 + $0x358] sm:$0xff] %v7678_v21  ;;  %v7672_v23 = vunpack.c.l.bf16 %v9337_v48  ;;  %v7679_v28 = vunpack.c.h.bf16 %v9337_v48  ;;  %9350 = vtanh.bf16 %v7411_v54  ;;  %v6742_v4 = vadd.f32 %v6741_v7, %v14228_v46 }
 0x5a7   :  { %7895 = vst [vmem:[%s15223_s11 + $0x318] sm:$0xff] %v7670_v63  ;;  %7902 = vst [vmem:[%s15223_s11 + $0x350] sm:$0xff] %v7677_v43  ;;  %9352 = vtanh.bf16 %v7413_v37  ;;  %v6745_v25 = vpop.f32.mrf.mxu1  ;;  %v6935_v10 = vadd.f32 %v6934_v41, %v14232_v20  ;;  %v6744_v35 = vadd.f32 %v6743_v1, %v14237_v11  ;;  %v6937_v56 = vadd.f32 %v6936_v33, %v14241_v8 }
 0x5a8   :  { %v6938_v52 = vpop.f32.mrf.mxu0  ;;  %7897 = vst [vmem:[%s15223_s11 + $0x328] sm:$0xff] %v7672_v23  ;;  %7904 = vst [vmem:[%s15223_s11 + $0x360] sm:$0xff] %v7679_v28  ;;  %v6746_v27 = vadd.f32 %v6745_v25, %v14228_v46 }
 0x5a9   :  { %v6939_v58 = vadd.f32 %v6938_v52, %v14232_v20  ;;  %v6747_v3 = vpop.f32.mrf.mxu1 }
 0x5aa   :  { %v6940_v62 = vpop.f32.mrf.mxu0  ;;  %v9339_v15 = vpop.eup %9338  ;;  %v7417_v34 = vpack.c.bf16 %v6746_v27, %v6742_v4  ;;  %v6748_v5 = vadd.f32 %v6747_v3, %v14237_v11 }
 0x5ab   :  { %v7419_v49 = vpack.c.bf16 %v6939_v58, %v6935_v10  ;;  %v6941_v32 = vadd.f32 %v6940_v62, %v14241_v8  ;;  %v9341_v12 = vpop.eup %9340  ;;  %v7683_v14 = vunpack.c.l.bf16 %v9339_v15  ;;  %v7690_v0 = vunpack.c.h.bf16 %v9339_v15  ;;  %v6751_v30 = vpop.f32.mrf.mxu1 }
 0x5ac   :  { %v6944_v59 = vpop.f32.mrf.mxu0  ;;  %v9343_v40 = vpop.eup %9342  ;;  %v7685_v16 = vunpack.c.l.bf16 %v9341_v12  ;;  %v7692_v47 = vunpack.c.h.bf16 %v9341_v12  ;;  %9354 = vtanh.bf16 %v7417_v34  ;;  %v7418_v2 = vpack.c.bf16 %v6748_v5, %v6744_v35 }
 0x5ad   :  { %v9345_v44 = vpop.eup %9344  ;;  %7908 = vst [vmem:[%s15223_s11 + $0x380] sm:$0xff] %v7683_v14  ;;  %7915 = vst [vmem:[%s15223_s11 + $0x3b8] sm:$0xff] %v7690_v0  ;;  %v7684_v9 = vunpack.c.l.bf16 %v9343_v40  ;;  %v7691_v51 = vunpack.c.h.bf16 %v9343_v40  ;;  %9356 = vtanh.bf16 %v7419_v49  ;;  %v7420_v45 = vpack.c.bf16 %v6941_v32, %v6937_v56  ;;  %v6753_v29 = vpop.f32.mrf.mxu1 }
 0x5ae   :  { %v6946_v18 = vpop.f32.mrf.mxu0  ;;  %7910 = vst [vmem:[%s15223_s11 + $0x390] sm:$0xff] %v7685_v16  ;;  %7917 = vst [vmem:[%s15223_s11 + $0x3c8] sm:$0xff] %v7692_v47  ;;  %v7686_v50 = vunpack.c.l.bf16 %v9345_v44  ;;  %v7693_v60 = vunpack.c.h.bf16 %v9345_v44  ;;  %9358 = vtanh.bf16 %v7418_v2  ;;  %v6752_v24 = vadd.f32 %v6751_v30, %v14228_v46 }
 0x5af   :  { %7909 = vst [vmem:[%s15223_s11 + $0x388] sm:$0xff] %v7684_v9  ;;  %7916 = vst [vmem:[%s15223_s11 + $0x3c0] sm:$0xff] %v7691_v51  ;;  %9360 = vtanh.bf16 %v7420_v45  ;;  %v6755_v61 = vpop.f32.mrf.mxu1  ;;  %v6945_v53 = vadd.f32 %v6944_v59, %v14232_v20  ;;  %v6754_v22 = vadd.f32 %v6753_v29, %v14237_v11  ;;  %v6947_v21 = vadd.f32 %v6946_v18, %v14241_v8 }
 0x5b0   :  { %v6948_v31 = vpop.f32.mrf.mxu0  ;;  %7911 = vst [vmem:[%s15223_s11 + $0x398] sm:$0xff] %v7686_v50  ;;  %7918 = vst [vmem:[%s15223_s11 + $0x3d0] sm:$0xff] %v7693_v60  ;;  %v6756_v39 = vadd.f32 %v6755_v61, %v14228_v46 }
 0x5b1   :  { %v6949_v19 = vadd.f32 %v6948_v31, %v14232_v20  ;;  %v6757_v26 = vpop.f32.mrf.mxu1 }
 0x5b2   :  { %v6950_v13 = vpop.f32.mrf.mxu0  ;;  %v9347_v36 = vpop.eup %9346  ;;  %v7424_v55 = vpack.c.bf16 %v6756_v39, %v6752_v24  ;;  %v6758_v57 = vadd.f32 %v6757_v26, %v14237_v11 }
 0x5b3   :  { %v7426_v6 = vpack.c.bf16 %v6949_v19, %v6945_v53  ;;  %v6951_v7 = vadd.f32 %v6950_v13, %v14241_v8  ;;  %v9349_v41 = vpop.eup %9348  ;;  %v7697_v38 = vunpack.c.l.bf16 %v9347_v36  ;;  %v7704_v17 = vunpack.c.h.bf16 %v9347_v36  ;;  %v6761_v54 = vpop.f32.mrf.mxu1 }
 0x5b4   :  { %v6954_v48 = vpop.f32.mrf.mxu0  ;;  %v9351_v63 = vpop.eup %9350  ;;  %v7699_v43 = vunpack.c.l.bf16 %v9349_v41  ;;  %v7706_v37 = vunpack.c.h.bf16 %v9349_v41  ;;  %9362 = vtanh.bf16 %v7424_v55  ;;  %v7425_v1 = vpack.c.bf16 %v6758_v57, %v6754_v22 }
 0x5b5   :  { %v9353_v33 = vpop.eup %9352  ;;  %7922 = vst [vmem:[%s15223_s11 + $0x3f0] sm:$0xff] %v7697_v38  ;;  %7929 = vst [vmem:[%s15223_s11 + $0x428] sm:$0xff] %v7704_v17  ;;  %v7698_v23 = vunpack.c.l.bf16 %v9351_v63  ;;  %v7705_v28 = vunpack.c.h.bf16 %v9351_v63  ;;  %9364 = vtanh.bf16 %v7426_v6  ;;  %v7427_v25 = vpack.c.bf16 %v6951_v7, %v6947_v21  ;;  %v6763_v52 = vpop.f32.mrf.mxu1 }
 0x5b6   :  { %v6956_v4 = vpop.f32.mrf.mxu0  ;;  %7924 = vst [vmem:[%s15223_s11 + $0x400] sm:$0xff] %v7699_v43  ;;  %7931 = vst [vmem:[%s15223_s11 + $0x438] sm:$0xff] %v7706_v37  ;;  %v7700_v10 = vunpack.c.l.bf16 %v9353_v33  ;;  %v7707_v27 = vunpack.c.h.bf16 %v9353_v33  ;;  %9366 = vtanh.bf16 %v7425_v1  ;;  %v6762_v3 = vadd.f32 %v6761_v54, %v14228_v46 }
 0x5b7   :  { %7923 = vst [vmem:[%s15223_s11 + $0x3f8] sm:$0xff] %v7698_v23  ;;  %7930 = vst [vmem:[%s15223_s11 + $0x430] sm:$0xff] %v7705_v28  ;;  %9368 = vtanh.bf16 %v7427_v25  ;;  %v6765_v58 = vpop.f32.mrf.mxu1  ;;  %v6955_v62 = vadd.f32 %v6954_v48, %v14232_v20  ;;  %v6764_v49 = vadd.f32 %v6763_v52, %v14237_v11  ;;  %v6957_v47 = vadd.f32 %v6956_v4, %v14241_v8 }
 0x5b8   :  { %v6958_v35 = vpop.f32.mrf.mxu0  ;;  %7925 = vst [vmem:[%s15223_s11 + $0x408] sm:$0xff] %v7700_v10  ;;  %7932 = vst [vmem:[%s15223_s11 + $0x440] sm:$0xff] %v7707_v27  ;;  %v6766_v15 = vadd.f32 %v6765_v58, %v14228_v46 }
 0x5b9   :  { %v6959_v34 = vadd.f32 %v6958_v35, %v14232_v20  ;;  %v6767_v5 = vpop.f32.mrf.mxu1 }
 0x5ba   :  { %v6960_v32 = vpop.f32.mrf.mxu0  ;;  %v9355_v12 = vpop.eup %9354  ;;  %v7431_v14 = vpack.c.bf16 %v6766_v15, %v6762_v3  ;;  %v6768_v56 = vadd.f32 %v6767_v5, %v14237_v11 }
 0x5bb   :  { %v7433_v0 = vpack.c.bf16 %v6959_v34, %v6955_v62  ;;  %v6961_v30 = vadd.f32 %v6960_v32, %v14241_v8  ;;  %v9357_v59 = vpop.eup %9356  ;;  %v7711_v40 = vunpack.c.l.bf16 %v9355_v12  ;;  %v7718_v16 = vunpack.c.h.bf16 %v9355_v12  ;;  %v6771_v2 = vpop.f32.mrf.mxu1 }
 0x5bc   :  { %v6964_v44 = vpop.f32.mrf.mxu0  ;;  %v9359_v9 = vpop.eup %9358  ;;  %v7713_v51 = vunpack.c.l.bf16 %v9357_v59  ;;  %v7720_v45 = vunpack.c.h.bf16 %v9357_v59  ;;  %9370 = vtanh.bf16 %v7431_v14  ;;  %v7432_v29 = vpack.c.bf16 %v6768_v56, %v6764_v49 }
 0x5bd   :  { %v9361_v18 = vpop.eup %9360  ;;  %7936 = vst [vmem:[%s15223_s11 + $0x460] sm:$0xff] %v7711_v40  ;;  %7943 = vst [vmem:[%s15223_s11 + $0x498] sm:$0xff] %v7718_v16  ;;  %v7712_v50 = vunpack.c.l.bf16 %v9359_v9  ;;  %v7719_v60 = vunpack.c.h.bf16 %v9359_v9  ;;  %9372 = vtanh.bf16 %v7433_v0  ;;  %v7434_v61 = vpack.c.bf16 %v6961_v30, %v6957_v47  ;;  %v6773_v31 = vpop.f32.mrf.mxu1 }
 0x5be   :  { %v6966_v24 = vpop.f32.mrf.mxu0  ;;  %7938 = vst [vmem:[%s15223_s11 + $0x470] sm:$0xff] %v7713_v51  ;;  %7945 = vst [vmem:[%s15223_s11 + $0x4a8] sm:$0xff] %v7720_v45  ;;  %v7714_v53 = vunpack.c.l.bf16 %v9361_v18  ;;  %v7721_v39 = vunpack.c.h.bf16 %v9361_v18  ;;  %9374 = vtanh.bf16 %v7432_v29  ;;  %v6772_v26 = vadd.f32 %v6771_v2, %v14228_v46 }
 0x5bf   :  { %7937 = vst [vmem:[%s15223_s11 + $0x468] sm:$0xff] %v7712_v50  ;;  %7944 = vst [vmem:[%s15223_s11 + $0x4a0] sm:$0xff] %v7719_v60  ;;  %9376 = vtanh.bf16 %v7434_v61  ;;  %v6775_v19 = vpop.f32.mrf.mxu1  ;;  %v6965_v13 = vadd.f32 %v6964_v44, %v14232_v20  ;;  %v6774_v6 = vadd.f32 %v6773_v31, %v14237_v11  ;;  %v6967_v37 = vadd.f32 %v6966_v24, %v14241_v8 }
 0x5c0   :  { %v6968_v22 = vpop.f32.mrf.mxu0  ;;  %7939 = vst [vmem:[%s15223_s11 + $0x478] sm:$0xff] %v7714_v53  ;;  %7946 = vst [vmem:[%s15223_s11 + $0x4b0] sm:$0xff] %v7721_v39  ;;  %v6776_v36 = vadd.f32 %v6775_v19, %v14228_v46 }
 0x5c1   :  { %v6969_v55 = vadd.f32 %v6968_v22, %v14232_v20  ;;  %v6777_v57 = vpop.f32.mrf.mxu1 }
 0x5c2   :  { %v6970_v7 = vpop.f32.mrf.mxu0  ;;  %v9363_v41 = vpop.eup %9362  ;;  %v7438_v38 = vpack.c.bf16 %v6776_v36, %v6772_v26  ;;  %v6778_v21 = vadd.f32 %v6777_v57, %v14237_v11 }
 0x5c3   :  { %v7440_v17 = vpack.c.bf16 %v6969_v55, %v6965_v13  ;;  %v6971_v54 = vadd.f32 %v6970_v7, %v14241_v8  ;;  %v9365_v48 = vpop.eup %9364  ;;  %v7725_v63 = vunpack.c.l.bf16 %v9363_v41  ;;  %v7732_v43 = vunpack.c.h.bf16 %v9363_v41  ;;  %v6781_v1 = vpop.f32.mrf.mxu1 }
 0x5c4   :  { %v6974_v33 = vpop.f32.mrf.mxu0  ;;  %v9367_v23 = vpop.eup %9366  ;;  %v7727_v28 = vunpack.c.l.bf16 %v9365_v48  ;;  %v7734_v25 = vunpack.c.h.bf16 %v9365_v48  ;;  %9378 = vtanh.bf16 %v7438_v38  ;;  %v7439_v52 = vpack.c.bf16 %v6778_v21, %v6774_v6 }
 0x5c5   :  { %v9369_v4 = vpop.eup %9368  ;;  %7950 = vst [vmem:[%s15223_s11 + $0x4d0] sm:$0xff] %v7725_v63  ;;  %7957 = vst [vmem:[%s15223_s11 + $0x508] sm:$0xff] %v7732_v43  ;;  %v7726_v10 = vunpack.c.l.bf16 %v9367_v23  ;;  %v7733_v27 = vunpack.c.h.bf16 %v9367_v23  ;;  %9380 = vtanh.bf16 %v7440_v17  ;;  %v7441_v58 = vpack.c.bf16 %v6971_v54, %v6967_v37  ;;  %v6783_v35 = vpop.f32.mrf.mxu1 }
 0x5c6   :  { %v6976_v3 = vpop.f32.mrf.mxu0  ;;  %7952 = vst [vmem:[%s15223_s11 + $0x4e0] sm:$0xff] %v7727_v28  ;;  %7959 = vst [vmem:[%s15223_s11 + $0x518] sm:$0xff] %v7734_v25  ;;  %v7728_v62 = vunpack.c.l.bf16 %v9369_v4  ;;  %v7735_v15 = vunpack.c.h.bf16 %v9369_v4  ;;  %9382 = vtanh.bf16 %v7439_v52  ;;  %v6782_v5 = vadd.f32 %v6781_v1, %v14228_v46 }
 0x5c7   :  { %7951 = vst [vmem:[%s15223_s11 + $0x4d8] sm:$0xff] %v7726_v10  ;;  %7958 = vst [vmem:[%s15223_s11 + $0x510] sm:$0xff] %v7733_v27  ;;  %9384 = vtanh.bf16 %v7441_v58  ;;  %v6785_v34 = vpop.f32.mrf.mxu1  ;;  %v6975_v32 = vadd.f32 %v6974_v33, %v14232_v20  ;;  %v6784_v0 = vadd.f32 %v6783_v35, %v14237_v11  ;;  %v6977_v45 = vadd.f32 %v6976_v3, %v14241_v8 }
 0x5c8   :  { %v6978_v49 = vpop.f32.mrf.mxu0  ;;  %7953 = vst [vmem:[%s15223_s11 + $0x4e8] sm:$0xff] %v7728_v62  ;;  %7960 = vst [vmem:[%s15223_s11 + $0x520] sm:$0xff] %v7735_v15  ;;  %v6786_v12 = vadd.f32 %v6785_v34, %v14228_v46 }
 0x5c9   :  { %v6979_v14 = vadd.f32 %v6978_v49, %v14232_v20  ;;  %v6787_v56 = vpop.f32.mrf.mxu1 }
 0x5ca   :  { %v6980_v30 = vpop.f32.mrf.mxu0  ;;  %v9371_v59 = vpop.eup %9370  ;;  %v7445_v40 = vpack.c.bf16 %v6786_v12, %v6782_v5  ;;  %v6788_v47 = vadd.f32 %v6787_v56, %v14237_v11  ;;  %v16058_v12 = vsub.s32 5, %v16054_v42 }
 0x5cb   :  { %v7447_v16 = vpack.c.bf16 %v6979_v14, %v6975_v32  ;;  %v6981_v2 = vadd.f32 %v6980_v30, %v14241_v8  ;;  %v9373_v44 = vpop.eup %9372  ;;  %v7739_v9 = vunpack.c.l.bf16 %v9371_v59  ;;  %v7746_v51 = vunpack.c.h.bf16 %v9371_v59  ;;  %v6791_v29 = vpop.f32.mrf.mxu1 }
 0x5cc   :  { %v6984_v18 = vpop.f32.mrf.mxu0  ;;  %v9375_v50 = vpop.eup %9374  ;;  %v7741_v60 = vunpack.c.l.bf16 %v9373_v44  ;;  %v7748_v61 = vunpack.c.h.bf16 %v9373_v44  ;;  %9386 = vtanh.bf16 %v7445_v40  ;;  %v7446_v31 = vpack.c.bf16 %v6788_v47, %v6784_v0 }
 0x5cd   :  { %v9377_v24 = vpop.eup %9376  ;;  %7964 = vst [vmem:[%s15223_s11 + $0x540] sm:$0xff] %v7739_v9  ;;  %7971 = vst [vmem:[%s15223_s11 + $0x578] sm:$0xff] %v7746_v51  ;;  %v7740_v53 = vunpack.c.l.bf16 %v9375_v50  ;;  %v7747_v39 = vunpack.c.h.bf16 %v9375_v50  ;;  %9388 = vtanh.bf16 %v7447_v16  ;;  %v7448_v19 = vpack.c.bf16 %v6981_v2, %v6977_v45  ;;  %v6793_v22 = vpop.f32.mrf.mxu1 }
 0x5ce   :  { %v6986_v26 = vpop.f32.mrf.mxu0  ;;  %7966 = vst [vmem:[%s15223_s11 + $0x550] sm:$0xff] %v7741_v60  ;;  %7973 = vst [vmem:[%s15223_s11 + $0x588] sm:$0xff] %v7748_v61  ;;  %v7742_v13 = vunpack.c.l.bf16 %v9377_v24  ;;  %v7749_v36 = vunpack.c.h.bf16 %v9377_v24  ;;  %9390 = vtanh.bf16 %v7446_v31  ;;  %v6792_v57 = vadd.f32 %v6791_v29, %v14228_v46 }
 0x5cf   :  { %7965 = vst [vmem:[%s15223_s11 + $0x548] sm:$0xff] %v7740_v53  ;;  %7972 = vst [vmem:[%s15223_s11 + $0x580] sm:$0xff] %v7747_v39  ;;  %9392 = vtanh.bf16 %v7448_v19  ;;  %v6795_v55 = vpop.f32.mrf.mxu1  ;;  %v6985_v7 = vadd.f32 %v6984_v18, %v14232_v20  ;;  %v6794_v17 = vadd.f32 %v6793_v22, %v14237_v11  ;;  %v6987_v25 = vadd.f32 %v6986_v26, %v14241_v8 }
 0x5d0   :  { %v6988_v6 = vpop.f32.mrf.mxu0  ;;  %7967 = vst [vmem:[%s15223_s11 + $0x558] sm:$0xff] %v7742_v13  ;;  %7974 = vst [vmem:[%s15223_s11 + $0x590] sm:$0xff] %v7749_v36  ;;  %v6796_v41 = vadd.f32 %v6795_v55, %v14228_v46  ;;  %v9519_v46 = vld [vmem:[%s15222_s10] sm:$0x7f]  ;;  %v16059_v40 = vsub.s32 6, %v16054_v42 }
 0x5d1   :  { %v6989_v38 = vadd.f32 %v6988_v6, %v14232_v20  ;;  %v6797_v21 = vpop.f32.mrf.mxu1  ;;  %v16057_v20 = vsub.s32 4, %v16054_v42  ;;  %v14730_v14 = vrot.slane %v9519_v46, %v16058_v12 }
 0x5d2   :  { %v6990_v54 = vpop.f32.mrf.mxu0  ;;  %v9379_v48 = vpop.eup %9378  ;;  %v7452_v63 = vpack.c.bf16 %v6796_v41, %v6792_v57  ;;  %v6798_v37 = vadd.f32 %v6797_v21, %v14237_v11  ;;  %v14748_v16 = vrot.slane %v9519_v46, %v16059_v40 }
 0x5d3   :  { %v7454_v43 = vpack.c.bf16 %v6989_v38, %v6985_v7  ;;  %v6991_v1 = vadd.f32 %v6990_v54, %v14241_v8  ;;  %v9381_v33 = vpop.eup %9380  ;;  %v7753_v23 = vunpack.c.l.bf16 %v9379_v48  ;;  %v7760_v28 = vunpack.c.h.bf16 %v9379_v48  ;;  %v7027_v4 = vpop.f32.mrf.mxu1 }
 0x5d4   :  { %v14714_v52 = vrot.slane %v9519_v46, %v16057_v20  ;;  %v8490_v10 = vpop.f32.mrf.mxu0  ;;  %v9383_v27 = vpop.eup %9382  ;;  %v7755_v58 = vunpack.c.l.bf16 %v9381_v33  ;;  %v7762_v11 = vunpack.c.h.bf16 %v9381_v33  ;;  %9394 = vtanh.bf16 %v7452_v63 }
 0x5d5   :  { %v7453_v35 = vpack.c.bf16 %v6798_v37, %v6794_v17  ;;  %v9385_v3 = vpop.eup %9384  ;;  %7978 = vst [vmem:[%s15223_s11 + $0x5b0] sm:$0xff] %v7753_v23  ;;  %7985 = vst [vmem:[%s15223_s11 + $0x5e8] sm:$0xff] %v7760_v28  ;;  %v7754_v8 = vunpack.c.l.bf16 %v9383_v27  ;;  %v7761_v62 = vunpack.c.h.bf16 %v9383_v27  ;;  %9396 = vtanh.bf16 %v7454_v43  ;;  %v7029_v34 = vpop.f32.mrf.mxu1 }
 0x5d6   :  { %v7455_v15 = vpack.c.bf16 %v6991_v1, %v6987_v25  ;;  %v8491_v49 = vpop.f32.mrf.mxu0  ;;  %7980 = vst [vmem:[%s15223_s11 + $0x5c0] sm:$0xff] %v7755_v58  ;;  %7987 = vst [vmem:[%s15223_s11 + $0x5f8] sm:$0xff] %v7762_v11  ;;  %v7756_v5 = vunpack.c.l.bf16 %v9385_v3  ;;  %v7763_v32 = vunpack.c.h.bf16 %v9385_v3  ;;  %v7028_v30 = vadd.f32 %v7027_v4, %v14714_v52 }
 0x5d7   :  { %9398 = vtanh.bf16 %v7453_v35  ;;  %7979 = vst [vmem:[%s15223_s11 + $0x5b8] sm:$0xff] %v7754_v8  ;;  %7986 = vst [vmem:[%s15223_s11 + $0x5f0] sm:$0xff] %v7761_v62  ;;  %v7031_v0 = vpop.f32.mrf.mxu1  ;;  %v8492_v47 = vadd.f32 %v8491_v49, %v8490_v10  ;;  %v7030_v51 = vadd.f32 %v7029_v34, %v14730_v14 }
 0x5d8   :  { %9400 = vtanh.bf16 %v7455_v15  ;;  %v8493_v56 = vpop.f32.mrf.mxu0  ;;  %7981 = vst [vmem:[%s15223_s11 + $0x5c8] sm:$0xff] %v7756_v5  ;;  %7988 = vst [vmem:[%s15223_s11 + $0x600] sm:$0xff] %v7763_v32  ;;  %v7032_v59 = vadd.f32 %v7031_v0, %v14714_v52 }
 0x5d9   :  { %v7033_v2 = vpop.f32.mrf.mxu1  ;;  %v7221_v36 = vadd.f32 %v8492_v47, %v14748_v16 }
 0x5da   :  { %v8494_v44 = vpop.f32.mrf.mxu0  ;;  %v9387_v9 = vpop.eup %9386  ;;  %v7351_v45 = vpack.c.bf16 %v7032_v59, %v7028_v30  ;;  %v7034_v29 = vadd.f32 %v7033_v2, %v14730_v14 }
 0x5db   :  { %v8495_v18 = vadd.f32 %v8494_v44, %v8493_v56  ;;  %v9389_v50 = vpop.eup %9388  ;;  %v7767_v60 = vunpack.c.l.bf16 %v9387_v9  ;;  %v7774_v61 = vunpack.c.h.bf16 %v9387_v9  ;;  %v7037_v31 = vpop.f32.mrf.mxu1 }
 0x5dc   :  { %v8496_v24 = vpop.f32.mrf.mxu0  ;;  %v9391_v53 = vpop.eup %9390  ;;  %v7769_v39 = vunpack.c.l.bf16 %v9389_v50  ;;  %v7776_v42 = vunpack.c.h.bf16 %v9389_v50  ;;  %9402 = vtanh.bf16 %v7351_v45  ;;  %v7352_v19 = vpack.c.bf16 %v7034_v29, %v7030_v51 }
 0x5dd   :  { %v9393_v22 = vpop.eup %9392  ;;  %7992 = vst [vmem:[%s15223_s11 + $0x620] sm:$0xff] %v7767_v60  ;;  %7999 = vst [vmem:[%s15223_s11 + $0x658] sm:$0xff] %v7774_v61  ;;  %v7768_v26 = vunpack.c.l.bf16 %v9391_v53  ;;  %v7775_v13 = vunpack.c.h.bf16 %v9391_v53  ;;  %v7224_v55 = vadd.f32 %v8495_v18, %v14748_v16  ;;  %v7039_v6 = vpop.f32.mrf.mxu1  ;;  %v7038_v54 = vadd.f32 %v7037_v31, %v14714_v52 }
 0x5de   :  { %v8497_v57 = vpop.f32.mrf.mxu0  ;;  %7994 = vst [vmem:[%s15223_s11 + $0x630] sm:$0xff] %v7769_v39  ;;  %8001 = vst [vmem:[%s15223_s11 + $0x668] sm:$0xff] %v7776_v42  ;;  %v7770_v7 = vunpack.c.l.bf16 %v9393_v22  ;;  %v7777_v41 = vunpack.c.h.bf16 %v9393_v22  ;;  %9404 = vtanh.bf16 %v7352_v19  ;;  %v7040_v33 = vadd.f32 %v7039_v6, %v14730_v14 }
 0x5df   :  { %7993 = vst [vmem:[%s15223_s11 + $0x628] sm:$0xff] %v7768_v26  ;;  %8000 = vst [vmem:[%s15223_s11 + $0x660] sm:$0xff] %v7775_v13  ;;  %v7353_v38 = vpack.c.bf16 %v7224_v55, %v7221_v36  ;;  %v7041_v17 = vpop.f32.mrf.mxu1  ;;  %v8498_v63 = vadd.f32 %v8497_v57, %v8496_v24 }
 0x5e0   :  { %v8499_v21 = vpop.f32.mrf.mxu0  ;;  %7995 = vst [vmem:[%s15223_s11 + $0x638] sm:$0xff] %v7770_v7  ;;  %8002 = vst [vmem:[%s15223_s11 + $0x670] sm:$0xff] %v7777_v41  ;;  %v7042_v48 = vadd.f32 %v7041_v17, %v14714_v52 }
 0x5e1   :  { %9406 = vtanh.bf16 %v7353_v38  ;;  %v7043_v43 = vpop.f32.mrf.mxu1  ;;  %v7229_v34 = vadd.f32 %v8498_v63, %v14748_v16 }
 0x5e2   :  { %v8500_v37 = vpop.f32.mrf.mxu0  ;;  %v9395_v1 = vpop.eup %9394  ;;  %v7358_v23 = vpack.c.bf16 %v7042_v48, %v7038_v54  ;;  %v7044_v28 = vadd.f32 %v7043_v43, %v14730_v14 }
 0x5e3   :  { %v8501_v25 = vadd.f32 %v8500_v37, %v8499_v21  ;;  %v9397_v46 = vpop.eup %9396  ;;  %v7781_v20 = vunpack.c.l.bf16 %v9395_v1  ;;  %v7788_v4 = vunpack.c.h.bf16 %v9395_v1  ;;  %v7047_v10 = vpop.f32.mrf.mxu1 }
 0x5e4   :  { %v8502_v27 = vpop.f32.mrf.mxu0  ;;  %v7783_v11 = vunpack.c.l.bf16 %v9397_v46  ;;  %v7790_v35 = vunpack.c.h.bf16 %v9397_v46  ;;  %9408 = vtanh.bf16 %v7358_v23  ;;  %v7359_v3 = vpack.c.bf16 %v7044_v28, %v7040_v33 }
 0x5e5   :  { %v9399_v58 = vpop.eup %9398  ;;  %8006 = vst [vmem:[%s15223_s11 + $0x690] sm:$0xff] %v7781_v20  ;;  %8013 = vst [vmem:[%s15223_s11 + $0x6c8] sm:$0xff] %v7788_v4  ;;  %v7232_v49 = vadd.f32 %v8501_v25, %v14748_v16  ;;  %v7049_v5 = vpop.f32.mrf.mxu1  ;;  %v7048_v40 = vadd.f32 %v7047_v10, %v14714_v52 }
 0x5e6   :  { %v9401_v8 = vpop.eup %9400  ;;  %v7782_v62 = vunpack.c.l.bf16 %v9399_v58  ;;  %v7789_v15 = vunpack.c.h.bf16 %v9399_v58  ;;  %v8503_v32 = vpop.f32.mrf.mxu0  ;;  %8008 = vst [vmem:[%s15223_s11 + $0x6a0] sm:$0xff] %v7783_v11  ;;  %8015 = vst [vmem:[%s15223_s11 + $0x6d8] sm:$0xff] %v7790_v35  ;;  %9410 = vtanh.bf16 %v7359_v3  ;;  %v7050_v45 = vadd.f32 %v7049_v5, %v14730_v14 }
 0x5e7   :  { %v7784_v12 = vunpack.c.l.bf16 %v9401_v8  ;;  %v7791_v0 = vunpack.c.h.bf16 %v9401_v8  ;;  %v7360_v56 = vpack.c.bf16 %v7232_v49, %v7229_v34  ;;  %v7051_v30 = vpop.f32.mrf.mxu1  ;;  %v8504_v47 = vadd.f32 %v8503_v32, %v8502_v27 }
 0x5e8   :  { %8007 = vst [vmem:[%s15223_s11 + $0x698] sm:$0xff] %v7782_v62  ;;  %8014 = vst [vmem:[%s15223_s11 + $0x6d0] sm:$0xff] %v7789_v15  ;;  %v8505_v59 = vpop.f32.mrf.mxu0  ;;  %v7052_v2 = vadd.f32 %v7051_v30, %v14714_v52 }
 0x5e9   :  { %8009 = vst [vmem:[%s15223_s11 + $0x6a8] sm:$0xff] %v7784_v12  ;;  %8016 = vst [vmem:[%s15223_s11 + $0x6e0] sm:$0xff] %v7791_v0  ;;  %9412 = vtanh.bf16 %v7360_v56  ;;  %v7053_v44 = vpop.f32.mrf.mxu1  ;;  %v7237_v39 = vadd.f32 %v8504_v47, %v14748_v16 }
 0x5ea   :  { %v8506_v9 = vpop.f32.mrf.mxu0  ;;  %v9403_v51 = vpop.eup %9402  ;;  %v7365_v29 = vpack.c.bf16 %v7052_v2, %v7048_v40  ;;  %v7054_v18 = vadd.f32 %v7053_v44, %v14730_v14 }
 0x5eb   :  { %v8507_v50 = vadd.f32 %v8506_v9, %v8505_v59  ;;  %v7575_v60 = vunpack.c.l.bf16 %v9403_v51  ;;  %v7582_v61 = vunpack.c.h.bf16 %v9403_v51  ;;  %v7057_v31 = vpop.f32.mrf.mxu1 }
 0x5ec   :  { %v8508_v24 = vpop.f32.mrf.mxu0  ;;  %v9405_v53 = vpop.eup %9404  ;;  %9414 = vtanh.bf16 %v7365_v29  ;;  %v7366_v42 = vpack.c.bf16 %v7054_v18, %v7050_v45  ;;  %v7058_v21 = vadd.f32 %v7057_v31, %v14714_v52 }
 0x5ed   :  { %v7240_v19 = vadd.f32 %v8507_v50, %v14748_v16  ;;  %7799 = vst [vmem:[%s15223_s11 + $0x20] sm:$0xff] %v7575_v60  ;;  %7807 = vst [vmem:[%s15223_s11 + $0x58] sm:$0xff] %v7582_v61  ;;  %v7576_v22 = vunpack.c.l.bf16 %v9405_v53  ;;  %v7583_v26 = vunpack.c.h.bf16 %v9405_v53  ;;  %v7059_v13 = vpop.f32.mrf.mxu1 }
 0x5ee   :  { %v8509_v36 = vpop.f32.mrf.mxu0  ;;  %9416 = vtanh.bf16 %v7366_v42  ;;  %v7060_v37 = vadd.f32 %v7059_v13, %v14730_v14 }
 0x5ef   :  { %v7367_v55 = vpack.c.bf16 %v7240_v19, %v7237_v39  ;;  %v9407_v6 = vpop.eup %9406  ;;  %7800 = vst [vmem:[%s15223_s11 + $0x28] sm:$0xff] %v7576_v22  ;;  %7808 = vst [vmem:[%s15223_s11 + $0x60] sm:$0xff] %v7583_v26  ;;  %v7061_v57 = vpop.f32.mrf.mxu1  ;;  %v8510_v17 = vadd.f32 %v8509_v36, %v8508_v24 }
 0x5f0   :  { %v8511_v7 = vpop.f32.mrf.mxu0  ;;  %v7577_v41 = vunpack.c.l.bf16 %v9407_v6  ;;  %v7584_v38 = vunpack.c.h.bf16 %v9407_v6  ;;  %v7062_v54 = vadd.f32 %v7061_v57, %v14714_v52 }
 0x5f1   :  { %9418 = vtanh.bf16 %v7367_v55  ;;  %v7063_v48 = vpop.f32.mrf.mxu1  ;;  %v7245_v10 = vadd.f32 %v8510_v17, %v14748_v16 }
 0x5f2   :  { %v8512_v63 = vpop.f32.mrf.mxu0  ;;  %v9409_v43 = vpop.eup %9408  ;;  %7802 = vst.msk [vmem:[%s15223_s11 + $0x30] sm:$0xff] %vm7801_vm0, %v7577_v41  ;;  %7809 = vst.msk [vmem:[%s15223_s11 + $0x68] sm:$0xff] %vm7801_vm0, %v7584_v38  ;;  %v7064_v1 = vadd.f32 %v7063_v48, %v14730_v14  ;;  %v7372_v25 = vpack.c.bf16 %v7062_v54, %v7058_v21 }
 0x5f3   :  { %v8513_v33 = vadd.f32 %v8512_v63, %v8511_v7  ;;  %v7589_v23 = vunpack.c.l.bf16 %v9409_v43  ;;  %v7596_v28 = vunpack.c.h.bf16 %v9409_v43  ;;  %v7067_v46 = vpop.f32.mrf.mxu1 }
 0x5f4   :  { %v8514_v20 = vpop.f32.mrf.mxu0  ;;  %v9411_v4 = vpop.eup %9410  ;;  %v7373_v27 = vpack.c.bf16 %v7064_v1, %v7060_v37  ;;  %9420 = vtanh.bf16 %v7372_v25  ;;  %v7068_v0 = vadd.f32 %v7067_v46, %v14714_v52 }
 0x5f5   :  { %v7248_v58 = vadd.f32 %v8513_v33, %v14748_v16  ;;  %7814 = vst [vmem:[%s15223_s11 + $0x90] sm:$0xff] %v7589_v23  ;;  %7821 = vst [vmem:[%s15223_s11 + $0xc8] sm:$0xff] %v7596_v28  ;;  %v7590_v11 = vunpack.c.l.bf16 %v9411_v4  ;;  %v7597_v35 = vunpack.c.h.bf16 %v9411_v4  ;;  %v7069_v3 = vpop.f32.mrf.mxu1 }
 0x5f6   :  { %v8515_v8 = vpop.f32.mrf.mxu0  ;;  %9422 = vtanh.bf16 %v7373_v27  ;;  %v7070_v47 = vadd.f32 %v7069_v3, %v14730_v14 }
 0x5f7   :  { %v7374_v62 = vpack.c.bf16 %v7248_v58, %v7245_v10  ;;  %v9413_v15 = vpop.eup %9412  ;;  %7815 = vst [vmem:[%s15223_s11 + $0x98] sm:$0xff] %v7590_v11  ;;  %7822 = vst [vmem:[%s15223_s11 + $0xd0] sm:$0xff] %v7597_v35  ;;  %v7071_v34 = vpop.f32.mrf.mxu1  ;;  %v8516_v12 = vadd.f32 %v8515_v8, %v8514_v20 }
 0x5f8   :  { %v8517_v49 = vpop.f32.mrf.mxu0  ;;  %v7591_v5 = vunpack.c.l.bf16 %v9413_v15  ;;  %v7598_v32 = vunpack.c.h.bf16 %v9413_v15  ;;  %v7072_v56 = vadd.f32 %v7071_v34, %v14714_v52 }
 0x5f9   :  { %9424 = vtanh.bf16 %v7374_v62  ;;  %v7073_v30 = vpop.f32.mrf.mxu1  ;;  %v7253_v60 = vadd.f32 %v8516_v12, %v14748_v16 }
 0x5fa   :  { %v8518_v59 = vpop.f32.mrf.mxu0  ;;  %v9415_v40 = vpop.eup %9414  ;;  %7816 = vst.msk [vmem:[%s15223_s11 + $0xa0] sm:$0xff] %vm7801_vm0, %v7591_v5  ;;  %7823 = vst.msk [vmem:[%s15223_s11 + $0xd8] sm:$0xff] %vm7801_vm0, %v7598_v32  ;;  %v7074_v2 = vadd.f32 %v7073_v30, %v14730_v14  ;;  %v7379_v45 = vpack.c.bf16 %v7072_v56, %v7068_v0 }
 0x5fb   :  { %v8519_v44 = vadd.f32 %v8518_v59, %v8517_v49  ;;  %v7603_v9 = vunpack.c.l.bf16 %v9415_v40  ;;  %v7610_v51 = vunpack.c.h.bf16 %v9415_v40  ;;  %v7077_v29 = vpop.f32.mrf.mxu1 }
 0x5fc   :  { %v8520_v18 = vpop.f32.mrf.mxu0  ;;  %v9417_v50 = vpop.eup %9416  ;;  %v7380_v61 = vpack.c.bf16 %v7074_v2, %v7070_v47  ;;  %9426 = vtanh.bf16 %v7379_v45  ;;  %v7078_v6 = vadd.f32 %v7077_v29, %v14714_v52 }
 0x5fd   :  { %v7256_v31 = vadd.f32 %v8519_v44, %v14748_v16  ;;  %7828 = vst [vmem:[%s15223_s11 + $0x100] sm:$0xff] %v7603_v9  ;;  %7835 = vst [vmem:[%s15223_s11 + $0x138] sm:$0xff] %v7610_v51  ;;  %v7604_v24 = vunpack.c.l.bf16 %v9417_v50  ;;  %v7611_v53 = vunpack.c.h.bf16 %v9417_v50  ;;  %v7079_v39 = vpop.f32.mrf.mxu1 }
 0x5fe   :  { %v8521_v42 = vpop.f32.mrf.mxu0  ;;  %9428 = vtanh.bf16 %v7380_v61  ;;  %v7080_v17 = vadd.f32 %v7079_v39, %v14730_v14 }
 0x5ff   :  { %v9419_v19 = vpop.eup %9418  ;;  %v7381_v22 = vpack.c.bf16 %v7256_v31, %v7253_v60  ;;  %7829 = vst [vmem:[%s15223_s11 + $0x108] sm:$0xff] %v7604_v24  ;;  %7836 = vst [vmem:[%s15223_s11 + $0x140] sm:$0xff] %v7611_v53  ;;  %v7081_v36 = vpop.f32.mrf.mxu1  ;;  %v8522_v7 = vadd.f32 %v8521_v42, %v8520_v18 }
 0x600   :  { %v7605_v26 = vunpack.c.l.bf16 %v9419_v19  ;;  %v7612_v13 = vunpack.c.h.bf16 %v9419_v19  ;;  %v8523_v55 = vpop.f32.mrf.mxu0  ;;  %v7082_v57 = vadd.f32 %v7081_v36, %v14714_v52 }
 0x601   :  { %9430 = vtanh.bf16 %v7381_v22  ;;  %v7083_v41 = vpop.f32.mrf.mxu1  ;;  %v7261_v20 = vadd.f32 %v8522_v7, %v14748_v16 }
 0x602   :  { %7830 = vst.msk [vmem:[%s15223_s11 + $0x110] sm:$0xff] %vm7801_vm0, %v7605_v26  ;;  %7837 = vst.msk [vmem:[%s15223_s11 + $0x148] sm:$0xff] %vm7801_vm0, %v7612_v13  ;;  %v8524_v38 = vpop.f32.mrf.mxu0  ;;  %v7386_v21 = vpack.c.bf16 %v7082_v57, %v7078_v6  ;;  %v7084_v54 = vadd.f32 %v7083_v41, %v14730_v14  ;;  %v9421_v63 = vpop.eup %9420 }
 0x603   :  { %v8525_v48 = vadd.f32 %v8524_v38, %v8523_v55  ;;  %v7087_v43 = vpop.f32.mrf.mxu1  ;;  %v7617_v33 = vunpack.c.l.bf16 %v9421_v63  ;;  %v7624_v23 = vunpack.c.h.bf16 %v9421_v63 }
 0x604   :  { %v8526_v37 = vpop.f32.mrf.mxu0  ;;  %v9423_v1 = vpop.eup %9422  ;;  %9432 = vtanh.bf16 %v7386_v21  ;;  %v7387_v28 = vpack.c.bf16 %v7084_v54, %v7080_v17  ;;  %v7088_v15 = vadd.f32 %v7087_v43, %v14714_v52 }
 0x605   :  { %v7618_v25 = vunpack.c.l.bf16 %v9423_v1  ;;  %v7625_v46 = vunpack.c.h.bf16 %v9423_v1  ;;  %v7264_v4 = vadd.f32 %v8525_v48, %v14748_v16  ;;  %v7089_v10 = vpop.f32.mrf.mxu1  ;;  %7842 = vst [vmem:[%s15223_s11 + $0x170] sm:$0xff] %v7617_v33  ;;  %7849 = vst [vmem:[%s15223_s11 + $0x1a8] sm:$0xff] %v7624_v23 }
 0x606   :  { %v8527_v27 = vpop.f32.mrf.mxu0  ;;  %9434 = vtanh.bf16 %v7387_v28  ;;  %v7090_v12 = vadd.f32 %v7089_v10, %v14730_v14 }
 0x607   :  { %v9425_v58 = vpop.eup %9424  ;;  %7843 = vst [vmem:[%s15223_s11 + $0x178] sm:$0xff] %v7618_v25  ;;  %7850 = vst [vmem:[%s15223_s11 + $0x1b0] sm:$0xff] %v7625_v46  ;;  %v7388_v3 = vpack.c.bf16 %v7264_v4, %v7261_v20  ;;  %v7091_v8 = vpop.f32.mrf.mxu1  ;;  %v8528_v49 = vadd.f32 %v8527_v27, %v8526_v37 }
 0x608   :  { %v7619_v11 = vunpack.c.l.bf16 %v9425_v58  ;;  %v7626_v35 = vunpack.c.h.bf16 %v9425_v58  ;;  %v8529_v62 = vpop.f32.mrf.mxu0  ;;  %v7092_v34 = vadd.f32 %v7091_v8, %v14714_v52 }
 0x609   :  { %9436 = vtanh.bf16 %v7388_v3  ;;  %v7093_v5 = vpop.f32.mrf.mxu1  ;;  %v7269_v18 = vadd.f32 %v8528_v49, %v14748_v16 }
 0x60a   :  { %7844 = vst.msk [vmem:[%s15223_s11 + $0x180] sm:$0xff] %vm7801_vm0, %v7619_v11  ;;  %7851 = vst.msk [vmem:[%s15223_s11 + $0x1b8] sm:$0xff] %vm7801_vm0, %v7626_v35  ;;  %v8530_v32 = vpop.f32.mrf.mxu0  ;;  %v7393_v0 = vpack.c.bf16 %v7092_v34, %v7088_v15  ;;  %v7094_v56 = vadd.f32 %v7093_v5, %v14730_v14  ;;  %v9427_v59 = vpop.eup %9426 }
 0x60b   :  { %v8531_v30 = vadd.f32 %v8530_v32, %v8529_v62  ;;  %v7097_v40 = vpop.f32.mrf.mxu1  ;;  %v7631_v44 = vunpack.c.l.bf16 %v9427_v59  ;;  %v7638_v9 = vunpack.c.h.bf16 %v9427_v59 }
 0x60c   :  { %v8532_v47 = vpop.f32.mrf.mxu0  ;;  %v9429_v2 = vpop.eup %9428  ;;  %9438 = vtanh.bf16 %v7393_v0  ;;  %v7394_v51 = vpack.c.bf16 %v7094_v56, %v7090_v12  ;;  %v7098_v22 = vadd.f32 %v7097_v40, %v14714_v52 }
 0x60d   :  { %v7632_v45 = vunpack.c.l.bf16 %v9429_v2  ;;  %v7639_v29 = vunpack.c.h.bf16 %v9429_v2  ;;  %v7272_v50 = vadd.f32 %v8531_v30, %v14748_v16  ;;  %v7099_v60 = vpop.f32.mrf.mxu1  ;;  %7856 = vst [vmem:[%s15223_s11 + $0x1e0] sm:$0xff] %v7631_v44  ;;  %7863 = vst [vmem:[%s15223_s11 + $0x218] sm:$0xff] %v7638_v9 }
 0x60e   :  { %v8533_v61 = vpop.f32.mrf.mxu0  ;;  %9440 = vtanh.bf16 %v7394_v51  ;;  %v7100_v57 = vadd.f32 %v7099_v60, %v14730_v14 }
 0x60f   :  { %v9431_v31 = vpop.eup %9430  ;;  %7857 = vst [vmem:[%s15223_s11 + $0x1e8] sm:$0xff] %v7632_v45  ;;  %7864 = vst [vmem:[%s15223_s11 + $0x220] sm:$0xff] %v7639_v29  ;;  %v7395_v39 = vpack.c.bf16 %v7272_v50, %v7269_v18  ;;  %v7101_v42 = vpop.f32.mrf.mxu1  ;;  %v8534_v26 = vadd.f32 %v8533_v61, %v8532_v47 }
 0x610   :  { %v7633_v24 = vunpack.c.l.bf16 %v9431_v31  ;;  %v7640_v53 = vunpack.c.h.bf16 %v9431_v31  ;;  %v8535_v19 = vpop.f32.mrf.mxu0  ;;  %v7102_v13 = vadd.f32 %v7101_v42, %v14714_v52 }
 0x611   :  { %9442 = vtanh.bf16 %v7395_v39  ;;  %v7103_v36 = vpop.f32.mrf.mxu1  ;;  %v7277_v43 = vadd.f32 %v8534_v26, %v14748_v16 }
 0x612   :  { %7858 = vst.msk [vmem:[%s15223_s11 + $0x1f0] sm:$0xff] %vm7801_vm0, %v7633_v24  ;;  %7865 = vst.msk [vmem:[%s15223_s11 + $0x228] sm:$0xff] %vm7801_vm0, %v7640_v53  ;;  %v8536_v55 = vpop.f32.mrf.mxu0  ;;  %v9433_v6 = vpop.eup %9432  ;;  %v7400_v7 = vpack.c.bf16 %v7102_v13, %v7098_v22  ;;  %v7104_v41 = vadd.f32 %v7103_v36, %v14730_v14 }
 0x613   :  { %v8537_v38 = vadd.f32 %v8536_v55, %v8535_v19  ;;  %v7645_v17 = vunpack.c.l.bf16 %v9433_v6  ;;  %v7652_v21 = vunpack.c.h.bf16 %v9433_v6  ;;  %v7107_v54 = vpop.f32.mrf.mxu1 }
 0x614   :  { %v8538_v48 = vpop.f32.mrf.mxu0  ;;  %v9435_v63 = vpop.eup %9434  ;;  %9444 = vtanh.bf16 %v7400_v7  ;;  %v7401_v37 = vpack.c.bf16 %v7104_v41, %v7100_v57  ;;  %v7108_v35 = vadd.f32 %v7107_v54, %v14714_v52 }
 0x615   :  { %v7280_v1 = vadd.f32 %v8537_v38, %v14748_v16  ;;  %7870 = vst [vmem:[%s15223_s11 + $0x250] sm:$0xff] %v7645_v17  ;;  %7877 = vst [vmem:[%s15223_s11 + $0x288] sm:$0xff] %v7652_v21  ;;  %v7646_v33 = vunpack.c.l.bf16 %v9435_v63  ;;  %v7653_v23 = vunpack.c.h.bf16 %v9435_v63  ;;  %v7109_v28 = vpop.f32.mrf.mxu1 }
 0x616   :  { %v8539_v25 = vpop.f32.mrf.mxu0  ;;  %9446 = vtanh.bf16 %v7401_v37  ;;  %v7110_v34 = vadd.f32 %v7109_v28, %v14730_v14 }
 0x617   :  { %v7402_v46 = vpack.c.bf16 %v7280_v1, %v7277_v43  ;;  %v9437_v20 = vpop.eup %9436  ;;  %7871 = vst [vmem:[%s15223_s11 + $0x258] sm:$0xff] %v7646_v33  ;;  %7878 = vst [vmem:[%s15223_s11 + $0x290] sm:$0xff] %v7653_v23  ;;  %v7111_v4 = vpop.f32.mrf.mxu1  ;;  %v8540_v11 = vadd.f32 %v8539_v25, %v8538_v48 }
 0x618   :  { %v8541_v10 = vpop.f32.mrf.mxu0  ;;  %v7647_v27 = vunpack.c.l.bf16 %v9437_v20  ;;  %v7654_v58 = vunpack.c.h.bf16 %v9437_v20  ;;  %v7112_v3 = vadd.f32 %v7111_v4, %v14714_v52 }
 0x619   :  { %9448 = vtanh.bf16 %v7402_v46  ;;  %v7113_v8 = vpop.f32.mrf.mxu1  ;;  %v7285_v40 = vadd.f32 %v8540_v11, %v14748_v16 }
 0x61a   :  { %v8542_v62 = vpop.f32.mrf.mxu0  ;;  %v9439_v15 = vpop.eup %9438  ;;  %7872 = vst.msk [vmem:[%s15223_s11 + $0x260] sm:$0xff] %vm7801_vm0, %v7647_v27  ;;  %7879 = vst.msk [vmem:[%s15223_s11 + $0x298] sm:$0xff] %vm7801_vm0, %v7654_v58  ;;  %v7114_v49 = vadd.f32 %v7113_v8, %v14730_v14  ;;  %v7407_v0 = vpack.c.bf16 %v7112_v3, %v7108_v35 }
 0x61b   :  { %v8543_v5 = vadd.f32 %v8542_v62, %v8541_v10  ;;  %v7659_v32 = vunpack.c.l.bf16 %v9439_v15  ;;  %v7666_v12 = vunpack.c.h.bf16 %v9439_v15  ;;  %v7117_v56 = vpop.f32.mrf.mxu1 }
 0x61c   :  { %v8544_v30 = vpop.f32.mrf.mxu0  ;;  %v9441_v59 = vpop.eup %9440  ;;  %v7408_v47 = vpack.c.bf16 %v7114_v49, %v7110_v34  ;;  %9450 = vtanh.bf16 %v7407_v0  ;;  %v7118_v53 = vadd.f32 %v7117_v56, %v14714_v52 }
 0x61d   :  { %v7288_v2 = vadd.f32 %v8543_v5, %v14748_v16  ;;  %7884 = vst [vmem:[%s15223_s11 + $0x2c0] sm:$0xff] %v7659_v32  ;;  %7891 = vst [vmem:[%s15223_s11 + $0x2f8] sm:$0xff] %v7666_v12  ;;  %v7660_v44 = vunpack.c.l.bf16 %v9441_v59  ;;  %v7667_v9 = vunpack.c.h.bf16 %v9441_v59  ;;  %v7119_v51 = vpop.f32.mrf.mxu1 }
 0x61e   :  { %v8545_v45 = vpop.f32.mrf.mxu0  ;;  %9452 = vtanh.bf16 %v7408_v47  ;;  %v7120_v26 = vadd.f32 %v7119_v51, %v14730_v14 }
 0x61f   :  { %v7409_v29 = vpack.c.bf16 %v7288_v2, %v7285_v40  ;;  %v9443_v18 = vpop.eup %9442  ;;  %7885 = vst [vmem:[%s15223_s11 + $0x2c8] sm:$0xff] %v7660_v44  ;;  %7892 = vst [vmem:[%s15223_s11 + $0x300] sm:$0xff] %v7667_v9  ;;  %v7121_v50 = vpop.f32.mrf.mxu1  ;;  %v8546_v24 = vadd.f32 %v8545_v45, %v8544_v30 }
 0x620   :  { %v8547_v60 = vpop.f32.mrf.mxu0  ;;  %v7661_v61 = vunpack.c.l.bf16 %v9443_v18  ;;  %v7668_v31 = vunpack.c.h.bf16 %v9443_v18  ;;  %v7122_v39 = vadd.f32 %v7121_v50, %v14714_v52 }
 0x621   :  { %9454 = vtanh.bf16 %v7409_v29  ;;  %v7123_v42 = vpop.f32.mrf.mxu1  ;;  %v7293_v17 = vadd.f32 %v8546_v24, %v14748_v16 }
 0x622   :  { %v8548_v19 = vpop.f32.mrf.mxu0  ;;  %v9445_v22 = vpop.eup %9444  ;;  %7886 = vst.msk [vmem:[%s15223_s11 + $0x2d0] sm:$0xff] %vm7801_vm0, %v7661_v61  ;;  %7893 = vst.msk [vmem:[%s15223_s11 + $0x308] sm:$0xff] %vm7801_vm0, %v7668_v31  ;;  %v7124_v13 = vadd.f32 %v7123_v42, %v14730_v14  ;;  %v7414_v57 = vpack.c.bf16 %v7122_v39, %v7118_v53 }
 0x623   :  { %v8549_v36 = vadd.f32 %v8548_v19, %v8547_v60  ;;  %v7673_v55 = vunpack.c.l.bf16 %v9445_v22  ;;  %v7680_v6 = vunpack.c.h.bf16 %v9445_v22  ;;  %v7127_v7 = vpop.f32.mrf.mxu1 }
 0x624   :  { %v8550_v41 = vpop.f32.mrf.mxu0  ;;  %v9447_v38 = vpop.eup %9446  ;;  %v7415_v21 = vpack.c.bf16 %v7124_v13, %v7120_v26  ;;  %9456 = vtanh.bf16 %v7414_v57  ;;  %v7128_v20 = vadd.f32 %v7127_v7, %v14714_v52 }
 0x625   :  { %v7296_v54 = vadd.f32 %v8549_v36, %v14748_v16  ;;  %7898 = vst [vmem:[%s15223_s11 + $0x330] sm:$0xff] %v7673_v55  ;;  %7905 = vst [vmem:[%s15223_s11 + $0x368] sm:$0xff] %v7680_v6  ;;  %v7674_v48 = vunpack.c.l.bf16 %v9447_v38  ;;  %v7681_v63 = vunpack.c.h.bf16 %v9447_v38  ;;  %v7129_v43 = vpop.f32.mrf.mxu1 }
 0x626   :  { %v8551_v37 = vpop.f32.mrf.mxu0  ;;  %9458 = vtanh.bf16 %v7415_v21  ;;  %v7130_v11 = vadd.f32 %v7129_v43, %v14730_v14 }
 0x627   :  { %v9449_v1 = vpop.eup %9448  ;;  %v7416_v33 = vpack.c.bf16 %v7296_v54, %v7293_v17  ;;  %7899 = vst [vmem:[%s15223_s11 + $0x338] sm:$0xff] %v7674_v48  ;;  %7906 = vst [vmem:[%s15223_s11 + $0x370] sm:$0xff] %v7681_v63  ;;  %v7131_v25 = vpop.f32.mrf.mxu1  ;;  %v8552_v10 = vadd.f32 %v8551_v37, %v8550_v41 }
 0x628   :  { %v7675_v23 = vunpack.c.l.bf16 %v9449_v1  ;;  %v7682_v28 = vunpack.c.h.bf16 %v9449_v1  ;;  %v8553_v46 = vpop.f32.mrf.mxu0  ;;  %v7132_v4 = vadd.f32 %v7131_v25, %v14714_v52 }
 0x629   :  { %9460 = vtanh.bf16 %v7416_v33  ;;  %v7133_v27 = vpop.f32.mrf.mxu1  ;;  %v7301_v30 = vadd.f32 %v8552_v10, %v14748_v16 }
 0x62a   :  { %7900 = vst.msk [vmem:[%s15223_s11 + $0x340] sm:$0xff] %vm7801_vm0, %v7675_v23  ;;  %7907 = vst.msk [vmem:[%s15223_s11 + $0x378] sm:$0xff] %vm7801_vm0, %v7682_v28  ;;  %v8554_v58 = vpop.f32.mrf.mxu0  ;;  %v7421_v35 = vpack.c.bf16 %v7132_v4, %v7128_v20  ;;  %v7134_v3 = vadd.f32 %v7133_v27, %v14730_v14  ;;  %v9451_v62 = vpop.eup %9450 }
 0x62b   :  { %v8555_v8 = vadd.f32 %v8554_v58, %v8553_v46  ;;  %v7137_v15 = vpop.f32.mrf.mxu1  ;;  %v7687_v5 = vunpack.c.l.bf16 %v9451_v62  ;;  %v7694_v32 = vunpack.c.h.bf16 %v9451_v62 }
 0x62c   :  { %v8556_v34 = vpop.f32.mrf.mxu0  ;;  %v9453_v49 = vpop.eup %9452  ;;  %9462 = vtanh.bf16 %v7421_v35  ;;  %v7422_v12 = vpack.c.bf16 %v7134_v3, %v7130_v11  ;;  %v7138_v18 = vadd.f32 %v7137_v15, %v14714_v52 }
 0x62d   :  { %v7688_v0 = vunpack.c.l.bf16 %v9453_v49  ;;  %v7695_v56 = vunpack.c.h.bf16 %v9453_v49  ;;  %v7304_v59 = vadd.f32 %v8555_v8, %v14748_v16  ;;  %v7139_v40 = vpop.f32.mrf.mxu1  ;;  %7912 = vst [vmem:[%s15223_s11 + $0x3a0] sm:$0xff] %v7687_v5  ;;  %7919 = vst [vmem:[%s15223_s11 + $0x3d8] sm:$0xff] %v7694_v32 }
 0x62e   :  { %v8557_v47 = vpop.f32.mrf.mxu0  ;;  %9464 = vtanh.bf16 %v7422_v12  ;;  %v7140_v24 = vadd.f32 %v7139_v40, %v14730_v14 }
 0x62f   :  { %v9455_v2 = vpop.eup %9454  ;;  %7913 = vst [vmem:[%s15223_s11 + $0x3a8] sm:$0xff] %v7688_v0  ;;  %7920 = vst [vmem:[%s15223_s11 + $0x3e0] sm:$0xff] %v7695_v56  ;;  %v7423_v51 = vpack.c.bf16 %v7304_v59, %v7301_v30  ;;  %v7141_v45 = vpop.f32.mrf.mxu1  ;;  %v8558_v60 = vadd.f32 %v8557_v47, %v8556_v34 }
 0x630   :  { %v7689_v44 = vunpack.c.l.bf16 %v9455_v2  ;;  %v7696_v9 = vunpack.c.h.bf16 %v9455_v2  ;;  %v8559_v29 = vpop.f32.mrf.mxu0  ;;  %v7142_v50 = vadd.f32 %v7141_v45, %v14714_v52 }
 0x631   :  { %9466 = vtanh.bf16 %v7423_v51  ;;  %v7143_v61 = vpop.f32.mrf.mxu1  ;;  %v7309_v41 = vadd.f32 %v8558_v60, %v14748_v16 }
 0x632   :  { %7914 = vst.msk [vmem:[%s15223_s11 + $0x3b0] sm:$0xff] %vm7801_vm0, %v7689_v44  ;;  %7921 = vst.msk [vmem:[%s15223_s11 + $0x3e8] sm:$0xff] %vm7801_vm0, %v7696_v9  ;;  %v8560_v31 = vpop.f32.mrf.mxu0  ;;  %v7428_v53 = vpack.c.bf16 %v7142_v50, %v7138_v18  ;;  %v7144_v39 = vadd.f32 %v7143_v61, %v14730_v14  ;;  %v9457_v19 = vpop.eup %9456 }
 0x633   :  { %v8561_v42 = vadd.f32 %v8560_v31, %v8559_v29  ;;  %v7147_v22 = vpop.f32.mrf.mxu1  ;;  %v7701_v36 = vunpack.c.l.bf16 %v9457_v19  ;;  %v7708_v55 = vunpack.c.h.bf16 %v9457_v19 }
 0x634   :  { %v8562_v26 = vpop.f32.mrf.mxu0  ;;  %v9459_v13 = vpop.eup %9458  ;;  %9468 = vtanh.bf16 %v7428_v53  ;;  %v7429_v6 = vpack.c.bf16 %v7144_v39, %v7140_v24  ;;  %v7148_v33 = vadd.f32 %v7147_v22, %v14714_v52 }
 0x635   :  { %v7702_v57 = vunpack.c.l.bf16 %v9459_v13  ;;  %v7709_v7 = vunpack.c.h.bf16 %v9459_v13  ;;  %v7312_v38 = vadd.f32 %v8561_v42, %v14748_v16  ;;  %v7149_v17 = vpop.f32.mrf.mxu1  ;;  %7926 = vst [vmem:[%s15223_s11 + $0x410] sm:$0xff] %v7701_v36  ;;  %7933 = vst [vmem:[%s15223_s11 + $0x448] sm:$0xff] %v7708_v55 }
 0x636   :  { %v8563_v21 = vpop.f32.mrf.mxu0  ;;  %9470 = vtanh.bf16 %v7429_v6  ;;  %v7150_v4 = vadd.f32 %v7149_v17, %v14730_v14 }
 0x637   :  { %v9461_v54 = vpop.eup %9460  ;;  %7927 = vst [vmem:[%s15223_s11 + $0x418] sm:$0xff] %v7702_v57  ;;  %7934 = vst [vmem:[%s15223_s11 + $0x450] sm:$0xff] %v7709_v7  ;;  %v7430_v43 = vpack.c.bf16 %v7312_v38, %v7309_v41  ;;  %v7151_v37 = vpop.f32.mrf.mxu1  ;;  %v8564_v23 = vadd.f32 %v8563_v21, %v8562_v26 }
 0x638   :  { %v7703_v48 = vunpack.c.l.bf16 %v9461_v54  ;;  %v7710_v63 = vunpack.c.h.bf16 %v9461_v54  ;;  %v8565_v1 = vpop.f32.mrf.mxu0  ;;  %v7152_v28 = vadd.f32 %v7151_v37, %v14714_v52 }
 0x639   :  { %9472 = vtanh.bf16 %v7430_v43  ;;  %v7153_v25 = vpop.f32.mrf.mxu1  ;;  %v7317_v15 = vadd.f32 %v8564_v23, %v14748_v16 }
 0x63a   :  { %7928 = vst.msk [vmem:[%s15223_s11 + $0x420] sm:$0xff] %vm7801_vm0, %v7703_v48  ;;  %7935 = vst.msk [vmem:[%s15223_s11 + $0x458] sm:$0xff] %vm7801_vm0, %v7710_v63  ;;  %v8566_v46 = vpop.f32.mrf.mxu0  ;;  %v9463_v20 = vpop.eup %9462  ;;  %v7435_v10 = vpack.c.bf16 %v7152_v28, %v7148_v33  ;;  %v7154_v27 = vadd.f32 %v7153_v25, %v14730_v14 }
 0x63b   :  { %v8567_v58 = vadd.f32 %v8566_v46, %v8565_v1  ;;  %v7715_v11 = vunpack.c.l.bf16 %v9463_v20  ;;  %v7722_v35 = vunpack.c.h.bf16 %v9463_v20  ;;  %v7157_v3 = vpop.f32.mrf.mxu1 }
 0x63c   :  { %v8568_v8 = vpop.f32.mrf.mxu0  ;;  %v9465_v62 = vpop.eup %9464  ;;  %9474 = vtanh.bf16 %v7435_v10  ;;  %v7436_v34 = vpack.c.bf16 %v7154_v27, %v7150_v4  ;;  %v7158_v9 = vadd.f32 %v7157_v3, %v14714_v52 }
 0x63d   :  { %v7320_v49 = vadd.f32 %v8567_v58, %v14748_v16  ;;  %7940 = vst [vmem:[%s15223_s11 + $0x480] sm:$0xff] %v7715_v11  ;;  %7947 = vst [vmem:[%s15223_s11 + $0x4b8] sm:$0xff] %v7722_v35  ;;  %v7716_v5 = vunpack.c.l.bf16 %v9465_v62  ;;  %v7723_v32 = vunpack.c.h.bf16 %v9465_v62  ;;  %v7159_v12 = vpop.f32.mrf.mxu1 }
 0x63e   :  { %v8569_v0 = vpop.f32.mrf.mxu0  ;;  %9476 = vtanh.bf16 %v7436_v34  ;;  %v7160_v50 = vadd.f32 %v7159_v12, %v14730_v14 }
 0x63f   :  { %v7437_v56 = vpack.c.bf16 %v7320_v49, %v7317_v15  ;;  %v9467_v30 = vpop.eup %9466  ;;  %7941 = vst [vmem:[%s15223_s11 + $0x488] sm:$0xff] %v7716_v5  ;;  %7948 = vst [vmem:[%s15223_s11 + $0x4c0] sm:$0xff] %v7723_v32  ;;  %v7161_v59 = vpop.f32.mrf.mxu1  ;;  %v8570_v44 = vadd.f32 %v8569_v0, %v8568_v8 }
 0x640   :  { %v8571_v40 = vpop.f32.mrf.mxu0  ;;  %v7717_v47 = vunpack.c.l.bf16 %v9467_v30  ;;  %v7724_v2 = vunpack.c.h.bf16 %v9467_v30  ;;  %v7162_v51 = vadd.f32 %v7161_v59, %v14714_v52 }
 0x641   :  { %9478 = vtanh.bf16 %v7437_v56  ;;  %v7163_v45 = vpop.f32.mrf.mxu1  ;;  %v7325_v22 = vadd.f32 %v8570_v44, %v14748_v16 }
 0x642   :  { %v8572_v29 = vpop.f32.mrf.mxu0  ;;  %v9469_v18 = vpop.eup %9468  ;;  %7942 = vst.msk [vmem:[%s15223_s11 + $0x490] sm:$0xff] %vm7801_vm0, %v7717_v47  ;;  %7949 = vst.msk [vmem:[%s15223_s11 + $0x4c8] sm:$0xff] %vm7801_vm0, %v7724_v2  ;;  %v7164_v60 = vadd.f32 %v7163_v45, %v14730_v14  ;;  %v7442_v53 = vpack.c.bf16 %v7162_v51, %v7158_v9 }
 0x643   :  { %v8573_v61 = vadd.f32 %v8572_v29, %v8571_v40  ;;  %v7729_v31 = vunpack.c.l.bf16 %v9469_v18  ;;  %v7736_v24 = vunpack.c.h.bf16 %v9469_v18  ;;  %v7167_v39 = vpop.f32.mrf.mxu1 }
 0x644   :  { %v8574_v42 = vpop.f32.mrf.mxu0  ;;  %v9471_v19 = vpop.eup %9470  ;;  %v7443_v26 = vpack.c.bf16 %v7164_v60, %v7160_v50  ;;  %9480 = vtanh.bf16 %v7442_v53  ;;  %v7168_v63 = vadd.f32 %v7167_v39, %v14714_v52 }
 0x645   :  { %v7328_v13 = vadd.f32 %v8573_v61, %v14748_v16  ;;  %7954 = vst [vmem:[%s15223_s11 + $0x4f0] sm:$0xff] %v7729_v31  ;;  %7961 = vst [vmem:[%s15223_s11 + $0x528] sm:$0xff] %v7736_v24  ;;  %v7730_v36 = vunpack.c.l.bf16 %v9471_v19  ;;  %v7737_v55 = vunpack.c.h.bf16 %v9471_v19  ;;  %v7169_v6 = vpop.f32.mrf.mxu1 }
 0x646   :  { %v8575_v57 = vpop.f32.mrf.mxu0  ;;  %9482 = vtanh.bf16 %v7443_v26  ;;  %v7170_v23 = vadd.f32 %v7169_v6, %v14730_v14 }
 0x647   :  { %v7444_v7 = vpack.c.bf16 %v7328_v13, %v7325_v22  ;;  %v9473_v41 = vpop.eup %9472  ;;  %7955 = vst [vmem:[%s15223_s11 + $0x4f8] sm:$0xff] %v7730_v36  ;;  %7962 = vst [vmem:[%s15223_s11 + $0x530] sm:$0xff] %v7737_v55  ;;  %v7171_v38 = vpop.f32.mrf.mxu1  ;;  %v8576_v48 = vadd.f32 %v8575_v57, %v8574_v42 }
 0x648   :  { %v8577_v17 = vpop.f32.mrf.mxu0  ;;  %v7731_v21 = vunpack.c.l.bf16 %v9473_v41  ;;  %v7738_v54 = vunpack.c.h.bf16 %v9473_v41  ;;  %v7172_v43 = vadd.f32 %v7171_v38, %v14714_v52 }
 0x649   :  { %9484 = vtanh.bf16 %v7444_v7  ;;  %v7173_v37 = vpop.f32.mrf.mxu1  ;;  %v7333_v11 = vadd.f32 %v8576_v48, %v14748_v16 }
 0x64a   :  { %v8578_v1 = vpop.f32.mrf.mxu0  ;;  %v9475_v33 = vpop.eup %9474  ;;  %7956 = vst.msk [vmem:[%s15223_s11 + $0x500] sm:$0xff] %vm7801_vm0, %v7731_v21  ;;  %7963 = vst.msk [vmem:[%s15223_s11 + $0x538] sm:$0xff] %vm7801_vm0, %v7738_v54  ;;  %v7174_v28 = vadd.f32 %v7173_v37, %v14730_v14  ;;  %v7449_v4 = vpack.c.bf16 %v7172_v43, %v7168_v63 }
 0x64b   :  { %v8579_v25 = vadd.f32 %v8578_v1, %v8577_v17  ;;  %v7743_v46 = vunpack.c.l.bf16 %v9475_v33  ;;  %v7750_v20 = vunpack.c.h.bf16 %v9475_v33  ;;  %v7177_v10 = vpop.f32.mrf.mxu1 }
 0x64c   :  { %v8580_v27 = vpop.f32.mrf.mxu0  ;;  %v9477_v58 = vpop.eup %9476  ;;  %v7450_v35 = vpack.c.bf16 %v7174_v28, %v7170_v23  ;;  %9486 = vtanh.bf16 %v7449_v4  ;;  %v7178_v30 = vadd.f32 %v7177_v10, %v14714_v52 }
 0x64d   :  { %v7336_v3 = vadd.f32 %v8579_v25, %v14748_v16  ;;  %7968 = vst [vmem:[%s15223_s11 + $0x560] sm:$0xff] %v7743_v46  ;;  %7975 = vst [vmem:[%s15223_s11 + $0x598] sm:$0xff] %v7750_v20  ;;  %v7744_v8 = vunpack.c.l.bf16 %v9477_v58  ;;  %v7751_v62 = vunpack.c.h.bf16 %v9477_v58  ;;  %v7179_v15 = vpop.f32.mrf.mxu1 }
 0x64e   :  { %v8581_v34 = vpop.f32.mrf.mxu0  ;;  %9488 = vtanh.bf16 %v7450_v35  ;;  %v7180_v44 = vadd.f32 %v7179_v15, %v14730_v14 }
 0x64f   :  { %v9479_v49 = vpop.eup %9478  ;;  %v7451_v5 = vpack.c.bf16 %v7336_v3, %v7333_v11  ;;  %7969 = vst [vmem:[%s15223_s11 + $0x568] sm:$0xff] %v7744_v8  ;;  %7976 = vst [vmem:[%s15223_s11 + $0x5a0] sm:$0xff] %v7751_v62  ;;  %v7181_v0 = vpop.f32.mrf.mxu1  ;;  %v8582_v40 = vadd.f32 %v8581_v34, %v8580_v27 }
 0x650   :  { %v7745_v32 = vunpack.c.l.bf16 %v9479_v49  ;;  %v7752_v12 = vunpack.c.h.bf16 %v9479_v49  ;;  %v8583_v56 = vpop.f32.mrf.mxu0  ;;  %v7182_v59 = vadd.f32 %v7181_v0, %v14714_v52 }
 0x651   :  { %9490 = vtanh.bf16 %v7451_v5  ;;  %v7183_v47 = vpop.f32.mrf.mxu1  ;;  %v7341_v24 = vadd.f32 %v8582_v40, %v14748_v16 }
 0x652   :  { %7970 = vst.msk [vmem:[%s15223_s11 + $0x570] sm:$0xff] %vm7801_vm0, %v7745_v32  ;;  %7977 = vst.msk [vmem:[%s15223_s11 + $0x5a8] sm:$0xff] %vm7801_vm0, %v7752_v12  ;;  %v8584_v2 = vpop.f32.mrf.mxu0  ;;  %v7456_v9 = vpack.c.bf16 %v7182_v59, %v7178_v30  ;;  %v7184_v51 = vadd.f32 %v7183_v47, %v14730_v14  ;;  %v9481_v52 = vpop.eup %9480 }
 0x653   :  { %v8585_v45 = vadd.f32 %v8584_v2, %v8583_v56  ;;  %v7757_v18 = vunpack.c.l.bf16 %v9481_v52  ;;  %v7764_v50 = vunpack.c.h.bf16 %v9481_v52 }
 0x654   :  { %v9483_v29 = vpop.eup %9482  ;;  %9492 = vtanh.bf16 %v7456_v9  ;;  %v7457_v60 = vpack.c.bf16 %v7184_v51, %v7180_v44 }
 0x655   :  { %v7758_v61 = vunpack.c.l.bf16 %v9483_v29  ;;  %v7765_v31 = vunpack.c.h.bf16 %v9483_v29  ;;  %v7344_v53 = vadd.f32 %v8585_v45, %v14748_v16  ;;  %7982 = vst [vmem:[%s15223_s11 + $0x5d0] sm:$0xff] %v7757_v18  ;;  %7989 = vst [vmem:[%s15223_s11 + $0x608] sm:$0xff] %v7764_v50 }
 0x656   :  { %9494 = vtanh.bf16 %v7457_v60 }
 0x657   :  { %v9485_v39 = vpop.eup %9484  ;;  %7983 = vst [vmem:[%s15223_s11 + $0x5d8] sm:$0xff] %v7758_v61  ;;  %7990 = vst [vmem:[%s15223_s11 + $0x610] sm:$0xff] %v7765_v31  ;;  %v7458_v42 = vpack.c.bf16 %v7344_v53, %v7341_v24 }
 0x658   :  { %v7759_v14 = vunpack.c.l.bf16 %v9485_v39  ;;  %v7766_v16 = vunpack.c.h.bf16 %v9485_v39 }
 0x659   :  { %9496 = vtanh.bf16 %v7458_v42 }
 0x65a   :  { %7984 = vst.msk [vmem:[%s15223_s11 + $0x5e0] sm:$0xff] %vm7801_vm0, %v7759_v14  ;;  %7991 = vst.msk [vmem:[%s15223_s11 + $0x618] sm:$0xff] %vm7801_vm0, %v7766_v16  ;;  %v9487_v19 = vpop.eup %9486 }
 0x65b   :  { %v7771_v26 = vunpack.c.l.bf16 %v9487_v19  ;;  %v7778_v13 = vunpack.c.h.bf16 %v9487_v19 }
 0x65c   :  { %v9489_v22 = vpop.eup %9488 }
 0x65d   :  { %v7772_v36 = vunpack.c.l.bf16 %v9489_v22  ;;  %v7779_v55 = vunpack.c.h.bf16 %v9489_v22  ;;  %7996 = vst [vmem:[%s15223_s11 + $0x640] sm:$0xff] %v7771_v26  ;;  %8003 = vst [vmem:[%s15223_s11 + $0x678] sm:$0xff] %v7778_v13 }
 0x65f   :  { %v9491_v6 = vpop.eup %9490  ;;  %7997 = vst [vmem:[%s15223_s11 + $0x648] sm:$0xff] %v7772_v36  ;;  %8004 = vst [vmem:[%s15223_s11 + $0x680] sm:$0xff] %v7779_v55 }
 0x660   :  { %v7773_v57 = vunpack.c.l.bf16 %v9491_v6  ;;  %v7780_v7 = vunpack.c.h.bf16 %v9491_v6 }
 0x662   :  { %7998 = vst.msk [vmem:[%s15223_s11 + $0x650] sm:$0xff] %vm7801_vm0, %v7773_v57  ;;  %8005 = vst.msk [vmem:[%s15223_s11 + $0x688] sm:$0xff] %vm7801_vm0, %v7780_v7  ;;  %v9493_v41 = vpop.eup %9492 }
 0x663   :  { %v7785_v38 = vunpack.c.l.bf16 %v9493_v41  ;;  %v7792_v17 = vunpack.c.h.bf16 %v9493_v41 }
 0x664   :  { %v9495_v21 = vpop.eup %9494 }
 0x665   :  { %8010 = vst [vmem:[%s15223_s11 + $0x6b0] sm:$0xff] %v7785_v38  ;;  %8017 = vst [vmem:[%s15223_s11 + $0x6e8] sm:$0xff] %v7792_v17  ;;  %v7786_v54 = vunpack.c.l.bf16 %v9495_v21  ;;  %v7793_v48 = vunpack.c.h.bf16 %v9495_v21 }
 0x667   :  { %v9497_v63 = vpop.eup %9496  ;;  %8011 = vst [vmem:[%s15223_s11 + $0x6b8] sm:$0xff] %v7786_v54  ;;  %8018 = vst [vmem:[%s15223_s11 + $0x6f0] sm:$0xff] %v7793_v48 }
 0x668   :  { %v7787_v43 = vunpack.c.l.bf16 %v9497_v63  ;;  %v7794_v37 = vunpack.c.h.bf16 %v9497_v63 }
 0x66a   :  { %8012 = vst.msk [vmem:[%s15223_s11 + $0x6c0] sm:$0xff] %vm7801_vm0, %v7787_v43  ;;  %8019 = vst.msk [vmem:[%s15223_s11 + $0x6f8] sm:$0xff] %vm7801_vm0, %v7794_v37 }
 0x66b   :  { %8024 = vsyncpa [#allocation3], 1 }
 0x66c   :  { %8025 = vsyncpa [#allocation5], 1 }

</bundles_post_ra>
